<compile_context>
chip_gen: v7x
topology: tpu7x:2x2x1
jax: 0.10.0
libtpu: 0.0.40
codegen_flags: <defaults>
</compile_context>

<pallas_src>
import jax
import jax.numpy as jnp
from jax.experimental import pallas as pl
from jax.experimental.pallas import tpu as pltpu

N, D_IN, HID, C_OUT = 128, 32, 32, 1    # nodes, in_channels, hidden_channels, out_channels
E, TE = 16, 8                            # target edges, edge tile per grid step (E//TE even for v7x)
NBLK = 2 * TE                            # (side, edge) candidate blocks handled per tile
WIDE = NBLK * HID                        # lane width of the wide depth-0 activations

# buffers / parameter defaults from IncompleteCN1Predictor.__init__ (compile-time constants)
BETA, ALPHA, PT, SCALE, OFFSET = 1.0, 1.0, 0.5, 5.0, 3.0

WKEYS = ["wcn1", "bcn1", "wcn2", "bcn2", "wcn3", "bcn3",
         "wij1", "bij1", "wij2", "bij2", "wl1", "bl1", "wl2", "bl2"]


def _mlp(cn, xij, w):
    """lin( xcnlin(cn) * beta + xijlin(xij) )  -- matches the nn.Sequential stacks."""
    h = jnp.maximum(jnp.dot(cn, w["wcn1"], preferred_element_type=jnp.float32) + w["bcn1"], 0.0)
    h = jnp.maximum(jnp.dot(h, w["wcn2"], preferred_element_type=jnp.float32) + w["bcn2"], 0.0)
    hcn = jnp.dot(h, w["wcn3"], preferred_element_type=jnp.float32) + w["bcn3"]
    g = jnp.maximum(jnp.dot(xij, w["wij1"], preferred_element_type=jnp.float32) + w["bij1"], 0.0)
    hij = jnp.dot(g, w["wij2"], preferred_element_type=jnp.float32) + w["bij2"]
    z = hcn * w["beta"] + hij
    z = jnp.maximum(jnp.dot(z, w["wl1"], preferred_element_type=jnp.float32) + w["bl1"], 0.0)
    return jnp.dot(z, w["wl2"], preferred_element_type=jnp.float32) + w["bl2"]


def _clampprob(logit, *, approx_recip):
    p0 = jax.nn.sigmoid(SCALE * (logit - OFFSET))
    denom = PT * p0 + 1.0 - p0
    if approx_recip:
        inv = pl.reciprocal(denom, approx=True)   # EUP slot (next to the sigmoid) -> ~free
    else:
        inv = 1.0 / denom
    return ALPHA * PT * p0 * inv


def _incn1_kernel(*refs):
    (x_ref, adj_ref, ai_ref, aj_ref, xi_ref, xj_ref,
     sel_ref, wcn1t_ref, bcn1t_ref, wcn2b_ref, bcn2t_ref, wcn3b_ref, bcn3t_ref,
     wij1t_ref, bij1t_ref, wij2b_ref, bij2t_ref, wl1b_ref, bl1t_ref, wl2b_ref,
     pwcn1, pbcn1, pwcn2, pbcn2, pwcn3, pbcn3,
     pwij1, pbij1, pwij2, pbij2, pwl1, pbl1, pwl2, pbl2,
     out_ref) = refs

    f32 = jnp.float32
    x = x_ref[...]                              # (N, D_IN) f32
    a = adj_ref[...]                            # (N, N)   bf16 {0,1} (exact)
    ai_r = ai_ref[...]                          # (TE, N)  rows adj[i_e], f32
    aj_r = aj_ref[...]                          # (TE, N)  rows adj[j_e], f32
    xi = xi_ref[...]                            # (TE, D_IN)
    xj = xj_ref[...]                            # (TE, D_IN)
    sel = sel_ref[...]                          # (NBLK, WIDE) block-broadcast selector

    # block k < TE  -> side 1 (edge (j_e, u)): CN mask a_j, residual weight a_i*(1-a_j)
    # block k >= TE -> side 2 (edge (i_e, u)): CN mask a_i, residual weight a_j*(1-a_i)
    masks_r = jnp.concatenate([aj_r, ai_r], axis=0)                        # (NBLK, N)
    masks_c = masks_r.T                                                    # (N, NBLK) 1 transpose
    mask_wide = jnp.dot(masks_c, sel, preferred_element_type=f32)          # (N, WIDE)

    # ---- 1. wide masked candidate features with the first xcnlin layer folded through A:
    #         block k of cn_wide == ((adj * mask_k) @ x) @ wcn1
    xw1_wide = jnp.dot(x, wcn1t_ref[...], preferred_element_type=f32)      # (N, WIDE)
    xm = (mask_wide * xw1_wide).astype(jnp.bfloat16)                       # masked features
    cn_wide = jnp.dot(a, xm, preferred_element_type=f32)                   # ONE bf16 MXU pass

    # ---- 2. depth-0 predictor kept lane-wide with block-diagonal kron(I_NBLK, W) weights
    #         (no axis-0 stacking, no per-block slicing; MXU has huge slack for the extra 0s)
    h = jnp.maximum(cn_wide + bcn1t_ref[...], 0.0)
    h = jnp.maximum(jnp.dot(h, wcn2b_ref[...], preferred_element_type=f32) + bcn2t_ref[...], 0.0)
    hcn = jnp.dot(h, wcn3b_ref[...], preferred_element_type=f32) + bcn3t_ref[...]

    # xij branch: fold the per-block x_u * x_{j/i} scaling into the first-layer weight
    xjxi = jnp.concatenate([xj, xi], axis=0)                               # (NBLK, D_IN)
    xjxi_wide = jnp.dot(xjxi.T, sel, preferred_element_type=f32)           # (D_IN, WIDE)
    wij1_eff = xjxi_wide * wij1t_ref[...]                                  # (D_IN, WIDE)
    g = jnp.maximum(jnp.dot(x, wij1_eff, preferred_element_type=f32) + bij1t_ref[...], 0.0)
    hij = jnp.dot(g, wij2b_ref[...], preferred_element_type=f32) + bij2t_ref[...]

    z = hcn * BETA + hij
    z = jnp.maximum(jnp.dot(z, wl1b_ref[...], preferred_element_type=f32) + bl1t_ref[...], 0.0)
    logit_cols = jnp.dot(z, wl2b_ref[...], preferred_element_type=f32) + pbl2[...]   # (N, NBLK)

    # ---- 3. clampprob on the dense column layout, ONE transpose back to row layout
    probs_r = _clampprob(logit_cols, approx_recip=True).T                  # (NBLK, N)
    p1 = probs_r[:TE]          # depth-0 prob of edge (j_e, u)
    p2 = probs_r[TE:]          # depth-0 prob of edge (i_e, u)

    # ---- 4. exact CN + both completion sides fused into ONE (TE,N)@(N,D_IN) f32 matmul
    m_comb = (ai_r * aj_r
              + p1 * ai_r * (1.0 - aj_r)
              + p2 * aj_r * (1.0 - ai_r))                                  # (TE, N)
    cn_sum = jnp.dot(m_comb, x, preferred_element_type=f32)                # (TE, D_IN)

    # ---- 5. batched final edge MLP + a single store of the whole tile
    w = dict(wcn1=pwcn1[...], bcn1=pbcn1[...], wcn2=pwcn2[...], bcn2=pbcn2[...],
             wcn3=pwcn3[...], bcn3=pbcn3[...], wij1=pwij1[...], bij1=pbij1[...],
             wij2=pwij2[...], bij2=pbij2[...], wl1=pwl1[...], bl1=pbl1[...],
             wl2=pwl2[...], bl2=pbl2[...], beta=BETA)
    out_ref[...] = _mlp(cn_sum, xi * xj, w).astype(out_ref.dtype)          # (TE, C_OUT)


def incn1_forward(x, adj, tar_ei, weights):
    # plain-JAX glue: per-edge row gathers; adjacency carried as bf16 ({0,1} -> lossless)
    ai = jnp.take(adj, tar_ei[0], axis=0)       # (E, N)
    aj = jnp.take(adj, tar_ei[1], axis=0)       # (E, N)
    xi = jnp.take(x, tar_ei[0], axis=0)         # (E, D_IN)
    xj = jnp.take(x, tar_ei[1], axis=0)         # (E, D_IN)
    adj_bf16 = adj.astype(jnp.bfloat16)

    # host-side one-time weight transforms for the lane-wide depth-0 predictor
    eye = jnp.eye(NBLK, dtype=jnp.float32)
    sel = jnp.kron(eye, jnp.ones((1, HID), jnp.float32))          # (NBLK, WIDE) block broadcast
    kron = lambda m: jnp.kron(eye, m)                             # block-diagonal kron(I_NBLK, W)
    ltile = lambda m: jnp.tile(m, (1, NBLK))                      # lane-tiled weights / biases
    w = weights
    wide = [sel,
            ltile(w["wcn1"]), ltile(w["bcn1"]),
            kron(w["wcn2"]), ltile(w["bcn2"]),
            kron(w["wcn3"]), ltile(w["bcn3"]),
            ltile(w["wij1"]), ltile(w["bij1"]),
            kron(w["wij2"]), ltile(w["bij2"]),
            kron(w["wl1"]), ltile(w["bl1"]),
            kron(w["wl2"])]
    plain = [w[k] for k in WKEYS]

    def full(arr):
        return pl.BlockSpec(arr.shape, lambda e: (0,) * arr.ndim)

    in_specs = (
        [full(x), full(adj_bf16),
         pl.BlockSpec((TE, N), lambda e: (e, 0)),
         pl.BlockSpec((TE, N), lambda e: (e, 0)),
         pl.BlockSpec((TE, D_IN), lambda e: (e, 0)),
         pl.BlockSpec((TE, D_IN), lambda e: (e, 0))]
        + [full(arr) for arr in wide]
        + [full(arr) for arr in plain]
    )
    out_spec = pl.BlockSpec((TE, C_OUT), lambda e: (e, 0))

    return pl.pallas_call(
        _incn1_kernel,
        out_shape=jax.ShapeDtypeStruct((E, C_OUT), jnp.float32),
        grid_spec=pltpu.PrefetchScalarGridSpec(
            num_scalar_prefetch=0,
            grid=(E // TE,),
            in_specs=in_specs,
            out_specs=out_spec),
        compiler_params=pltpu.CompilerParams(
            dimension_semantics=("parallel",),          # edge tiles independent (v7x megacore)
            vmem_limit_bytes=32 * 1024 * 1024),
    )(x, adj_bf16, ai, aj, xi, xj, *wide, *plain)


def reference_forward(x, adj, tar_ei, weights):
    """Pure-JAX mirror of the module's forward (same math, used for validation)."""
    w = dict(weights, beta=BETA)
    outs = []
    for e in range(E):
        i, j = tar_ei[0, e], tar_ei[1, e]
        a_i, a_j = adj[i][None, :], adj[j][None, :]
        xi, xj = x[i][None, :], x[j][None, :]
        xcn = jnp.dot(a_i * a_j, x, preferred_element_type=jnp.float32)
        logit1 = _mlp(jnp.dot(adj * a_j, x, preferred_element_type=jnp.float32), x * xj, w)
        prob1 = _clampprob(logit1, approx_recip=False).reshape(1, N)
        xcn1 = jnp.dot(prob1 * a_i * (1.0 - a_j), x, preferred_element_type=jnp.float32)
        logit2 = _mlp(jnp.dot(adj * a_i, x, preferred_element_type=jnp.float32), x * xi, w)
        prob2 = _clampprob(logit2, approx_recip=False).reshape(1, N)
        xcn2 = jnp.dot(prob2 * a_j * (1.0 - a_i), x, preferred_element_type=jnp.float32)
        outs.append(_mlp(xcn + xcn1 + xcn2, xi * xj, w)[0])
    return jnp.stack(outs)


def init_params(key):
    def linear(k, fin, fout):
        k1, k2 = jax.random.split(k)
        bound = 1.0 / (fin ** 0.5)
        W = jax.random.uniform(k1, (fin, fout), jnp.float32, -bound, bound)
        b = jax.random.uniform(k2, (1, fout), jnp.float32, -bound, bound)
        return W, b

    keys = jax.random.split(key, 7)
    w = {}
    w["wcn1"], w["bcn1"] = linear(keys[0], D_IN, HID)   # xcnlin
    w["wcn2"], w["bcn2"] = linear(keys[1], HID, HID)
    w["wcn3"], w["bcn3"] = linear(keys[2], HID, HID)
    w["wij1"], w["bij1"] = linear(keys[3], D_IN, HID)   # xijlin
    w["wij2"], w["bij2"] = linear(keys[4], HID, HID)
    w["wl1"], w["bl1"] = linear(keys[5], HID, HID)      # lin
    w["wl2"], w["bl2"] = linear(keys[6], HID, C_OUT)
    return w


if __name__ == "__main__":
    key = jax.random.PRNGKey(0)
    k1, k2, k3, k4 = jax.random.split(key, 4)

    x = jax.random.normal(k1, (N, D_IN), jnp.float32) * 0.5
    a_up = (jax.random.uniform(k2, (N, N)) < 0.08).astype(jnp.float32)
    adj = jnp.clip(a_up + a_up.T, 0.0, 1.0) * (1.0 - jnp.eye(N, dtype=jnp.float32))
    tar_ei = jax.random.randint(k3, (2, E), 0, N, dtype=jnp.int32)
    weights = init_params(k4)

    out = incn1_forward(x, adj, tar_ei, weights)
    out = jax.block_until_ready(out)

    ref = jax.block_until_ready(reference_forward(x, adj, tar_ei, weights))
    assert out.shape == (E, C_OUT)
    # 2e-3 headroom covers the EUP approximate reciprocal and the bf16 candidate matmul;
    # both only perturb the depth-0 probabilities, which sigmoid(scale*(.-offset)) squashes.
    assert jnp.allclose(out, ref, rtol=2e-3, atol=2e-3), (out, ref)

    print("KERNEL_OK")
</pallas_src>

<mosaic_0001>
module attributes {stable_mosaic.version = 11 : i64} {
  func.func @_incn1_kernel(%arg0: i32, %arg1: memref<128x32xf32, #tpu.memory_space<vmem>>, %arg2: memref<128x128xbf16, #tpu.memory_space<vmem>>, %arg3: memref<8x128xf32, #tpu.memory_space<vmem>>, %arg4: memref<8x128xf32, #tpu.memory_space<vmem>>, %arg5: memref<8x32xf32, #tpu.memory_space<vmem>>, %arg6: memref<8x32xf32, #tpu.memory_space<vmem>>, %arg7: memref<16x512xf32, #tpu.memory_space<vmem>>, %arg8: memref<32x512xf32, #tpu.memory_space<vmem>>, %arg9: memref<1x512xf32, #tpu.memory_space<vmem>>, %arg10: memref<512x512xf32, #tpu.memory_space<vmem>>, %arg11: memref<1x512xf32, #tpu.memory_space<vmem>>, %arg12: memref<512x512xf32, #tpu.memory_space<vmem>>, %arg13: memref<1x512xf32, #tpu.memory_space<vmem>>, %arg14: memref<32x512xf32, #tpu.memory_space<vmem>>, %arg15: memref<1x512xf32, #tpu.memory_space<vmem>>, %arg16: memref<512x512xf32, #tpu.memory_space<vmem>>, %arg17: memref<1x512xf32, #tpu.memory_space<vmem>>, %arg18: memref<512x512xf32, #tpu.memory_space<vmem>>, %arg19: memref<1x512xf32, #tpu.memory_space<vmem>>, %arg20: memref<512x16xf32, #tpu.memory_space<vmem>>, %arg21: memref<32x32xf32, #tpu.memory_space<vmem>>, %arg22: memref<1x32xf32, #tpu.memory_space<vmem>>, %arg23: memref<32x32xf32, #tpu.memory_space<vmem>>, %arg24: memref<1x32xf32, #tpu.memory_space<vmem>>, %arg25: memref<32x32xf32, #tpu.memory_space<vmem>>, %arg26: memref<1x32xf32, #tpu.memory_space<vmem>>, %arg27: memref<32x32xf32, #tpu.memory_space<vmem>>, %arg28: memref<1x32xf32, #tpu.memory_space<vmem>>, %arg29: memref<32x32xf32, #tpu.memory_space<vmem>>, %arg30: memref<1x32xf32, #tpu.memory_space<vmem>>, %arg31: memref<32x32xf32, #tpu.memory_space<vmem>>, %arg32: memref<1x32xf32, #tpu.memory_space<vmem>>, %arg33: memref<32x1xf32, #tpu.memory_space<vmem>>, %arg34: memref<1x1xf32, #tpu.memory_space<vmem>>, %arg35: memref<8x1xf32, #tpu.memory_space<vmem>>) attributes {dimension_semantics = [#tpu.dimension_semantics<parallel>], iteration_bounds = array<i64: 2>, scalar_prefetch = 0 : i64, scratch_operands = 0 : i64, tpu.core_type = #tpu.core_type<tc>, window_params = [{pipeline_mode = #tpu.pipeline_mode<synchronous>, transform_indices = @transform_0, window_bounds = array<i64: 128, 32>}, {pipeline_mode = #tpu.pipeline_mode<synchronous>, transform_indices = @transform_1, window_bounds = array<i64: 128, 128>}, {transform_indices = @transform_2, window_bounds = array<i64: 8, 128>}, {transform_indices = @transform_3, window_bounds = array<i64: 8, 128>}, {transform_indices = @transform_4, window_bounds = array<i64: 8, 32>}, {transform_indices = @transform_5, window_bounds = array<i64: 8, 32>}, {pipeline_mode = #tpu.pipeline_mode<synchronous>, transform_indices = @transform_6, window_bounds = array<i64: 16, 512>}, {pipeline_mode = #tpu.pipeline_mode<synchronous>, transform_indices = @transform_7, window_bounds = array<i64: 32, 512>}, {pipeline_mode = #tpu.pipeline_mode<synchronous>, transform_indices = @transform_8, window_bounds = array<i64: 1, 512>}, {pipeline_mode = #tpu.pipeline_mode<synchronous>, transform_indices = @transform_9, window_bounds = array<i64: 512, 512>}, {pipeline_mode = #tpu.pipeline_mode<synchronous>, transform_indices = @transform_10, window_bounds = array<i64: 1, 512>}, {pipeline_mode = #tpu.pipeline_mode<synchronous>, transform_indices = @transform_11, window_bounds = array<i64: 512, 512>}, {pipeline_mode = #tpu.pipeline_mode<synchronous>, transform_indices = @transform_12, window_bounds = array<i64: 1, 512>}, {pipeline_mode = #tpu.pipeline_mode<synchronous>, transform_indices = @transform_13, window_bounds = array<i64: 32, 512>}, {pipeline_mode = #tpu.pipeline_mode<synchronous>, transform_indices = @transform_14, window_bounds = array<i64: 1, 512>}, {pipeline_mode = #tpu.pipeline_mode<synchronous>, transform_indices = @transform_15, window_bounds = array<i64: 512, 512>}, {pipeline_mode = #tpu.pipeline_mode<synchronous>, transform_indices = @transform_16, window_bounds = array<i64: 1, 512>}, {pipeline_mode = #tpu.pipeline_mode<synchronous>, transform_indices = @transform_17, window_bounds = array<i64: 512, 512>}, {pipeline_mode = #tpu.pipeline_mode<synchronous>, transform_indices = @transform_18, window_bounds = array<i64: 1, 512>}, {pipeline_mode = #tpu.pipeline_mode<synchronous>, transform_indices = @transform_19, window_bounds = array<i64: 512, 16>}, {pipeline_mode = #tpu.pipeline_mode<synchronous>, transform_indices = @transform_20, window_bounds = array<i64: 32, 32>}, {pipeline_mode = #tpu.pipeline_mode<synchronous>, transform_indices = @transform_21, window_bounds = array<i64: 1, 32>}, {pipeline_mode = #tpu.pipeline_mode<synchronous>, transform_indices = @transform_22, window_bounds = array<i64: 32, 32>}, {pipeline_mode = #tpu.pipeline_mode<synchronous>, transform_indices = @transform_23, window_bounds = array<i64: 1, 32>}, {pipeline_mode = #tpu.pipeline_mode<synchronous>, transform_indices = @transform_24, window_bounds = array<i64: 32, 32>}, {pipeline_mode = #tpu.pipeline_mode<synchronous>, transform_indices = @transform_25, window_bounds = array<i64: 1, 32>}, {pipeline_mode = #tpu.pipeline_mode<synchronous>, transform_indices = @transform_26, window_bounds = array<i64: 32, 32>}, {pipeline_mode = #tpu.pipeline_mode<synchronous>, transform_indices = @transform_27, window_bounds = array<i64: 1, 32>}, {pipeline_mode = #tpu.pipeline_mode<synchronous>, transform_indices = @transform_28, window_bounds = array<i64: 32, 32>}, {pipeline_mode = #tpu.pipeline_mode<synchronous>, transform_indices = @transform_29, window_bounds = array<i64: 1, 32>}, {pipeline_mode = #tpu.pipeline_mode<synchronous>, transform_indices = @transform_30, window_bounds = array<i64: 32, 32>}, {pipeline_mode = #tpu.pipeline_mode<synchronous>, transform_indices = @transform_31, window_bounds = array<i64: 1, 32>}, {pipeline_mode = #tpu.pipeline_mode<synchronous>, transform_indices = @transform_32, window_bounds = array<i64: 32, 1>}, {pipeline_mode = #tpu.pipeline_mode<synchronous>, transform_indices = @transform_33, window_bounds = array<i64: 1, 1>}, {transform_indices = @transform_34, window_bounds = array<i64: 8, 1>}]} {
    %c0 = arith.constant 0 : index
    %c0_0 = arith.constant 0 : index
    %0 = vector.load %arg1[%c0, %c0_0] : memref<128x32xf32, #tpu.memory_space<vmem>>, vector<128x32xf32>
    %c0_1 = arith.constant 0 : index
    %c0_2 = arith.constant 0 : index
    %1 = vector.load %arg2[%c0_1, %c0_2] : memref<128x128xbf16, #tpu.memory_space<vmem>>, vector<128x128xbf16>
    %c0_3 = arith.constant 0 : index
    %c0_4 = arith.constant 0 : index
    %2 = vector.load %arg3[%c0_3, %c0_4] : memref<8x128xf32, #tpu.memory_space<vmem>>, vector<8x128xf32>
    %c0_5 = arith.constant 0 : index
    %c0_6 = arith.constant 0 : index
    %3 = vector.load %arg4[%c0_5, %c0_6] : memref<8x128xf32, #tpu.memory_space<vmem>>, vector<8x128xf32>
    %c0_7 = arith.constant 0 : index
    %c0_8 = arith.constant 0 : index
    %4 = vector.load %arg5[%c0_7, %c0_8] : memref<8x32xf32, #tpu.memory_space<vmem>>, vector<8x32xf32>
    %c0_9 = arith.constant 0 : index
    %c0_10 = arith.constant 0 : index
    %5 = vector.load %arg6[%c0_9, %c0_10] : memref<8x32xf32, #tpu.memory_space<vmem>>, vector<8x32xf32>
    %c0_11 = arith.constant 0 : index
    %c0_12 = arith.constant 0 : index
    %6 = vector.load %arg7[%c0_11, %c0_12] : memref<16x512xf32, #tpu.memory_space<vmem>>, vector<16x512xf32>
    %7 = tpu.concatenate %3, %2 in 0 : vector<8x128xf32>, vector<8x128xf32> -> vector<16x128xf32>
    %8 = tpu.transpose %7, [1, 0] : vector<16x128xf32> -> vector<128x16xf32>
    %cst = arith.constant dense<0.000000e+00> : vector<128x512xf32>
    %9 = tpu.matmul %8, %6, %cst {dimension_numbers = #tpu.dot_dimension_numbers<[1], [0], [0], [1], [0, 0, 1, 1], [], []>} : vector<128x16xf32>, vector<16x512xf32>, vector<128x512xf32> -> vector<128x512xf32>
    %c0_13 = arith.constant 0 : index
    %c0_14 = arith.constant 0 : index
    %10 = vector.load %arg8[%c0_13, %c0_14] : memref<32x512xf32, #tpu.memory_space<vmem>>, vector<32x512xf32>
    %cst_15 = arith.constant dense<0.000000e+00> : vector<128x512xf32>
    %11 = tpu.matmul %0, %10, %cst_15 {dimension_numbers = #tpu.dot_dimension_numbers<[1], [0], [0], [1], [0, 0, 1, 1], [], []>} : vector<128x32xf32>, vector<32x512xf32>, vector<128x512xf32> -> vector<128x512xf32>
    %12 = arith.mulf %9, %11 : vector<128x512xf32>
    %13 = arith.truncf %12 : vector<128x512xf32> to vector<128x512xbf16>
    %cst_16 = arith.constant dense<0.000000e+00> : vector<128x512xf32>
    %14 = tpu.matmul %1, %13, %cst_16 {dimension_numbers = #tpu.dot_dimension_numbers<[1], [0], [0], [1], [0, 0, 1, 1], [], []>} : vector<128x128xbf16>, vector<128x512xbf16>, vector<128x512xf32> -> vector<128x512xf32>
    %c0_17 = arith.constant 0 : index
    %c0_18 = arith.constant 0 : index
    %15 = vector.load %arg9[%c0_17, %c0_18] : memref<1x512xf32, #tpu.memory_space<vmem>>, vector<1x512xf32>
    %16 = vector.broadcast %15 : vector<1x512xf32> to vector<128x512xf32>
    %17 = arith.addf %14, %16 : vector<128x512xf32>
    %cst_19 = arith.constant 0.000000e+00 : f32
    %18 = vector.broadcast %cst_19 : f32 to vector<128x512xf32>
    %19 = arith.maximumf %17, %18 : vector<128x512xf32>
    %c0_20 = arith.constant 0 : index
    %c0_21 = arith.constant 0 : index
    %20 = vector.load %arg10[%c0_20, %c0_21] : memref<512x512xf32, #tpu.memory_space<vmem>>, vector<512x512xf32>
    %cst_22 = arith.constant dense<0.000000e+00> : vector<128x512xf32>
    %21 = tpu.matmul %19, %20, %cst_22 {dimension_numbers = #tpu.dot_dimension_numbers<[1], [0], [0], [1], [0, 0, 1, 1], [], []>} : vector<128x512xf32>, vector<512x512xf32>, vector<128x512xf32> -> vector<128x512xf32>
    %c0_23 = arith.constant 0 : index
    %c0_24 = arith.constant 0 : index
    %22 = vector.load %arg11[%c0_23, %c0_24] : memref<1x512xf32, #tpu.memory_space<vmem>>, vector<1x512xf32>
    %23 = vector.broadcast %22 : vector<1x512xf32> to vector<128x512xf32>
    %24 = arith.addf %21, %23 : vector<128x512xf32>
    %cst_25 = arith.constant 0.000000e+00 : f32
    %25 = vector.broadcast %cst_25 : f32 to vector<128x512xf32>
    %26 = arith.maximumf %24, %25 : vector<128x512xf32>
    %c0_26 = arith.constant 0 : index
    %c0_27 = arith.constant 0 : index
    %27 = vector.load %arg12[%c0_26, %c0_27] : memref<512x512xf32, #tpu.memory_space<vmem>>, vector<512x512xf32>
    %cst_28 = arith.constant dense<0.000000e+00> : vector<128x512xf32>
    %28 = tpu.matmul %26, %27, %cst_28 {dimension_numbers = #tpu.dot_dimension_numbers<[1], [0], [0], [1], [0, 0, 1, 1], [], []>} : vector<128x512xf32>, vector<512x512xf32>, vector<128x512xf32> -> vector<128x512xf32>
    %c0_29 = arith.constant 0 : index
    %c0_30 = arith.constant 0 : index
    %29 = vector.load %arg13[%c0_29, %c0_30] : memref<1x512xf32, #tpu.memory_space<vmem>>, vector<1x512xf32>
    %30 = vector.broadcast %29 : vector<1x512xf32> to vector<128x512xf32>
    %31 = arith.addf %28, %30 : vector<128x512xf32>
    %32 = tpu.concatenate %5, %4 in 0 : vector<8x32xf32>, vector<8x32xf32> -> vector<16x32xf32>
    %33 = tpu.transpose %32, [1, 0] : vector<16x32xf32> -> vector<32x16xf32>
    %cst_31 = arith.constant dense<0.000000e+00> : vector<32x512xf32>
    %34 = tpu.matmul %33, %6, %cst_31 {dimension_numbers = #tpu.dot_dimension_numbers<[1], [0], [0], [1], [0, 0, 1, 1], [], []>} : vector<32x16xf32>, vector<16x512xf32>, vector<32x512xf32> -> vector<32x512xf32>
    %c0_32 = arith.constant 0 : index
    %c0_33 = arith.constant 0 : index
    %35 = vector.load %arg14[%c0_32, %c0_33] : memref<32x512xf32, #tpu.memory_space<vmem>>, vector<32x512xf32>
    %36 = arith.mulf %34, %35 : vector<32x512xf32>
    %cst_34 = arith.constant dense<0.000000e+00> : vector<128x512xf32>
    %37 = tpu.matmul %0, %36, %cst_34 {dimension_numbers = #tpu.dot_dimension_numbers<[1], [0], [0], [1], [0, 0, 1, 1], [], []>} : vector<128x32xf32>, vector<32x512xf32>, vector<128x512xf32> -> vector<128x512xf32>
    %c0_35 = arith.constant 0 : index
    %c0_36 = arith.constant 0 : index
    %38 = vector.load %arg15[%c0_35, %c0_36] : memref<1x512xf32, #tpu.memory_space<vmem>>, vector<1x512xf32>
    %39 = vector.broadcast %38 : vector<1x512xf32> to vector<128x512xf32>
    %40 = arith.addf %37, %39 : vector<128x512xf32>
    %cst_37 = arith.constant 0.000000e+00 : f32
    %41 = vector.broadcast %cst_37 : f32 to vector<128x512xf32>
    %42 = arith.maximumf %40, %41 : vector<128x512xf32>
    %c0_38 = arith.constant 0 : index
    %c0_39 = arith.constant 0 : index
    %43 = vector.load %arg16[%c0_38, %c0_39] : memref<512x512xf32, #tpu.memory_space<vmem>>, vector<512x512xf32>
    %cst_40 = arith.constant dense<0.000000e+00> : vector<128x512xf32>
    %44 = tpu.matmul %42, %43, %cst_40 {dimension_numbers = #tpu.dot_dimension_numbers<[1], [0], [0], [1], [0, 0, 1, 1], [], []>} : vector<128x512xf32>, vector<512x512xf32>, vector<128x512xf32> -> vector<128x512xf32>
    %c0_41 = arith.constant 0 : index
    %c0_42 = arith.constant 0 : index
    %45 = vector.load %arg17[%c0_41, %c0_42] : memref<1x512xf32, #tpu.memory_space<vmem>>, vector<1x512xf32>
    %46 = vector.broadcast %45 : vector<1x512xf32> to vector<128x512xf32>
    %47 = arith.addf %44, %46 : vector<128x512xf32>
    %cst_43 = arith.constant 1.000000e+00 : f32
    %48 = vector.broadcast %cst_43 : f32 to vector<128x512xf32>
    %49 = arith.mulf %31, %48 : vector<128x512xf32>
    %50 = arith.addf %49, %47 : vector<128x512xf32>
    %c0_44 = arith.constant 0 : index
    %c0_45 = arith.constant 0 : index
    %51 = vector.load %arg18[%c0_44, %c0_45] : memref<512x512xf32, #tpu.memory_space<vmem>>, vector<512x512xf32>
    %cst_46 = arith.constant dense<0.000000e+00> : vector<128x512xf32>
    %52 = tpu.matmul %50, %51, %cst_46 {dimension_numbers = #tpu.dot_dimension_numbers<[1], [0], [0], [1], [0, 0, 1, 1], [], []>} : vector<128x512xf32>, vector<512x512xf32>, vector<128x512xf32> -> vector<128x512xf32>
    %c0_47 = arith.constant 0 : index
    %c0_48 = arith.constant 0 : index
    %53 = vector.load %arg19[%c0_47, %c0_48] : memref<1x512xf32, #tpu.memory_space<vmem>>, vector<1x512xf32>
    %54 = vector.broadcast %53 : vector<1x512xf32> to vector<128x512xf32>
    %55 = arith.addf %52, %54 : vector<128x512xf32>
    %cst_49 = arith.constant 0.000000e+00 : f32
    %56 = vector.broadcast %cst_49 : f32 to vector<128x512xf32>
    %57 = arith.maximumf %55, %56 : vector<128x512xf32>
    %c0_50 = arith.constant 0 : index
    %c0_51 = arith.constant 0 : index
    %58 = vector.load %arg20[%c0_50, %c0_51] : memref<512x16xf32, #tpu.memory_space<vmem>>, vector<512x16xf32>
    %cst_52 = arith.constant dense<0.000000e+00> : vector<128x16xf32>
    %59 = tpu.matmul %57, %58, %cst_52 {dimension_numbers = #tpu.dot_dimension_numbers<[1], [0], [0], [1], [0, 0, 1, 1], [], []>} : vector<128x512xf32>, vector<512x16xf32>, vector<128x16xf32> -> vector<128x16xf32>
    %c0_53 = arith.constant 0 : index
    %c0_54 = arith.constant 0 : index
    %60 = vector.load %arg34[%c0_53, %c0_54] : memref<1x1xf32, #tpu.memory_space<vmem>>, vector<1x1xf32>
    %61 = vector.broadcast %60 : vector<1x1xf32> to vector<128x16xf32>
    %62 = arith.addf %59, %61 : vector<128x16xf32>
    %cst_55 = arith.constant 3.000000e+00 : f32
    %63 = vector.broadcast %cst_55 : f32 to vector<128x16xf32>
    %64 = arith.subf %62, %63 : vector<128x16xf32>
    %cst_56 = arith.constant 5.000000e+00 : f32
    %65 = vector.broadcast %cst_56 : f32 to vector<128x16xf32>
    %66 = arith.mulf %65, %64 : vector<128x16xf32>
    %67 = arith.negf %66 : vector<128x16xf32>
    %68 = math.exp %67 : vector<128x16xf32>
    %cst_57 = arith.constant 1.000000e+00 : f32
    %69 = vector.broadcast %cst_57 : f32 to vector<128x16xf32>
    %70 = arith.addf %69, %68 : vector<128x16xf32>
    %71 = arith.divf %69, %70 : vector<128x16xf32>
    %cst_58 = arith.constant 5.000000e-01 : f32
    %72 = vector.broadcast %cst_58 : f32 to vector<128x16xf32>
    %73 = arith.mulf %72, %71 : vector<128x16xf32>
    %cst_59 = arith.constant 1.000000e+00 : f32
    %74 = vector.broadcast %cst_59 : f32 to vector<128x16xf32>
    %75 = arith.addf %73, %74 : vector<128x16xf32>
    %76 = arith.subf %75, %71 : vector<128x16xf32>
    %77 = tpu.reciprocal %76 {approx = true} : vector<128x16xf32> -> vector<128x16xf32>
    %cst_60 = arith.constant 5.000000e-01 : f32
    %78 = vector.broadcast %cst_60 : f32 to vector<128x16xf32>
    %79 = arith.mulf %78, %71 : vector<128x16xf32>
    %80 = arith.mulf %79, %77 : vector<128x16xf32>
    %81 = tpu.transpose %80, [1, 0] : vector<128x16xf32> -> vector<16x128xf32>
    %82 = vector.extract_strided_slice %81 {offsets = [0, 0], sizes = [8, 128], strides = [1, 1]} : vector<16x128xf32> to vector<8x128xf32>
    %83 = vector.extract_strided_slice %81 {offsets = [8, 0], sizes = [8, 128], strides = [1, 1]} : vector<16x128xf32> to vector<8x128xf32>
    %84 = arith.mulf %2, %3 : vector<8x128xf32>
    %85 = arith.mulf %82, %2 : vector<8x128xf32>
    %cst_61 = arith.constant 1.000000e+00 : f32
    %86 = vector.broadcast %cst_61 : f32 to vector<8x128xf32>
    %87 = arith.subf %86, %3 : vector<8x128xf32>
    %88 = arith.mulf %85, %87 : vector<8x128xf32>
    %89 = arith.addf %84, %88 : vector<8x128xf32>
    %90 = arith.mulf %83, %3 : vector<8x128xf32>
    %cst_62 = arith.constant 1.000000e+00 : f32
    %91 = vector.broadcast %cst_62 : f32 to vector<8x128xf32>
    %92 = arith.subf %91, %2 : vector<8x128xf32>
    %93 = arith.mulf %90, %92 : vector<8x128xf32>
    %94 = arith.addf %89, %93 : vector<8x128xf32>
    %cst_63 = arith.constant dense<0.000000e+00> : vector<8x32xf32>
    %95 = tpu.matmul %94, %0, %cst_63 {dimension_numbers = #tpu.dot_dimension_numbers<[1], [0], [0], [1], [0, 0, 1, 1], [], []>} : vector<8x128xf32>, vector<128x32xf32>, vector<8x32xf32> -> vector<8x32xf32>
    %c0_64 = arith.constant 0 : index
    %c0_65 = arith.constant 0 : index
    %96 = vector.load %arg21[%c0_64, %c0_65] : memref<32x32xf32, #tpu.memory_space<vmem>>, vector<32x32xf32>
    %c0_66 = arith.constant 0 : index
    %c0_67 = arith.constant 0 : index
    %97 = vector.load %arg22[%c0_66, %c0_67] : memref<1x32xf32, #tpu.memory_space<vmem>>, vector<1x32xf32>
    %c0_68 = arith.constant 0 : index
    %c0_69 = arith.constant 0 : index
    %98 = vector.load %arg23[%c0_68, %c0_69] : memref<32x32xf32, #tpu.memory_space<vmem>>, vector<32x32xf32>
    %c0_70 = arith.constant 0 : index
    %c0_71 = arith.constant 0 : index
    %99 = vector.load %arg24[%c0_70, %c0_71] : memref<1x32xf32, #tpu.memory_space<vmem>>, vector<1x32xf32>
    %c0_72 = arith.constant 0 : index
    %c0_73 = arith.constant 0 : index
    %100 = vector.load %arg25[%c0_72, %c0_73] : memref<32x32xf32, #tpu.memory_space<vmem>>, vector<32x32xf32>
    %c0_74 = arith.constant 0 : index
    %c0_75 = arith.constant 0 : index
    %101 = vector.load %arg26[%c0_74, %c0_75] : memref<1x32xf32, #tpu.memory_space<vmem>>, vector<1x32xf32>
    %c0_76 = arith.constant 0 : index
    %c0_77 = arith.constant 0 : index
    %102 = vector.load %arg27[%c0_76, %c0_77] : memref<32x32xf32, #tpu.memory_space<vmem>>, vector<32x32xf32>
    %c0_78 = arith.constant 0 : index
    %c0_79 = arith.constant 0 : index
    %103 = vector.load %arg28[%c0_78, %c0_79] : memref<1x32xf32, #tpu.memory_space<vmem>>, vector<1x32xf32>
    %c0_80 = arith.constant 0 : index
    %c0_81 = arith.constant 0 : index
    %104 = vector.load %arg29[%c0_80, %c0_81] : memref<32x32xf32, #tpu.memory_space<vmem>>, vector<32x32xf32>
    %c0_82 = arith.constant 0 : index
    %c0_83 = arith.constant 0 : index
    %105 = vector.load %arg30[%c0_82, %c0_83] : memref<1x32xf32, #tpu.memory_space<vmem>>, vector<1x32xf32>
    %c0_84 = arith.constant 0 : index
    %c0_85 = arith.constant 0 : index
    %106 = vector.load %arg31[%c0_84, %c0_85] : memref<32x32xf32, #tpu.memory_space<vmem>>, vector<32x32xf32>
    %c0_86 = arith.constant 0 : index
    %c0_87 = arith.constant 0 : index
    %107 = vector.load %arg32[%c0_86, %c0_87] : memref<1x32xf32, #tpu.memory_space<vmem>>, vector<1x32xf32>
    %c0_88 = arith.constant 0 : index
    %c0_89 = arith.constant 0 : index
    %108 = vector.load %arg33[%c0_88, %c0_89] : memref<32x1xf32, #tpu.memory_space<vmem>>, vector<32x1xf32>
    %c0_90 = arith.constant 0 : index
    %c0_91 = arith.constant 0 : index
    %109 = vector.load %arg34[%c0_90, %c0_91] : memref<1x1xf32, #tpu.memory_space<vmem>>, vector<1x1xf32>
    %110 = arith.mulf %4, %5 : vector<8x32xf32>
    %cst_92 = arith.constant dense<0.000000e+00> : vector<8x32xf32>
    %111 = tpu.matmul %95, %96, %cst_92 {dimension_numbers = #tpu.dot_dimension_numbers<[1], [0], [0], [1], [0, 0, 1, 1], [], []>} : vector<8x32xf32>, vector<32x32xf32>, vector<8x32xf32> -> vector<8x32xf32>
    %112 = vector.broadcast %97 : vector<1x32xf32> to vector<8x32xf32>
    %113 = arith.addf %111, %112 : vector<8x32xf32>
    %cst_93 = arith.constant 0.000000e+00 : f32
    %114 = vector.broadcast %cst_93 : f32 to vector<8x32xf32>
    %115 = arith.maximumf %113, %114 : vector<8x32xf32>
    %cst_94 = arith.constant dense<0.000000e+00> : vector<8x32xf32>
    %116 = tpu.matmul %115, %98, %cst_94 {dimension_numbers = #tpu.dot_dimension_numbers<[1], [0], [0], [1], [0, 0, 1, 1], [], []>} : vector<8x32xf32>, vector<32x32xf32>, vector<8x32xf32> -> vector<8x32xf32>
    %117 = vector.broadcast %99 : vector<1x32xf32> to vector<8x32xf32>
    %118 = arith.addf %116, %117 : vector<8x32xf32>
    %cst_95 = arith.constant 0.000000e+00 : f32
    %119 = vector.broadcast %cst_95 : f32 to vector<8x32xf32>
    %120 = arith.maximumf %118, %119 : vector<8x32xf32>
    %cst_96 = arith.constant dense<0.000000e+00> : vector<8x32xf32>
    %121 = tpu.matmul %120, %100, %cst_96 {dimension_numbers = #tpu.dot_dimension_numbers<[1], [0], [0], [1], [0, 0, 1, 1], [], []>} : vector<8x32xf32>, vector<32x32xf32>, vector<8x32xf32> -> vector<8x32xf32>
    %122 = vector.broadcast %101 : vector<1x32xf32> to vector<8x32xf32>
    %123 = arith.addf %121, %122 : vector<8x32xf32>
    %cst_97 = arith.constant dense<0.000000e+00> : vector<8x32xf32>
    %124 = tpu.matmul %110, %102, %cst_97 {dimension_numbers = #tpu.dot_dimension_numbers<[1], [0], [0], [1], [0, 0, 1, 1], [], []>} : vector<8x32xf32>, vector<32x32xf32>, vector<8x32xf32> -> vector<8x32xf32>
    %125 = vector.broadcast %103 : vector<1x32xf32> to vector<8x32xf32>
    %126 = arith.addf %124, %125 : vector<8x32xf32>
    %cst_98 = arith.constant 0.000000e+00 : f32
    %127 = vector.broadcast %cst_98 : f32 to vector<8x32xf32>
    %128 = arith.maximumf %126, %127 : vector<8x32xf32>
    %cst_99 = arith.constant dense<0.000000e+00> : vector<8x32xf32>
    %129 = tpu.matmul %128, %104, %cst_99 {dimension_numbers = #tpu.dot_dimension_numbers<[1], [0], [0], [1], [0, 0, 1, 1], [], []>} : vector<8x32xf32>, vector<32x32xf32>, vector<8x32xf32> -> vector<8x32xf32>
    %130 = vector.broadcast %105 : vector<1x32xf32> to vector<8x32xf32>
    %131 = arith.addf %129, %130 : vector<8x32xf32>
    %cst_100 = arith.constant 1.000000e+00 : f32
    %132 = vector.broadcast %cst_100 : f32 to vector<8x32xf32>
    %133 = arith.mulf %123, %132 : vector<8x32xf32>
    %134 = arith.addf %133, %131 : vector<8x32xf32>
    %cst_101 = arith.constant dense<0.000000e+00> : vector<8x32xf32>
    %135 = tpu.matmul %134, %106, %cst_101 {dimension_numbers = #tpu.dot_dimension_numbers<[1], [0], [0], [1], [0, 0, 1, 1], [], []>} : vector<8x32xf32>, vector<32x32xf32>, vector<8x32xf32> -> vector<8x32xf32>
    %136 = vector.broadcast %107 : vector<1x32xf32> to vector<8x32xf32>
    %137 = arith.addf %135, %136 : vector<8x32xf32>
    %cst_102 = arith.constant 0.000000e+00 : f32
    %138 = vector.broadcast %cst_102 : f32 to vector<8x32xf32>
    %139 = arith.maximumf %137, %138 : vector<8x32xf32>
    %cst_103 = arith.constant dense<0.000000e+00> : vector<8x1xf32>
    %140 = tpu.matmul %139, %108, %cst_103 {dimension_numbers = #tpu.dot_dimension_numbers<[1], [0], [0], [1], [0, 0, 1, 1], [], []>} : vector<8x32xf32>, vector<32x1xf32>, vector<8x1xf32> -> vector<8x1xf32>
    %141 = vector.broadcast %109 : vector<1x1xf32> to vector<8x1xf32>
    %142 = arith.addf %140, %141 : vector<8x1xf32>
    %c0_104 = arith.constant 0 : index
    %c0_105 = arith.constant 0 : index
    %143 = vector.load %arg35[%c0_104, %c0_105] : memref<8x1xf32, #tpu.memory_space<vmem>>, vector<8x1xf32>
    tpu.vector_store %arg35[%c0_104, %c0_105], %142 {strides = array<i32>} : memref<8x1xf32, #tpu.memory_space<vmem>>, vector<8x1xf32>,
    return
  }
  func.func @transform_0(%arg0: i32) -> (i32, i32) {
    %c0_i32 = arith.constant 0 : i32
    %c0_i32_0 = arith.constant 0 : i32
    %c0_i32_1 = arith.constant 0 : i32
    return %c0_i32, %c0_i32_0 : i32, i32
  }
  func.func @transform_1(%arg0: i32) -> (i32, i32) {
    %c0_i32 = arith.constant 0 : i32
    %c0_i32_0 = arith.constant 0 : i32
    %c0_i32_1 = arith.constant 0 : i32
    return %c0_i32, %c0_i32_0 : i32, i32
  }
  func.func @transform_2(%arg0: i32) -> (i32, i32) {
    %c0_i32 = arith.constant 0 : i32
    %c0_i32_0 = arith.constant 0 : i32
    return %arg0, %c0_i32 : i32, i32
  }
  func.func @transform_3(%arg0: i32) -> (i32, i32) {
    %c0_i32 = arith.constant 0 : i32
    %c0_i32_0 = arith.constant 0 : i32
    return %arg0, %c0_i32 : i32, i32
  }
  func.func @transform_4(%arg0: i32) -> (i32, i32) {
    %c0_i32 = arith.constant 0 : i32
    %c0_i32_0 = arith.constant 0 : i32
    return %arg0, %c0_i32 : i32, i32
  }
  func.func @transform_5(%arg0: i32) -> (i32, i32) {
    %c0_i32 = arith.constant 0 : i32
    %c0_i32_0 = arith.constant 0 : i32
    return %arg0, %c0_i32 : i32, i32
  }
  func.func @transform_6(%arg0: i32) -> (i32, i32) {
    %c0_i32 = arith.constant 0 : i32
    %c0_i32_0 = arith.constant 0 : i32
    %c0_i32_1 = arith.constant 0 : i32
    return %c0_i32, %c0_i32_0 : i32, i32
  }
  func.func @transform_7(%arg0: i32) -> (i32, i32) {
    %c0_i32 = arith.constant 0 : i32
    %c0_i32_0 = arith.constant 0 : i32
    %c0_i32_1 = arith.constant 0 : i32
    return %c0_i32, %c0_i32_0 : i32, i32
  }
  func.func @transform_8(%arg0: i32) -> (i32, i32) {
    %c0_i32 = arith.constant 0 : i32
    %c0_i32_0 = arith.constant 0 : i32
    %c0_i32_1 = arith.constant 0 : i32
    return %c0_i32, %c0_i32_0 : i32, i32
  }
  func.func @transform_9(%arg0: i32) -> (i32, i32) {
    %c0_i32 = arith.constant 0 : i32
    %c0_i32_0 = arith.constant 0 : i32
    %c0_i32_1 = arith.constant 0 : i32
    return %c0_i32, %c0_i32_0 : i32, i32
  }
  func.func @transform_10(%arg0: i32) -> (i32, i32) {
    %c0_i32 = arith.constant 0 : i32
    %c0_i32_0 = arith.constant 0 : i32
    %c0_i32_1 = arith.constant 0 : i32
    return %c0_i32, %c0_i32_0 : i32, i32
  }
  func.func @transform_11(%arg0: i32) -> (i32, i32) {
    %c0_i32 = arith.constant 0 : i32
    %c0_i32_0 = arith.constant 0 : i32
    %c0_i32_1 = arith.constant 0 : i32
    return %c0_i32, %c0_i32_0 : i32, i32
  }
  func.func @transform_12(%arg0: i32) -> (i32, i32) {
    %c0_i32 = arith.constant 0 : i32
    %c0_i32_0 = arith.constant 0 : i32
    %c0_i32_1 = arith.constant 0 : i32
    return %c0_i32, %c0_i32_0 : i32, i32
  }
  func.func @transform_13(%arg0: i32) -> (i32, i32) {
    %c0_i32 = arith.constant 0 : i32
    %c0_i32_0 = arith.constant 0 : i32
    %c0_i32_1 = arith.constant 0 : i32
    return %c0_i32, %c0_i32_0 : i32, i32
  }
  func.func @transform_14(%arg0: i32) -> (i32, i32) {
    %c0_i32 = arith.constant 0 : i32
    %c0_i32_0 = arith.constant 0 : i32
    %c0_i32_1 = arith.constant 0 : i32
    return %c0_i32, %c0_i32_0 : i32, i32
  }
  func.func @transform_15(%arg0: i32) -> (i32, i32) {
    %c0_i32 = arith.constant 0 : i32
    %c0_i32_0 = arith.constant 0 : i32
    %c0_i32_1 = arith.constant 0 : i32
    return %c0_i32, %c0_i32_0 : i32, i32
  }
  func.func @transform_16(%arg0: i32) -> (i32, i32) {
    %c0_i32 = arith.constant 0 : i32
    %c0_i32_0 = arith.constant 0 : i32
    %c0_i32_1 = arith.constant 0 : i32
    return %c0_i32, %c0_i32_0 : i32, i32
  }
  func.func @transform_17(%arg0: i32) -> (i32, i32) {
    %c0_i32 = arith.constant 0 : i32
    %c0_i32_0 = arith.constant 0 : i32
    %c0_i32_1 = arith.constant 0 : i32
    return %c0_i32, %c0_i32_0 : i32, i32
  }
  func.func @transform_18(%arg0: i32) -> (i32, i32) {
    %c0_i32 = arith.constant 0 : i32
    %c0_i32_0 = arith.constant 0 : i32
    %c0_i32_1 = arith.constant 0 : i32
    return %c0_i32, %c0_i32_0 : i32, i32
  }
  func.func @transform_19(%arg0: i32) -> (i32, i32) {
    %c0_i32 = arith.constant 0 : i32
    %c0_i32_0 = arith.constant 0 : i32
    %c0_i32_1 = arith.constant 0 : i32
    return %c0_i32, %c0_i32_0 : i32, i32
  }
  func.func @transform_20(%arg0: i32) -> (i32, i32) {
    %c0_i32 = arith.constant 0 : i32
    %c0_i32_0 = arith.constant 0 : i32
    %c0_i32_1 = arith.constant 0 : i32
    return %c0_i32, %c0_i32_0 : i32, i32
  }
  func.func @transform_21(%arg0: i32) -> (i32, i32) {
    %c0_i32 = arith.constant 0 : i32
    %c0_i32_0 = arith.constant 0 : i32
    %c0_i32_1 = arith.constant 0 : i32
    return %c0_i32, %c0_i32_0 : i32, i32
  }
  func.func @transform_22(%arg0: i32) -> (i32, i32) {
    %c0_i32 = arith.constant 0 : i32
    %c0_i32_0 = arith.constant 0 : i32
    %c0_i32_1 = arith.constant 0 : i32
    return %c0_i32, %c0_i32_0 : i32, i32
  }
  func.func @transform_23(%arg0: i32) -> (i32, i32) {
    %c0_i32 = arith.constant 0 : i32
    %c0_i32_0 = arith.constant 0 : i32
    %c0_i32_1 = arith.constant 0 : i32
    return %c0_i32, %c0_i32_0 : i32, i32
  }
  func.func @transform_24(%arg0: i32) -> (i32, i32) {
    %c0_i32 = arith.constant 0 : i32
    %c0_i32_0 = arith.constant 0 : i32
    %c0_i32_1 = arith.constant 0 : i32
    return %c0_i32, %c0_i32_0 : i32, i32
  }
  func.func @transform_25(%arg0: i32) -> (i32, i32) {
    %c0_i32 = arith.constant 0 : i32
    %c0_i32_0 = arith.constant 0 : i32
    %c0_i32_1 = arith.constant 0 : i32
    return %c0_i32, %c0_i32_0 : i32, i32
  }
  func.func @transform_26(%arg0: i32) -> (i32, i32) {
    %c0_i32 = arith.constant 0 : i32
    %c0_i32_0 = arith.constant 0 : i32
    %c0_i32_1 = arith.constant 0 : i32
    return %c0_i32, %c0_i32_0 : i32, i32
  }
  func.func @transform_27(%arg0: i32) -> (i32, i32) {
    %c0_i32 = arith.constant 0 : i32
    %c0_i32_0 = arith.constant 0 : i32
    %c0_i32_1 = arith.constant 0 : i32
    return %c0_i32, %c0_i32_0 : i32, i32
  }
  func.func @transform_28(%arg0: i32) -> (i32, i32) {
    %c0_i32 = arith.constant 0 : i32
    %c0_i32_0 = arith.constant 0 : i32
    %c0_i32_1 = arith.constant 0 : i32
    return %c0_i32, %c0_i32_0 : i32, i32
  }
  func.func @transform_29(%arg0: i32) -> (i32, i32) {
    %c0_i32 = arith.constant 0 : i32
    %c0_i32_0 = arith.constant 0 : i32
    %c0_i32_1 = arith.constant 0 : i32
    return %c0_i32, %c0_i32_0 : i32, i32
  }
  func.func @transform_30(%arg0: i32) -> (i32, i32) {
    %c0_i32 = arith.constant 0 : i32
    %c0_i32_0 = arith.constant 0 : i32
    %c0_i32_1 = arith.constant 0 : i32
    return %c0_i32, %c0_i32_0 : i32, i32
  }
  func.func @transform_31(%arg0: i32) -> (i32, i32) {
    %c0_i32 = arith.constant 0 : i32
    %c0_i32_0 = arith.constant 0 : i32
    %c0_i32_1 = arith.constant 0 : i32
    return %c0_i32, %c0_i32_0 : i32, i32
  }
  func.func @transform_32(%arg0: i32) -> (i32, i32) {
    %c0_i32 = arith.constant 0 : i32
    %c0_i32_0 = arith.constant 0 : i32
    %c0_i32_1 = arith.constant 0 : i32
    return %c0_i32, %c0_i32_0 : i32, i32
  }
  func.func @transform_33(%arg0: i32) -> (i32, i32) {
    %c0_i32 = arith.constant 0 : i32
    %c0_i32_0 = arith.constant 0 : i32
    %c0_i32_1 = arith.constant 0 : i32
    return %c0_i32, %c0_i32_0 : i32, i32
  }
  func.func @transform_34(%arg0: i32) -> (i32, i32) {
    %c0_i32 = arith.constant 0 : i32
    %c0_i32_0 = arith.constant 0 : i32
    return %arg0, %c0_i32 : i32, i32
  }
}

</mosaic_0001>

<bundles_post_ra>
// kernel: tpu_custom_call.1
= control target key start
LH: loop header
LB: loop body
LE: loop exit
PB: predicated region body
PF: predicated region fallthrough
CT: control target
= control target key end

     0   :  { %s11065_s6 = smov 1   ;;  %s11066_s10 = smov 2   ;;  %s12974_s0 = inlined_call_operand.smem [shape: u32[35], index: -1, kind: input, shape index: {}] }
   0x1   :  { %s11117_s5 = sld [smem:[%s12974_s0]]   ;;  %s11067_s14 = smov 3  }
   0x2   :  { %s11122_s9 = sld [smem:[%s12974_s0 + %s11065_s6]]   ;;  %s11068_s18 = smov 4  }
   0x3   :  { %s11127_s13 = sld [smem:[%s12974_s0 + %s11066_s10]]   ;;  %s11069_s22 = smov 5  }
   0x4   :  { %s11132_s17 = sld [smem:[%s12974_s0 + %s11067_s14]]   ;;  %s11070_s26 = smov 6  }
   0x5   :  { %s11137_s21 = sld [smem:[%s12974_s0 + %s11068_s18]]   ;;  %s11071_s30 = smov 7  }
   0x6   :  { %s11142_s25 = sld [smem:[%s12974_s0 + %s11069_s22]]   ;;  %s11072_s4 = smov 8  }
   0x7   :  { %s11147_s29 = sld [smem:[%s12974_s0 + %s11070_s26]]   ;;  %s11073_s10 = smov 9  }
   0x8   :  { %s11152_s3 = sld [smem:[%s12974_s0 + %s11071_s30]]   ;;  %s11074_s15 = smov 10  }
   0x9   :  { %s11157_s8 = sld [smem:[%s12974_s0 + %s11072_s4]]   ;;  %s11075_s20 = smov 11  }
   0xa   :  { %s11162_s14 = sld [smem:[%s12974_s0 + %s11073_s10]]   ;;  %s11076_s26 = smov 12  }
   0xb   :  { %s11167_s19 = sld [smem:[%s12974_s0 + %s11074_s15]]   ;;  %s11077_s1 = smov 13  }
   0xc   :  { %s11172_s24 = sld [smem:[%s12974_s0 + %s11075_s20]]   ;;  %s11078_s7 = smov 14  }
   0xd   :  { %s11177_s30 = sld [smem:[%s12974_s0 + %s11076_s26]]   ;;  %s11079_s15 = smov 15  }
   0xe   :  { %s11182_s6 = sld [smem:[%s12974_s0 + %s11077_s1]]   ;;  %s11080_s22 = smov 16  }
   0xf   :  { %s11187_s12 = sld [smem:[%s12974_s0 + %s11078_s7]]   ;;  %s11081_s28 = smov 17  }
  0x10   :  { %s11192_s20 = sld [smem:[%s12974_s0 + %s11079_s15]]   ;;  %s11082_s7 = smov 18  }
  0x11   :  { %s11197_s27 = sld [smem:[%s12974_s0 + %s11080_s22]]   ;;  %s11083_s15 = smov 19  }
  0x12   :  { %s11202_s4 = sld [smem:[%s12974_s0 + %s11081_s28]]   ;;  %s11084_s22 = smov 20  }
  0x13   :  { %13000 = sst [smem:[#allocation13_spill]] %s11177_s30  ;;  %s11085_s28 = smov 21  }
  0x14   :  { %13001 = sst [smem:[#allocation14_spill]] %s11182_s6  ;;  %s11098_s10 = smov 34  }
  0x15   :  { %13002 = sst [smem:[#allocation15_spill]] %s11187_s12 }
  0x16   :  { %s11207_s30 = sld [smem:[%s12974_s0 + %s11082_s7]]   ;;  %s11086_s7 = smov 22  }
  0x17   :  { %13003 = sst [smem:[#allocation16_spill]] %s11197_s27 }
  0x18   :  { %s11212_s12 = sld [smem:[%s12974_s0 + %s11083_s15]]   ;;  %s11087_s15 = smov 23  }
  0x19   :  { %s11217_s27 = sld [smem:[%s12974_s0 + %s11084_s22]]   ;;  %s11088_s22 = smov 24  }
  0x1a   :  { %s11222_s6 = sld [smem:[%s12974_s0 + %s11085_s28]]   ;;  %s11089_s28 = smov 25  }
  0x1c   :  { %13004 = sst [smem:[#allocation17_spill]] %s11207_s30 }
  0x1d   :  { %s11227_s30 = sld [smem:[%s12974_s0 + %s11086_s7]]   ;;  %s11090_s7 = smov 26  }
  0x1e   :  { %13005 = sst [smem:[#allocation18_spill]] %s11212_s12 }
  0x1f   :  { %13006 = sst [smem:[#allocation19_spill]] %s11217_s27 }
  0x20   :  { %13007 = sst [smem:[#allocation20_spill]] %s11222_s6 }
  0x21   :  { %s11232_s12 = sld [smem:[%s12974_s0 + %s11087_s15]]   ;;  %s11091_s15 = smov 27  }
  0x22   :  { %s11237_s27 = sld [smem:[%s12974_s0 + %s11088_s22]]   ;;  %s11092_s22 = smov 28  }
  0x23   :  { %13008 = sst [smem:[#allocation21_spill]] %s11227_s30 }
  0x24   :  { %s11242_s6 = sld [smem:[%s12974_s0 + %s11089_s28]]   ;;  %s11093_s28 = smov 29  }
  0x25   :  { %s11247_s30 = sld [smem:[%s12974_s0 + %s11090_s7]]   ;;  %s11094_s7 = smov 30  }
  0x27   :  { %13009 = sst [smem:[#allocation22_spill]] %s11232_s12 }
  0x28   :  { %13010 = sst [smem:[#allocation23_spill]] %s11237_s27 }
  0x29   :  { %s11252_s12 = sld [smem:[%s12974_s0 + %s11091_s15]]   ;;  %s11095_s15 = smov 31  }
  0x2a   :  { %13011 = sst [smem:[#allocation24_spill]] %s11242_s6 }
  0x2b   :  { %13012 = sst [smem:[#allocation25_spill]] %s11247_s30 }
  0x2c   :  { %s11257_s27 = sld [smem:[%s12974_s0 + %s11092_s22]]   ;;  %s11096_s22 = smov 32  }
  0x2d   :  { %s11262_s6 = sld [smem:[%s12974_s0 + %s11093_s28]]   ;;  %s11097_s28 = smov 33  }
  0x2e   :  { %s11267_s30 = sld [smem:[%s12974_s0 + %s11094_s7]]  }
  0x2f   :  { %13013 = sst [smem:[#allocation26_spill]] %s11252_s12 }
  0x30   :  { %s11272_s12 = sld [smem:[%s12974_s0 + %s11095_s15]]  }
  0x32   :  { %13014 = sst [smem:[#allocation27_spill]] %s11257_s27 }
  0x33   :  { %13015 = sst [smem:[#allocation28_spill]] %s11262_s6 }
  0x34   :  { %13016 = sst [smem:[#allocation29_spill]] %s11267_s30 }
  0x35   :  { %s11277_s27 = sld [smem:[%s12974_s0 + %s11096_s22]]  }
  0x36   :  { %s8418_s6 = sld [smem:[%s12974_s0 + %s11097_s28]]  }
  0x37   :  { %s11285_s30 = sld [smem:[%s12974_s0 + %s11098_s10]]  }
  0x3c   :  { %v74_v0 = vstv %s8418_s6 }
  0x3d   :  { %75 = vst [vmem:[#allocation2] sm:$0x1] %v74_v0 }
  0x3e   :  { %76 = vsyncpa [#allocation4], 0 }
  0x3f   :  { %77 = vsyncpa [#allocation6], 0 }
  0x40   :  { %78 = vsyncpa [#allocation9], 0  ;;  %s11287_s15 = smov 0  }
  0x41 LB: > { %s11293_s16 = sadd.s32 4294967295, %s11063_s15   ;;  %p8422_p0 = scmp.ge.s32.totalorder %s11063_s15, 1  ;;  %s11063_s15 = sphi %s11287_s15, %s84_s15  }
  0x42   : > { %p849_p1 = scmp.lt.s32.totalorder %s11063_s15, 3  ;;  %p12983_p2 = scmp.eq.s32.totalorder %s11293_s16, 0 }
  0x43   : > { %s11099_s6 = smov [#allocation5]   ;;  %s11100_s22 = smov [#allocation3]  }
  0x44   : > { %p11298_p3 = pnand %p8422_p0, %p849_p1  ;;  %s892_s18 = sshll.u32 %s11099_s6, 4  ;;  %s11302_s18 = int_to_ptr.vmem [resolvable:$true] %s892_s18 }
  0x45   : > { %s876_s23 = sshll.u32 %s11100_s22, 4  ;;  %s11101_s28 = smov [#allocation7]   ;;  %s11306_s23 = int_to_ptr.vmem [resolvable:$true] %s876_s23 }
  0x46   : > { %s13017_s0 = scalar_select %p11298_p3, 1, 0 }
  0x47   : > { %p10720_p4 = pneg %p11298_p3  ;;  %s914_s1 = sshll.u32 %s11101_s28, 4  ;;  %s11314_s1 = int_to_ptr.vmem [resolvable:$true] %s914_s1 }
  0x48   : > { %s11102_s2 = smov [#allocation8]   ;;  %s10933_s7 = scalar_lea.hbm %s11172_s24, 32768 }
  0x49   : > { %p11310_p5 = pnand %p12983_p2, %p10720_p4  ;;  %s11316_s10 = sshll.u32 %s11102_s2, 4  ;;  %s931_s10 = int_to_ptr.vmem [resolvable:$true] %s11316_s10 }
  0x4a   : > { %p10934_p6 = scmp.ne.s32.totalorder %s11172_s24, %s10933_s7  ;;  %p10940_p10 = scmp.lt.u32.totalorder %s10933_s7, %s11172_s24 }
  0x4b   : > { %p11322_p7 = pneg %p11310_p5 }
  0x4d   : > { %p10936_p8 = pnand %p11322_p7, %p10934_p6 }
  0x4f   : > { %p10937_p9 = pneg %p10936_p8 }
  0x51   : > { %p10942_p11 = pnand %p10940_p10, %p10937_p9 }
  0x53   : > { %10945 = shalt.err (!%p10942_p11)
}
  0x54   : > { %s10946_s6 = scalar_lea.vmem %s11302_s18, 32768  ;;  %p10954_p1 = scmp.lt.s32.totalorder %s11302_s18, %s11302_s18 }
  0x55   : > { %p10947_p12 = scmp.ne.s32.totalorder %s11302_s18, %s10946_s6  ;;  %p10955_p4 = scmp.lt.s32.totalorder %s10946_s6, %s10946_s6 }
  0x57   : > { %p10949_p13 = pnand %p10947_p12, %p11322_p7  ;;  %p10956_p2 = por %p10955_p4, %p10954_p1 }
  0x59   : > { %p10950_p0 = pneg %p10949_p13 }
  0x5b   : > { %p10957_p3 = pnand %p10956_p2, %p10950_p0 }
  0x5d   : > { %10960 = shalt.err (!%p10957_p3)
}
  0x5e   : > { %s11103_s22 = smov 512   ;;  %s11104_s28 = smov 32  }
  0x5f   : > { %10726 = dma.hbm_to_vmem [thread:$0]  (!%p11310_p5), %s11172_s24, 32768, %s11302_s18, [#allocation6], %s11103_s22, %s11103_s22, %s11104_s28  }
  0x60   : > { %s10961_s2 = scalar_lea.hbm %s11162_s14, 32768 }
  0x61   : > { %p10962_p6 = scmp.ne.s32.totalorder %s11162_s14, %s10961_s2  ;;  %p10968_p3 = scmp.lt.u32.totalorder %s10961_s2, %s11162_s14 }
  0x63   : > { %p10964_p8 = pnand %p10962_p6, %p11322_p7 }
  0x65   : > { %p10965_p2 = pneg %p10964_p8 }
  0x67   : > { %p10970_p9 = pnand %p10968_p3, %p10965_p2 }
  0x69   : > { %10973 = shalt.err (!%p10970_p9)
}
  0x6a   : > { %s10974_s7 = scalar_lea.vmem %s11306_s23, 32768  ;;  %p10982_p13 = scmp.lt.s32.totalorder %s11306_s23, %s11306_s23 }
  0x6b   : > { %p10975_p10 = scmp.ne.s32.totalorder %s11306_s23, %s10974_s7  ;;  %p10983_p0 = scmp.lt.s32.totalorder %s10974_s7, %s10974_s7 }
  0x6d   : > { %p10977_p11 = pnand %p10975_p10, %p11322_p7  ;;  %p10984_p1 = por %p10983_p0, %p10982_p13 }
  0x6f   : > { %p10978_p12 = pneg %p10977_p11 }
  0x71   : > { %p10985_p4 = pnand %p10984_p1, %p10978_p12 }
  0x73   : > { %10988 = shalt.err (!%p10985_p4)
}
  0x74   : > { %10723 = dma.hbm_to_vmem [thread:$0]  (!%p11310_p5), %s11162_s14, 32768, %s11306_s23, [#allocation4], %s11103_s22, %s11103_s22, %s11104_s28  }
  0x75   : > { %s10989_s18 = scalar_lea.hbm %s11192_s20, 32768 }
  0x76   : > { %p10990_p6 = scmp.ne.s32.totalorder %s11192_s20, %s10989_s18  ;;  %p10996_p3 = scmp.lt.u32.totalorder %s10989_s18, %s11192_s20 }
  0x78   : > { %p10992_p8 = pnand %p10990_p6, %p11322_p7 }
  0x7a   : > { %p10993_p2 = pneg %p10992_p8 }
  0x7c   : > { %p10998_p9 = pnand %p10996_p3, %p10993_p2 }
  0x7e   : > { %11001 = shalt.err (!%p10998_p9)
}
  0x7f   : > { %s11002_s6 = scalar_lea.vmem %s11314_s1, 32768  ;;  %p11010_p13 = scmp.lt.s32.totalorder %s11314_s1, %s11314_s1 }
  0x80   : > { %p11003_p10 = scmp.ne.s32.totalorder %s11314_s1, %s11002_s6  ;;  %p11011_p0 = scmp.lt.s32.totalorder %s11002_s6, %s11002_s6 }
  0x82   : > { %p11005_p11 = pnand %p11003_p10, %p11322_p7  ;;  %p11012_p1 = por %p11011_p0, %p11010_p13 }
  0x84   : > { %p11006_p12 = pneg %p11005_p11 }
  0x86   : > { %p11013_p4 = pnand %p11012_p1, %p11006_p12 }
  0x88   : > { %11016 = shalt.err (!%p11013_p4)
}
  0x89   : > { %10729 = dma.hbm_to_vmem [thread:$0]  (!%p11310_p5), %s11192_s20, 32768, %s11314_s1, [#allocation6], %s11103_s22, %s11103_s22, %s11104_s28  }
  0x8a   : > { %s11017_s23 = scalar_lea.hbm %s11202_s4, 32768 }
  0x8b   : > { %p11018_p6 = scmp.ne.s32.totalorder %s11202_s4, %s11017_s23  ;;  %p11024_p3 = scmp.lt.u32.totalorder %s11017_s23, %s11202_s4 }
  0x8d   : > { %p11020_p8 = pnand %p11018_p6, %p11322_p7 }
  0x8f   : > { %p11021_p2 = pneg %p11020_p8 }
  0x91   : > { %p11026_p9 = pnand %p11024_p3, %p11021_p2 }
  0x93   : > { %11029 = shalt.err (!%p11026_p9)
}
  0x94   : > { %s11030_s2 = scalar_lea.vmem %s931_s10, 32768  ;;  %p11038_p13 = scmp.lt.s32.totalorder %s931_s10, %s931_s10 }
  0x95   : > { %p11031_p10 = scmp.ne.s32.totalorder %s931_s10, %s11030_s2  ;;  %p11039_p0 = scmp.lt.s32.totalorder %s11030_s2, %s11030_s2 }
  0x97   : > { %p11033_p11 = pnand %p11031_p10, %p11322_p7  ;;  %p11040_p1 = por %p11039_p0, %p11038_p13 }
  0x99   : > { %p11034_p12 = pneg %p11033_p11 }
  0x9b   : > { %p11041_p4 = pnand %p11040_p1, %p11034_p12 }
  0x9d   : > { %11044 = shalt.err (!%p11041_p4)
}
  0x9e   : > { %10732 = dma.hbm_to_vmem [thread:$0]  (!%p11310_p5), %s11202_s4, 32768, %s931_s10, [#allocation9], %s11103_s22, %s11103_s22, %s11104_s28  }
  0x9f   : > { %p13020_p6 = scmp.ne.s32.totalorder %s13017_s0, 0 }
  0xa1   : > { %1022 = sbr.rel (%p13020_p6) target bundleno = 4007 (0xfa7), region = 156 }
  0xa8   : > { %p13021_p8 = scmp.eq.s32.totalorder %s11293_s16, 0 }
  0xaa   : > { %11050 = dma.done.wait (%p13021_p8), [#allocation4], 32768   ;;  %p13022_p7 = pmov %p13021_p8 }
  0xac   : > { %11052 = vsyncadd (%p13022_p7), [#allocation4], 4294934528  ;;  %p13023_p2 = pmov %p13022_p7 }
  0xae   : > { %11054 = dma.done.wait (%p13023_p2), [#allocation6], 65536   ;;  %p13024_p3 = pmov %p13023_p2 }
  0xaf   : > { %p13025_p9 = pmov %p13023_p2 }
  0xb0   : > { %11056 = vsyncadd (%p13024_p3), [#allocation6], 4294901760 }
  0xb1   : > { %11058 = dma.done.wait (%p13025_p9), [#allocation9], 32768   ;;  %p13026_p5 = pmov %p13023_p2 }
  0xb2   : > { %p1130_p10 = scmp.lt.s32.totalorder %s11293_s16, 1  ;;  %v12985_v1 = vmov 0.0   ;;  %v1188_v4 = vld [vmem:[%s11147_s29 + $0x8] sm:$0xff]  ;;  %v1190_v6 = vld [vmem:[%s11147_s29 + $0x18] sm:$0xff]  ;;  %v1187_v10 = vld [vmem:[%s11147_s29] sm:$0xff]  ;;  %vm1227_vm0 = vcmask 130048  }
  0xb3   : > { %11060 = vsyncadd (%p13026_p5), [#allocation9], 4294934528  ;;  %1340 = vmatprep.mubr.f32.mxu0 %v12985_v1  ;;  %1501 = vmatprep.mubr.f32.mxu1 %v12985_v1  ;;  %v1192_v5 = vld [vmem:[%s11147_s29 + $0x28] sm:$0xff]  ;;  %v1194_v7 = vld [vmem:[%s11147_s29 + $0x38] sm:$0xff]  ;;  %vm1614_vm1 = vcmask 261120   ;;  %s13078_s11 = sld [smem:[#allocation14_spill]] }
  0xb4   : > { %s13099_s16 = smov (!%p1130_p10, %s11293_s16), 1  ;;  %v11426_v8 = vpack.c.bf16 %v1192_v5, %v1188_v4  ;;  %v11428_v9 = vpack.c.bf16 %v1194_v7, %v1190_v6  ;;  %v1191_v11 = vld [vmem:[%s11147_s29 + $0x20] sm:$0xff]  ;;  %v1189_v12 = vld [vmem:[%s11147_s29 + $0x10] sm:$0xff]  ;;  %v1599_v16 = vld [vmem:[%s11152_s3 + $0x8] sm:$0xff]  ;;  %s13079_s22 = sld [smem:[#allocation15_spill]]  ;;  %vm11108_vm2 = vmmov 0  }
  0xb5   : > { %s11410_s0 = sshll.u32 %s13099_s16, 3  ;;  %v11433_v13 = vpack.c.bf16 %v1191_v11, %v1187_v10  ;;  %v1193_v14 = vld [vmem:[%s11147_s29 + $0x30] sm:$0xff]  ;;  %v1603_v17 = vld [vmem:[%s11152_s3 + $0x28] sm:$0xff]  ;;  %v1601_v19 = vld [vmem:[%s11152_s3 + $0x18] sm:$0xff]  ;;  %s13081_s28 = sld [smem:[#allocation13_spill]]  ;;  %vm8254_vm3 = vcmask 7168  }
  0xb6   : > { %s11414_s26 = scalar_lea.vmem %s11132_s17, %s11410_s0  ;;  %s11418_s1 = scalar_lea.vmem %s11127_s13, %s11410_s0  ;;  %13027 = vst [vmem:[#allocation30_spill] sm:$0xff] %v11426_v8  ;;  %13028 = vst [vmem:[#allocation31_spill] sm:$0xff] %v11428_v9  ;;  %8923 = vmatprep.subr.bf16.mxu0 %v11426_v8  ;;  %8927 = vmatprep.subr.bf16.mxu1 %v11428_v9  ;;  %v11438_v15 = vpack.c.bf16 %v1193_v14, %v1189_v12  ;;  %v8930_v18 = vpack.c.bf16 %v1603_v17, %v1599_v16  ;;  %v1605_v20 = vld [vmem:[%s11152_s3 + $0x38] sm:$0xff]  ;;  %v1598_v22 = vld [vmem:[%s11152_s3] sm:$0xff] }
  0xb7   : > { %v1184_v2 = vld [vmem:[%s11414_s26] sm:$0xff]  ;;  %13029 = vst [vmem:[#allocation32_spill] sm:$0xff] %v11433_v13  ;;  %8925 = vmatpush1.bf16.msra.mxu0 %v11433_v13  ;;  %v8938_v21 = vpack.c.bf16 %v1605_v20, %v1601_v19  ;;  %v1607_v24 = vld [vmem:[%s11152_s3 + $0x48] sm:$0xff]  ;;  %v1600_v25 = vld [vmem:[%s11152_s3 + $0x10] sm:$0xff]  ;;  %v12987_v19 = vmov 0   ;;  %s1145_s16 = scalar_lea.vmem %s11142_s25, %s11410_s0  ;;  %s1141_s10 = scalar_lea.vmem %s11137_s21, %s11410_s0 }
  0xb8   : > { %v1183_v3 = vld [vmem:[%s11418_s1] sm:$0xff]  ;;  %1195 = vxpose.xlu0.b32.start [1/2] (short) %v1184_v2, 128  ;;  %13030 = vst [vmem:[#allocation33_spill] sm:$0xff] %v11438_v15  ;;  %8929 = vmatpush1.bf16.msra.mxu1 %v11438_v15  ;;  %v1604_v26 = vld [vmem:[%s11152_s3 + $0x30] sm:$0xff]  ;;  %v1611_v27 = vld [vmem:[%s11152_s3 + $0x68] sm:$0xff]  ;;  %s13082_s7 = sld [smem:[#allocation16_spill]]  ;;  %s13083_s18 = sld [smem:[#allocation18_spill]] }
  0xb9   : > { %8931 = vmatprep.subr.bf16.mxu0 %v8930_v18  ;;  %8939 = vmatprep.subr.bf16.mxu1 %v8938_v21  ;;  %v1602_v23 = vld [vmem:[%s11152_s3 + $0x20] sm:$0xff]  ;;  %v1609_v28 = vld [vmem:[%s11152_s3 + $0x58] sm:$0xff]  ;;  %v8940_v32 = vpack.c.bf16 %v1604_v26, %v1600_v25  ;;  %v8934_v34 = vpack.c.bf16 %v1611_v27, %v1607_v24  ;;  %v1608_v37 = vld [vmem:[%s11152_s3 + $0x50] sm:$0xff]  ;;  %s13084_s6 = sld [smem:[#allocation17_spill]]  ;;  %s13085_s23 = sld [smem:[#allocation19_spill]] }
  0xba   : > { %v1613_v29 = vld [vmem:[%s11152_s3 + $0x78] sm:$0xff]  ;;  %v8932_v30 = vpack.c.bf16 %v1602_v23, %v1598_v22  ;;  %v1606_v31 = vld [vmem:[%s11152_s3 + $0x40] sm:$0xff]  ;;  %v1612_v38 = vld [vmem:[%s11152_s3 + $0x70] sm:$0xff]  ;;  %s13087_s2 = sld [smem:[#allocation21_spill]] }
  0xbb   : > { %v1610_v35 = vld [vmem:[%s11152_s3 + $0x60] sm:$0xff]  ;;  %v8942_v36 = vpack.c.bf16 %v1613_v29, %v1609_v28  ;;  %v8944_v40 = vpack.c.bf16 %v1612_v38, %v1608_v37  ;;  %v1152_v57 = vld [vmem:[%s11117_s5 + $0x8] sm:$0xff]  ;;  %v1153_v58 = vld [vmem:[%s11117_s5 + $0x10] sm:$0xff] }
  0xbc   : > { %1196 = vxpose.xlu0.b32.end [2/2] (short) %v1183_v3, 128  ;;  %v8936_v39 = vpack.c.bf16 %v1610_v35, %v1606_v31  ;;  %v1151_v56 = vld [vmem:[%s11117_s5] sm:$0xff]  ;;  %v1154_v59 = vld [vmem:[%s11117_s5 + $0x18] sm:$0xff]  ;;  %v1156_v61 = vld [vmem:[%s11117_s5 + $0x28] sm:$0xff] }
  0xbd   : > { %v1155_v60 = vld [vmem:[%s11117_s5 + $0x20] sm:$0xff]  ;;  %v1157_v62 = vld [vmem:[%s11117_s5 + $0x30] sm:$0xff]  ;;  %v1158_v63 = vld [vmem:[%s11117_s5 + $0x38] sm:$0xff] }
  0xbe   : > { %v1159_v0 = vld [vmem:[%s11117_s5 + $0x40] sm:$0xff]  ;;  %v1160_v2 = vld [vmem:[%s11117_s5 + $0x48] sm:$0xff]  ;;  %v1161_v3 = vld [vmem:[%s11117_s5 + $0x50] sm:$0xff] }
  0xbf   : > { %v1162_v4 = vld [vmem:[%s11117_s5 + $0x58] sm:$0xff]  ;;  %v1163_v5 = vld [vmem:[%s11117_s5 + $0x60] sm:$0xff]  ;;  %v1164_v6 = vld [vmem:[%s11117_s5 + $0x68] sm:$0xff] }
  0xc0   : > { %v1165_v7 = vld [vmem:[%s11117_s5 + $0x70] sm:$0xff]  ;;  %v1166_v10 = vld [vmem:[%s11117_s5 + $0x78] sm:$0xff] }
  0xe5   : > { %10793 = vset.pattern.permute.xlu0 %v12987_v19 }
 0x138   : > { %v1211_v33 = vpop.trf.xlu0 }
 0x139   : > { %8438 = vmatmul.mubr.msk.f32.vlgmr.msra.gmra.mrb[0].mxu0 %vm1227_vm0, %v1211_v33  ;;  %8454 = vmatmul.mubr.msk.f32.vlgmr.msra.gmra.mrb[0].mxu1 %vm1227_vm0, %v1211_v33 }
 0x13a   : > { %1346 = vmatprep.mubr.f32.mxu0 %v12985_v1  ;;  %1507 = vmatprep.mubr.f32.mxu1 %v12985_v1 }
 0x13b   : > { %8933 = vmatpush1.bf16.msra.mxu0 %v8932_v30  ;;  %8941 = vmatpush1.bf16.msra.mxu1 %v8940_v32 }
 0x13c   : > { %v1212_v41 = vpop.trf.xlu0  ;;  %8935 = vmatprep.subr.bf16.mxu0 %v8934_v34  ;;  %8943 = vmatprep.subr.bf16.mxu1 %v8942_v36 }
 0x13d   : > { %8439 = vmatmul.mubr.msk.f32.gmra.mrb[2].mxu0 %vm1227_vm0, %v1212_v41  ;;  %8455 = vmatmul.mubr.msk.f32.gmra.mrb[2].mxu1 %vm1227_vm0, %v1212_v41 }
 0x13e   : > { %1352 = vmatprep.mubr.f32.mxu0 %v12985_v1  ;;  %1513 = vmatprep.mubr.f32.mxu1 %v12985_v1 }
 0x13f   : > { %8937 = vmatpush1.bf16.msra.mxu0 %v8936_v39  ;;  %8945 = vmatpush1.bf16.msra.mxu1 %v8944_v40 }
 0x140   : > { %v1213_v42 = vpop.trf.xlu0 }
 0x141   : > { %8440 = vmatmul.mubr.msk.f32.gmra.mrb[4].mxu0 %vm1227_vm0, %v1213_v42  ;;  %8456 = vmatmul.mubr.msk.f32.gmra.mrb[4].mxu1 %vm1227_vm0, %v1213_v42 }
 0x142   : > { %1358 = vmatprep.mubr.f32.mxu0 %v12985_v1  ;;  %1519 = vmatprep.mubr.f32.mxu1 %v12985_v1 }
 0x144   : > { %v1214_v43 = vpop.trf.xlu0 }
 0x145   : > { %8441 = vmatmul.mubr.msk.f32.gmra.mrb[6].mxu0 %vm1227_vm0, %v1214_v43  ;;  %8457 = vmatmul.mubr.msk.f32.gmra.mrb[6].mxu1 %vm1227_vm0, %v1214_v43 }
 0x146   : > { %1364 = vmatprep.mubr.f32.mxu0 %v12985_v1  ;;  %1525 = vmatprep.mubr.f32.mxu1 %v12985_v1 }
 0x148   : > { %v1215_v44 = vpop.trf.xlu0 }
 0x149   : > { %8442 = vmatmul.mubr.msk.f32.gmra.mrb[8].mxu0 %vm1227_vm0, %v1215_v44  ;;  %8458 = vmatmul.mubr.msk.f32.gmra.mrb[8].mxu1 %vm1227_vm0, %v1215_v44 }
 0x14a   : > { %1370 = vmatprep.mubr.f32.mxu0 %v12985_v1  ;;  %1531 = vmatprep.mubr.f32.mxu1 %v12985_v1 }
 0x14c   : > { %v1216_v45 = vpop.trf.xlu0 }
 0x14d   : > { %8443 = vmatmul.mubr.msk.f32.gmra.mrb[10].mxu0 %vm1227_vm0, %v1216_v45  ;;  %8459 = vmatmul.mubr.msk.f32.gmra.mrb[10].mxu1 %vm1227_vm0, %v1216_v45 }
 0x14e   : > { %1376 = vmatprep.mubr.f32.mxu0 %v12985_v1  ;;  %1537 = vmatprep.mubr.f32.mxu1 %v12985_v1 }
 0x150   : > { %v1217_v46 = vpop.trf.xlu0 }
 0x151   : > { %8444 = vmatmul.mubr.msk.f32.gmra.mrb[12].mxu0 %vm1227_vm0, %v1217_v46  ;;  %8460 = vmatmul.mubr.msk.f32.gmra.mrb[12].mxu1 %vm1227_vm0, %v1217_v46 }
 0x152   : > { %1382 = vmatprep.mubr.f32.mxu0 %v12985_v1  ;;  %1543 = vmatprep.mubr.f32.mxu1 %v12985_v1 }
 0x154   : > { %v1218_v47 = vpop.trf.xlu0 }
 0x155   : > { %8445 = vmatmul.mubr.msk.f32.gmra.mrb[14].mxu0 %vm1227_vm0, %v1218_v47  ;;  %8461 = vmatmul.mubr.msk.f32.gmra.mrb[14].mxu1 %vm1227_vm0, %v1218_v47 }
 0x156   : > { %1388 = vmatprep.mubr.f32.mxu0 %v12985_v1  ;;  %1549 = vmatprep.mubr.f32.mxu1 %v12985_v1 }
 0x158   : > { %v1219_v48 = vpop.trf.xlu0 }
 0x159   : > { %8446 = vmatmul.mubr.msk.f32.gmra.mrb[16].mxu0 %vm1227_vm0, %v1219_v48  ;;  %8462 = vmatmul.mubr.msk.f32.gmra.mrb[16].mxu1 %vm1227_vm0, %v1219_v48 }
 0x15a   : > { %1394 = vmatprep.mubr.f32.mxu0 %v12985_v1  ;;  %1555 = vmatprep.mubr.f32.mxu1 %v12985_v1 }
 0x15c   : > { %v1220_v49 = vpop.trf.xlu0 }
 0x15d   : > { %8447 = vmatmul.mubr.msk.f32.gmra.mrb[18].mxu0 %vm1227_vm0, %v1220_v49  ;;  %8463 = vmatmul.mubr.msk.f32.gmra.mrb[18].mxu1 %vm1227_vm0, %v1220_v49 }
 0x15e   : > { %1400 = vmatprep.mubr.f32.mxu0 %v12985_v1  ;;  %1561 = vmatprep.mubr.f32.mxu1 %v12985_v1 }
 0x160   : > { %v1221_v50 = vpop.trf.xlu0 }
 0x161   : > { %8448 = vmatmul.mubr.msk.f32.gmra.mrb[20].mxu0 %vm1227_vm0, %v1221_v50  ;;  %8464 = vmatmul.mubr.msk.f32.gmra.mrb[20].mxu1 %vm1227_vm0, %v1221_v50 }
 0x162   : > { %1406 = vmatprep.mubr.f32.mxu0 %v12985_v1  ;;  %1567 = vmatprep.mubr.f32.mxu1 %v12985_v1 }
 0x164   : > { %v1222_v51 = vpop.trf.xlu0 }
 0x165   : > { %8449 = vmatmul.mubr.msk.f32.gmra.mrb[22].mxu0 %vm1227_vm0, %v1222_v51  ;;  %8465 = vmatmul.mubr.msk.f32.gmra.mrb[22].mxu1 %vm1227_vm0, %v1222_v51 }
 0x166   : > { %1412 = vmatprep.mubr.f32.mxu0 %v12985_v1  ;;  %1573 = vmatprep.mubr.f32.mxu1 %v12985_v1 }
 0x168   : > { %v1223_v52 = vpop.trf.xlu0 }
 0x169   : > { %8450 = vmatmul.mubr.msk.f32.gmra.mrb[24].mxu0 %vm1227_vm0, %v1223_v52  ;;  %8466 = vmatmul.mubr.msk.f32.gmra.mrb[24].mxu1 %vm1227_vm0, %v1223_v52 }
 0x16a   : > { %1418 = vmatprep.mubr.f32.mxu0 %v12985_v1  ;;  %1579 = vmatprep.mubr.f32.mxu1 %v12985_v1 }
 0x16c   : > { %v1224_v53 = vpop.trf.xlu0 }
 0x16d   : > { %8451 = vmatmul.mubr.msk.f32.gmra.mrb[26].mxu0 %vm1227_vm0, %v1224_v53  ;;  %8467 = vmatmul.mubr.msk.f32.gmra.mrb[26].mxu1 %vm1227_vm0, %v1224_v53 }
 0x16e   : > { %1424 = vmatprep.mubr.f32.mxu0 %v12985_v1  ;;  %1585 = vmatprep.mubr.f32.mxu1 %v12985_v1 }
 0x170   : > { %v1225_v54 = vpop.trf.xlu0 }
 0x171   : > { %8452 = vmatmul.mubr.msk.f32.gmra.mrb[28].mxu0 %vm1227_vm0, %v1225_v54  ;;  %8468 = vmatmul.mubr.msk.f32.gmra.mrb[28].mxu1 %vm1227_vm0, %v1225_v54 }
 0x172   : > { %1430 = vmatprep.mubr.f32.mxu0 %v12985_v1  ;;  %1591 = vmatprep.mubr.f32.mxu1 %v12985_v1 }
 0x174   : > { %v1226_v55 = vpop.trf.xlu0 }
 0x175   : > { %8453 = vmatmul.mubr.msk.f32.gmra.mrb[30].mxu0 %vm1227_vm0, %v1226_v55  ;;  %8469 = vmatmul.mubr.msk.f32.gmra.mrb[30].mxu1 %vm1227_vm0, %v1226_v55 }
 0x176   : > { %1727 = vmatprep.mubr.f32.mxu0 %v12985_v1  ;;  %1888 = vmatprep.mubr.f32.mxu1 %v12985_v1 }
 0x179   : > { %8470 = vmatmul.mubr.msk.f32.vlgmr.msra.gmra.mrb[32].mxu0 %vm1614_vm1, %v1151_v56  ;;  %8486 = vmatmul.mubr.msk.f32.vlgmr.msra.gmra.mrb[32].mxu1 %vm1614_vm1, %v1151_v56 }
 0x17a   : > { %1733 = vmatprep.mubr.f32.mxu0 %v12985_v1  ;;  %1894 = vmatprep.mubr.f32.mxu1 %v12985_v1 }
 0x17d   : > { %8471 = vmatmul.mubr.msk.f32.gmra.mrb[34].mxu0 %vm1614_vm1, %v1152_v57  ;;  %8487 = vmatmul.mubr.msk.f32.gmra.mrb[34].mxu1 %vm1614_vm1, %v1152_v57 }
 0x17e   : > { %1739 = vmatprep.mubr.f32.mxu0 %v12985_v1  ;;  %1900 = vmatprep.mubr.f32.mxu1 %v12985_v1 }
 0x181   : > { %8472 = vmatmul.mubr.msk.f32.gmra.mrb[36].mxu0 %vm1614_vm1, %v1153_v58  ;;  %8488 = vmatmul.mubr.msk.f32.gmra.mrb[36].mxu1 %vm1614_vm1, %v1153_v58 }
 0x182   : > { %1745 = vmatprep.mubr.f32.mxu0 %v12985_v1  ;;  %1906 = vmatprep.mubr.f32.mxu1 %v12985_v1 }
 0x185   : > { %8473 = vmatmul.mubr.msk.f32.gmra.mrb[38].mxu0 %vm1614_vm1, %v1154_v59  ;;  %8489 = vmatmul.mubr.msk.f32.gmra.mrb[38].mxu1 %vm1614_vm1, %v1154_v59 }
 0x186   : > { %1751 = vmatprep.mubr.f32.mxu0 %v12985_v1  ;;  %1912 = vmatprep.mubr.f32.mxu1 %v12985_v1 }
 0x189   : > { %8474 = vmatmul.mubr.msk.f32.gmra.mrb[40].mxu0 %vm1614_vm1, %v1155_v60  ;;  %8490 = vmatmul.mubr.msk.f32.gmra.mrb[40].mxu1 %vm1614_vm1, %v1155_v60 }
 0x18a   : > { %1757 = vmatprep.mubr.f32.mxu0 %v12985_v1  ;;  %1918 = vmatprep.mubr.f32.mxu1 %v12985_v1 }
 0x18d   : > { %8475 = vmatmul.mubr.msk.f32.gmra.mrb[42].mxu0 %vm1614_vm1, %v1156_v61  ;;  %8491 = vmatmul.mubr.msk.f32.gmra.mrb[42].mxu1 %vm1614_vm1, %v1156_v61 }
 0x18e   : > { %1763 = vmatprep.mubr.f32.mxu0 %v12985_v1  ;;  %1924 = vmatprep.mubr.f32.mxu1 %v12985_v1 }
 0x191   : > { %8476 = vmatmul.mubr.msk.f32.gmra.mrb[44].mxu0 %vm1614_vm1, %v1157_v62  ;;  %8492 = vmatmul.mubr.msk.f32.gmra.mrb[44].mxu1 %vm1614_vm1, %v1157_v62 }
 0x192   : > { %1769 = vmatprep.mubr.f32.mxu0 %v12985_v1  ;;  %1930 = vmatprep.mubr.f32.mxu1 %v12985_v1 }
 0x195   : > { %8477 = vmatmul.mubr.msk.f32.gmra.mrb[46].mxu0 %vm1614_vm1, %v1158_v63  ;;  %8493 = vmatmul.mubr.msk.f32.gmra.mrb[46].mxu1 %vm1614_vm1, %v1158_v63 }
 0x196   : > { %1775 = vmatprep.mubr.f32.mxu0 %v12985_v1  ;;  %1936 = vmatprep.mubr.f32.mxu1 %v12985_v1 }
 0x199   : > { %8478 = vmatmul.mubr.msk.f32.gmra.mrb[48].mxu0 %vm1614_vm1, %v1159_v0  ;;  %8494 = vmatmul.mubr.msk.f32.gmra.mrb[48].mxu1 %vm1614_vm1, %v1159_v0 }
 0x19a   : > { %1781 = vmatprep.mubr.f32.mxu0 %v12985_v1  ;;  %1942 = vmatprep.mubr.f32.mxu1 %v12985_v1 }
 0x19d   : > { %8479 = vmatmul.mubr.msk.f32.gmra.mrb[50].mxu0 %vm1614_vm1, %v1160_v2  ;;  %8495 = vmatmul.mubr.msk.f32.gmra.mrb[50].mxu1 %vm1614_vm1, %v1160_v2 }
 0x19e   : > { %1787 = vmatprep.mubr.f32.mxu0 %v12985_v1  ;;  %1948 = vmatprep.mubr.f32.mxu1 %v12985_v1 }
 0x1a1   : > { %8480 = vmatmul.mubr.msk.f32.gmra.mrb[52].mxu0 %vm1614_vm1, %v1161_v3  ;;  %8496 = vmatmul.mubr.msk.f32.gmra.mrb[52].mxu1 %vm1614_vm1, %v1161_v3 }
 0x1a2   : > { %1793 = vmatprep.mubr.f32.mxu0 %v12985_v1  ;;  %1954 = vmatprep.mubr.f32.mxu1 %v12985_v1 }
 0x1a5   : > { %8481 = vmatmul.mubr.msk.f32.gmra.mrb[54].mxu0 %vm1614_vm1, %v1162_v4  ;;  %8497 = vmatmul.mubr.msk.f32.gmra.mrb[54].mxu1 %vm1614_vm1, %v1162_v4 }
 0x1a6   : > { %1799 = vmatprep.mubr.f32.mxu0 %v12985_v1  ;;  %1960 = vmatprep.mubr.f32.mxu1 %v12985_v1 }
 0x1a9   : > { %8482 = vmatmul.mubr.msk.f32.gmra.mrb[56].mxu0 %vm1614_vm1, %v1163_v5  ;;  %8498 = vmatmul.mubr.msk.f32.gmra.mrb[56].mxu1 %vm1614_vm1, %v1163_v5 }
 0x1aa   : > { %1805 = vmatprep.mubr.f32.mxu0 %v12985_v1  ;;  %1966 = vmatprep.mubr.f32.mxu1 %v12985_v1 }
 0x1ad   : > { %8483 = vmatmul.mubr.msk.f32.gmra.mrb[58].mxu0 %vm1614_vm1, %v1164_v6  ;;  %8499 = vmatmul.mubr.msk.f32.gmra.mrb[58].mxu1 %vm1614_vm1, %v1164_v6 }
 0x1ae   : > { %1811 = vmatprep.mubr.f32.mxu0 %v12985_v1  ;;  %1972 = vmatprep.mubr.f32.mxu1 %v12985_v1 }
 0x1b1   : > { %8484 = vmatmul.mubr.msk.f32.gmra.mrb[60].mxu0 %vm1614_vm1, %v1165_v7  ;;  %8500 = vmatmul.mubr.msk.f32.gmra.mrb[60].mxu1 %vm1614_vm1, %v1165_v7 }
 0x1b2   : > { %1817 = vmatprep.mubr.f32.mxu0 %v12985_v1  ;;  %1978 = vmatprep.mubr.f32.mxu1 %v12985_v1 }
 0x1b5   : > { %8485 = vmatmul.mubr.msk.f32.gmra.mrb[62].mxu0 %vm1614_vm1, %v1166_v10  ;;  %8501 = vmatmul.mubr.msk.f32.gmra.mrb[62].mxu1 %vm1614_vm1, %v1166_v10 }
 0x1b6   : > { %2183 = vmatprep.mubr.bf16.mxu0 %v12987_v19  ;;  %2296 = vmatprep.mubr.bf16.mxu1 %v12987_v19 }
 0x20c   : > { %v11600_v11 = vpop.f32.mrb[0].mxu0  ;;  %v11602_v12 = vpop.f32.mrb[0].mxu1 }
 0x20d   : > { %v11604_v14 = vpop.f32.mrb[1].mxu0  ;;  %v11606_v16 = vpop.f32.mrb[1].mxu1 }
 0x210   : > { %v11608_v17 = vpop.f32.mrb[2].mxu0  ;;  %v11610_v18 = vpop.f32.mrb[2].mxu1 }
 0x211   : > { %v11614_v20 = vpop.f32.mrb[3].mxu0  ;;  %v11616_v21 = vpop.f32.mrb[3].mxu1 }
 0x214   : > { %v11619_v22 = vpop.f32.mrb[4].mxu0  ;;  %v11621_v23 = vpop.f32.mrb[4].mxu1 }
 0x215   : > { %v11623_v24 = vpop.f32.mrb[5].mxu0  ;;  %v11625_v25 = vpop.f32.mrb[5].mxu1 }
 0x218   : > { %v11627_v26 = vpop.f32.mrb[6].mxu0  ;;  %v11629_v27 = vpop.f32.mrb[6].mxu1 }
 0x219   : > { %v11631_v28 = vpop.f32.mrb[7].mxu0  ;;  %v11633_v29 = vpop.f32.mrb[7].mxu1 }
 0x21c   : > { %v11635_v30 = vpop.f32.mrb[8].mxu0  ;;  %v11637_v31 = vpop.f32.mrb[8].mxu1 }
 0x21d   : > { %v11639_v32 = vpop.f32.mrb[9].mxu0  ;;  %v11641_v33 = vpop.f32.mrb[9].mxu1 }
 0x220   : > { %v11643_v34 = vpop.f32.mrb[10].mxu0  ;;  %v11645_v35 = vpop.f32.mrb[10].mxu1 }
 0x221   : > { %v11647_v36 = vpop.f32.mrb[11].mxu0  ;;  %v11649_v37 = vpop.f32.mrb[11].mxu1 }
 0x224   : > { %v11651_v38 = vpop.f32.mrb[12].mxu0  ;;  %v11653_v39 = vpop.f32.mrb[12].mxu1 }
 0x225   : > { %v11655_v40 = vpop.f32.mrb[13].mxu0  ;;  %v11657_v41 = vpop.f32.mrb[13].mxu1 }
 0x228   : > { %v11659_v42 = vpop.f32.mrb[14].mxu0  ;;  %v11661_v43 = vpop.f32.mrb[14].mxu1 }
 0x229   : > { %v11663_v44 = vpop.f32.mrb[15].mxu0  ;;  %v11665_v45 = vpop.f32.mrb[15].mxu1 }
 0x22c   : > { %v11667_v46 = vpop.f32.mrb[16].mxu0  ;;  %v11669_v47 = vpop.f32.mrb[16].mxu1 }
 0x22d   : > { %v11671_v48 = vpop.f32.mrb[17].mxu0  ;;  %v11673_v49 = vpop.f32.mrb[17].mxu1 }
 0x230   : > { %v11675_v50 = vpop.f32.mrb[18].mxu0  ;;  %v11677_v51 = vpop.f32.mrb[18].mxu1 }
 0x231   : > { %v11679_v52 = vpop.f32.mrb[19].mxu0  ;;  %v11681_v53 = vpop.f32.mrb[19].mxu1 }
 0x234   : > { %v11683_v54 = vpop.f32.mrb[20].mxu0  ;;  %v11685_v55 = vpop.f32.mrb[20].mxu1 }
 0x235   : > { %v11687_v56 = vpop.f32.mrb[21].mxu0  ;;  %v11689_v57 = vpop.f32.mrb[21].mxu1 }
 0x238   : > { %v11691_v58 = vpop.f32.mrb[22].mxu0  ;;  %v11693_v59 = vpop.f32.mrb[22].mxu1 }
 0x239   : > { %v11695_v60 = vpop.f32.mrb[23].mxu0  ;;  %v11697_v61 = vpop.f32.mrb[23].mxu1 }
 0x23a   : > { %13031 = vst [vmem:[#allocation34_spill] sm:$0xff] %v11697_v61 }
 0x23c   : > { %v11699_v62 = vpop.f32.mrb[24].mxu0  ;;  %v11701_v63 = vpop.f32.mrb[24].mxu1 }
 0x23d   : > { %13032 = vst [vmem:[#allocation35_spill] sm:$0xff] %v11699_v62  ;;  %13033 = vst [vmem:[#allocation36_spill] sm:$0xff] %v11701_v63  ;;  %v11703_v0 = vpop.f32.mrb[25].mxu0  ;;  %v11705_v2 = vpop.f32.mrb[25].mxu1 }
 0x23e   : > { %13034 = vst [vmem:[#allocation37_spill] sm:$0xff] %v11703_v0  ;;  %13035 = vst [vmem:[#allocation38_spill] sm:$0xff] %v11705_v2 }
 0x240   : > { %v11707_v3 = vpop.f32.mrb[26].mxu0  ;;  %v11709_v4 = vpop.f32.mrb[26].mxu1 }
 0x241   : > { %13036 = vst [vmem:[#allocation39_spill] sm:$0xff] %v11707_v3  ;;  %13037 = vst [vmem:[#allocation40_spill] sm:$0xff] %v11709_v4  ;;  %v11711_v5 = vpop.f32.mrb[27].mxu0  ;;  %v11713_v6 = vpop.f32.mrb[27].mxu1 }
 0x242   : > { %13038 = vst [vmem:[#allocation41_spill] sm:$0xff] %v11711_v5  ;;  %13039 = vst [vmem:[#allocation42_spill] sm:$0xff] %v11713_v6 }
 0x244   : > { %v11715_v7 = vpop.f32.mrb[28].mxu0  ;;  %v11717_v10 = vpop.f32.mrb[28].mxu1 }
 0x245   : > { %13040 = vst [vmem:[#allocation43_spill] sm:$0xff] %v11715_v7  ;;  %13041 = vst [vmem:[#allocation44_spill] sm:$0xff] %v11717_v10  ;;  %v11719_v1 = vpop.f32.mrb[29].mxu0  ;;  %v11721_v19 = vpop.f32.mrb[29].mxu1 }
 0x246   : > { %13042 = vst [vmem:[#allocation45_spill] sm:$0xff] %v11719_v1  ;;  %13043 = vst [vmem:[#allocation46_spill] sm:$0xff] %v11721_v19 }
 0x248   : > { %v11723_v15 = vpop.f32.mrb[30].mxu0  ;;  %v11725_v13 = vpop.f32.mrb[30].mxu1 }
 0x249   : > { %13044 = vst [vmem:[#allocation47_spill] sm:$0xff] %v11723_v15  ;;  %13045 = vst [vmem:[#allocation48_spill] sm:$0xff] %v11725_v13  ;;  %v11727_v9 = vpop.f32.mrb[31].mxu0  ;;  %v11729_v8 = vpop.f32.mrb[31].mxu1 }
 0x24a   : > { %13046 = vst [vmem:[#allocation49_spill] sm:$0xff] %v11727_v9  ;;  %13047 = vst [vmem:[#allocation50_spill] sm:$0xff] %v11729_v8 }
 0x24c   : > { %v1729_v4 = vpop.f32.mrb[32].mxu0  ;;  %v1890_v5 = vpop.f32.mrb[32].mxu1 }
 0x24d   : > { %v1985_v6 = vmul.f32 %v1729_v4, %v11600_v11  ;;  %v1987_v7 = vmul.f32 %v1890_v5, %v11602_v12  ;;  %v1731_v3 = vpop.f32.mrb[33].mxu0  ;;  %v1892_v10 = vpop.f32.mrb[33].mxu1 }
 0x24e   : > { %v1986_v1 = vmul.f32 %v1731_v3, %v11604_v14  ;;  %v1988_v19 = vmul.f32 %v1892_v10, %v11606_v16 }
 0x250   : > { %v1735_v2 = vpop.f32.mrb[34].mxu0  ;;  %v1896_v15 = vpop.f32.mrb[34].mxu1 }
 0x251   : > { %v1989_v13 = vmul.f32 %v1735_v2, %v11608_v17  ;;  %v1991_v9 = vmul.f32 %v1896_v15, %v11610_v18  ;;  %v1737_v0 = vpop.f32.mrb[35].mxu0  ;;  %v1898_v8 = vpop.f32.mrb[35].mxu1 }
 0x252   : > { %v1990_v63 = vmul.f32 %v1737_v0, %v11614_v20  ;;  %v1992_v11 = vmul.f32 %v1898_v8, %v11616_v21 }
 0x253   : > { %v2049_v4 = vpack.c.bf16 %v1989_v13, %v1985_v6  ;;  %v2051_v12 = vpack.c.bf16 %v1991_v9, %v1987_v7 }
 0x254   : > { %v2050_v5 = vpack.c.bf16 %v1990_v63, %v1986_v1  ;;  %v2052_v62 = vpack.c.bf16 %v1992_v11, %v1988_v19  ;;  %v1741_v61 = vpop.f32.mrb[36].mxu0  ;;  %v1902_v14 = vpop.f32.mrb[36].mxu1 }
 0x255   : > { %v1993_v16 = vmul.f32 %v1741_v61, %v11619_v22  ;;  %v1995_v3 = vmul.f32 %v1902_v14, %v11621_v23  ;;  %v1743_v10 = vpop.f32.mrb[37].mxu0  ;;  %v1904_v17 = vpop.f32.mrb[37].mxu1 }
 0x256   : > { %v1994_v15 = vmul.f32 %v1743_v10, %v11623_v24  ;;  %v1996_v18 = vmul.f32 %v1904_v17, %v11625_v25  ;;  %2151 = vmatprep.subr.bf16.mxu0 %v2050_v5  ;;  %2264 = vmatprep.subr.bf16.mxu1 %v2052_v62 }
 0x257   : > { %2152 = vmatpush1.bf16.msra.mxu0 %v2049_v4  ;;  %2265 = vmatpush1.bf16.msra.mxu1 %v2051_v12 }
 0x258   : > { %v1747_v8 = vpop.f32.mrb[38].mxu0  ;;  %v1908_v9 = vpop.f32.mrb[38].mxu1 }
 0x259   : > { %v1997_v1 = vmul.f32 %v1747_v8, %v11627_v26  ;;  %v1999_v13 = vmul.f32 %v1908_v9, %v11629_v27  ;;  %v1749_v19 = vpop.f32.mrb[39].mxu0  ;;  %v1910_v20 = vpop.f32.mrb[39].mxu1 }
 0x25a   : > { %v1998_v21 = vmul.f32 %v1749_v19, %v11631_v28  ;;  %v2000_v22 = vmul.f32 %v1910_v20, %v11633_v29 }
 0x25b   : > { %v2053_v23 = vpack.c.bf16 %v1997_v1, %v1993_v16  ;;  %v2055_v24 = vpack.c.bf16 %v1999_v13, %v1995_v3 }
 0x25c   : > { %v2054_v61 = vpack.c.bf16 %v1998_v21, %v1994_v15  ;;  %v2056_v25 = vpack.c.bf16 %v2000_v22, %v1996_v18  ;;  %v1753_v63 = vpop.f32.mrb[40].mxu0  ;;  %v1914_v62 = vpop.f32.mrb[40].mxu1 }
 0x25d   : > { %v2001_v0 = vmul.f32 %v1753_v63, %v11635_v30  ;;  %v2003_v2 = vmul.f32 %v1914_v62, %v11637_v31  ;;  %v1755_v6 = vpop.f32.mrb[41].mxu0  ;;  %v1916_v26 = vpop.f32.mrb[41].mxu1 }
 0x25e   : > { %v2002_v27 = vmul.f32 %v1755_v6, %v11639_v32  ;;  %v2004_v7 = vmul.f32 %v1916_v26, %v11641_v33  ;;  %2153 = vmatprep.subr.bf16.mxu0 %v2054_v61  ;;  %2266 = vmatprep.subr.bf16.mxu1 %v2056_v25 }
 0x25f   : > { %2154 = vmatpush1.bf16.msra.mxu0 %v2053_v23  ;;  %2267 = vmatpush1.bf16.msra.mxu1 %v2055_v24 }
 0x260   : > { %v1759_v28 = vpop.f32.mrb[42].mxu0  ;;  %v1920_v29 = vpop.f32.mrb[42].mxu1 }
 0x261   : > { %v2005_v11 = vmul.f32 %v1759_v28, %v11643_v34  ;;  %v2007_v4 = vmul.f32 %v1920_v29, %v11645_v35  ;;  %v1761_v12 = vpop.f32.mrb[43].mxu0  ;;  %v1922_v30 = vpop.f32.mrb[43].mxu1 }
 0x262   : > { %v2006_v31 = vmul.f32 %v1761_v12, %v11647_v36  ;;  %v2008_v5 = vmul.f32 %v1922_v30, %v11649_v37 }
 0x263   : > { %v2057_v14 = vpack.c.bf16 %v2005_v11, %v2001_v0  ;;  %v2059_v32 = vpack.c.bf16 %v2007_v4, %v2003_v2 }
 0x264   : > { %v2058_v16 = vpack.c.bf16 %v2006_v31, %v2002_v27  ;;  %v2060_v33 = vpack.c.bf16 %v2008_v5, %v2004_v7  ;;  %v1765_v3 = vpop.f32.mrb[44].mxu0  ;;  %v1926_v10 = vpop.f32.mrb[44].mxu1 }
 0x265   : > { %v2009_v17 = vmul.f32 %v1765_v3, %v11651_v38  ;;  %v2011_v15 = vmul.f32 %v1926_v10, %v11653_v39  ;;  %v1767_v18 = vpop.f32.mrb[45].mxu0  ;;  %v1928_v34 = vpop.f32.mrb[45].mxu1 }
 0x266   : > { %v2010_v35 = vmul.f32 %v1767_v18, %v11655_v40  ;;  %v2012_v8 = vmul.f32 %v1928_v34, %v11657_v41  ;;  %2155 = vmatprep.subr.bf16.mxu0 %v2058_v16  ;;  %2268 = vmatprep.subr.bf16.mxu1 %v2060_v33  ;;  %v13050_v18 = vld [vmem:[#allocation36_spill] sm:$0xff] }
 0x267   : > { %2156 = vmatpush1.bf16.msra.mxu0 %v2057_v14  ;;  %2269 = vmatpush1.bf16.msra.mxu1 %v2059_v32  ;;  %v13048_v14 = vld [vmem:[#allocation34_spill] sm:$0xff] }
 0x268   : > { %v1771_v36 = vpop.f32.mrb[46].mxu0  ;;  %v1932_v37 = vpop.f32.mrb[46].mxu1 }
 0x269   : > { %v2013_v9 = vmul.f32 %v1771_v36, %v11659_v42  ;;  %v2015_v1 = vmul.f32 %v1932_v37, %v11661_v43  ;;  %v1773_v13 = vpop.f32.mrb[47].mxu0  ;;  %v1934_v38 = vpop.f32.mrb[47].mxu1  ;;  %v13052_v36 = vld [vmem:[#allocation38_spill] sm:$0xff] }
 0x26a   : > { %v2014_v39 = vmul.f32 %v1773_v13, %v11663_v44  ;;  %v2016_v19 = vmul.f32 %v1934_v38, %v11665_v45  ;;  %v13054_v38 = vld [vmem:[#allocation40_spill] sm:$0xff] }
 0x26b   : > { %v2061_v20 = vpack.c.bf16 %v2013_v9, %v2009_v17  ;;  %v2063_v40 = vpack.c.bf16 %v2015_v1, %v2011_v15  ;;  %v13049_v17 = vld [vmem:[#allocation35_spill] sm:$0xff] }
 0x26c   : > { %v2062_v21 = vpack.c.bf16 %v2014_v39, %v2010_v35  ;;  %v2064_v41 = vpack.c.bf16 %v2016_v19, %v2012_v8  ;;  %v1777_v22 = vpop.f32.mrb[48].mxu0  ;;  %v1938_v23 = vpop.f32.mrb[48].mxu1  ;;  %v13051_v8 = vld [vmem:[#allocation37_spill] sm:$0xff]  ;;  %v13053_v1 = vld [vmem:[#allocation39_spill] sm:$0xff] }
 0x26d   : > { %v2017_v24 = vmul.f32 %v1777_v22, %v11667_v46  ;;  %v2019_v61 = vmul.f32 %v1938_v23, %v11669_v47  ;;  %v1779_v25 = vpop.f32.mrb[49].mxu0  ;;  %v1940_v42 = vpop.f32.mrb[49].mxu1 }
 0x26e   : > { %v2018_v43 = vmul.f32 %v1779_v25, %v11671_v48  ;;  %v2020_v63 = vmul.f32 %v1940_v42, %v11673_v49  ;;  %2157 = vmatprep.subr.bf16.mxu0 %v2062_v21  ;;  %2270 = vmatprep.subr.bf16.mxu1 %v2064_v41  ;;  %v13056_v41 = vld [vmem:[#allocation42_spill] sm:$0xff] }
 0x26f   : > { %2158 = vmatpush1.bf16.msra.mxu0 %v2061_v20  ;;  %2271 = vmatpush1.bf16.msra.mxu1 %v2063_v40  ;;  %v13055_v40 = vld [vmem:[#allocation41_spill] sm:$0xff] }
 0x270   : > { %v1783_v44 = vpop.f32.mrb[50].mxu0  ;;  %v1944_v45 = vpop.f32.mrb[50].mxu1 }
 0x271   : > { %v2021_v62 = vmul.f32 %v1783_v44, %v11675_v50  ;;  %v2023_v0 = vmul.f32 %v1944_v45, %v11677_v51  ;;  %v1785_v2 = vpop.f32.mrb[51].mxu0  ;;  %v1946_v46 = vpop.f32.mrb[51].mxu1  ;;  %v13058_v45 = vld [vmem:[#allocation44_spill] sm:$0xff] }
 0x272   : > { %v2022_v47 = vmul.f32 %v1785_v2, %v11679_v52  ;;  %v2024_v6 = vmul.f32 %v1946_v46, %v11681_v53  ;;  %v13059_v46 = vld [vmem:[#allocation45_spill] sm:$0xff] }
 0x273   : > { %v2065_v26 = vpack.c.bf16 %v2021_v62, %v2017_v24  ;;  %v2067_v48 = vpack.c.bf16 %v2023_v0, %v2019_v61 }
 0x274   : > { %v2066_v27 = vpack.c.bf16 %v2022_v47, %v2018_v43  ;;  %v2068_v49 = vpack.c.bf16 %v2024_v6, %v2020_v63  ;;  %v1789_v7 = vpop.f32.mrb[52].mxu0  ;;  %v1950_v28 = vpop.f32.mrb[52].mxu1  ;;  %v13057_v63 = vld [vmem:[#allocation43_spill] sm:$0xff]  ;;  %v13060_v6 = vld [vmem:[#allocation46_spill] sm:$0xff] }
 0x275   : > { %v2025_v29 = vmul.f32 %v1789_v7, %v11683_v54  ;;  %v2027_v11 = vmul.f32 %v1950_v28, %v11685_v55  ;;  %v1791_v4 = vpop.f32.mrb[53].mxu0  ;;  %v1952_v50 = vpop.f32.mrb[53].mxu1  ;;  %v13061_v7 = vld [vmem:[#allocation47_spill] sm:$0xff] }
 0x276   : > { %v2026_v51 = vmul.f32 %v1791_v4, %v11687_v56  ;;  %v2028_v12 = vmul.f32 %v1952_v50, %v11689_v57  ;;  %2159 = vmatprep.subr.bf16.mxu0 %v2066_v27  ;;  %2272 = vmatprep.subr.bf16.mxu1 %v2068_v49  ;;  %v2442_v49 = vld [vmem:[#allocation3 + $0x8] sm:$0xff] }
 0x277   : > { %2160 = vmatpush1.bf16.msra.mxu0 %v2065_v26  ;;  %2273 = vmatpush1.bf16.msra.mxu1 %v2067_v48 }
 0x278   : > { %v1795_v52 = vpop.f32.mrb[54].mxu0  ;;  %v1956_v53 = vpop.f32.mrb[54].mxu1 }
 0x279   : > { %v2029_v30 = vmul.f32 %v1795_v52, %v11691_v58  ;;  %v2031_v31 = vmul.f32 %v1956_v53, %v11693_v59  ;;  %v1797_v5 = vpop.f32.mrb[55].mxu0  ;;  %v1958_v54 = vpop.f32.mrb[55].mxu1  ;;  %v2448_v52 = vld [vmem:[#allocation3 + $0x38] sm:$0xff] }
 0x27a   : > { %v2030_v55 = vmul.f32 %v1797_v5, %v11695_v60  ;;  %v2032_v32 = vmul.f32 %v1958_v54, %v13048_v14  ;;  %v13063_v53 = vld [vmem:[#allocation49_spill] sm:$0xff] }
 0x27b   : > { %v2069_v16 = vpack.c.bf16 %v2029_v30, %v2025_v29  ;;  %v2071_v56 = vpack.c.bf16 %v2031_v31, %v2027_v11  ;;  %v13062_v29 = vld [vmem:[#allocation48_spill] sm:$0xff]  ;;  %v13064_v31 = vld [vmem:[#allocation50_spill] sm:$0xff] }
 0x27c   : > { %v2070_v33 = vpack.c.bf16 %v2030_v55, %v2026_v51  ;;  %v2072_v57 = vpack.c.bf16 %v2032_v32, %v2028_v12  ;;  %v1801_v3 = vpop.f32.mrb[56].mxu0  ;;  %v1962_v10 = vpop.f32.mrb[56].mxu1  ;;  %v2446_v51 = vld [vmem:[#allocation3 + $0x28] sm:$0xff]  ;;  %v2444_v12 = vld [vmem:[#allocation3 + $0x18] sm:$0xff] }
 0x27d   : > { %v2033_v15 = vmul.f32 %v1801_v3, %v13049_v17  ;;  %v2035_v34 = vmul.f32 %v1962_v10, %v13050_v18  ;;  %v1803_v35 = vpop.f32.mrb[57].mxu0  ;;  %v1964_v58 = vpop.f32.mrb[57].mxu1  ;;  %v2445_v3 = vld [vmem:[#allocation3 + $0x20] sm:$0xff]  ;;  %v2443_v10 = vld [vmem:[#allocation3 + $0x10] sm:$0xff]  ;;  %v2454_v18 = vld [vmem:[#allocation3 + $0x68] sm:$0xff] }
 0x27e   : > { %v2034_v59 = vmul.f32 %v1803_v35, %v13051_v8  ;;  %v2036_v37 = vmul.f32 %v1964_v58, %v13052_v36  ;;  %2161 = vmatprep.subr.bf16.mxu0 %v2070_v33  ;;  %2274 = vmatprep.subr.bf16.mxu1 %v2072_v57  ;;  %v9074_v33 = vpack.c.bf16 %v2448_v52, %v2444_v12  ;;  %v2441_v57 = vld [vmem:[#allocation3] sm:$0xff]  ;;  %v2447_v17 = vld [vmem:[#allocation3 + $0x30] sm:$0xff]  ;;  %v2456_v35 = vld [vmem:[#allocation3 + $0x78] sm:$0xff] }
 0x27f   : > { %2162 = vmatpush1.bf16.msra.mxu0 %v2069_v16  ;;  %2275 = vmatpush1.bf16.msra.mxu1 %v2071_v56  ;;  %v10794_v16 = vld [vmem:[%s11122_s9] sm:$0xff]   ;;  %v8946_v56 = vpack.c.bf16 %v2446_v51, %v2442_v49  ;;  %v8948_v58 = vpack.c.bf16 %v2445_v3, %v2441_v57  ;;  %v9076_v8 = vpack.c.bf16 %v2447_v17, %v2443_v10  ;;  %v2478_v49 = vld [vmem:[#allocation3 + $0x128] sm:$0xff]  ;;  %v2483_v3 = vld [vmem:[#allocation3 + $0x150] sm:$0xff] }
 0x280   : > { %v1807_v60 = vpop.f32.mrb[58].mxu0  ;;  %v1968_v9 = vpop.f32.mrb[58].mxu1  ;;  %v2453_v36 = vld [vmem:[#allocation3 + $0x60] sm:$0xff]  ;;  %v2487_v10 = vld [vmem:[#allocation3 + $0x170] sm:$0xff]  ;;  %v2490_v17 = vld [vmem:[#allocation3 + $0x188] sm:$0xff] }
 0x281   : > { %v2037_v13 = vmul.f32 %v1807_v60, %v13053_v1  ;;  %v2039_v39 = vmul.f32 %v1968_v9, %v13054_v38  ;;  %v1809_v19 = vpop.f32.mrb[59].mxu0  ;;  %v1970_v20 = vpop.f32.mrb[59].mxu1  ;;  %v2451_v9 = vld [vmem:[#allocation3 + $0x50] sm:$0xff]  ;;  %v2462_v38 = vld [vmem:[#allocation3 + $0xa8] sm:$0xff]  ;;  %v2477_v51 = vld [vmem:[#allocation3 + $0x120] sm:$0xff] }
 0x282   : > { %v2038_v21 = vmul.f32 %v1809_v19, %v13055_v40  ;;  %v2040_v22 = vmul.f32 %v1970_v20, %v13056_v41  ;;  %v2455_v1 = vld [vmem:[#allocation3 + $0x70] sm:$0xff]  ;;  %v2464_v19 = vld [vmem:[#allocation3 + $0xb8] sm:$0xff]  ;;  %v13065_v20 = vmov 0   ;;  %v10795_v40 = vld [vmem:[%s11122_s9 + $0x8] sm:$0xff]  }
 0x283   : > { %v2073_v23 = vpack.c.bf16 %v2037_v13, %v2033_v15  ;;  %v2075_v24 = vpack.c.bf16 %v2039_v39, %v2035_v34  ;;  %v2450_v15 = vld [vmem:[#allocation3 + $0x48] sm:$0xff]  ;;  %v2452_v34 = vld [vmem:[#allocation3 + $0x58] sm:$0xff]  ;;  %v9080_v41 = vpack.c.bf16 %v2455_v1, %v2451_v9  ;;  %v2491_v9 = vld [vmem:[#allocation3 + $0x190] sm:$0xff] }
 0x284   : > { %v2074_v61 = vpack.c.bf16 %v2038_v21, %v2034_v59  ;;  %v2076_v25 = vpack.c.bf16 %v2040_v22, %v2036_v37  ;;  %v1813_v42 = vpop.f32.mrb[60].mxu0  ;;  %v1974_v43 = vpop.f32.mrb[60].mxu1  ;;  %v2449_v59 = vld [vmem:[#allocation3 + $0x40] sm:$0xff]  ;;  %v8950_v37 = vpack.c.bf16 %v2454_v18, %v2450_v15  ;;  %v9078_v60 = vpack.c.bf16 %v2456_v35, %v2452_v34  ;;  %v2458_v13 = vld [vmem:[#allocation3 + $0x88] sm:$0xff]  ;;  %v2460_v39 = vld [vmem:[#allocation3 + $0x98] sm:$0xff] }
 0x285   : > { %v2041_v44 = vmul.f32 %v1813_v42, %v13057_v63  ;;  %v2043_v62 = vmul.f32 %v1974_v43, %v13058_v45  ;;  %v1815_v0 = vpop.f32.mrb[61].mxu0  ;;  %v1976_v2 = vpop.f32.mrb[61].mxu1  ;;  %v8952_v21 = vpack.c.bf16 %v2453_v36, %v2449_v59  ;;  %v2457_v22 = vld [vmem:[#allocation3 + $0x80] sm:$0xff]  ;;  %v2463_v42 = vld [vmem:[#allocation3 + $0xb0] sm:$0xff]  ;;  %v2466_v43 = vld [vmem:[#allocation3 + $0xc8] sm:$0xff] }
 0x286   : > { %v2042_v47 = vmul.f32 %v1815_v0, %v13059_v46  ;;  %v2044_v26 = vmul.f32 %v1976_v2, %v13060_v6  ;;  %2163 = vmatprep.subr.bf16.mxu0 %v2074_v61  ;;  %2276 = vmatprep.subr.bf16.mxu1 %v2076_v25  ;;  %v9082_v61 = vpack.c.bf16 %v2464_v19, %v2460_v39  ;;  %v2459_v25 = vld [vmem:[#allocation3 + $0x90] sm:$0xff]  ;;  %v2470_v63 = vld [vmem:[#allocation3 + $0xe8] sm:$0xff]  ;;  %v2472_v45 = vld [vmem:[#allocation3 + $0xf8] sm:$0xff] }
 0x287   : > { %2164 = vmatpush1.bf16.msra.mxu0 %v2073_v23  ;;  %2277 = vmatpush1.bf16.msra.mxu1 %v2075_v24  ;;  %v2461_v23 = vld [vmem:[#allocation3 + $0xa0] sm:$0xff]  ;;  %v8954_v24 = vpack.c.bf16 %v2462_v38, %v2458_v13  ;;  %v9084_v0 = vpack.c.bf16 %v2463_v42, %v2459_v25  ;;  %v2494_v15 = vld [vmem:[#allocation3 + $0x1a8] sm:$0xff]  ;;  %v2492_v18 = vld [vmem:[#allocation3 + $0x198] sm:$0xff] }
 0x288   : > { %v1819_v48 = vpop.f32.mrb[62].mxu0  ;;  %v1980_v27 = vpop.f32.mrb[62].mxu1  ;;  %v2465_v2 = vld [vmem:[#allocation3 + $0xc0] sm:$0xff]  ;;  %v2496_v34 = vld [vmem:[#allocation3 + $0x1b8] sm:$0xff]  ;;  %v2495_v1 = vld [vmem:[#allocation3 + $0x1b0] sm:$0xff] }
 0x289   : > { %v2045_v28 = vmul.f32 %v1819_v48, %v13061_v7  ;;  %v2047_v11 = vmul.f32 %v1980_v27, %v13062_v29  ;;  %v1821_v4 = vpop.f32.mrb[63].mxu0  ;;  %v1982_v50 = vpop.f32.mrb[63].mxu1  ;;  %v2469_v46 = vld [vmem:[#allocation3 + $0xe0] sm:$0xff]  ;;  %v2471_v48 = vld [vmem:[#allocation3 + $0xf0] sm:$0xff]  ;;  %v2474_v27 = vld [vmem:[#allocation3 + $0x108] sm:$0xff] }
 0x28a   : > { %v2046_v30 = vmul.f32 %v1821_v4, %v13063_v53  ;;  %v2048_v5 = vmul.f32 %v1982_v50, %v13064_v31  ;;  %v2476_v7 = vld [vmem:[#allocation3 + $0x118] sm:$0xff]  ;;  %v10796_v29 = vld [vmem:[%s11122_s9 + $0x10] sm:$0xff]   ;;  %v2473_v50 = vld [vmem:[#allocation3 + $0x100] sm:$0xff]  ;;  %v8962_v12 = vpack.c.bf16 %v2478_v49, %v2474_v27 }
 0x28b   : > { %v2077_v54 = vpack.c.bf16 %v2045_v28, %v2041_v44  ;;  %v2079_v55 = vpack.c.bf16 %v2047_v11, %v2043_v62  ;;  %v2468_v44 = vld [vmem:[#allocation3 + $0xd8] sm:$0xff]  ;;  %v8956_v62 = vpack.c.bf16 %v2461_v23, %v2457_v22  ;;  %v8960_v11 = vpack.c.bf16 %v2469_v46, %v2465_v2  ;;  %v2475_v53 = vld [vmem:[#allocation3 + $0x110] sm:$0xff]  ;;  %v2482_v31 = vld [vmem:[#allocation3 + $0x148] sm:$0xff] }
 0x28c   : > { %v2078_v14 = vpack.c.bf16 %v2046_v30, %v2042_v47  ;;  %v2080_v32 = vpack.c.bf16 %v2048_v5, %v2044_v26  ;;  %v8958_v47 = vpack.c.bf16 %v2470_v63, %v2466_v43  ;;  %v9086_v6 = vpack.c.bf16 %v2472_v45, %v2468_v44  ;;  %v2467_v26 = vld [vmem:[#allocation3 + $0xd0] sm:$0xff]  ;;  %v2480_v28 = vld [vmem:[#allocation3 + $0x138] sm:$0xff]  ;;  %v2486_v5 = vld [vmem:[#allocation3 + $0x168] sm:$0xff] }
 0x28d   : > { %v9088_v4 = vpack.c.bf16 %v2471_v48, %v2467_v26  ;;  %v9090_v52 = vpack.c.bf16 %v2480_v28, %v2476_v7  ;;  %v2479_v30 = vld [vmem:[#allocation3 + $0x130] sm:$0xff]  ;;  %v2489_v59 = vld [vmem:[#allocation3 + $0x180] sm:$0xff]  ;;  %v2498_v13 = vld [vmem:[#allocation3 + $0x1c8] sm:$0xff] }
 0x28e   : > { %2165 = vmatprep.subr.bf16.mxu0 %v2078_v14  ;;  %2278 = vmatprep.subr.bf16.mxu1 %v2080_v32  ;;  %v8964_v14 = vpack.c.bf16 %v2477_v51, %v2473_v50  ;;  %v9092_v32 = vpack.c.bf16 %v2479_v30, %v2475_v53  ;;  %v10797_v35 = vld [vmem:[%s11122_s9 + $0x18] sm:$0xff]   ;;  %v2493_v36 = vld [vmem:[#allocation3 + $0x1a0] sm:$0xff]  ;;  %v2502_v38 = vld [vmem:[#allocation3 + $0x1e8] sm:$0xff] }
 0x28f   : > { %2166 = vmatpush1.bf16.msra.mxu0 %v2077_v54  ;;  %2279 = vmatpush1.bf16.msra.mxu1 %v2079_v55  ;;  %v2484_v54 = vld [vmem:[#allocation3 + $0x158] sm:$0xff]  ;;  %v2501_v22 = vld [vmem:[#allocation3 + $0x1e0] sm:$0xff]  ;;  %v8974_v23 = vpack.c.bf16 %v2502_v38, %v2498_v13  ;;  %v2503_v25 = vld [vmem:[#allocation3 + $0x1f0] sm:$0xff] }
 0x290   : > { %8947 = vmatprep.subr.bf16.mxu0 %v8946_v56  ;;  %9075 = vmatprep.subr.bf16.mxu1 %v9074_v33  ;;  %v2488_v55 = vld [vmem:[#allocation3 + $0x178] sm:$0xff]  ;;  %v2485_v56 = vld [vmem:[#allocation3 + $0x160] sm:$0xff]  ;;  %v8966_v33 = vpack.c.bf16 %v2486_v5, %v2482_v31  ;;  %v2506_v42 = vld [vmem:[#allocation3 + $0x208] sm:$0xff] }
 0x291   : > { %v9094_v57 = vpack.c.bf16 %v2488_v55, %v2484_v54  ;;  %v2500_v39 = vld [vmem:[#allocation3 + $0x1d8] sm:$0xff]  ;;  %v2510_v43 = vld [vmem:[#allocation3 + $0x228] sm:$0xff]  ;;  %v2505_v2 = vld [vmem:[#allocation3 + $0x200] sm:$0xff] }
 0x292   : > { %2184 = vmatmul.mubr.bf16.vlgmr.msra.gmra.mrb[64].mxu0 %v10794_v16  ;;  %2297 = vmatmul.mubr.bf16.vlgmr.msra.gmra.mrb[64].mxu1 %v10794_v16  ;;  %v2481_v16 = vld [vmem:[#allocation3 + $0x140] sm:$0xff]  ;;  %v2504_v19 = vld [vmem:[#allocation3 + $0x1f8] sm:$0xff]  ;;  %v2507_v26 = vld [vmem:[#allocation3 + $0x210] sm:$0xff] }
 0x293   : > { %2193 = vmatprep.mubr.bf16.mxu0 %v13065_v20  ;;  %2306 = vmatprep.mubr.bf16.mxu1 %v13065_v20  ;;  %v2508_v63 = vld [vmem:[#allocation3 + $0x218] sm:$0xff]  ;;  %v2509_v46 = vld [vmem:[#allocation3 + $0x220] sm:$0xff]  ;;  %v2511_v48 = vld [vmem:[#allocation3 + $0x230] sm:$0xff] }
 0x294   : > { %8949 = vmatpush1.bf16.msra.mxu0 %v8948_v58  ;;  %9077 = vmatpush1.bf16.msra.mxu1 %v9076_v8  ;;  %v8968_v58 = vpack.c.bf16 %v2485_v56, %v2481_v16  ;;  %v9096_v8 = vpack.c.bf16 %v2487_v10, %v2483_v3  ;;  %v2512_v44 = vld [vmem:[#allocation3 + $0x238] sm:$0xff]  ;;  %v2514_v27 = vld [vmem:[#allocation3 + $0x248] sm:$0xff]  ;;  %v2517_v50 = vld [vmem:[#allocation3 + $0x260] sm:$0xff] }
 0x295   : > { %8951 = vmatprep.subr.bf16.mxu0 %v8950_v37  ;;  %9079 = vmatprep.subr.bf16.mxu1 %v9078_v60  ;;  %v8970_v37 = vpack.c.bf16 %v2494_v15, %v2490_v17  ;;  %v9098_v60 = vpack.c.bf16 %v2496_v34, %v2492_v18  ;;  %v10798_v45 = vld [vmem:[%s11122_s9 + $0x20] sm:$0xff]   ;;  %v2518_v49 = vld [vmem:[#allocation3 + $0x268] sm:$0xff]  ;;  %v2519_v53 = vld [vmem:[#allocation3 + $0x270] sm:$0xff] }
 0x296   : > { %v2516_v7 = vld [vmem:[#allocation3 + $0x258] sm:$0xff]  ;;  %v8982_v51 = vpack.c.bf16 %v2518_v49, %v2514_v27  ;;  %v2522_v30 = vld [vmem:[#allocation3 + $0x288] sm:$0xff]  ;;  %v2521_v16 = vld [vmem:[#allocation3 + $0x280] sm:$0xff] }
 0x297   : > { %v2520_v28 = vld [vmem:[#allocation3 + $0x278] sm:$0xff]  ;;  %v2526_v31 = vld [vmem:[#allocation3 + $0x2a8] sm:$0xff]  ;;  %v2525_v56 = vld [vmem:[#allocation3 + $0x2a0] sm:$0xff] }
 0x298   : > { %8953 = vmatpush1.bf16.msra.mxu0 %v8952_v21  ;;  %9081 = vmatpush1.bf16.msra.mxu1 %v9080_v41  ;;  %v9100_v21 = vpack.c.bf16 %v2495_v1, %v2491_v9  ;;  %v2497_v41 = vld [vmem:[#allocation3 + $0x1c0] sm:$0xff]  ;;  %v2524_v5 = vld [vmem:[#allocation3 + $0x298] sm:$0xff]  ;;  %v2523_v3 = vld [vmem:[#allocation3 + $0x290] sm:$0xff] }
 0x299   : > { %8955 = vmatprep.subr.bf16.mxu0 %v8954_v24  ;;  %9083 = vmatprep.subr.bf16.mxu1 %v9082_v61  ;;  %v9102_v24 = vpack.c.bf16 %v2504_v19, %v2500_v39  ;;  %v2499_v61 = vld [vmem:[#allocation3 + $0x1d0] sm:$0xff]  ;;  %v2528_v54 = vld [vmem:[#allocation3 + $0x2b8] sm:$0xff]  ;;  %v10799_v55 = vld [vmem:[%s11122_s9 + $0x28] sm:$0xff]  }
 0x29a   : > { %2194 = vmatmul.mubr.bf16.gmra.mrb[68].mxu0 %v10795_v40  ;;  %2307 = vmatmul.mubr.bf16.gmra.mrb[68].mxu1 %v10795_v40  ;;  %v8972_v40 = vpack.c.bf16 %v2493_v36, %v2489_v59  ;;  %v2527_v10 = vld [vmem:[#allocation3 + $0x2b0] sm:$0xff]  ;;  %v2530_v17 = vld [vmem:[#allocation3 + $0x2c8] sm:$0xff]  ;;  %v2532_v18 = vld [vmem:[#allocation3 + $0x2d8] sm:$0xff] }
 0x29b   : > { %2203 = vmatprep.mubr.bf16.mxu0 %v13065_v20  ;;  %2316 = vmatprep.mubr.bf16.mxu1 %v13065_v20  ;;  %v2534_v15 = vld [vmem:[#allocation3 + $0x2e8] sm:$0xff]  ;;  %v2536_v34 = vld [vmem:[#allocation3 + $0x2f8] sm:$0xff]  ;;  %v2533_v59 = vld [vmem:[#allocation3 + $0x2e0] sm:$0xff] }
 0x29c   : > { %8957 = vmatpush1.bf16.msra.mxu0 %v8956_v62  ;;  %9085 = vmatpush1.bf16.msra.mxu1 %v9084_v0  ;;  %v8976_v62 = vpack.c.bf16 %v2501_v22, %v2497_v41  ;;  %v9104_v0 = vpack.c.bf16 %v2503_v25, %v2499_v61  ;;  %v8990_v36 = vpack.c.bf16 %v2534_v15, %v2530_v17  ;;  %v2535_v9 = vld [vmem:[#allocation3 + $0x2f0] sm:$0xff]  ;;  %v2538_v1 = vld [vmem:[#allocation3 + $0x308] sm:$0xff]  ;;  %v2540_v38 = vld [vmem:[#allocation3 + $0x318] sm:$0xff] }
 0x29d   : > { %8959 = vmatprep.subr.bf16.mxu0 %v8958_v47  ;;  %9087 = vmatprep.subr.bf16.mxu1 %v9086_v6  ;;  %v8978_v47 = vpack.c.bf16 %v2510_v43, %v2506_v42  ;;  %v9106_v6 = vpack.c.bf16 %v2512_v44, %v2508_v63  ;;  %v2542_v13 = vld [vmem:[#allocation3 + $0x328] sm:$0xff]  ;;  %v2544_v39 = vld [vmem:[#allocation3 + $0x338] sm:$0xff]  ;;  %v2537_v41 = vld [vmem:[#allocation3 + $0x300] sm:$0xff] }
 0x29e   : > { %v10800_v19 = vld [vmem:[%s11122_s9 + $0x30] sm:$0xff]   ;;  %v2541_v22 = vld [vmem:[#allocation3 + $0x320] sm:$0xff]  ;;  %v2548_v63 = vld [vmem:[#allocation3 + $0x358] sm:$0xff] }
 0x29f   : > { %v2539_v61 = vld [vmem:[#allocation3 + $0x310] sm:$0xff]  ;;  %v2546_v42 = vld [vmem:[#allocation3 + $0x348] sm:$0xff]  ;;  %v2552_v44 = vld [vmem:[#allocation3 + $0x378] sm:$0xff] }
 0x2a0   : > { %8961 = vmatpush1.bf16.msra.mxu0 %v8960_v11  ;;  %9089 = vmatpush1.bf16.msra.mxu1 %v9088_v4  ;;  %v9108_v11 = vpack.c.bf16 %v2511_v48, %v2507_v26  ;;  %v2513_v4 = vld [vmem:[#allocation3 + $0x240] sm:$0xff]  ;;  %v2543_v25 = vld [vmem:[#allocation3 + $0x330] sm:$0xff]  ;;  %v2550_v43 = vld [vmem:[#allocation3 + $0x368] sm:$0xff] }
 0x2a1   : > { %8963 = vmatprep.subr.bf16.mxu0 %v8962_v12  ;;  %9091 = vmatprep.subr.bf16.mxu1 %v9090_v52  ;;  %v9110_v12 = vpack.c.bf16 %v2520_v28, %v2516_v7  ;;  %v2515_v52 = vld [vmem:[#allocation3 + $0x250] sm:$0xff]  ;;  %v2554_v48 = vld [vmem:[#allocation3 + $0x388] sm:$0xff]  ;;  %v2556_v49 = vld [vmem:[#allocation3 + $0x398] sm:$0xff] }
 0x2a2   : > { %2204 = vmatmul.mubr.bf16.gmra.mrb[72].mxu0 %v10796_v29  ;;  %2317 = vmatmul.mubr.bf16.gmra.mrb[72].mxu1 %v10796_v29  ;;  %v8980_v29 = vpack.c.bf16 %v2509_v46, %v2505_v2  ;;  %v2549_v2 = vld [vmem:[#allocation3 + $0x360] sm:$0xff]  ;;  %v8998_v46 = vpack.c.bf16 %v2550_v43, %v2546_v42  ;;  %v2551_v26 = vld [vmem:[#allocation3 + $0x370] sm:$0xff]  ;;  %v2558_v27 = vld [vmem:[#allocation3 + $0x3a8] sm:$0xff] }
 0x2a3   : > { %2213 = vmatprep.mubr.bf16.mxu0 %v13065_v20  ;;  %2326 = vmatprep.mubr.bf16.mxu1 %v13065_v20  ;;  %v2560_v7 = vld [vmem:[#allocation3 + $0x3b8] sm:$0xff]  ;;  %v2570_v17 = vld [vmem:[#allocation3 + $0x408] sm:$0xff] }
 0x2a4   : > { %8965 = vmatpush1.bf16.msra.mxu0 %v8964_v14  ;;  %9093 = vmatpush1.bf16.msra.mxu1 %v9092_v32  ;;  %v8984_v14 = vpack.c.bf16 %v2517_v50, %v2513_v4  ;;  %v9112_v32 = vpack.c.bf16 %v2519_v53, %v2515_v52  ;;  %v9130_v4 = vpack.c.bf16 %v2560_v7, %v2556_v49  ;;  %v10801_v50 = vld [vmem:[%s11122_s9 + $0x38] sm:$0xff]   ;;  %v2574_v15 = vld [vmem:[#allocation3 + $0x428] sm:$0xff] }
 0x2a5   : > { %8967 = vmatprep.subr.bf16.mxu0 %v8966_v33  ;;  %9095 = vmatprep.subr.bf16.mxu1 %v9094_v57  ;;  %v8986_v33 = vpack.c.bf16 %v2526_v31, %v2522_v30  ;;  %v9114_v57 = vpack.c.bf16 %v2528_v54, %v2524_v5  ;;  %v2555_v52 = vld [vmem:[#allocation3 + $0x390] sm:$0xff]  ;;  %v2562_v31 = vld [vmem:[#allocation3 + $0x3c8] sm:$0xff]  ;;  %v2564_v54 = vld [vmem:[#allocation3 + $0x3d8] sm:$0xff] }
 0x2a6   : > { %v2566_v5 = vld [vmem:[#allocation3 + $0x3e8] sm:$0xff]  ;;  %v2579_v49 = vld [vmem:[#allocation3 + $0x450] sm:$0xff] }
 0x2a8   : > { %8969 = vmatpush1.bf16.msra.mxu0 %v8968_v58  ;;  %9097 = vmatpush1.bf16.msra.mxu1 %v9096_v8  ;;  %v9116_v58 = vpack.c.bf16 %v2527_v10, %v2523_v3  ;;  %v2529_v8 = vld [vmem:[#allocation3 + $0x2c0] sm:$0xff]  ;;  %v2567_v3 = vld [vmem:[#allocation3 + $0x3f0] sm:$0xff] }
 0x2a9   : > { %8971 = vmatprep.subr.bf16.mxu0 %v8970_v37  ;;  %9099 = vmatprep.subr.bf16.mxu1 %v9098_v60  ;;  %v9118_v37 = vpack.c.bf16 %v2536_v34, %v2532_v18  ;;  %v2531_v60 = vld [vmem:[#allocation3 + $0x2d0] sm:$0xff]  ;;  %v2572_v18 = vld [vmem:[#allocation3 + $0x418] sm:$0xff]  ;;  %v9010_v34 = vpack.c.bf16 %v2574_v15, %v2570_v17  ;;  %v2594_v15 = vld [vmem:[#allocation3 + $0x4c8] sm:$0xff] }
 0x2aa   : > { %2214 = vmatmul.mubr.bf16.gmra.mrb[76].mxu0 %v10797_v35  ;;  %2327 = vmatmul.mubr.bf16.gmra.mrb[76].mxu1 %v10797_v35  ;;  %v8988_v35 = vpack.c.bf16 %v2525_v56, %v2521_v16  ;;  %v2565_v16 = vld [vmem:[#allocation3 + $0x3e0] sm:$0xff]  ;;  %v2591_v17 = vld [vmem:[#allocation3 + $0x4b0] sm:$0xff] }
 0x2ab   : > { %2223 = vmatprep.mubr.bf16.mxu0 %v13065_v20  ;;  %2336 = vmatprep.mubr.bf16.mxu1 %v13065_v20 }
 0x2ac   : > { %8973 = vmatpush1.bf16.msra.mxu0 %v8972_v40  ;;  %9101 = vmatpush1.bf16.msra.mxu1 %v9100_v21  ;;  %v8992_v40 = vpack.c.bf16 %v2533_v59, %v2529_v8  ;;  %v9120_v21 = vpack.c.bf16 %v2535_v9, %v2531_v60  ;;  %v2083_v8 = vlaneseq }
 0x2ad   : > { %8975 = vmatprep.subr.bf16.mxu0 %v8974_v23  ;;  %9103 = vmatprep.subr.bf16.mxu1 %v9102_v24  ;;  %v8994_v23 = vpack.c.bf16 %v2542_v13, %v2538_v1  ;;  %v9122_v24 = vpack.c.bf16 %v2544_v39, %v2540_v38 }
 0x2ae   : > { %v11817_v59 = vshrl.u32 %v2083_v8, 7 }
 0x2b0   : > { %8977 = vmatpush1.bf16.msra.mxu0 %v8976_v62  ;;  %9105 = vmatpush1.bf16.msra.mxu1 %v9104_v0  ;;  %v9124_v62 = vpack.c.bf16 %v2543_v25, %v2539_v61  ;;  %v2545_v0 = vld [vmem:[#allocation3 + $0x340] sm:$0xff]  ;;  %v11826_v60 = vsub.s32 1, %v11817_v59  ;;  %v2575_v61 = vld [vmem:[#allocation3 + $0x430] sm:$0xff]  ;;  %v2578_v25 = vld [vmem:[#allocation3 + $0x448] sm:$0xff] }
 0x2b1   : > { %8979 = vmatprep.subr.bf16.mxu0 %v8978_v47  ;;  %9107 = vmatprep.subr.bf16.mxu1 %v9106_v6  ;;  %v9126_v47 = vpack.c.bf16 %v2552_v44, %v2548_v63  ;;  %v2547_v6 = vld [vmem:[#allocation3 + $0x350] sm:$0xff]  ;;  %v9000_v28 = vpack.c.bf16 %v2549_v2, %v2545_v0  ;;  %v2582_v63 = vld [vmem:[#allocation3 + $0x468] sm:$0xff]  ;;  %v2580_v44 = vld [vmem:[#allocation3 + $0x458] sm:$0xff] }
 0x2b2   : > { %2224 = vmatmul.mubr.bf16.gmra.mrb[80].mxu0 %v10798_v45  ;;  %2337 = vmatmul.mubr.bf16.gmra.mrb[80].mxu1 %v10798_v45  ;;  %v8996_v45 = vpack.c.bf16 %v2541_v22, %v2537_v41  ;;  %13067 = vst [vmem:[#allocation35_spill] sm:$0xff] %v11826_v60 }
 0x2b3   : > { %2233 = vmatprep.mubr.bf16.mxu0 %v13065_v20  ;;  %2346 = vmatprep.mubr.bf16.mxu1 %v13065_v20 }
 0x2b4   : > { %8981 = vmatpush1.bf16.msra.mxu0 %v8980_v29  ;;  %9109 = vmatpush1.bf16.msra.mxu1 %v9108_v11  ;;  %v9128_v29 = vpack.c.bf16 %v2551_v26, %v2547_v6  ;;  %v9002_v11 = vpack.c.bf16 %v2558_v27, %v2554_v48  ;;  %v2577_v48 = vld [vmem:[#allocation3 + $0x440] sm:$0xff] }
 0x2b5   : > { %8983 = vmatprep.subr.bf16.mxu0 %v8982_v51  ;;  %9111 = vmatprep.subr.bf16.mxu1 %v9110_v12  ;;  %v2553_v51 = vld [vmem:[#allocation3 + $0x380] sm:$0xff] }
 0x2b6   : > { %v2557_v12 = vld [vmem:[#allocation3 + $0x3a0] sm:$0xff] }
 0x2b7   : > { %v9004_v53 = vpack.c.bf16 %v2557_v12, %v2553_v51  ;;  %v2581_v27 = vld [vmem:[#allocation3 + $0x460] sm:$0xff] }
 0x2b8   : > { %8985 = vmatpush1.bf16.msra.mxu0 %v8984_v14  ;;  %9113 = vmatpush1.bf16.msra.mxu1 %v9112_v32  ;;  %v2568_v14 = vld [vmem:[#allocation3 + $0x3f8] sm:$0xff]  ;;  %v2561_v32 = vld [vmem:[#allocation3 + $0x3c0] sm:$0xff]  ;;  %v9016_v12 = vpack.c.bf16 %v2581_v27, %v2577_v48  ;;  %v2606_v48 = vld [vmem:[#allocation3 + $0x528] sm:$0xff] }
 0x2b9   : > { %8987 = vmatprep.subr.bf16.mxu0 %v8986_v33  ;;  %9115 = vmatprep.subr.bf16.mxu1 %v9114_v57  ;;  %v9134_v56 = vpack.c.bf16 %v2568_v14, %v2564_v54  ;;  %v9008_v33 = vpack.c.bf16 %v2565_v16, %v2561_v32  ;;  %v2563_v57 = vld [vmem:[#allocation3 + $0x3d0] sm:$0xff]  ;;  %v2588_v54 = vld [vmem:[#allocation3 + $0x498] sm:$0xff] }
 0x2ba   : > { %2234 = vmatmul.mubr.bf16.gmra.mrb[84].mxu0 %v10799_v55  ;;  %2347 = vmatmul.mubr.bf16.gmra.mrb[84].mxu1 %v10799_v55  ;;  %v9006_v55 = vpack.c.bf16 %v2566_v5, %v2562_v31  ;;  %v9136_v10 = vpack.c.bf16 %v2567_v3, %v2563_v57  ;;  %v2587_v57 = vld [vmem:[#allocation3 + $0x490] sm:$0xff] }
 0x2bb   : > { %2243 = vmatprep.mubr.bf16.mxu0 %v13065_v20  ;;  %2356 = vmatprep.mubr.bf16.mxu1 %v13065_v20 }
 0x2bc   : > { %8989 = vmatpush1.bf16.msra.mxu0 %v8988_v35  ;;  %9117 = vmatpush1.bf16.msra.mxu1 %v9116_v58  ;;  %v2576_v35 = vld [vmem:[#allocation3 + $0x438] sm:$0xff] }
 0x2bd   : > { %8991 = vmatprep.subr.bf16.mxu0 %v8990_v36  ;;  %9119 = vmatprep.subr.bf16.mxu1 %v9118_v37  ;;  %v9138_v58 = vpack.c.bf16 %v2576_v35, %v2572_v18  ;;  %v11820_v36 = vsub.s32 0, %v11817_v59  ;;  %v11823_v37 = vld [vmem:[%s11157_s8] sm:$0xf]  ;;  %v2598_v18 = vld [vmem:[#allocation3 + $0x4e8] sm:$0xff] }
 0x2be   : > { %v11834_v1 = vrot.slane %v11823_v37, %v11826_v60 }
 0x2bf   : > { %13066 = vst [vmem:[#allocation34_spill] sm:$0xff] %v11820_v36  ;;  %v11830_v9 = vrot.slane %v11823_v37, %v11820_v36  ;;  %v2694_v36 = vld [vmem:[#allocation3 + $0x7e8] sm:$0xff] }
 0x2c0   : > { %8993 = vmatpush1.bf16.msra.mxu0 %v8992_v40  ;;  %9121 = vmatpush1.bf16.msra.mxu1 %v9120_v21  ;;  %v2569_v40 = vld [vmem:[#allocation3 + $0x400] sm:$0xff] }
 0x2c1   : > { %8995 = vmatprep.subr.bf16.mxu0 %v8994_v23  ;;  %9123 = vmatprep.subr.bf16.mxu1 %v9122_v24  ;;  %v2573_v21 = vld [vmem:[#allocation3 + $0x420] sm:$0xff]  ;;  %v2571_v24 = vld [vmem:[#allocation3 + $0x410] sm:$0xff] }
 0x2c2   : > { %2244 = vmatmul.mubr.bf16.gmra.mrb[88].mxu0 %v10800_v19  ;;  %2357 = vmatmul.mubr.bf16.gmra.mrb[88].mxu1 %v10800_v19  ;;  %v9140_v26 = vpack.c.bf16 %v2575_v61, %v2571_v24  ;;  %v9022_v24 = vpack.c.bf16 %v2598_v18, %v2594_v15  ;;  %v2593_v61 = vld [vmem:[#allocation3 + $0x4c0] sm:$0xff]  ;;  %v2616_v15 = vld [vmem:[#allocation3 + $0x578] sm:$0xff] }
 0x2c3   : > { %2253 = vmatprep.mubr.bf16.mxu0 %v13065_v20  ;;  %2366 = vmatprep.mubr.bf16.mxu1 %v13065_v20  ;;  %v2559_v20 = vld [vmem:[#allocation3 + $0x3b0] sm:$0xff] }
 0x2c4   : > { %8997 = vmatpush1.bf16.msra.mxu0 %v8996_v45  ;;  %9125 = vmatpush1.bf16.msra.mxu1 %v9124_v62  ;;  %v9132_v30 = vpack.c.bf16 %v2559_v20, %v2555_v52  ;;  %v2584_v45 = vld [vmem:[#allocation3 + $0x478] sm:$0xff] }
 0x2c5   : > { %8999 = vmatprep.subr.bf16.mxu0 %v8998_v46  ;;  %9127 = vmatprep.subr.bf16.mxu1 %v9126_v47  ;;  %v9012_v46 = vpack.c.bf16 %v2573_v21, %v2569_v40  ;;  %v2596_v40 = vld [vmem:[#allocation3 + $0x4d8] sm:$0xff] }
 0x2c6   : > { %v2600_v21 = vld [vmem:[#allocation3 + $0x4f8] sm:$0xff] }
 0x2c8   : > { %9001 = vmatpush1.bf16.msra.mxu0 %v9000_v28  ;;  %9129 = vmatpush1.bf16.msra.mxu1 %v9128_v29  ;;  %v9014_v28 = vpack.c.bf16 %v2582_v63, %v2578_v25  ;;  %v9142_v29 = vpack.c.bf16 %v2584_v45, %v2580_v44  ;;  %v2597_v25 = vld [vmem:[#allocation3 + $0x4e0] sm:$0xff]  ;;  %v2599_v63 = vld [vmem:[#allocation3 + $0x4f0] sm:$0xff]  ;;  %v9150_v45 = vpack.c.bf16 %v2600_v21, %v2596_v40 }
 0x2c9   : > { %9003 = vmatprep.subr.bf16.mxu0 %v9002_v11  ;;  %9131 = vmatprep.subr.bf16.mxu1 %v9130_v4  ;;  %v2583_v11 = vld [vmem:[#allocation3 + $0x470] sm:$0xff]  ;;  %v2586_v4 = vld [vmem:[#allocation3 + $0x488] sm:$0xff] }
 0x2ca   : > { %2254 = vmatmul.mubr.bf16.gmra.mrb[92].mxu0 %v10801_v50  ;;  %2367 = vmatmul.mubr.bf16.gmra.mrb[92].mxu1 %v10801_v50  ;;  %v2590_v50 = vld [vmem:[#allocation3 + $0x4a8] sm:$0xff]  ;;  %v9144_v31 = vpack.c.bf16 %v2583_v11, %v2579_v49  ;;  %v2608_v11 = vld [vmem:[#allocation3 + $0x538] sm:$0xff] }
 0x2cb   : > { %v9018_v5 = vpack.c.bf16 %v2590_v50, %v2586_v4 }
 0x2cc   : > { %9005 = vmatpush1.bf16.msra.mxu0 %v9004_v53  ;;  %9133 = vmatpush1.bf16.msra.mxu1 %v9132_v30 }
 0x2cd   : > { %9007 = vmatprep.subr.bf16.mxu0 %v9006_v55  ;;  %9135 = vmatprep.subr.bf16.mxu1 %v9134_v56  ;;  %v2592_v55 = vld [vmem:[#allocation3 + $0x4b8] sm:$0xff]  ;;  %v2585_v56 = vld [vmem:[#allocation3 + $0x480] sm:$0xff] }
 0x2ce   : > { %v9146_v8 = vpack.c.bf16 %v2592_v55, %v2588_v54  ;;  %v2607_v54 = vld [vmem:[#allocation3 + $0x530] sm:$0xff] }
 0x2d0   : > { %9009 = vmatpush1.bf16.msra.mxu0 %v9008_v33  ;;  %9137 = vmatpush1.bf16.msra.mxu1 %v9136_v10  ;;  %v2589_v33 = vld [vmem:[#allocation3 + $0x4a0] sm:$0xff] }
 0x2d1   : > { %9011 = vmatprep.subr.bf16.mxu0 %v9010_v34  ;;  %9139 = vmatprep.subr.bf16.mxu1 %v9138_v58 }
 0x365   : > { %v2185_v13 = vpop.f32.mrb[64].mxu0  ;;  %v11836_v38 = vpop.f32.mrb[64].mxu1 }
 0x366   : > { %v2186_v39 = vadd.f32 %v2185_v13, %v11830_v9  ;;  %v2187_v19 = vpop.f32.mrb[65].mxu0  ;;  %v11839_v41 = vpop.f32.mrb[65].mxu1 }
 0x367   : > { %v2188_v22 = vadd.f32 %v2187_v19, %v11834_v1  ;;  %v2189_v23 = vpop.f32.mrb[66].mxu0  ;;  %v11842_v42 = vpop.f32.mrb[66].mxu1  ;;  %v9020_v19 = vpack.c.bf16 %v2589_v33, %v2585_v56  ;;  %v2610_v56 = vld [vmem:[#allocation3 + $0x548] sm:$0xff] }
 0x368   : > { %v2191_v43 = vpop.f32.mrb[67].mxu0  ;;  %v11844_v62 = vpop.f32.mrb[67].mxu1  ;;  %v2377_v47 = vmax.f32 %v2186_v39, 0.0  ;;  %v2190_v6 = vadd.f32 %v2189_v23, %v11830_v9  ;;  %v9148_v23 = vpack.c.bf16 %v2591_v17, %v2587_v57  ;;  %v2614_v33 = vld [vmem:[#allocation3 + $0x568] sm:$0xff]  ;;  %v2612_v17 = vld [vmem:[#allocation3 + $0x558] sm:$0xff] }
 0x369   : > { %v2378_v0 = vmax.f32 %v2188_v22, 0.0  ;;  %v2192_v2 = vadd.f32 %v2191_v43, %v11834_v1  ;;  %v2595_v43 = vld [vmem:[#allocation3 + $0x4d0] sm:$0xff] }
 0x36a   : > { %v2381_v53 = vmax.f32 %v2190_v6, 0.0  ;;  %v9024_v6 = vpack.c.bf16 %v2597_v25, %v2593_v61  ;;  %v2622_v61 = vld [vmem:[#allocation3 + $0x5a8] sm:$0xff] }
 0x36b   : > { %v2382_v7 = vmax.f32 %v2192_v2, 0.0  ;;  %2783 = vmatprep.mubr.f32.mxu0 %v2378_v0  ;;  %3105 = vmatprep.mubr.f32.mxu1 %v2378_v0 }
 0x36c   : > { %2784 = vmatmul.mubr.f32.vlgmr.msra.gmra.mrb[96].mxu0 %v2377_v47  ;;  %3106 = vmatmul.mubr.f32.vlgmr.msra.gmra.mrb[96].mxu1 %v2377_v47 }
 0x36d   : > { %v2195_v51 = vpop.f32.mrb[68].mxu0  ;;  %2789 = vmatprep.mubr.f32.mxu0 %v2382_v7  ;;  %9013 = vmatpush1.bf16.msra.mxu0 %v9012_v46  ;;  %v11848_v52 = vpop.f32.mrb[68].mxu1 }
 0x36e   : > { %v2196_v20 = vadd.f32 %v2195_v51, %v11830_v9  ;;  %3111 = vmatprep.mubr.f32.mxu1 %v2382_v7  ;;  %9141 = vmatpush1.bf16.msra.mxu1 %v9140_v26  ;;  %v2197_v30 = vpop.f32.mrb[69].mxu0  ;;  %v11851_v14 = vpop.f32.mrb[69].mxu1  ;;  %v2602_v26 = vld [vmem:[#allocation3 + $0x508] sm:$0xff]  ;;  %v2601_v51 = vld [vmem:[#allocation3 + $0x500] sm:$0xff] }
 0x36f   : > { %v2198_v32 = vadd.f32 %v2197_v30, %v11834_v1  ;;  %v2199_v16 = vpop.f32.mrb[70].mxu0  ;;  %9015 = vmatprep.subr.bf16.mxu0 %v9014_v28  ;;  %9143 = vmatprep.subr.bf16.mxu1 %v9142_v29  ;;  %v11854_v3 = vpop.f32.mrb[70].mxu1  ;;  %v9152_v28 = vpack.c.bf16 %v2599_v63, %v2595_v43  ;;  %v2604_v29 = vld [vmem:[#allocation3 + $0x518] sm:$0xff] }
 0x370   : > { %v2201_v10 = vpop.f32.mrb[71].mxu0  ;;  %2790 = vmatmul.mubr.f32.gmra.mrb[98].mxu0 %v2381_v53  ;;  %3112 = vmatmul.mubr.f32.gmra.mrb[98].mxu1 %v2381_v53  ;;  %v11856_v34 = vpop.f32.mrb[71].mxu1  ;;  %v2385_v13 = vmax.f32 %v2196_v20, 0.0  ;;  %v2200_v39 = vadd.f32 %v2199_v16, %v11830_v9  ;;  %v9154_v16 = vpack.c.bf16 %v2608_v11, %v2604_v29 }
 0x371   : > { %v2386_v35 = vmax.f32 %v2198_v32, 0.0  ;;  %v2202_v58 = vadd.f32 %v2201_v10, %v11834_v1  ;;  %9017 = vmatpush1.bf16.msra.mxu0 %v9016_v12  ;;  %v2605_v12 = vld [vmem:[#allocation3 + $0x520] sm:$0xff] }
 0x372   : > { %9145 = vmatpush1.bf16.msra.mxu1 %v9144_v31  ;;  %9019 = vmatprep.subr.bf16.mxu0 %v9018_v5  ;;  %v2389_v2 = vmax.f32 %v2200_v39, 0.0  ;;  %v9026_v31 = vpack.c.bf16 %v2606_v48, %v2602_v26  ;;  %v2603_v5 = vld [vmem:[#allocation3 + $0x510] sm:$0xff]  ;;  %v9028_v10 = vpack.c.bf16 %v2605_v12, %v2601_v51  ;;  %v2617_v48 = vld [vmem:[#allocation3 + $0x580] sm:$0xff] }
 0x373   : > { %v2390_v22 = vmax.f32 %v2202_v58, 0.0  ;;  %2795 = vmatprep.mubr.f32.mxu0 %v2386_v35  ;;  %3117 = vmatprep.mubr.f32.mxu1 %v2386_v35  ;;  %v9156_v18 = vpack.c.bf16 %v2607_v54, %v2603_v5  ;;  %v2609_v35 = vld [vmem:[#allocation3 + $0x540] sm:$0xff]  ;;  %v2611_v39 = vld [vmem:[#allocation3 + $0x550] sm:$0xff] }
 0x374   : > { %2796 = vmatmul.mubr.f32.gmra.mrb[100].mxu0 %v2385_v13  ;;  %3118 = vmatmul.mubr.f32.gmra.mrb[100].mxu1 %v2385_v13  ;;  %v2613_v58 = vld [vmem:[#allocation3 + $0x560] sm:$0xff]  ;;  %v9030_v13 = vpack.c.bf16 %v2614_v33, %v2610_v56  ;;  %v2623_v51 = vld [vmem:[#allocation3 + $0x5b0] sm:$0xff] }
 0x375   : > { %9147 = vmatprep.subr.bf16.mxu1 %v9146_v8  ;;  %v2205_v44 = vpop.f32.mrb[72].mxu0  ;;  %2801 = vmatprep.mubr.f32.mxu0 %v2390_v22  ;;  %v11860_v0 = vpop.f32.mrb[72].mxu1  ;;  %v2625_v33 = vld [vmem:[#allocation3 + $0x5c0] sm:$0xff] }
 0x376   : > { %v2206_v46 = vadd.f32 %v2205_v44, %v11830_v9  ;;  %9021 = vmatpush1.bf16.msra.mxu0 %v9020_v19  ;;  %3123 = vmatprep.mubr.f32.mxu1 %v2390_v22  ;;  %v2207_v47 = vpop.f32.mrb[73].mxu0  ;;  %v11863_v27 = vpop.f32.mrb[73].mxu1  ;;  %v2615_v19 = vld [vmem:[#allocation3 + $0x570] sm:$0xff] }
 0x377   : > { %9149 = vmatpush1.bf16.msra.mxu1 %v9148_v23  ;;  %v2208_v49 = vadd.f32 %v2207_v47, %v11834_v1  ;;  %v2209_v7 = vpop.f32.mrb[74].mxu0  ;;  %9023 = vmatprep.subr.bf16.mxu0 %v9022_v24  ;;  %v11866_v4 = vpop.f32.mrb[74].mxu1  ;;  %v9158_v23 = vpack.c.bf16 %v2616_v15, %v2612_v17  ;;  %v2618_v24 = vld [vmem:[#allocation3 + $0x588] sm:$0xff]  ;;  %v9160_v26 = vpack.c.bf16 %v2615_v19, %v2611_v39  ;;  %v2627_v15 = vld [vmem:[#allocation3 + $0x5d0] sm:$0xff] }
 0x378   : > { %v2211_v50 = vpop.f32.mrb[75].mxu0  ;;  %2802 = vmatmul.mubr.f32.gmra.mrb[102].mxu0 %v2389_v2  ;;  %3124 = vmatmul.mubr.f32.gmra.mrb[102].mxu1 %v2389_v2  ;;  %v11868_v53 = vpop.f32.mrb[75].mxu1  ;;  %v2393_v55 = vmax.f32 %v2206_v46, 0.0  ;;  %v2210_v32 = vadd.f32 %v2209_v7, %v11830_v9  ;;  %v2620_v2 = vld [vmem:[#allocation3 + $0x598] sm:$0xff]  ;;  %v9034_v11 = vpack.c.bf16 %v2622_v61, %v2618_v24  ;;  %v2638_v39 = vld [vmem:[#allocation3 + $0x628] sm:$0xff] }
 0x379   : > { %v2394_v20 = vmax.f32 %v2208_v49, 0.0  ;;  %v2212_v30 = vadd.f32 %v2211_v50, %v11834_v1  ;;  %9151 = vmatprep.subr.bf16.mxu1 %v9150_v45  ;;  %v9032_v45 = vpack.c.bf16 %v2613_v58, %v2609_v35  ;;  %v2624_v46 = vld [vmem:[#allocation3 + $0x5b8] sm:$0xff]  ;;  %v2621_v49 = vld [vmem:[#allocation3 + $0x5a0] sm:$0xff]  ;;  %v2619_v50 = vld [vmem:[#allocation3 + $0x590] sm:$0xff] }
 0x37a   : > { %9025 = vmatpush1.bf16.msra.mxu0 %v9024_v6  ;;  %v2397_v21 = vmax.f32 %v2210_v32, 0.0  ;;  %v9162_v12 = vpack.c.bf16 %v2624_v46, %v2620_v2  ;;  %v2628_v32 = vld [vmem:[#allocation3 + $0x5d8] sm:$0xff]  ;;  %v9164_v56 = vpack.c.bf16 %v2623_v51, %v2619_v50  ;;  %v2633_v46 = vld [vmem:[#allocation3 + $0x600] sm:$0xff]  ;;  %v2642_v51 = vld [vmem:[#allocation3 + $0x648] sm:$0xff] }
 0x37b   : > { %v2398_v57 = vmax.f32 %v2212_v30, 0.0  ;;  %9153 = vmatpush1.bf16.msra.mxu1 %v9152_v28  ;;  %2807 = vmatprep.mubr.f32.mxu0 %v2394_v20  ;;  %v2630_v30 = vld [vmem:[#allocation3 + $0x5e8] sm:$0xff] }
 0x37c   : > { %3129 = vmatprep.mubr.f32.mxu1 %v2394_v20  ;;  %2808 = vmatmul.mubr.f32.gmra.mrb[104].mxu0 %v2393_v55  ;;  %v2626_v20 = vld [vmem:[#allocation3 + $0x5c8] sm:$0xff] }
 0x37d   : > { %9027 = vmatprep.subr.bf16.mxu0 %v9026_v31  ;;  %3130 = vmatmul.mubr.f32.gmra.mrb[104].mxu1 %v2393_v55  ;;  %v2215_v8 = vpop.f32.mrb[76].mxu0  ;;  %v11872_v40 = vpop.f32.mrb[76].mxu1  ;;  %v9036_v55 = vpack.c.bf16 %v2621_v49, %v2617_v48  ;;  %v9038_v17 = vpack.c.bf16 %v2630_v30, %v2626_v20 }
 0x37e   : > { %9155 = vmatprep.subr.bf16.mxu1 %v9154_v16  ;;  %2813 = vmatprep.mubr.f32.mxu0 %v2398_v57  ;;  %v2217_v22 = vpop.f32.mrb[77].mxu0  ;;  %v11874_v25 = vpop.f32.mrb[77].mxu1  ;;  %v2216_v43 = vadd.f32 %v2215_v8, %v11830_v9  ;;  %v2632_v16 = vld [vmem:[#allocation3 + $0x5f8] sm:$0xff] }
 0x37f   : > { %9029 = vmatpush1.bf16.msra.mxu0 %v9028_v10  ;;  %3135 = vmatprep.mubr.f32.mxu1 %v2398_v57  ;;  %v2218_v63 = vadd.f32 %v2217_v22, %v11834_v1  ;;  %v2219_v44 = vpop.f32.mrb[78].mxu0  ;;  %v11878_v47 = vpop.f32.mrb[78].mxu1  ;;  %v2629_v57 = vld [vmem:[#allocation3 + $0x5e0] sm:$0xff]  ;;  %v9166_v8 = vpack.c.bf16 %v2632_v16, %v2628_v32 }
 0x380   : > { %9157 = vmatpush1.bf16.msra.mxu1 %v9156_v18  ;;  %v2221_v6 = vpop.f32.mrb[79].mxu0  ;;  %2814 = vmatmul.mubr.f32.gmra.mrb[106].mxu0 %v2397_v21  ;;  %v11880_v7 = vpop.f32.mrb[79].mxu1  ;;  %v2401_v31 = vmax.f32 %v2216_v43, 0.0  ;;  %v2220_v5 = vadd.f32 %v2219_v44, %v11830_v9  ;;  %v2631_v18 = vld [vmem:[#allocation3 + $0x5f0] sm:$0xff]  ;;  %v9040_v61 = vpack.c.bf16 %v2629_v57, %v2625_v33  ;;  %v2636_v43 = vld [vmem:[#allocation3 + $0x618] sm:$0xff]  ;;  %v2641_v16 = vld [vmem:[#allocation3 + $0x640] sm:$0xff] }
 0x381   : > { %v2402_v28 = vmax.f32 %v2218_v63, 0.0  ;;  %v2222_v29 = vadd.f32 %v2221_v6, %v11834_v1  ;;  %9031 = vmatprep.subr.bf16.mxu0 %v9030_v13  ;;  %3136 = vmatmul.mubr.f32.gmra.mrb[106].mxu1 %v2397_v21  ;;  %v2634_v13 = vld [vmem:[#allocation3 + $0x608] sm:$0xff]  ;;  %v2640_v63 = vld [vmem:[#allocation3 + $0x638] sm:$0xff]  ;;  %v9168_v2 = vpack.c.bf16 %v2631_v18, %v2627_v15  ;;  %v2637_v6 = vld [vmem:[#allocation3 + $0x620] sm:$0xff] }
 0x382   : > { %9159 = vmatprep.subr.bf16.mxu1 %v9158_v23  ;;  %v2405_v21 = vmax.f32 %v2220_v5, 0.0  ;;  %v9170_v50 = vpack.c.bf16 %v2640_v63, %v2636_v43  ;;  %v9044_v5 = vpack.c.bf16 %v2637_v6, %v2633_v46  ;;  %v2652_v43 = vld [vmem:[#allocation3 + $0x698] sm:$0xff]  ;;  %v2649_v6 = vld [vmem:[#allocation3 + $0x680] sm:$0xff] }
 0x383   : > { %v2406_v54 = vmax.f32 %v2222_v29, 0.0  ;;  %9033 = vmatpush1.bf16.msra.mxu0 %v9032_v45  ;;  %2819 = vmatprep.mubr.f32.mxu0 %v2402_v28  ;;  %v2635_v29 = vld [vmem:[#allocation3 + $0x610] sm:$0xff]  ;;  %v2656_v63 = vld [vmem:[#allocation3 + $0x6b8] sm:$0xff] }
 0x384   : > { %9161 = vmatpush1.bf16.msra.mxu1 %v9160_v26  ;;  %3141 = vmatprep.mubr.f32.mxu1 %v2402_v28  ;;  %v9042_v28 = vpack.c.bf16 %v2638_v39, %v2634_v13  ;;  %v2654_v13 = vld [vmem:[#allocation3 + $0x6a8] sm:$0xff] }
 0x385   : > { %2820 = vmatmul.mubr.f32.gmra.mrb[108].mxu0 %v2401_v31  ;;  %9035 = vmatprep.subr.bf16.mxu0 %v9034_v11  ;;  %v2225_v10 = vpop.f32.mrb[80].mxu0  ;;  %v11884_v35 = vpop.f32.mrb[80].mxu1  ;;  %v2639_v11 = vld [vmem:[#allocation3 + $0x630] sm:$0xff] }
 0x386   : > { %3142 = vmatmul.mubr.f32.gmra.mrb[108].mxu1 %v2401_v31  ;;  %9163 = vmatprep.subr.bf16.mxu1 %v9162_v12  ;;  %v2227_v58 = vpop.f32.mrb[81].mxu0  ;;  %v11886_v19 = vpop.f32.mrb[81].mxu1  ;;  %v2226_v22 = vadd.f32 %v2225_v10, %v11830_v9  ;;  %v2646_v12 = vld [vmem:[#allocation3 + $0x668] sm:$0xff]  ;;  %v9172_v32 = vpack.c.bf16 %v2639_v11, %v2635_v29  ;;  %v2643_v10 = vld [vmem:[#allocation3 + $0x650] sm:$0xff] }
 0x387   : > { %2825 = vmatprep.mubr.f32.mxu0 %v2406_v54  ;;  %9037 = vmatpush1.bf16.msra.mxu0 %v9036_v55  ;;  %v2228_v23 = vadd.f32 %v2227_v58, %v11834_v1  ;;  %v2229_v24 = vpop.f32.mrb[82].mxu0  ;;  %v11890_v44 = vpop.f32.mrb[82].mxu1  ;;  %v2648_v55 = vld [vmem:[#allocation3 + $0x678] sm:$0xff]  ;;  %v9046_v57 = vpack.c.bf16 %v2646_v12, %v2642_v51  ;;  %v2655_v51 = vld [vmem:[#allocation3 + $0x6b0] sm:$0xff]  ;;  %v9178_v12 = vpack.c.bf16 %v2656_v63, %v2652_v43 }
 0x388   : > { %3147 = vmatprep.mubr.f32.mxu1 %v2406_v54  ;;  %9165 = vmatpush1.bf16.msra.mxu1 %v9164_v56  ;;  %v2231_v45 = vpop.f32.mrb[83].mxu0  ;;  %v11892_v26 = vpop.f32.mrb[83].mxu1  ;;  %v2409_v20 = vmax.f32 %v2226_v22, 0.0  ;;  %v2230_v30 = vadd.f32 %v2229_v24, %v11830_v9  ;;  %v2644_v54 = vld [vmem:[#allocation3 + $0x658] sm:$0xff]  ;;  %v2645_v56 = vld [vmem:[#allocation3 + $0x660] sm:$0xff] }
 0x389   : > { %v2410_v48 = vmax.f32 %v2228_v23, 0.0  ;;  %v2232_v49 = vadd.f32 %v2231_v45, %v11834_v1  ;;  %2826 = vmatmul.mubr.f32.gmra.mrb[110].mxu0 %v2405_v21  ;;  %9039 = vmatprep.subr.bf16.mxu0 %v9038_v17  ;;  %v2647_v17 = vld [vmem:[#allocation3 + $0x670] sm:$0xff]  ;;  %v9174_v58 = vpack.c.bf16 %v2648_v55, %v2644_v54 }
 0x38a   : > { %3148 = vmatmul.mubr.f32.gmra.mrb[110].mxu1 %v2405_v21  ;;  %9167 = vmatprep.subr.bf16.mxu1 %v9166_v8  ;;  %v2650_v8 = vld [vmem:[#allocation3 + $0x688] sm:$0xff]  ;;  %v2413_v21 = vmax.f32 %v2230_v30, 0.0  ;;  %v9176_v46 = vpack.c.bf16 %v2647_v17, %v2643_v10 }
 0x38b   : > { %v2414_v31 = vmax.f32 %v2232_v49, 0.0  ;;  %9041 = vmatpush1.bf16.msra.mxu0 %v9040_v61  ;;  %2831 = vmatprep.mubr.f32.mxu0 %v2410_v48  ;;  %v9048_v61 = vpack.c.bf16 %v2645_v56, %v2641_v16  ;;  %v9050_v11 = vpack.c.bf16 %v2654_v13, %v2650_v8  ;;  %v2662_v30 = vld [vmem:[#allocation3 + $0x6e8] sm:$0xff]  ;;  %v2664_v16 = vld [vmem:[#allocation3 + $0x6f8] sm:$0xff] }
 0x38c   : > { %9169 = vmatpush1.bf16.msra.mxu1 %v9168_v2  ;;  %3153 = vmatprep.mubr.f32.mxu1 %v2410_v48  ;;  %v2653_v48 = vld [vmem:[#allocation3 + $0x6a0] sm:$0xff] }
 0x38d   : > { %2832 = vmatmul.mubr.f32.gmra.mrb[112].mxu0 %v2409_v20  ;;  %9043 = vmatprep.subr.bf16.mxu0 %v9042_v28  ;;  %v2235_v33 = vpop.f32.mrb[84].mxu0  ;;  %v11896_v15 = vpop.f32.mrb[84].mxu1  ;;  %v9052_v55 = vpack.c.bf16 %v2653_v48, %v2649_v6  ;;  %v2672_v48 = vld [vmem:[#allocation3 + $0x738] sm:$0xff] }
 0x38e   : > { %3154 = vmatmul.mubr.f32.gmra.mrb[112].mxu1 %v2409_v20  ;;  %9171 = vmatprep.subr.bf16.mxu1 %v9170_v50  ;;  %v2237_v18 = vpop.f32.mrb[85].mxu0  ;;  %v11898_v39 = vpop.f32.mrb[85].mxu1  ;;  %v2236_v22 = vadd.f32 %v2235_v33, %v11830_v9  ;;  %v2651_v50 = vld [vmem:[#allocation3 + $0x690] sm:$0xff]  ;;  %v2658_v20 = vld [vmem:[#allocation3 + $0x6c8] sm:$0xff]  ;;  %v2657_v33 = vld [vmem:[#allocation3 + $0x6c0] sm:$0xff] }
 0x38f   : > { %2837 = vmatprep.mubr.f32.mxu0 %v2414_v31  ;;  %9045 = vmatpush1.bf16.msra.mxu0 %v9044_v5  ;;  %v2238_v23 = vadd.f32 %v2237_v18, %v11834_v1  ;;  %v2239_v24 = vpop.f32.mrb[86].mxu0  ;;  %v11902_v45 = vpop.f32.mrb[86].mxu1  ;;  %v9180_v56 = vpack.c.bf16 %v2655_v51, %v2651_v50  ;;  %v9054_v17 = vpack.c.bf16 %v2662_v30, %v2658_v20  ;;  %v2659_v18 = vld [vmem:[#allocation3 + $0x6d0] sm:$0xff] }
 0x390   : > { %3159 = vmatprep.mubr.f32.mxu1 %v2414_v31  ;;  %9173 = vmatpush1.bf16.msra.mxu1 %v9172_v32  ;;  %v2241_v2 = vpop.f32.mrb[87].mxu0  ;;  %v11904_v49 = vpop.f32.mrb[87].mxu1  ;;  %v2417_v31 = vmax.f32 %v2236_v22, 0.0  ;;  %v2240_v5 = vadd.f32 %v2239_v24, %v11830_v9  ;;  %v2660_v32 = vld [vmem:[#allocation3 + $0x6d8] sm:$0xff]  ;;  %v2666_v22 = vld [vmem:[#allocation3 + $0x708] sm:$0xff] }
 0x391   : > { %v2418_v28 = vmax.f32 %v2238_v23, 0.0  ;;  %v2242_v29 = vadd.f32 %v2241_v2, %v11834_v1  ;;  %2838 = vmatmul.mubr.f32.gmra.mrb[114].mxu0 %v2413_v21  ;;  %9047 = vmatprep.subr.bf16.mxu0 %v9046_v57  ;;  %v2661_v57 = vld [vmem:[#allocation3 + $0x6e0] sm:$0xff]  ;;  %v2670_v23 = vld [vmem:[#allocation3 + $0x728] sm:$0xff]  ;;  %v2668_v24 = vld [vmem:[#allocation3 + $0x718] sm:$0xff] }
 0x392   : > { %3160 = vmatmul.mubr.f32.gmra.mrb[114].mxu1 %v2413_v21  ;;  %9175 = vmatprep.subr.bf16.mxu1 %v9174_v58  ;;  %v2663_v58 = vld [vmem:[#allocation3 + $0x6f0] sm:$0xff]  ;;  %v9182_v21 = vpack.c.bf16 %v2664_v16, %v2660_v32  ;;  %v2421_v43 = vmax.f32 %v2240_v5, 0.0  ;;  %v9056_v6 = vpack.c.bf16 %v2661_v57, %v2657_v33  ;;  %v9186_v32 = vpack.c.bf16 %v2672_v48, %v2668_v24  ;;  %v2674_v33 = vld [vmem:[#allocation3 + $0x748] sm:$0xff] }
 0x393   : > { %v2422_v54 = vmax.f32 %v2242_v29, 0.0  ;;  %9049 = vmatpush1.bf16.msra.mxu0 %v9048_v61  ;;  %2843 = vmatprep.mubr.f32.mxu0 %v2418_v28  ;;  %v2669_v29 = vld [vmem:[#allocation3 + $0x720] sm:$0xff]  ;;  %v9184_v51 = vpack.c.bf16 %v2663_v58, %v2659_v18  ;;  %v2667_v5 = vld [vmem:[#allocation3 + $0x710] sm:$0xff]  ;;  %v2678_v57 = vld [vmem:[#allocation3 + $0x768] sm:$0xff] }
 0x394   : > { %9177 = vmatpush1.bf16.msra.mxu1 %v9176_v46  ;;  %3165 = vmatprep.mubr.f32.mxu1 %v2418_v28  ;;  %v2665_v28 = vld [vmem:[#allocation3 + $0x700] sm:$0xff]  ;;  %v2680_v58 = vld [vmem:[#allocation3 + $0x778] sm:$0xff]  ;;  %v2675_v24 = vld [vmem:[#allocation3 + $0x750] sm:$0xff] }
 0x395   : > { %2844 = vmatmul.mubr.f32.gmra.mrb[116].mxu0 %v2417_v31  ;;  %9051 = vmatprep.subr.bf16.mxu0 %v9050_v11  ;;  %v2245_v10 = vpop.f32.mrb[88].mxu0  ;;  %v11908_v8 = vpop.f32.mrb[88].mxu1  ;;  %v9060_v16 = vpack.c.bf16 %v2669_v29, %v2665_v28  ;;  %v2682_v28 = vld [vmem:[#allocation3 + $0x788] sm:$0xff] }
 0x396   : > { %3166 = vmatmul.mubr.f32.gmra.mrb[116].mxu1 %v2417_v31  ;;  %9179 = vmatprep.subr.bf16.mxu1 %v9178_v12  ;;  %v2247_v13 = vpop.f32.mrb[89].mxu0  ;;  %v11910_v61 = vpop.f32.mrb[89].mxu1  ;;  %v2246_v63 = vadd.f32 %v2245_v10, %v11830_v9  ;;  %v9058_v31 = vpack.c.bf16 %v2670_v23, %v2666_v22  ;;  %v9062_v23 = vpack.c.bf16 %v2678_v57, %v2674_v33  ;;  %v2686_v29 = vld [vmem:[#allocation3 + $0x7a8] sm:$0xff]  ;;  %v2681_v33 = vld [vmem:[#allocation3 + $0x780] sm:$0xff] }
 0x397   : > { %2849 = vmatprep.mubr.f32.mxu0 %v2422_v54  ;;  %9053 = vmatpush1.bf16.msra.mxu0 %v9052_v55  ;;  %v2248_v2 = vadd.f32 %v2247_v13, %v11834_v1  ;;  %v2249_v46 = vpop.f32.mrb[90].mxu0  ;;  %v11914_v11 = vpop.f32.mrb[90].mxu1  ;;  %v2671_v55 = vld [vmem:[#allocation3 + $0x730] sm:$0xff]  ;;  %v2673_v13 = vld [vmem:[#allocation3 + $0x740] sm:$0xff] }
 0x398   : > { %3171 = vmatprep.mubr.f32.mxu1 %v2422_v54  ;;  %9181 = vmatpush1.bf16.msra.mxu1 %v9180_v56  ;;  %v2251_v50 = vpop.f32.mrb[91].mxu0  ;;  %v11916_v12 = vpop.f32.mrb[91].mxu1  ;;  %v2676_v54 = vld [vmem:[#allocation3 + $0x758] sm:$0xff]  ;;  %v2425_v56 = vmax.f32 %v2246_v63, 0.0  ;;  %v2250_v10 = vadd.f32 %v2249_v46, %v11830_v9  ;;  %v2685_v57 = vld [vmem:[#allocation3 + $0x7a0] sm:$0xff] }
 0x399   : > { %v2426_v20 = vmax.f32 %v2248_v2, 0.0  ;;  %v2252_v30 = vadd.f32 %v2251_v50, %v11834_v1  ;;  %2850 = vmatmul.mubr.f32.gmra.mrb[118].mxu0 %v2421_v43  ;;  %9055 = vmatprep.subr.bf16.mxu0 %v9054_v17  ;;  %v2677_v2 = vld [vmem:[#allocation3 + $0x760] sm:$0xff]  ;;  %v11921_v17 = vsub.s32 3, %v11817_v59  ;;  %v2684_v50 = vld [vmem:[#allocation3 + $0x798] sm:$0xff] }
 0x39a   : > { %3172 = vmatmul.mubr.f32.gmra.mrb[118].mxu1 %v2421_v43  ;;  %9183 = vmatprep.subr.bf16.mxu1 %v9182_v21  ;;  %v9188_v21 = vpack.c.bf16 %v2671_v55, %v2667_v5  ;;  %v2679_v43 = vld [vmem:[#allocation3 + $0x770] sm:$0xff]  ;;  %v9064_v48 = vpack.c.bf16 %v2677_v2, %v2673_v13 }
 0x39b   : > { %v2430_v18 = vmax.f32 %v2252_v30, 0.0  ;;  %9057 = vmatpush1.bf16.msra.mxu0 %v9056_v6  ;;  %2855 = vmatprep.mubr.f32.mxu0 %v2426_v20  ;;  %13068 = vst [vmem:[#allocation36_spill] sm:$0xff] %v11921_v17  ;;  %v9190_v6 = vpack.c.bf16 %v2680_v58, %v2676_v54  ;;  %v11931_v55 = vrot.slane %v11823_v37, %v11921_v17  ;;  %v11936_v58 = vsub.s32 2, %v11817_v59  ;;  %v2687_v17 = vld [vmem:[#allocation3 + $0x7b0] sm:$0xff] }
 0x39c   : > { %9185 = vmatpush1.bf16.msra.mxu1 %v9184_v51  ;;  %3177 = vmatprep.mubr.f32.mxu1 %v2426_v20  ;;  %v2429_v51 = vmax.f32 %v2250_v10, 0.0  ;;  %v9192_v10 = vpack.c.bf16 %v2679_v43, %v2675_v24 }
 0x39d   : > { %2856 = vmatmul.mubr.f32.gmra.mrb[120].mxu0 %v2425_v56  ;;  %9059 = vmatprep.subr.bf16.mxu0 %v9058_v31  ;;  %v2255_v22 = vpop.f32.mrb[92].mxu0  ;;  %v11923_v63 = vpop.f32.mrb[92].mxu1 }
 0x39e   : > { %3178 = vmatmul.mubr.f32.gmra.mrb[120].mxu1 %v2425_v56  ;;  %9187 = vmatprep.subr.bf16.mxu1 %v9186_v32  ;;  %v2257_v46 = vpop.f32.mrb[93].mxu0  ;;  %v11925_v30 = vpop.f32.mrb[93].mxu1  ;;  %v2256_v20 = vadd.f32 %v2255_v22, %v11830_v9  ;;  %v2688_v32 = vld [vmem:[#allocation3 + $0x7b8] sm:$0xff]  ;;  %v9066_v22 = vpack.c.bf16 %v2686_v29, %v2682_v28  ;;  %v11946_v28 = vrot.slane %v11823_v37, %v11936_v58  ;;  %v2689_v29 = vld [vmem:[#allocation3 + $0x7c0] sm:$0xff] }
 0x39f   : > { %2861 = vmatprep.mubr.f32.mxu0 %v2430_v18  ;;  %9061 = vmatpush1.bf16.msra.mxu0 %v9060_v16  ;;  %v2258_v31 = vadd.f32 %v2257_v46, %v11834_v1  ;;  %v2259_v5 = vpop.f32.mrb[94].mxu0  ;;  %v11933_v54 = vpop.f32.mrb[94].mxu1  ;;  %v2683_v46 = vld [vmem:[#allocation3 + $0x790] sm:$0xff]  ;;  %v9194_v60 = vpack.c.bf16 %v2688_v32, %v2684_v50  ;;  %v2693_v50 = vld [vmem:[#allocation3 + $0x7e0] sm:$0xff]  ;;  %v3430_v32 = vld [vmem:[#allocation5 + $0x18] sm:$0xff] }
 0x3a0   : > { %3183 = vmatprep.mubr.f32.mxu1 %v2430_v18  ;;  %9189 = vmatpush1.bf16.msra.mxu1 %v9188_v21  ;;  %v2261_v56 = vpop.f32.mrb[95].mxu0  ;;  %v11938_v16 = vpop.f32.mrb[95].mxu1  ;;  %v9068_v18 = vpack.c.bf16 %v2685_v57, %v2681_v33  ;;  %v2690_v21 = vld [vmem:[#allocation3 + $0x7c8] sm:$0xff]  ;;  %v2433_v24 = vmax.f32 %v2256_v20, 0.0  ;;  %v2260_v59 = vadd.f32 %v2259_v5, %v11830_v9  ;;  %v3434_v33 = vld [vmem:[#allocation5 + $0x38] sm:$0xff]  ;;  %v9072_v37 = vpack.c.bf16 %v2693_v50, %v2689_v29  ;;  %v3435_v50 = vld [vmem:[#allocation5 + $0x40] sm:$0xff] }
 0x3a1   : > { %v2434_v13 = vmax.f32 %v2258_v31, 0.0  ;;  %v2262_v2 = vadd.f32 %v2261_v56, %v11834_v1  ;;  %2862 = vmatmul.mubr.f32.gmra.mrb[122].mxu0 %v2429_v51  ;;  %9063 = vmatprep.subr.bf16.mxu0 %v9062_v23  ;;  %v2301_v31 = vadd.f32 %v11839_v41, %v11931_v55  ;;  %v2692_v1 = vld [vmem:[#allocation3 + $0x7d8] sm:$0xff]  ;;  %v9070_v9 = vpack.c.bf16 %v2694_v36, %v2690_v21  ;;  %v3428_v20 = vld [vmem:[#allocation5 + $0x8] sm:$0xff] }
 0x3a2   : > { %3184 = vmatmul.mubr.f32.gmra.mrb[122].mxu1 %v2429_v51  ;;  %9191 = vmatprep.subr.bf16.mxu1 %v9190_v6  ;;  %v2696_v23 = vld [vmem:[#allocation3 + $0x7f8] sm:$0xff]  ;;  %v9196_v6 = vpack.c.bf16 %v2687_v17, %v2683_v46  ;;  %v2691_v51 = vld [vmem:[#allocation3 + $0x7d0] sm:$0xff]  ;;  %v3432_v5 = vld [vmem:[#allocation5 + $0x28] sm:$0xff]  ;;  %v2437_v57 = vmax.f32 %v2260_v59, 0.0  ;;  %v2299_v17 = vadd.f32 %v11836_v38, %v11946_v28  ;;  %v2311_v38 = vadd.f32 %v11851_v14, %v11931_v55 }
 0x3a3   : > { %v2438_v43 = vmax.f32 %v2262_v2, 0.0  ;;  %9065 = vmatpush1.bf16.msra.mxu0 %v9064_v48  ;;  %2867 = vmatprep.mubr.f32.mxu0 %v2434_v13  ;;  %v2695_v48 = vld [vmem:[#allocation3 + $0x7f0] sm:$0xff]  ;;  %v9198_v41 = vpack.c.bf16 %v2696_v23, %v2692_v1  ;;  %v2380_v56 = vmax.f32 %v2301_v31, 0.0  ;;  %v3427_v2 = vld [vmem:[#allocation5] sm:$0xff]  ;;  %v3436_v21 = vld [vmem:[#allocation5 + $0x48] sm:$0xff]  ;;  %v2303_v31 = vadd.f32 %v11842_v42, %v11946_v28 }
 0x3a4   : > { %9193 = vmatpush1.bf16.msra.mxu1 %v9192_v10  ;;  %3189 = vmatprep.mubr.f32.mxu1 %v2434_v13  ;;  %v9200_v36 = vpack.c.bf16 %v2695_v48, %v2691_v51  ;;  %v2305_v10 = vadd.f32 %v11844_v62, %v11931_v55  ;;  %v9330_v13 = vpack.c.bf16 %v3434_v33, %v3430_v32  ;;  %v3429_v46 = vld [vmem:[#allocation5 + $0x10] sm:$0xff]  ;;  %v3438_v59 = vld [vmem:[#allocation5 + $0x58] sm:$0xff]  ;;  %v2379_v62 = vmax.f32 %v2299_v17, 0.0 }
 0x3a5   : > { %2868 = vmatmul.mubr.f32.gmra.mrb[124].mxu0 %v2433_v24  ;;  %9067 = vmatprep.subr.bf16.mxu0 %v9066_v22  ;;  %v3431_v22 = vld [vmem:[#allocation5 + $0x20] sm:$0xff]  ;;  %v3437_v51 = vld [vmem:[#allocation5 + $0x50] sm:$0xff]  ;;  %v3446_v42 = vld [vmem:[#allocation5 + $0x98] sm:$0xff]  ;;  %v2383_v33 = vmax.f32 %v2303_v31, 0.0 }
 0x3a6   : > { %3190 = vmatmul.mubr.f32.gmra.mrb[124].mxu1 %v2433_v24  ;;  %9195 = vmatprep.subr.bf16.mxu1 %v9194_v60  ;;  %v9202_v60 = vpack.c.bf16 %v3432_v5, %v3428_v20  ;;  %v3440_v24 = vld [vmem:[#allocation5 + $0x68] sm:$0xff]  ;;  %v9204_v1 = vpack.c.bf16 %v3431_v22, %v3427_v2  ;;  %v2384_v23 = vmax.f32 %v2305_v10, 0.0  ;;  %v3441_v14 = vld [vmem:[#allocation5 + $0x70] sm:$0xff]  ;;  %v2388_v5 = vmax.f32 %v2311_v38, 0.0  ;;  %v3450_v32 = vld [vmem:[#allocation5 + $0xb8] sm:$0xff] }
 0x3a7   : > { %2873 = vmatprep.mubr.f32.mxu0 %v2438_v43  ;;  %9069 = vmatpush1.bf16.msra.mxu0 %v9068_v18  ;;  %v3433_v18 = vld [vmem:[#allocation5 + $0x30] sm:$0xff]  ;;  %v9206_v29 = vpack.c.bf16 %v3440_v24, %v3436_v21  ;;  %v3444_v20 = vld [vmem:[#allocation5 + $0x88] sm:$0xff]  ;;  %v9336_v17 = vpack.c.bf16 %v3441_v14, %v3437_v51  ;;  %v3443_v10 = vld [vmem:[#allocation5 + $0x80] sm:$0xff]  ;;  %v9338_v2 = vpack.c.bf16 %v3450_v32, %v3446_v42 }
 0x3a8   : > { %3195 = vmatprep.mubr.f32.mxu1 %v2438_v43  ;;  %9197 = vmatpush1.bf16.msra.mxu1 %v9196_v6  ;;  %v3442_v43 = vld [vmem:[#allocation5 + $0x78] sm:$0xff]  ;;  %v9332_v6 = vpack.c.bf16 %v3433_v18, %v3429_v46  ;;  %v3449_v22 = vld [vmem:[#allocation5 + $0xb0] sm:$0xff]  ;;  %v3452_v46 = vld [vmem:[#allocation5 + $0xc8] sm:$0xff]  ;;  %v2313_v38 = vadd.f32 %v11854_v3, %v11946_v28 }
 0x3a9   : > { %2874 = vmatmul.mubr.f32.gmra.mrb[126].mxu0 %v2437_v57  ;;  %9071 = vmatprep.subr.bf16.mxu0 %v9070_v9  ;;  %v3439_v9 = vld [vmem:[#allocation5 + $0x60] sm:$0xff]  ;;  %v9334_v48 = vpack.c.bf16 %v3442_v43, %v3438_v59  ;;  %v3456_v18 = vld [vmem:[#allocation5 + $0xe8] sm:$0xff]  ;;  %v3454_v21 = vld [vmem:[#allocation5 + $0xd8] sm:$0xff] }
 0x3aa   : > { %3196 = vmatmul.mubr.f32.gmra.mrb[126].mxu1 %v2437_v57  ;;  %9199 = vmatprep.subr.bf16.mxu1 %v9198_v41  ;;  %v3448_v41 = vld [vmem:[#allocation5 + $0xa8] sm:$0xff]  ;;  %v2309_v57 = vadd.f32 %v11848_v52, %v11946_v28  ;;  %v2321_v52 = vadd.f32 %v11863_v27, %v11931_v55  ;;  %v9214_v31 = vpack.c.bf16 %v3456_v18, %v3452_v46  ;;  %v3462_v3 = vld [vmem:[#allocation5 + $0x118] sm:$0xff]  ;;  %v2391_v14 = vmax.f32 %v2313_v38, 0.0  ;;  %v3473_v38 = vld [vmem:[#allocation5 + $0x170] sm:$0xff] }
 0x3ab   : > { %9073 = vmatpush1.bf16.msra.mxu0 %v9072_v37  ;;  %2944 = vmatprep.mubr.f32.mxu0 %v2380_v56  ;;  %v2315_v37 = vadd.f32 %v11856_v34, %v11931_v55  ;;  %v3458_v34 = vld [vmem:[#allocation5 + $0xf8] sm:$0xff] }
 0x3ac   : > { %9201 = vmatpush1.bf16.msra.mxu1 %v9200_v36  ;;  %3266 = vmatprep.mubr.f32.mxu1 %v2380_v56  ;;  %v9208_v56 = vpack.c.bf16 %v3439_v9, %v3435_v50  ;;  %v9210_v36 = vpack.c.bf16 %v3448_v41, %v3444_v20  ;;  %v2387_v24 = vmax.f32 %v2309_v57, 0.0  ;;  %v9342_v27 = vpack.c.bf16 %v3458_v34, %v3454_v21  ;;  %v3460_v50 = vld [vmem:[#allocation5 + $0x108] sm:$0xff]  ;;  %v3463_v57 = vld [vmem:[#allocation5 + $0x120] sm:$0xff] }
 0x3ad   : > { %9203 = vmatprep.subr.bf16.mxu0 %v9202_v60  ;;  %9331 = vmatprep.subr.bf16.mxu1 %v9330_v13  ;;  %v3447_v60 = vld [vmem:[#allocation5 + $0xa0] sm:$0xff]  ;;  %v3445_v13 = vld [vmem:[#allocation5 + $0x90] sm:$0xff]  ;;  %v2392_v43 = vmax.f32 %v2315_v37, 0.0  ;;  %v3464_v9 = vld [vmem:[#allocation5 + $0x128] sm:$0xff]  ;;  %v2396_v51 = vmax.f32 %v2321_v52, 0.0  ;;  %v2319_v20 = vadd.f32 %v11860_v0, %v11946_v28  ;;  %v2331_v0 = vadd.f32 %v11874_v25, %v11931_v55 }
 0x3ae   : > { %2945 = vmatmul.mubr.f32.vlgmr.msra.gmra.mrb[96].mxu0 %v2379_v62  ;;  %v9212_v59 = vpack.c.bf16 %v3447_v60, %v3443_v10  ;;  %v9218_v32 = vpack.c.bf16 %v3464_v9, %v3460_v50  ;;  %v3472_v10 = vld [vmem:[#allocation5 + $0x168] sm:$0xff]  ;;  %v3470_v60 = vld [vmem:[#allocation5 + $0x158] sm:$0xff]  ;;  %v3467_v21 = vld [vmem:[#allocation5 + $0x140] sm:$0xff] }
 0x3af   : > { %3267 = vmatmul.mubr.f32.vlgmr.msra.gmra.mrb[96].mxu1 %v2379_v62  ;;  %2950 = vmatprep.mubr.f32.mxu0 %v2384_v23  ;;  %v9340_v62 = vpack.c.bf16 %v3449_v22, %v3445_v13  ;;  %v2395_v13 = vmax.f32 %v2319_v20, 0.0  ;;  %v3471_v34 = vld [vmem:[#allocation5 + $0x160] sm:$0xff]  ;;  %v3484_v20 = vld [vmem:[#allocation5 + $0x1c8] sm:$0xff] }
 0x3b0   : > { %3272 = vmatprep.mubr.f32.mxu1 %v2384_v23  ;;  %9205 = vmatpush1.bf16.msra.mxu0 %v9204_v1  ;;  %v3451_v1 = vld [vmem:[#allocation5 + $0xc0] sm:$0xff] }
 0x3b1   : > { %9333 = vmatpush1.bf16.msra.mxu1 %v9332_v6  ;;  %9207 = vmatprep.subr.bf16.mxu0 %v9206_v29  ;;  %v3455_v23 = vld [vmem:[#allocation5 + $0xe0] sm:$0xff]  ;;  %v3453_v6 = vld [vmem:[#allocation5 + $0xd0] sm:$0xff] }
 0x3b2   : > { %2951 = vmatmul.mubr.f32.gmra.mrb[98].mxu0 %v2383_v33  ;;  %9335 = vmatprep.subr.bf16.mxu1 %v9334_v48  ;;  %v3457_v29 = vld [vmem:[#allocation5 + $0xf0] sm:$0xff]  ;;  %v3466_v48 = vld [vmem:[#allocation5 + $0x138] sm:$0xff]  ;;  %v9216_v41 = vpack.c.bf16 %v3455_v23, %v3451_v1  ;;  %v2329_v23 = vadd.f32 %v11872_v40, %v11946_v28  ;;  %v3475_v9 = vld [vmem:[#allocation5 + $0x180] sm:$0xff]  ;;  %v2341_v40 = vadd.f32 %v11886_v19, %v11931_v55 }
 0x3b3   : > { %3273 = vmatmul.mubr.f32.gmra.mrb[98].mxu1 %v2383_v33  ;;  %2956 = vmatprep.mubr.f32.mxu0 %v2388_v5  ;;  %v9344_v42 = vpack.c.bf16 %v3457_v29, %v3453_v6  ;;  %v3459_v33 = vld [vmem:[#allocation5 + $0x100] sm:$0xff]  ;;  %v9346_v37 = vpack.c.bf16 %v3466_v48, %v3462_v3  ;;  %v9224_v6 = vpack.c.bf16 %v3471_v34, %v3467_v21  ;;  %v3477_v3 = vld [vmem:[#allocation5 + $0x190] sm:$0xff] }
 0x3b4   : > { %3278 = vmatprep.mubr.f32.mxu1 %v2388_v5  ;;  %9209 = vmatpush1.bf16.msra.mxu0 %v9208_v56  ;;  %v2325_v5 = vadd.f32 %v11868_v53, %v11931_v55  ;;  %v3461_v56 = vld [vmem:[#allocation5 + $0x110] sm:$0xff]  ;;  %v3474_v53 = vld [vmem:[#allocation5 + $0x178] sm:$0xff]  ;;  %v9220_v22 = vpack.c.bf16 %v3463_v57, %v3459_v33 }
 0x3b5   : > { %9337 = vmatpush1.bf16.msra.mxu1 %v9336_v17  ;;  %9211 = vmatprep.subr.bf16.mxu0 %v9210_v36  ;;  %v3465_v17 = vld [vmem:[#allocation5 + $0x130] sm:$0xff]  ;;  %v3468_v36 = vld [vmem:[#allocation5 + $0x148] sm:$0xff]  ;;  %v9350_v25 = vpack.c.bf16 %v3474_v53, %v3470_v60 }
 0x3b6   : > { %2957 = vmatmul.mubr.f32.gmra.mrb[100].mxu0 %v2387_v24  ;;  %9339 = vmatprep.subr.bf16.mxu1 %v9338_v2  ;;  %v2323_v2 = vadd.f32 %v11866_v4, %v11946_v28  ;;  %v2400_v46 = vmax.f32 %v2325_v5, 0.0  ;;  %v9348_v18 = vpack.c.bf16 %v3465_v17, %v3461_v56  ;;  %v9222_v52 = vpack.c.bf16 %v3472_v10, %v3468_v36  ;;  %v3478_v4 = vld [vmem:[#allocation5 + $0x198] sm:$0xff]  ;;  %v3483_v17 = vld [vmem:[#allocation5 + $0x1c0] sm:$0xff]  ;;  %v3485_v10 = vld [vmem:[#allocation5 + $0x1d0] sm:$0xff] }
 0x3b7   : > { %3279 = vmatmul.mubr.f32.gmra.mrb[100].mxu1 %v2387_v24  ;;  %2962 = vmatprep.mubr.f32.mxu0 %v2392_v43  ;;  %v3469_v24 = vld [vmem:[#allocation5 + $0x150] sm:$0xff]  ;;  %v3486_v5 = vld [vmem:[#allocation5 + $0x1d8] sm:$0xff]  ;;  %v3487_v36 = vld [vmem:[#allocation5 + $0x1e0] sm:$0xff] }
 0x3b8   : > { %3284 = vmatprep.mubr.f32.mxu1 %v2392_v43  ;;  %9213 = vmatpush1.bf16.msra.mxu0 %v9212_v59  ;;  %v3476_v59 = vld [vmem:[#allocation5 + $0x188] sm:$0xff]  ;;  %v2399_v1 = vmax.f32 %v2323_v2, 0.0  ;;  %v9352_v29 = vpack.c.bf16 %v3473_v38, %v3469_v24  ;;  %v3498_v2 = vld [vmem:[#allocation5 + $0x238] sm:$0xff]  ;;  %v3491_v24 = vld [vmem:[#allocation5 + $0x200] sm:$0xff] }
 0x3b9   : > { %9341 = vmatpush1.bf16.msra.mxu1 %v9340_v62  ;;  %9215 = vmatprep.subr.bf16.mxu0 %v9214_v31  ;;  %v3480_v43 = vld [vmem:[#allocation5 + $0x1a8] sm:$0xff]  ;;  %v2404_v62 = vmax.f32 %v2331_v0, 0.0  ;;  %v3482_v31 = vld [vmem:[#allocation5 + $0x1b8] sm:$0xff]  ;;  %v3489_v0 = vld [vmem:[#allocation5 + $0x1f0] sm:$0xff] }
 0x3ba   : > { %2963 = vmatmul.mubr.f32.gmra.mrb[102].mxu0 %v2391_v14  ;;  %9343 = vmatprep.subr.bf16.mxu1 %v9342_v27  ;;  %v2335_v27 = vadd.f32 %v11880_v7, %v11931_v55  ;;  %v9226_v50 = vpack.c.bf16 %v3480_v43, %v3476_v59  ;;  %v9354_v48 = vpack.c.bf16 %v3482_v31, %v3478_v4  ;;  %v3490_v7 = vld [vmem:[#allocation5 + $0x1f8] sm:$0xff]  ;;  %v3492_v60 = vld [vmem:[#allocation5 + $0x208] sm:$0xff]  ;;  %v3493_v38 = vld [vmem:[#allocation5 + $0x210] sm:$0xff] }
 0x3bb   : > { %3285 = vmatmul.mubr.f32.gmra.mrb[102].mxu1 %v2391_v14  ;;  %2968 = vmatprep.mubr.f32.mxu0 %v2396_v51  ;;  %v3481_v14 = vld [vmem:[#allocation5 + $0x1b0] sm:$0xff]  ;;  %v9358_v19 = vpack.c.bf16 %v3490_v7, %v3486_v5  ;;  %v3496_v53 = vld [vmem:[#allocation5 + $0x228] sm:$0xff]  ;;  %v9360_v21 = vpack.c.bf16 %v3489_v0, %v3485_v10  ;;  %v3502_v31 = vld [vmem:[#allocation5 + $0x258] sm:$0xff]  ;;  %v2349_v7 = vadd.f32 %v11896_v15, %v11946_v28 }
 0x3bc   : > { %3290 = vmatprep.mubr.f32.mxu1 %v2396_v51  ;;  %9217 = vmatpush1.bf16.msra.mxu0 %v9216_v41  ;;  %v3479_v51 = vld [vmem:[#allocation5 + $0x1a0] sm:$0xff]  ;;  %v3488_v41 = vld [vmem:[#allocation5 + $0x1e8] sm:$0xff]  ;;  %v2408_v57 = vmax.f32 %v2335_v27, 0.0  ;;  %v9356_v56 = vpack.c.bf16 %v3481_v14, %v3477_v3  ;;  %v9234_v34 = vpack.c.bf16 %v3496_v53, %v3492_v60  ;;  %v3497_v43 = vld [vmem:[#allocation5 + $0x230] sm:$0xff]  ;;  %v2361_v15 = vadd.f32 %v11910_v61, %v11931_v55 }
 0x3bd   : > { %9345 = vmatpush1.bf16.msra.mxu1 %v9344_v42  ;;  %9219 = vmatprep.subr.bf16.mxu0 %v9218_v32  ;;  %v2403_v42 = vmax.f32 %v2329_v23, 0.0  ;;  %v2333_v32 = vadd.f32 %v11878_v47, %v11946_v28  ;;  %v9228_v33 = vpack.c.bf16 %v3479_v51, %v3475_v9  ;;  %v3494_v47 = vld [vmem:[#allocation5 + $0x218] sm:$0xff]  ;;  %v3504_v4 = vld [vmem:[#allocation5 + $0x268] sm:$0xff]  ;;  %v2343_v23 = vadd.f32 %v11890_v44, %v11946_v28  ;;  %v3499_v9 = vld [vmem:[#allocation5 + $0x240] sm:$0xff] }
 0x3be   : > { %2969 = vmatmul.mubr.f32.gmra.mrb[104].mxu0 %v2395_v13  ;;  %9347 = vmatprep.subr.bf16.mxu1 %v9346_v37  ;;  %v9230_v37 = vpack.c.bf16 %v3488_v41, %v3484_v20  ;;  %v9362_v59 = vpack.c.bf16 %v3498_v2, %v3494_v47  ;;  %v3503_v51 = vld [vmem:[#allocation5 + $0x260] sm:$0xff]  ;;  %v3501_v3 = vld [vmem:[#allocation5 + $0x250] sm:$0xff]  ;;  %v3508_v14 = vld [vmem:[#allocation5 + $0x288] sm:$0xff]  ;;  %v2419_v53 = vmax.f32 %v2349_v7, 0.0 }
 0x3bf   : > { %3291 = vmatmul.mubr.f32.gmra.mrb[104].mxu1 %v2395_v13  ;;  %2974 = vmatprep.mubr.f32.mxu0 %v2400_v46  ;;  %v2412_v13 = vmax.f32 %v2341_v40, 0.0  ;;  %v3512_v20 = vld [vmem:[#allocation5 + $0x2a8] sm:$0xff]  ;;  %v3510_v44 = vld [vmem:[#allocation5 + $0x298] sm:$0xff]  ;;  %v2415_v5 = vmax.f32 %v2343_v23, 0.0  ;;  %v3513_v10 = vld [vmem:[#allocation5 + $0x2b0] sm:$0xff] }
 0x3c0   : > { %3296 = vmatprep.mubr.f32.mxu1 %v2400_v46  ;;  %9221 = vmatpush1.bf16.msra.mxu0 %v9220_v22  ;;  %v2407_v22 = vmax.f32 %v2333_v32, 0.0  ;;  %v2339_v46 = vadd.f32 %v11884_v35, %v11946_v28  ;;  %v2351_v35 = vadd.f32 %v11898_v39, %v11931_v55  ;;  %v3514_v40 = vld [vmem:[#allocation5 + $0x2b8] sm:$0xff]  ;;  %v2355_v32 = vadd.f32 %v11904_v49, %v11931_v55  ;;  %v3520_v0 = vld [vmem:[#allocation5 + $0x2e8] sm:$0xff]  ;;  %v3527_v23 = vld [vmem:[#allocation5 + $0x320] sm:$0xff] }
 0x3c1   : > { %9349 = vmatpush1.bf16.msra.mxu1 %v9348_v18  ;;  %9223 = vmatprep.subr.bf16.mxu0 %v9222_v52  ;;  %v9232_v18 = vpack.c.bf16 %v3487_v36, %v3483_v17  ;;  %v2345_v52 = vadd.f32 %v11892_v26, %v11931_v55  ;;  %v3506_v26 = vld [vmem:[#allocation5 + $0x278] sm:$0xff]  ;;  %v3509_v17 = vld [vmem:[#allocation5 + $0x290] sm:$0xff]  ;;  %v9370_v36 = vpack.c.bf16 %v3514_v40, %v3510_v44  ;;  %v3531_v44 = vld [vmem:[#allocation5 + $0x340] sm:$0xff] }
 0x3c2   : > { %2975 = vmatmul.mubr.f32.gmra.mrb[106].mxu0 %v2399_v1  ;;  %9351 = vmatprep.subr.bf16.mxu1 %v9350_v25  ;;  %v3495_v25 = vld [vmem:[#allocation5 + $0x220] sm:$0xff]  ;;  %v9366_v39 = vpack.c.bf16 %v3506_v26, %v3502_v31  ;;  %v2420_v41 = vmax.f32 %v2351_v35, 0.0  ;;  %v3518_v60 = vld [vmem:[#allocation5 + $0x2d8] sm:$0xff]  ;;  %v2424_v2 = vmax.f32 %v2355_v32, 0.0  ;;  %v2365_v35 = vadd.f32 %v11916_v12, %v11931_v55  ;;  %v3537_v7 = vld [vmem:[#allocation5 + $0x370] sm:$0xff] }
 0x3c3   : > { %3297 = vmatmul.mubr.f32.gmra.mrb[106].mxu1 %v2399_v1  ;;  %2980 = vmatprep.mubr.f32.mxu0 %v2404_v62  ;;  %v2411_v1 = vmax.f32 %v2339_v46, 0.0  ;;  %v2416_v27 = vmax.f32 %v2345_v52, 0.0  ;;  %v3522_v49 = vld [vmem:[#allocation5 + $0x2f8] sm:$0xff]  ;;  %v3519_v52 = vld [vmem:[#allocation5 + $0x2e0] sm:$0xff]  ;;  %v3544_v32 = vld [vmem:[#allocation5 + $0x3a8] sm:$0xff] }
 0x3c4   : > { %3302 = vmatprep.mubr.f32.mxu1 %v2404_v62  ;;  %9225 = vmatpush1.bf16.msra.mxu0 %v9224_v6  ;;  %v3500_v62 = vld [vmem:[#allocation5 + $0x248] sm:$0xff]  ;;  %v9236_v6 = vpack.c.bf16 %v3495_v25, %v3491_v24  ;;  %v9374_v61 = vpack.c.bf16 %v3522_v49, %v3518_v60  ;;  %v3538_v12 = vld [vmem:[#allocation5 + $0x378] sm:$0xff]  ;;  %v3535_v40 = vld [vmem:[#allocation5 + $0x360] sm:$0xff]  ;;  %v2373_v60 = vadd.f32 %v11933_v54, %v11946_v28 }
 0x3c5   : > { %9353 = vmatpush1.bf16.msra.mxu1 %v9352_v29  ;;  %9227 = vmatprep.subr.bf16.mxu0 %v9226_v50  ;;  %v9364_v29 = vpack.c.bf16 %v3497_v43, %v3493_v38  ;;  %v9238_v50 = vpack.c.bf16 %v3504_v4, %v3500_v62  ;;  %v3524_v24 = vld [vmem:[#allocation5 + $0x308] sm:$0xff]  ;;  %v2428_v38 = vmax.f32 %v2361_v15, 0.0  ;;  %v2359_v62 = vadd.f32 %v11908_v8, %v11946_v28  ;;  %v3543_v49 = vld [vmem:[#allocation5 + $0x3a0] sm:$0xff] }
 0x3c6   : > { %2981 = vmatmul.mubr.f32.gmra.mrb[108].mxu0 %v2403_v42  ;;  %9355 = vmatprep.subr.bf16.mxu1 %v9354_v48  ;;  %v3505_v48 = vld [vmem:[#allocation5 + $0x270] sm:$0xff]  ;;  %v3528_v25 = vld [vmem:[#allocation5 + $0x328] sm:$0xff]  ;;  %v2371_v8 = vadd.f32 %v11925_v30, %v11931_v55 }
 0x3c7   : > { %3303 = vmatmul.mubr.f32.gmra.mrb[108].mxu1 %v2403_v42  ;;  %2986 = vmatprep.mubr.f32.mxu0 %v2408_v57  ;;  %v9240_v42 = vpack.c.bf16 %v3503_v51, %v3499_v9  ;;  %v9250_v26 = vpack.c.bf16 %v3528_v25, %v3524_v24  ;;  %v3536_v9 = vld [vmem:[#allocation5 + $0x368] sm:$0xff]  ;;  %v3534_v51 = vld [vmem:[#allocation5 + $0x358] sm:$0xff]  ;;  %v3549_v24 = vld [vmem:[#allocation5 + $0x3d0] sm:$0xff] }
 0x3c8   : > { %3308 = vmatprep.mubr.f32.mxu1 %v2408_v57  ;;  %9229 = vmatpush1.bf16.msra.mxu0 %v9228_v33  ;;  %v9368_v33 = vpack.c.bf16 %v3505_v48, %v3501_v3  ;;  %v9242_v57 = vpack.c.bf16 %v3512_v20, %v3508_v14  ;;  %v2427_v3 = vmax.f32 %v2359_v62, 0.0  ;;  %v2432_v14 = vmax.f32 %v2365_v35, 0.0  ;;  %v3548_v54 = vld [vmem:[#allocation5 + $0x3c8] sm:$0xff]  ;;  %v3553_v25 = vld [vmem:[#allocation5 + $0x3f0] sm:$0xff]  ;;  %v1186_v62 = vld [vmem:[%s1145_s16] sm:$0xff]  ;;  %s13088_s16 = sld [smem:[#allocation23_spill]] }
 0x3c9   : > { %9357 = vmatpush1.bf16.msra.mxu1 %v9356_v56  ;;  %9231 = vmatprep.subr.bf16.mxu0 %v9230_v37  ;;  %v3507_v56 = vld [vmem:[#allocation5 + $0x280] sm:$0xff]  ;;  %v9382_v30 = vpack.c.bf16 %v3538_v12, %v3534_v51  ;;  %v3562_v35 = vld [vmem:[#allocation5 + $0x438] sm:$0xff] }
 0x3ca   : > { %2987 = vmatmul.mubr.f32.gmra.mrb[110].mxu0 %v2407_v22  ;;  %9359 = vmatprep.subr.bf16.mxu1 %v9358_v19  ;;  %v3511_v37 = vld [vmem:[#allocation5 + $0x2a0] sm:$0xff]  ;;  %v3516_v19 = vld [vmem:[#allocation5 + $0x2c8] sm:$0xff] }
 0x3cb   : > { %3309 = vmatmul.mubr.f32.gmra.mrb[110].mxu1 %v2407_v22  ;;  %2992 = vmatprep.mubr.f32.mxu0 %v2412_v13  ;;  %v9244_v47 = vpack.c.bf16 %v3511_v37, %v3507_v56  ;;  %v9372_v22 = vpack.c.bf16 %v3513_v10, %v3509_v17  ;;  %v9246_v46 = vpack.c.bf16 %v3520_v0, %v3516_v19  ;;  %v3559_v51 = vld [vmem:[#allocation5 + $0x420] sm:$0xff] }
 0x3cc   : > { %3314 = vmatprep.mubr.f32.mxu1 %v2412_v13  ;;  %9233 = vmatpush1.bf16.msra.mxu0 %v9232_v18  ;;  %v2353_v13 = vadd.f32 %v11902_v45, %v11946_v28  ;;  %v3515_v18 = vld [vmem:[#allocation5 + $0x2c0] sm:$0xff]  ;;  %v3526_v45 = vld [vmem:[#allocation5 + $0x318] sm:$0xff]  ;;  %v2369_v37 = vadd.f32 %v11923_v63, %v11946_v28  ;;  %v9256_v17 = vpack.c.bf16 %v3535_v40, %v3531_v44  ;;  %v3568_v40 = vld [vmem:[#allocation5 + $0x468] sm:$0xff] }
 0x3cd   : > { %9361 = vmatpush1.bf16.msra.mxu1 %v9360_v21  ;;  %9235 = vmatprep.subr.bf16.mxu0 %v9234_v34  ;;  %v3517_v21 = vld [vmem:[#allocation5 + $0x2d0] sm:$0xff]  ;;  %v9248_v4 = vpack.c.bf16 %v3519_v52, %v3515_v18  ;;  %v3554_v18 = vld [vmem:[#allocation5 + $0x3f8] sm:$0xff]  ;;  %v3547_v52 = vld [vmem:[#allocation5 + $0x3c0] sm:$0xff] }
 0x3ce   : > { %2993 = vmatmul.mubr.f32.gmra.mrb[112].mxu0 %v2411_v1  ;;  %9363 = vmatprep.subr.bf16.mxu1 %v9362_v59  ;;  %v3521_v34 = vld [vmem:[#allocation5 + $0x2f0] sm:$0xff]  ;;  %v3530_v59 = vld [vmem:[#allocation5 + $0x338] sm:$0xff]  ;;  %v2423_v43 = vmax.f32 %v2353_v13, 0.0  ;;  %v2435_v15 = vmax.f32 %v2369_v37, 0.0 }
 0x3cf   : > { %3315 = vmatmul.mubr.f32.gmra.mrb[112].mxu1 %v2411_v1  ;;  %2998 = vmatprep.mubr.f32.mxu0 %v2416_v27  ;;  %v9376_v31 = vpack.c.bf16 %v3521_v34, %v3517_v21  ;;  %v3523_v1 = vld [vmem:[#allocation5 + $0x300] sm:$0xff] }
 0x3d0   : > { %3320 = vmatprep.mubr.f32.mxu1 %v2416_v27  ;;  %9237 = vmatpush1.bf16.msra.mxu0 %v9236_v6  ;;  %v3525_v6 = vld [vmem:[#allocation5 + $0x310] sm:$0xff]  ;;  %v9378_v27 = vpack.c.bf16 %v3530_v59, %v3526_v45  ;;  %v9252_v48 = vpack.c.bf16 %v3527_v23, %v3523_v1  ;;  %v3551_v21 = vld [vmem:[#allocation5 + $0x3e0] sm:$0xff]  ;;  %v3556_v45 = vld [vmem:[#allocation5 + $0x408] sm:$0xff] }
 0x3d1   : > { %9365 = vmatpush1.bf16.msra.mxu1 %v9364_v29  ;;  %9239 = vmatprep.subr.bf16.mxu0 %v9238_v50  ;;  %v3529_v29 = vld [vmem:[#allocation5 + $0x330] sm:$0xff]  ;;  %v3532_v50 = vld [vmem:[#allocation5 + $0x348] sm:$0xff]  ;;  %v9264_v34 = vpack.c.bf16 %v3551_v21, %v3547_v52  ;;  %v12017_v23 = vld [vmem:[%s11167_s19] sm:$0xf] }
 0x3d2   : > { %2999 = vmatmul.mubr.f32.gmra.mrb[114].mxu0 %v2415_v5  ;;  %9367 = vmatprep.subr.bf16.mxu1 %v9366_v39  ;;  %v2363_v39 = vadd.f32 %v11914_v11, %v11946_v28  ;;  %v9380_v20 = vpack.c.bf16 %v3529_v29, %v3525_v6  ;;  %v3542_v11 = vld [vmem:[#allocation5 + $0x398] sm:$0xff]  ;;  %v3552_v28 = vld [vmem:[#allocation5 + $0x3e8] sm:$0xff]  ;;  %v13070_v6 = vld [vmem:[#allocation34_spill] sm:$0xff] }
 0x3d3   : > { %3321 = vmatmul.mubr.f32.gmra.mrb[114].mxu1 %v2415_v5  ;;  %3004 = vmatprep.mubr.f32.mxu0 %v2420_v41  ;;  %v3533_v5 = vld [vmem:[#allocation5 + $0x350] sm:$0xff]  ;;  %v3560_v59 = vld [vmem:[#allocation5 + $0x428] sm:$0xff] }
 0x3d4   : > { %3326 = vmatprep.mubr.f32.mxu1 %v2420_v41  ;;  %9241 = vmatpush1.bf16.msra.mxu0 %v9240_v42  ;;  %v9254_v41 = vpack.c.bf16 %v3536_v9, %v3532_v50  ;;  %v3540_v42 = vld [vmem:[#allocation5 + $0x388] sm:$0xff]  ;;  %v2431_v56 = vmax.f32 %v2363_v39, 0.0  ;;  %v9384_v10 = vpack.c.bf16 %v3537_v7, %v3533_v5  ;;  %v3566_v5 = vld [vmem:[#allocation5 + $0x458] sm:$0xff] }
 0x3d5   : > { %9369 = vmatpush1.bf16.msra.mxu1 %v9368_v33  ;;  %9243 = vmatprep.subr.bf16.mxu0 %v9242_v57  ;;  %v2436_v33 = vmax.f32 %v2371_v8, 0.0  ;;  %v3546_v57 = vld [vmem:[#allocation5 + $0x3b8] sm:$0xff]  ;;  %v9258_v19 = vpack.c.bf16 %v3544_v32, %v3540_v42  ;;  %v13071_v29 = vld [vmem:[#allocation35_spill] sm:$0xff]  ;;  %v3555_v8 = vld [vmem:[#allocation5 + $0x400] sm:$0xff] }
 0x3d6   : > { %3005 = vmatmul.mubr.f32.gmra.mrb[116].mxu0 %v2419_v53  ;;  %9371 = vmatprep.subr.bf16.mxu1 %v9370_v36  ;;  %v2375_v36 = vadd.f32 %v11938_v16, %v11931_v55  ;;  %v9386_v0 = vpack.c.bf16 %v3546_v57, %v3542_v11  ;;  %v2439_v55 = vmax.f32 %v2373_v60, 0.0  ;;  %v3539_v16 = vld [vmem:[#allocation5 + $0x380] sm:$0xff]  ;;  %v12025_v50 = vrot.slane %v12017_v23, %v13071_v29  ;;  %v3572_v60 = vld [vmem:[#allocation5 + $0x488] sm:$0xff] }
 0x3d7   : > { %3327 = vmatmul.mubr.f32.gmra.mrb[116].mxu1 %v2419_v53  ;;  %3010 = vmatprep.mubr.f32.mxu0 %v2424_v2  ;;  %v3541_v53 = vld [vmem:[#allocation5 + $0x390] sm:$0xff]  ;;  %v9260_v13 = vpack.c.bf16 %v3543_v49, %v3539_v16  ;;  %v9268_v32 = vpack.c.bf16 %v3559_v51, %v3555_v8  ;;  %v3563_v11 = vld [vmem:[#allocation5 + $0x440] sm:$0xff]  ;;  %v3576_v16 = vld [vmem:[#allocation5 + $0x4a8] sm:$0xff] }
 0x3d8   : > { %3332 = vmatprep.mubr.f32.mxu1 %v2424_v2  ;;  %9245 = vmatpush1.bf16.msra.mxu0 %v9244_v47  ;;  %v2440_v63 = vmax.f32 %v2375_v36, 0.0  ;;  %v3545_v47 = vld [vmem:[#allocation5 + $0x3b0] sm:$0xff]  ;;  %v3567_v57 = vld [vmem:[#allocation5 + $0x460] sm:$0xff]  ;;  %v3574_v49 = vld [vmem:[#allocation5 + $0x498] sm:$0xff] }
 0x3d9   : > { %9373 = vmatpush1.bf16.msra.mxu1 %v9372_v22  ;;  %9247 = vmatprep.subr.bf16.mxu0 %v9246_v46  ;;  %v9388_v2 = vpack.c.bf16 %v3545_v47, %v3541_v53  ;;  %v3550_v22 = vld [vmem:[#allocation5 + $0x3d8] sm:$0xff]  ;;  %v9262_v46 = vpack.c.bf16 %v3552_v28, %v3548_v54  ;;  %v3571_v28 = vld [vmem:[#allocation5 + $0x480] sm:$0xff] }
 0x3da   : > { %3011 = vmatmul.mubr.f32.gmra.mrb[118].mxu0 %v2423_v43  ;;  %9375 = vmatprep.subr.bf16.mxu1 %v9374_v61  ;;  %v9390_v61 = vpack.c.bf16 %v3554_v18, %v3550_v22  ;;  %v3578_v53 = vld [vmem:[#allocation5 + $0x4b8] sm:$0xff]  ;;  %v3575_v22 = vld [vmem:[#allocation5 + $0x4a0] sm:$0xff] }
 0x3db   : > { %3333 = vmatmul.mubr.f32.gmra.mrb[118].mxu1 %v2423_v43  ;;  %3016 = vmatprep.mubr.f32.mxu0 %v2428_v38  ;;  %v3558_v43 = vld [vmem:[#allocation5 + $0x418] sm:$0xff]  ;;  %v3579_v8 = vld [vmem:[#allocation5 + $0x4c0] sm:$0xff] }
 0x3dc   : > { %3338 = vmatprep.mubr.f32.mxu1 %v2428_v38  ;;  %9249 = vmatpush1.bf16.msra.mxu0 %v9248_v4  ;;  %v9392_v38 = vpack.c.bf16 %v3553_v25, %v3549_v24  ;;  %v9266_v4 = vpack.c.bf16 %v3560_v59, %v3556_v45  ;;  %v3573_v24 = vld [vmem:[#allocation5 + $0x490] sm:$0xff]  ;;  %v3583_v51 = vld [vmem:[#allocation5 + $0x4e0] sm:$0xff] }
 0x3dd   : > { %9377 = vmatpush1.bf16.msra.mxu1 %v9376_v31  ;;  %9251 = vmatprep.subr.bf16.mxu0 %v9250_v26  ;;  %v9394_v31 = vpack.c.bf16 %v3562_v35, %v3558_v43  ;;  %v1185_v26 = vld [vmem:[%s1141_s10] sm:$0xff]  ;;  %v3577_v25 = vld [vmem:[#allocation5 + $0x4b0] sm:$0xff]  ;;  %v3584_v43 = vld [vmem:[#allocation5 + $0x4e8] sm:$0xff]  ;;  %s13091_s10 = sld [smem:[#allocation29_spill]] }
 0x3de   : > { %3017 = vmatmul.mubr.f32.gmra.mrb[120].mxu0 %v2427_v3  ;;  %9379 = vmatprep.subr.bf16.mxu1 %v9378_v27  ;;  %v12014_v1 = vmul.f32 %v1186_v62, %v1185_v26  ;;  %v12021_v27 = vrot.slane %v12017_v23, %v13070_v6 }
 0x3df   : > { %3339 = vmatmul.mubr.f32.gmra.mrb[120].mxu1 %v2427_v3  ;;  %3022 = vmatprep.mubr.f32.mxu0 %v2432_v14 }
 0x3e0   : > { %3344 = vmatprep.mubr.f32.mxu1 %v2432_v14  ;;  %9253 = vmatpush1.bf16.msra.mxu0 %v9252_v48  ;;  %13069 = vst [vmem:[#allocation37_spill] sm:$0xff] %v12014_v1  ;;  %v3557_v48 = vld [vmem:[#allocation5 + $0x410] sm:$0xff]  ;;  %v3675_v1 = vld [vmem:[#allocation5 + $0x7c0] sm:$0xff] }
 0x3e1   : > { %9381 = vmatpush1.bf16.msra.mxu1 %v9380_v20  ;;  %9255 = vmatprep.subr.bf16.mxu0 %v9254_v41  ;;  %v3561_v14 = vld [vmem:[#allocation5 + $0x430] sm:$0xff]  ;;  %v3564_v20 = vld [vmem:[#allocation5 + $0x448] sm:$0xff] }
 0x3e2   : > { %3023 = vmatmul.mubr.f32.gmra.mrb[122].mxu0 %v2431_v56  ;;  %9383 = vmatprep.subr.bf16.mxu1 %v9382_v30  ;;  %v3570_v30 = vld [vmem:[#allocation5 + $0x478] sm:$0xff] }
 0x3e3   : > { %3345 = vmatmul.mubr.f32.gmra.mrb[122].mxu1 %v2431_v56  ;;  %3028 = vmatprep.mubr.f32.mxu0 %v2436_v33 }
 0x3e4   : > { %3350 = vmatprep.mubr.f32.mxu1 %v2436_v33  ;;  %9257 = vmatpush1.bf16.msra.mxu0 %v9256_v17  ;;  %v9396_v33 = vpack.c.bf16 %v3561_v14, %v3557_v48 }
 0x3e5   : > { %9385 = vmatpush1.bf16.msra.mxu1 %v9384_v10  ;;  %9259 = vmatprep.subr.bf16.mxu0 %v9258_v19  ;;  %v9270_v10 = vpack.c.bf16 %v3568_v40, %v3564_v20  ;;  %v9398_v19 = vpack.c.bf16 %v3570_v30, %v3566_v5  ;;  %v3581_v40 = vld [vmem:[#allocation5 + $0x4d0] sm:$0xff]  ;;  %v3588_v30 = vld [vmem:[#allocation5 + $0x508] sm:$0xff] }
 0x3e6   : > { %3029 = vmatmul.mubr.f32.gmra.mrb[124].mxu0 %v2435_v15  ;;  %9387 = vmatprep.subr.bf16.mxu1 %v9386_v0  ;;  %v3565_v0 = vld [vmem:[#allocation5 + $0x450] sm:$0xff] }
 0x3e7   : > { %3351 = vmatmul.mubr.f32.gmra.mrb[124].mxu1 %v2435_v15  ;;  %3034 = vmatprep.mubr.f32.mxu0 %v2440_v63  ;;  %v3569_v15 = vld [vmem:[#allocation5 + $0x470] sm:$0xff] }
 0x3e8   : > { %3356 = vmatprep.mubr.f32.mxu1 %v2440_v63  ;;  %9261 = vmatpush1.bf16.msra.mxu0 %v9260_v13  ;;  %v9400_v54 = vpack.c.bf16 %v3569_v15, %v3565_v0  ;;  %v3585_v5 = vld [vmem:[#allocation5 + $0x4f0] sm:$0xff] }
 0x3e9   : > { %9389 = vmatpush1.bf16.msra.mxu1 %v9388_v2  ;;  %9263 = vmatprep.subr.bf16.mxu0 %v9262_v46  ;;  %v9272_v2 = vpack.c.bf16 %v3567_v57, %v3563_v11  ;;  %v3594_v11 = vld [vmem:[#allocation5 + $0x538] sm:$0xff] }
 0x3ea   : > { %3035 = vmatmul.mubr.f32.gmra.mrb[126].mxu0 %v2439_v55  ;;  %9391 = vmatprep.subr.bf16.mxu1 %v9390_v61  ;;  %v9274_v61 = vpack.c.bf16 %v3576_v16, %v3572_v60 }
 0x3eb   : > { %3357 = vmatmul.mubr.f32.gmra.mrb[126].mxu1 %v2439_v55  ;;  %4349 = vxpose.xlu1.b32.start [1/2] (short) (narrow) %v1186_v62, 32  ;;  %v3582_v62 = vld [vmem:[#allocation5 + $0x4d8] sm:$0xff] }
 0x3ec   : > { %9265 = vmatpush1.bf16.msra.mxu0 %v9264_v34  ;;  %v9402_v34 = vpack.c.bf16 %v3578_v53, %v3574_v49  ;;  %v3589_v53 = vld [vmem:[#allocation5 + $0x510] sm:$0xff] }
 0x3ed   : > { %9393 = vmatpush1.bf16.msra.mxu1 %v9392_v38  ;;  %9267 = vmatprep.subr.bf16.mxu0 %v9266_v4  ;;  %v3580_v38 = vld [vmem:[#allocation5 + $0x4c8] sm:$0xff]  ;;  %v3586_v4 = vld [vmem:[#allocation5 + $0x4f8] sm:$0xff] }
 0x3ee   : > { %9395 = vmatprep.subr.bf16.mxu1 %v9394_v31  ;;  %v9278_v20 = vpack.c.bf16 %v3584_v43, %v3580_v38 }
 0x3ef   : > { %4350 = vxpose.xlu1.b32.end [2/2] (short) (narrow) %v1185_v26, 32  ;;  %v9276_v26 = vpack.c.bf16 %v3575_v22, %v3571_v28  ;;  %v3600_v28 = vld [vmem:[#allocation5 + $0x568] sm:$0xff]  ;;  %v3598_v22 = vld [vmem:[#allocation5 + $0x558] sm:$0xff] }
 0x481   : > { %v2946_v9 = vpop.f32.mrb[96].mxu0 }
 0x482   : > { %v10124_v12 = vadd.f32 %v2946_v9, %v12021_v27  ;;  %v12028_v3 = vpop.f32.mrb[96].mxu1  ;;  %v2948_v39 = vpop.f32.mrb[97].mxu0  ;;  %v9404_v9 = vpack.c.bf16 %v3577_v25, %v3573_v24  ;;  %v3595_v24 = vld [vmem:[#allocation5 + $0x540] sm:$0xff] }
 0x483   : > { %v10125_v41 = vadd.f32 %v2948_v39, %v12025_v50  ;;  %v12031_v44 = vpop.f32.mrb[97].mxu1  ;;  %v3599_v25 = vld [vmem:[#allocation5 + $0x560] sm:$0xff] }
 0x484   : > { %v3363_v56 = vmax.f32 %v10124_v12, 0.0 }
 0x485   : > { %v3364_v7 = vmax.f32 %v10125_v41, 0.0  ;;  %v2952_v42 = vpop.f32.mrb[98].mxu0  ;;  %v9406_v41 = vpack.c.bf16 %v3586_v4, %v3582_v62 }
 0x486   : > { %v10126_v37 = vadd.f32 %v2952_v42, %v12021_v27  ;;  %v12034_v17 = vpop.f32.mrb[98].mxu1  ;;  %v2954_v36 = vpop.f32.mrb[99].mxu0 }
 0x487   : > { %v10127_v63 = vadd.f32 %v2954_v36, %v12025_v50  ;;  %v12037_v55 = vpop.f32.mrb[99].mxu1  ;;  %3769 = vmatprep.mubr.f32.mxu0 %v3364_v7  ;;  %4091 = vmatprep.mubr.f32.mxu1 %v3364_v7  ;;  %v9408_v36 = vpack.c.bf16 %v3585_v5, %v3581_v40  ;;  %v9288_v40 = vpack.c.bf16 %v3599_v25, %v3595_v24  ;;  %v3613_v25 = vld [vmem:[#allocation5 + $0x5d0] sm:$0xff] }
 0x488   : > { %3770 = vmatmul.mubr.f32.vlgmr.msra.gmra.mrb[128].mxu0 %v3363_v56  ;;  %4092 = vmatmul.mubr.f32.vlgmr.msra.gmra.mrb[128].mxu1 %v3363_v56  ;;  %v3367_v46 = vmax.f32 %v10126_v37, 0.0  ;;  %v9280_v37 = vpack.c.bf16 %v3583_v51, %v3579_v8 }
 0x489   : > { %v3368_v13 = vmax.f32 %v10127_v63, 0.0  ;;  %v2958_v47 = vpop.f32.mrb[100].mxu0  ;;  %9269 = vmatpush1.bf16.msra.mxu0 %v9268_v32  ;;  %9397 = vmatpush1.bf16.msra.mxu1 %v9396_v33  ;;  %v3592_v32 = vld [vmem:[#allocation5 + $0x528] sm:$0xff]  ;;  %v3590_v33 = vld [vmem:[#allocation5 + $0x518] sm:$0xff] }
 0x48a   : > { %v10128_v18 = vadd.f32 %v2958_v47, %v12021_v27  ;;  %v12040_v52 = vpop.f32.mrb[100].mxu1  ;;  %v2960_v21 = vpop.f32.mrb[101].mxu0  ;;  %9271 = vmatprep.subr.bf16.mxu0 %v9270_v10  ;;  %9399 = vmatprep.subr.bf16.mxu1 %v9398_v19  ;;  %v3587_v10 = vld [vmem:[#allocation5 + $0x500] sm:$0xff]  ;;  %v9282_v16 = vpack.c.bf16 %v3592_v32, %v3588_v30  ;;  %v9410_v49 = vpack.c.bf16 %v3594_v11, %v3590_v33  ;;  %v3596_v47 = vld [vmem:[#allocation5 + $0x548] sm:$0xff] }
 0x48b   : > { %v10129_v45 = vadd.f32 %v2960_v21, %v12025_v50  ;;  %v12043_v59 = vpop.f32.mrb[101].mxu1  ;;  %3775 = vmatprep.mubr.f32.mxu0 %v3368_v13  ;;  %4097 = vmatprep.mubr.f32.mxu1 %v3368_v13  ;;  %v3591_v19 = vld [vmem:[#allocation5 + $0x520] sm:$0xff]  ;;  %v3593_v13 = vld [vmem:[#allocation5 + $0x530] sm:$0xff]  ;;  %v9286_v4 = vpack.c.bf16 %v3600_v28, %v3596_v47 }
 0x48c   : > { %3776 = vmatmul.mubr.f32.gmra.mrb[130].mxu0 %v3367_v46  ;;  %4098 = vmatmul.mubr.f32.gmra.mrb[130].mxu1 %v3367_v46  ;;  %v3371_v12 = vmax.f32 %v10128_v18, 0.0  ;;  %v3602_v46 = vld [vmem:[#allocation5 + $0x578] sm:$0xff]  ;;  %v3603_v30 = vld [vmem:[#allocation5 + $0x580] sm:$0xff] }
 0x48d   : > { %v3372_v35 = vmax.f32 %v10129_v45, 0.0  ;;  %v2964_v31 = vpop.f32.mrb[102].mxu0  ;;  %9273 = vmatpush1.bf16.msra.mxu0 %v9272_v2  ;;  %9401 = vmatpush1.bf16.msra.mxu1 %v9400_v54  ;;  %v3611_v28 = vld [vmem:[#allocation5 + $0x5c0] sm:$0xff] }
 0x48e   : > { %v10130_v39 = vadd.f32 %v2964_v31, %v12021_v27  ;;  %v12046_v48 = vpop.f32.mrb[102].mxu1  ;;  %v2966_v14 = vpop.f32.mrb[103].mxu0  ;;  %9275 = vmatprep.subr.bf16.mxu0 %v9274_v61  ;;  %9403 = vmatprep.subr.bf16.mxu1 %v9402_v34  ;;  %v9284_v61 = vpack.c.bf16 %v3591_v19, %v3587_v10  ;;  %v9412_v34 = vpack.c.bf16 %v3593_v13, %v3589_v53  ;;  %v3597_v31 = vld [vmem:[#allocation5 + $0x550] sm:$0xff]  ;;  %v3612_v19 = vld [vmem:[#allocation5 + $0x5c8] sm:$0xff] }
 0x48f   : > { %v10131_v7 = vadd.f32 %v2966_v14, %v12025_v50  ;;  %v12049_v42 = vpop.f32.mrb[103].mxu1  ;;  %3781 = vmatprep.mubr.f32.mxu0 %v3372_v35  ;;  %4103 = vmatprep.mubr.f32.mxu1 %v3372_v35  ;;  %v9414_v35 = vpack.c.bf16 %v3602_v46, %v3598_v22  ;;  %v3610_v14 = vld [vmem:[#allocation5 + $0x5b8] sm:$0xff]  ;;  %v3609_v10 = vld [vmem:[#allocation5 + $0x5b0] sm:$0xff]  ;;  %v3615_v22 = vld [vmem:[#allocation5 + $0x5e0] sm:$0xff] }
 0x490   : > { %3782 = vmatmul.mubr.f32.gmra.mrb[132].mxu0 %v3371_v12  ;;  %4104 = vmatmul.mubr.f32.gmra.mrb[132].mxu1 %v3371_v12  ;;  %v3375_v0 = vmax.f32 %v10130_v39, 0.0  ;;  %v3608_v12 = vld [vmem:[#allocation5 + $0x5a8] sm:$0xff]  ;;  %v3606_v39 = vld [vmem:[#allocation5 + $0x598] sm:$0xff] }
 0x491   : > { %v3376_v57 = vmax.f32 %v10131_v7, 0.0  ;;  %v2970_v56 = vpop.f32.mrb[104].mxu0  ;;  %9277 = vmatpush1.bf16.msra.mxu0 %v9276_v26  ;;  %9405 = vmatpush1.bf16.msra.mxu1 %v9404_v9  ;;  %v3601_v26 = vld [vmem:[#allocation5 + $0x570] sm:$0xff]  ;;  %v3604_v9 = vld [vmem:[#allocation5 + $0x588] sm:$0xff]  ;;  %v3607_v7 = vld [vmem:[#allocation5 + $0x5a0] sm:$0xff] }
 0x492   : > { %v10132_v15 = vadd.f32 %v2970_v56, %v12021_v27  ;;  %v12052_v60 = vpop.f32.mrb[104].mxu1  ;;  %v2972_v63 = vpop.f32.mrb[105].mxu0  ;;  %9279 = vmatprep.subr.bf16.mxu0 %v9278_v20  ;;  %9407 = vmatprep.subr.bf16.mxu1 %v9406_v41  ;;  %v9416_v5 = vpack.c.bf16 %v3601_v26, %v3597_v31  ;;  %v9290_v56 = vpack.c.bf16 %v3608_v12, %v3604_v9  ;;  %v3622_v31 = vld [vmem:[#allocation5 + $0x618] sm:$0xff] }
 0x493   : > { %v10133_v2 = vadd.f32 %v2972_v63, %v12025_v50  ;;  %v12055_v54 = vpop.f32.mrb[105].mxu1  ;;  %3787 = vmatprep.mubr.f32.mxu0 %v3376_v57  ;;  %4109 = vmatprep.mubr.f32.mxu1 %v3376_v57  ;;  %v3616_v63 = vld [vmem:[#allocation5 + $0x5e8] sm:$0xff]  ;;  %v9292_v47 = vpack.c.bf16 %v3607_v7, %v3603_v30  ;;  %v3626_v26 = vld [vmem:[#allocation5 + $0x638] sm:$0xff]  ;;  %v9296_v12 = vpack.c.bf16 %v3615_v22, %v3611_v28 }
 0x494   : > { %3788 = vmatmul.mubr.f32.gmra.mrb[134].mxu0 %v3375_v0  ;;  %4110 = vmatmul.mubr.f32.gmra.mrb[134].mxu1 %v3375_v0  ;;  %v3379_v38 = vmax.f32 %v10132_v15, 0.0 }
 0x495   : > { %v3380_v18 = vmax.f32 %v10133_v2, 0.0  ;;  %v2976_v21 = vpop.f32.mrb[106].mxu0  ;;  %9281 = vmatpush1.bf16.msra.mxu0 %v9280_v37  ;;  %9409 = vmatpush1.bf16.msra.mxu1 %v9408_v36  ;;  %v9418_v37 = vpack.c.bf16 %v3610_v14, %v3606_v39  ;;  %v3605_v36 = vld [vmem:[#allocation5 + $0x590] sm:$0xff]  ;;  %v3619_v14 = vld [vmem:[#allocation5 + $0x600] sm:$0xff] }
 0x496   : > { %v10134_v45 = vadd.f32 %v2976_v21, %v12021_v27  ;;  %v12058_v43 = vpop.f32.mrb[106].mxu1  ;;  %v2978_v62 = vpop.f32.mrb[107].mxu0  ;;  %9283 = vmatprep.subr.bf16.mxu0 %v9282_v16  ;;  %9411 = vmatprep.subr.bf16.mxu1 %v9410_v49  ;;  %v3614_v16 = vld [vmem:[#allocation5 + $0x5d8] sm:$0xff]  ;;  %v9420_v2 = vpack.c.bf16 %v3609_v10, %v3605_v36  ;;  %v3632_v10 = vld [vmem:[#allocation5 + $0x668] sm:$0xff] }
 0x497   : > { %v10135_v8 = vadd.f32 %v2978_v62, %v12025_v50  ;;  %v12061_v51 = vpop.f32.mrb[107].mxu1  ;;  %3793 = vmatprep.mubr.f32.mxu0 %v3380_v18  ;;  %4115 = vmatprep.mubr.f32.mxu1 %v3380_v18  ;;  %v3618_v49 = vld [vmem:[#allocation5 + $0x5f8] sm:$0xff] }
 0x498   : > { %3794 = vmatmul.mubr.f32.gmra.mrb[136].mxu0 %v3379_v38  ;;  %4116 = vmatmul.mubr.f32.gmra.mrb[136].mxu1 %v3379_v38  ;;  %v3383_v32 = vmax.f32 %v10134_v45, 0.0  ;;  %v9422_v24 = vpack.c.bf16 %v3618_v49, %v3614_v16  ;;  %v3617_v38 = vld [vmem:[#allocation5 + $0x5f0] sm:$0xff]  ;;  %v3620_v45 = vld [vmem:[#allocation5 + $0x608] sm:$0xff] }
 0x499   : > { %v3384_v20 = vmax.f32 %v10135_v8, 0.0  ;;  %v2982_v41 = vpop.f32.mrb[108].mxu0  ;;  %9285 = vmatpush1.bf16.msra.mxu0 %v9284_v61  ;;  %9413 = vmatpush1.bf16.msra.mxu1 %v9412_v34  ;;  %v9294_v34 = vpack.c.bf16 %v3616_v63, %v3612_v19  ;;  %v9424_v39 = vpack.c.bf16 %v3617_v38, %v3613_v25  ;;  %v3630_v19 = vld [vmem:[#allocation5 + $0x658] sm:$0xff]  ;;  %v3636_v25 = vld [vmem:[#allocation5 + $0x688] sm:$0xff] }
 0x49a   : > { %v10136_v33 = vadd.f32 %v2982_v41, %v12021_v27  ;;  %v12064_v11 = vpop.f32.mrb[108].mxu1  ;;  %v2984_v57 = vpop.f32.mrb[109].mxu0  ;;  %9287 = vmatprep.subr.bf16.mxu0 %v9286_v4  ;;  %9415 = vmatprep.subr.bf16.mxu1 %v9414_v35  ;;  %v3624_v35 = vld [vmem:[#allocation5 + $0x628] sm:$0xff] }
 0x49b   : > { %v10137_v0 = vadd.f32 %v2984_v57, %v12025_v50  ;;  %v12067_v15 = vpop.f32.mrb[109].mxu1  ;;  %3799 = vmatprep.mubr.f32.mxu0 %v3384_v20  ;;  %4121 = vmatprep.mubr.f32.mxu1 %v3384_v20  ;;  %v3623_v20 = vld [vmem:[#allocation5 + $0x620] sm:$0xff]  ;;  %v9298_v7 = vpack.c.bf16 %v3624_v35, %v3620_v45  ;;  %v3625_v57 = vld [vmem:[#allocation5 + $0x630] sm:$0xff]  ;;  %v3638_v35 = vld [vmem:[#allocation5 + $0x698] sm:$0xff] }
 0x49c   : > { %3800 = vmatmul.mubr.f32.gmra.mrb[138].mxu0 %v3383_v32  ;;  %4122 = vmatmul.mubr.f32.gmra.mrb[138].mxu1 %v3383_v32  ;;  %v3387_v46 = vmax.f32 %v10136_v33, 0.0  ;;  %v9426_v32 = vpack.c.bf16 %v3626_v26, %v3622_v31  ;;  %v3621_v33 = vld [vmem:[#allocation5 + $0x610] sm:$0xff]  ;;  %v9300_v49 = vpack.c.bf16 %v3623_v20, %v3619_v14  ;;  %v3642_v31 = vld [vmem:[#allocation5 + $0x6b8] sm:$0xff]  ;;  %v3639_v14 = vld [vmem:[#allocation5 + $0x6a0] sm:$0xff] }
 0x49d   : > { %v3388_v53 = vmax.f32 %v10137_v0, 0.0  ;;  %v2988_v13 = vpop.f32.mrb[110].mxu0  ;;  %9289 = vmatpush1.bf16.msra.mxu0 %v9288_v40  ;;  %9417 = vmatpush1.bf16.msra.mxu1 %v9416_v5  ;;  %v3634_v0 = vld [vmem:[#allocation5 + $0x678] sm:$0xff] }
 0x49e   : > { %v10138_v18 = vadd.f32 %v2988_v13, %v12021_v27  ;;  %v12070_v21 = vpop.f32.mrb[110].mxu1  ;;  %v2990_v61 = vpop.f32.mrb[111].mxu0  ;;  %9291 = vmatprep.subr.bf16.mxu0 %v9290_v56  ;;  %9419 = vmatprep.subr.bf16.mxu1 %v9418_v37  ;;  %v3628_v56 = vld [vmem:[#allocation5 + $0x648] sm:$0xff]  ;;  %v3627_v13 = vld [vmem:[#allocation5 + $0x640] sm:$0xff] }
 0x49f   : > { %v10139_v62 = vadd.f32 %v2990_v61, %v12025_v50  ;;  %v12073_v4 = vpop.f32.mrb[111].mxu1  ;;  %3805 = vmatprep.mubr.f32.mxu0 %v3388_v53  ;;  %4127 = vmatprep.mubr.f32.mxu1 %v3388_v53  ;;  %v9428_v53 = vpack.c.bf16 %v3625_v57, %v3621_v33  ;;  %v9430_v61 = vpack.c.bf16 %v3634_v0, %v3630_v19  ;;  %v3637_v33 = vld [vmem:[#allocation5 + $0x690] sm:$0xff]  ;;  %v3648_v19 = vld [vmem:[#allocation5 + $0x6e8] sm:$0xff]  ;;  %v3646_v0 = vld [vmem:[#allocation5 + $0x6d8] sm:$0xff] }
 0x4a0   : > { %3806 = vmatmul.mubr.f32.gmra.mrb[140].mxu0 %v3387_v46  ;;  %4128 = vmatmul.mubr.f32.gmra.mrb[140].mxu1 %v3387_v46  ;;  %v3391_v41 = vmax.f32 %v10138_v18, 0.0  ;;  %v9302_v18 = vpack.c.bf16 %v3632_v10, %v3628_v56  ;;  %v3641_v57 = vld [vmem:[#allocation5 + $0x6b0] sm:$0xff]  ;;  %v3644_v56 = vld [vmem:[#allocation5 + $0x6c8] sm:$0xff] }
 0x4a1   : > { %v3392_v9 = vmax.f32 %v10139_v62, 0.0  ;;  %v2994_v8 = vpop.f32.mrb[112].mxu0  ;;  %9293 = vmatpush1.bf16.msra.mxu0 %v9292_v47  ;;  %9421 = vmatpush1.bf16.msra.mxu1 %v9420_v2  ;;  %v3631_v47 = vld [vmem:[#allocation5 + $0x660] sm:$0xff]  ;;  %v3640_v62 = vld [vmem:[#allocation5 + $0x6a8] sm:$0xff] }
 0x4a2   : > { %v10140_v40 = vadd.f32 %v2994_v8, %v12021_v27  ;;  %v12076_v5 = vpop.f32.mrb[112].mxu1  ;;  %v2996_v30 = vpop.f32.mrb[113].mxu0  ;;  %9295 = vmatprep.subr.bf16.mxu0 %v9294_v34  ;;  %9423 = vmatprep.subr.bf16.mxu1 %v9422_v24  ;;  %v3629_v34 = vld [vmem:[#allocation5 + $0x650] sm:$0xff]  ;;  %v9304_v8 = vpack.c.bf16 %v3631_v47, %v3627_v13  ;;  %v9436_v13 = vpack.c.bf16 %v3641_v57, %v3637_v33  ;;  %v3643_v47 = vld [vmem:[#allocation5 + $0x6c0] sm:$0xff] }
 0x4a3   : > { %v10141_v37 = vadd.f32 %v2996_v30, %v12025_v50  ;;  %v12079_v36 = vpop.f32.mrb[113].mxu1  ;;  %3811 = vmatprep.mubr.f32.mxu0 %v3392_v9  ;;  %4133 = vmatprep.mubr.f32.mxu1 %v3392_v9  ;;  %v3633_v24 = vld [vmem:[#allocation5 + $0x670] sm:$0xff] }
 0x4a4   : > { %3812 = vmatmul.mubr.f32.gmra.mrb[142].mxu0 %v3391_v41  ;;  %4134 = vmatmul.mubr.f32.gmra.mrb[142].mxu1 %v3391_v41  ;;  %v3395_v2 = vmax.f32 %v10140_v40, 0.0 }
 0x4a5   : > { %v3396_v63 = vmax.f32 %v10141_v37, 0.0  ;;  %v3000_v16 = vpop.f32.mrb[114].mxu0  ;;  %9297 = vmatpush1.bf16.msra.mxu0 %v9296_v12  ;;  %9425 = vmatpush1.bf16.msra.mxu1 %v9424_v39  ;;  %v9432_v12 = vpack.c.bf16 %v3633_v24, %v3629_v34  ;;  %v3635_v39 = vld [vmem:[#allocation5 + $0x680] sm:$0xff]  ;;  %v9310_v34 = vpack.c.bf16 %v3648_v19, %v3644_v56  ;;  %v3653_v19 = vld [vmem:[#allocation5 + $0x710] sm:$0xff] }
 0x4a6   : > { %v10142_v28 = vadd.f32 %v3000_v16, %v12021_v27  ;;  %v12082_v22 = vpop.f32.mrb[114].mxu1  ;;  %v3002_v46 = vpop.f32.mrb[115].mxu0  ;;  %9299 = vmatprep.subr.bf16.mxu0 %v9298_v7  ;;  %9427 = vmatprep.subr.bf16.mxu1 %v9426_v32  ;;  %v9306_v7 = vpack.c.bf16 %v3640_v62, %v3636_v25  ;;  %v9434_v32 = vpack.c.bf16 %v3642_v31, %v3638_v35  ;;  %v3645_v25 = vld [vmem:[#allocation5 + $0x6d0] sm:$0xff]  ;;  %v3652_v62 = vld [vmem:[#allocation5 + $0x708] sm:$0xff] }
 0x4a7   : > { %v10143_v38 = vadd.f32 %v3002_v46, %v12025_v50  ;;  %v12085_v45 = vpop.f32.mrb[115].mxu1  ;;  %3817 = vmatprep.mubr.f32.mxu0 %v3396_v63  ;;  %4139 = vmatprep.mubr.f32.mxu1 %v3396_v63  ;;  %v3650_v63 = vld [vmem:[#allocation5 + $0x6f8] sm:$0xff] }
 0x4a8   : > { %3818 = vmatmul.mubr.f32.gmra.mrb[144].mxu0 %v3395_v2  ;;  %4140 = vmatmul.mubr.f32.gmra.mrb[144].mxu1 %v3395_v2  ;;  %v3399_v20 = vmax.f32 %v10142_v28, 0.0  ;;  %v3647_v2 = vld [vmem:[#allocation5 + $0x6e0] sm:$0xff]  ;;  %v9438_v24 = vpack.c.bf16 %v3650_v63, %v3646_v0  ;;  %v3657_v0 = vld [vmem:[#allocation5 + $0x730] sm:$0xff]  ;;  %v3660_v63 = vld [vmem:[#allocation5 + $0x748] sm:$0xff] }
 0x4a9   : > { %v3400_v26 = vmax.f32 %v10143_v38, 0.0  ;;  %v3006_v9 = vpop.f32.mrb[116].mxu0  ;;  %9301 = vmatpush1.bf16.msra.mxu0 %v9300_v49  ;;  %9429 = vmatpush1.bf16.msra.mxu1 %v9428_v53  ;;  %v9308_v53 = vpack.c.bf16 %v3639_v14, %v3635_v39  ;;  %v3649_v38 = vld [vmem:[#allocation5 + $0x6f0] sm:$0xff]  ;;  %v9312_v14 = vpack.c.bf16 %v3647_v2, %v3643_v47  ;;  %v3666_v47 = vld [vmem:[#allocation5 + $0x778] sm:$0xff] }
 0x4aa   : > { %v10144_v41 = vadd.f32 %v3006_v9, %v12021_v27  ;;  %v12088_v40 = vpop.f32.mrb[116].mxu1  ;;  %v3008_v30 = vpop.f32.mrb[117].mxu0  ;;  %9303 = vmatprep.subr.bf16.mxu0 %v9302_v18  ;;  %9431 = vmatprep.subr.bf16.mxu1 %v9430_v61  ;;  %v3654_v9 = vld [vmem:[#allocation5 + $0x718] sm:$0xff] }
 0x4ab   : > { %v10145_v37 = vadd.f32 %v3008_v30, %v12025_v50  ;;  %v12091_v10 = vpop.f32.mrb[117].mxu1  ;;  %3823 = vmatprep.mubr.f32.mxu0 %v3400_v26  ;;  %4145 = vmatprep.mubr.f32.mxu1 %v3400_v26  ;;  %v3656_v26 = vld [vmem:[#allocation5 + $0x728] sm:$0xff]  ;;  %v3655_v30 = vld [vmem:[#allocation5 + $0x720] sm:$0xff] }
 0x4ac   : > { %3824 = vmatmul.mubr.f32.gmra.mrb[146].mxu0 %v3399_v20  ;;  %4146 = vmatmul.mubr.f32.gmra.mrb[146].mxu1 %v3399_v20  ;;  %v3403_v28 = vmax.f32 %v10144_v41, 0.0  ;;  %v9440_v20 = vpack.c.bf16 %v3649_v38, %v3645_v25  ;;  %v3651_v41 = vld [vmem:[#allocation5 + $0x700] sm:$0xff]  ;;  %v9314_v56 = vpack.c.bf16 %v3656_v26, %v3652_v62 }
 0x4ad   : > { %v3404_v16 = vmax.f32 %v10145_v37, 0.0  ;;  %v3012_v49 = vpop.f32.mrb[118].mxu0  ;;  %9305 = vmatpush1.bf16.msra.mxu0 %v9304_v8  ;;  %9433 = vmatpush1.bf16.msra.mxu1 %v9432_v12  ;;  %v3658_v8 = vld [vmem:[#allocation5 + $0x738] sm:$0xff] }
 0x4ae   : > { %v10146_v46 = vadd.f32 %v3012_v49, %v12021_v27  ;;  %v12094_v18 = vpop.f32.mrb[118].mxu1  ;;  %v3014_v61 = vpop.f32.mrb[119].mxu0  ;;  %9307 = vmatprep.subr.bf16.mxu0 %v9306_v7  ;;  %9435 = vmatprep.subr.bf16.mxu1 %v9434_v32  ;;  %v9442_v37 = vpack.c.bf16 %v3658_v8, %v3654_v9  ;;  %v3661_v8 = vld [vmem:[#allocation5 + $0x750] sm:$0xff] }
 0x4af   : > { %v10147_v35 = vadd.f32 %v3014_v61, %v12025_v50  ;;  %v12097_v31 = vpop.f32.mrb[119].mxu1  ;;  %3829 = vmatprep.mubr.f32.mxu0 %v3404_v16  ;;  %4151 = vmatprep.mubr.f32.mxu1 %v3404_v16  ;;  %v9444_v61 = vpack.c.bf16 %v3657_v0, %v3653_v19  ;;  %v3667_v19 = vld [vmem:[#allocation5 + $0x780] sm:$0xff] }
 0x4b0   : > { %3830 = vmatmul.mubr.f32.gmra.mrb[148].mxu0 %v3403_v28  ;;  %4152 = vmatmul.mubr.f32.gmra.mrb[148].mxu1 %v3403_v28  ;;  %v3407_v7 = vmax.f32 %v10146_v46, 0.0  ;;  %v9316_v46 = vpack.c.bf16 %v3655_v30, %v3651_v41  ;;  %v3672_v41 = vld [vmem:[#allocation5 + $0x7a8] sm:$0xff]  ;;  %v3670_v30 = vld [vmem:[#allocation5 + $0x798] sm:$0xff]  ;;  %v3671_v0 = vld [vmem:[#allocation5 + $0x7a0] sm:$0xff] }
 0x4b1   : > { %v3408_v12 = vmax.f32 %v10147_v35, 0.0  ;;  %v3018_v39 = vpop.f32.mrb[120].mxu0  ;;  %9309 = vmatpush1.bf16.msra.mxu0 %v9308_v53  ;;  %9437 = vmatpush1.bf16.msra.mxu1 %v9436_v13  ;;  %v3664_v53 = vld [vmem:[#allocation5 + $0x768] sm:$0xff]  ;;  %v3662_v13 = vld [vmem:[#allocation5 + $0x758] sm:$0xff] }
 0x4b2   : > { %v10148_v32 = vadd.f32 %v3018_v39, %v12021_v27  ;;  %v12100_v33 = vpop.f32.mrb[120].mxu1  ;;  %v3020_v57 = vpop.f32.mrb[121].mxu0  ;;  %9311 = vmatprep.subr.bf16.mxu0 %v9310_v34  ;;  %9439 = vmatprep.subr.bf16.mxu1 %v9438_v24  ;;  %v3659_v34 = vld [vmem:[#allocation5 + $0x740] sm:$0xff]  ;;  %v9318_v26 = vpack.c.bf16 %v3664_v53, %v3660_v63  ;;  %v9446_v9 = vpack.c.bf16 %v3666_v47, %v3662_v13  ;;  %v3668_v39 = vld [vmem:[#allocation5 + $0x788] sm:$0xff] }
 0x4b3   : > { %v10149_v16 = vadd.f32 %v3020_v57, %v12025_v50  ;;  %v12103_v49 = vpop.f32.mrb[121].mxu1  ;;  %3835 = vmatprep.mubr.f32.mxu0 %v3408_v12  ;;  %4157 = vmatprep.mubr.f32.mxu1 %v3408_v12  ;;  %v3663_v24 = vld [vmem:[#allocation5 + $0x760] sm:$0xff]  ;;  %v3665_v12 = vld [vmem:[#allocation5 + $0x770] sm:$0xff]  ;;  %v9322_v47 = vpack.c.bf16 %v3672_v41, %v3668_v39  ;;  %v9324_v39 = vpack.c.bf16 %v3671_v0, %v3667_v19 }
 0x4b4   : > { %3836 = vmatmul.mubr.f32.gmra.mrb[150].mxu0 %v3407_v7  ;;  %4158 = vmatmul.mubr.f32.gmra.mrb[150].mxu1 %v3407_v7  ;;  %v3411_v25 = vmax.f32 %v10148_v32, 0.0  ;;  %v3674_v7 = vld [vmem:[#allocation5 + $0x7b8] sm:$0xff]  ;;  %v3677_v19 = vld [vmem:[#allocation5 + $0x7d0] sm:$0xff] }
 0x4b5   : > { %v3412_v2 = vmax.f32 %v10149_v16, 0.0  ;;  %v3024_v28 = vpop.f32.mrb[122].mxu0  ;;  %9313 = vmatpush1.bf16.msra.mxu0 %v9312_v14  ;;  %9441 = vmatpush1.bf16.msra.mxu1 %v9440_v20 }
 0x4b6   : > { %v10150_v38 = vadd.f32 %v3024_v28, %v12021_v27  ;;  %v12106_v62 = vpop.f32.mrb[122].mxu1  ;;  %v3026_v35 = vpop.f32.mrb[123].mxu0  ;;  %9315 = vmatprep.subr.bf16.mxu0 %v9314_v56  ;;  %9443 = vmatprep.subr.bf16.mxu1 %v9442_v37  ;;  %v9320_v56 = vpack.c.bf16 %v3663_v24, %v3659_v34  ;;  %v9448_v37 = vpack.c.bf16 %v3665_v12, %v3661_v8  ;;  %v3669_v28 = vld [vmem:[#allocation5 + $0x790] sm:$0xff]  ;;  %v3680_v24 = vld [vmem:[#allocation5 + $0x7e8] sm:$0xff]  ;;  %v3682_v8 = vld [vmem:[#allocation5 + $0x7f8] sm:$0xff] }
 0x4b7   : > { %v10151_v14 = vadd.f32 %v3026_v35, %v12025_v50  ;;  %v12109_v20 = vpop.f32.mrb[123].mxu1  ;;  %3841 = vmatprep.mubr.f32.mxu0 %v3412_v2  ;;  %4163 = vmatprep.mubr.f32.mxu1 %v3412_v2  ;;  %v9450_v2 = vpack.c.bf16 %v3674_v7, %v3670_v30  ;;  %v3676_v35 = vld [vmem:[#allocation5 + $0x7c8] sm:$0xff] }
 0x4b8   : > { %3842 = vmatmul.mubr.f32.gmra.mrb[152].mxu0 %v3411_v25  ;;  %4164 = vmatmul.mubr.f32.gmra.mrb[152].mxu1 %v3411_v25  ;;  %v3415_v63 = vmax.f32 %v10150_v38, 0.0  ;;  %v3673_v25 = vld [vmem:[#allocation5 + $0x7b0] sm:$0xff]  ;;  %v3678_v38 = vld [vmem:[#allocation5 + $0x7d8] sm:$0xff] }
 0x4b9   : > { %v3416_v32 = vmax.f32 %v10151_v14, 0.0  ;;  %v3030_v57 = vpop.f32.mrb[124].mxu0  ;;  %9317 = vmatpush1.bf16.msra.mxu0 %v9316_v46  ;;  %9445 = vmatpush1.bf16.msra.mxu1 %v9444_v61  ;;  %v13072_v14 = vld [vmem:[#allocation36_spill] sm:$0xff]  ;;  %v9452_v41 = vpack.c.bf16 %v3673_v25, %v3669_v28 }
 0x4ba   : > { %v10152_v16 = vadd.f32 %v3030_v57, %v12021_v27  ;;  %v12112_v53 = vpop.f32.mrb[124].mxu1  ;;  %v3032_v13 = vpop.f32.mrb[125].mxu0  ;;  %9319 = vmatprep.subr.bf16.mxu0 %v9318_v26  ;;  %9447 = vmatprep.subr.bf16.mxu1 %v9446_v9  ;;  %v12116_v46 = vrot.slane %v12017_v23, %v13072_v14  ;;  %v12123_v26 = vrot.slane %v12017_v23, %v11936_v58  ;;  %v3679_v14 = vld [vmem:[#allocation5 + $0x7e0] sm:$0xff] }
 0x4bb   : > { %v10153_v61 = vadd.f32 %v3032_v13, %v12025_v50  ;;  %v12119_v34 = vpop.f32.mrb[125].mxu1  ;;  %3847 = vmatprep.mubr.f32.mxu0 %v3416_v32  ;;  %4169 = vmatprep.mubr.f32.mxu1 %v3416_v32  ;;  %v9326_v13 = vpack.c.bf16 %v3680_v24, %v3676_v35 }
 0x4bc   : > { %3848 = vmatmul.mubr.f32.gmra.mrb[154].mxu0 %v3415_v63  ;;  %4170 = vmatmul.mubr.f32.gmra.mrb[154].mxu1 %v3415_v63  ;;  %v3419_v30 = vmax.f32 %v10152_v16, 0.0  ;;  %v9454_v63 = vpack.c.bf16 %v3682_v8, %v3678_v38  ;;  %v10157_v23 = vadd.f32 %v12031_v44, %v12116_v46  ;;  %v9328_v16 = vpack.c.bf16 %v3679_v14, %v3675_v1  ;;  %v13073_v14 = vld [vmem:[#allocation30_spill] sm:$0xff]  ;;  %v13075_v38 = vld [vmem:[#allocation32_spill] sm:$0xff] }
 0x4bd   : > { %v3420_v9 = vmax.f32 %v10153_v61, 0.0  ;;  %v3036_v12 = vpop.f32.mrb[126].mxu0  ;;  %9321 = vmatpush1.bf16.msra.mxu0 %v9320_v56  ;;  %9449 = vmatpush1.bf16.msra.mxu1 %v9448_v37  ;;  %v10159_v28 = vadd.f32 %v12037_v55, %v12116_v46  ;;  %v10158_v1 = vadd.f32 %v12034_v17, %v12123_v26  ;;  %v10161_v35 = vadd.f32 %v12043_v59, %v12116_v46  ;;  %v13074_v61 = vld [vmem:[#allocation31_spill] sm:$0xff] }
 0x4be   : > { %v10154_v7 = vadd.f32 %v3036_v12, %v12021_v27  ;;  %v12126_v57 = vpop.f32.mrb[126].mxu1  ;;  %v3038_v32 = vpop.f32.mrb[127].mxu0  ;;  %9323 = vmatprep.subr.bf16.mxu0 %v9322_v47  ;;  %9451 = vmatprep.subr.bf16.mxu1 %v9450_v2  ;;  %v3681_v27 = vld [vmem:[#allocation5 + $0x7f0] sm:$0xff]  ;;  %v10156_v47 = vadd.f32 %v12028_v3, %v12123_v26  ;;  %v10160_v24 = vadd.f32 %v12040_v52, %v12123_v26 }
 0x4bf   : > { %v10155_v56 = vadd.f32 %v3038_v32, %v12025_v50  ;;  %v12131_v37 = vpop.f32.mrb[127].mxu1  ;;  %3853 = vmatprep.mubr.f32.mxu0 %v3420_v9  ;;  %4175 = vmatprep.mubr.f32.mxu1 %v3420_v9  ;;  %v9456_v44 = vpack.c.bf16 %v3681_v27, %v3677_v19  ;;  %v3366_v50 = vmax.f32 %v10157_v23, 0.0  ;;  %v3370_v3 = vmax.f32 %v10159_v28, 0.0  ;;  %v13076_v9 = vld [vmem:[#allocation33_spill] sm:$0xff] }
 0x4c0   : > { %3854 = vmatmul.mubr.f32.gmra.mrb[156].mxu0 %v3419_v30  ;;  %4176 = vmatmul.mubr.f32.gmra.mrb[156].mxu1 %v3419_v30  ;;  %v3423_v2 = vmax.f32 %v10154_v7, 0.0  ;;  %v3365_v25 = vmax.f32 %v10156_v47, 0.0  ;;  %v3369_v55 = vmax.f32 %v10158_v1, 0.0  ;;  %v3374_v17 = vmax.f32 %v10161_v35, 0.0 }
 0x4c1   : > { %v3424_v0 = vmax.f32 %v10155_v56, 0.0  ;;  %9325 = vmatpush1.bf16.msra.mxu0 %v9324_v39  ;;  %9453 = vmatpush1.bf16.msra.mxu1 %v9452_v41  ;;  %v10163_v8 = vadd.f32 %v12049_v42, %v12116_v46  ;;  %v3373_v59 = vmax.f32 %v10160_v24, 0.0  ;;  %v10162_v12 = vadd.f32 %v12046_v48, %v12123_v26  ;;  %v4365_v24 = vpop.trf.xlu1 }
 0x4c2   : > { %9327 = vmatprep.subr.bf16.mxu0 %v9326_v13  ;;  %9455 = vmatprep.subr.bf16.mxu1 %v9454_v63  ;;  %v10165_v52 = vadd.f32 %v12055_v54, %v12116_v46  ;;  %v10164_v42 = vadd.f32 %v12052_v60, %v12123_v26  ;;  %v10167_v7 = vadd.f32 %v12061_v51, %v12116_v46 }
 0x4c3   : > { %3859 = vmatprep.mubr.f32.mxu0 %v3424_v0  ;;  %4181 = vmatprep.mubr.f32.mxu1 %v3424_v0  ;;  %v3378_v39 = vmax.f32 %v10163_v8, 0.0  ;;  %v3377_v41 = vmax.f32 %v10162_v12, 0.0  ;;  %v10166_v32 = vadd.f32 %v12058_v43, %v12123_v26  ;;  %v10169_v13 = vadd.f32 %v12067_v15, %v12116_v46 }
 0x4c4   : > { %3860 = vmatmul.mubr.f32.gmra.mrb[158].mxu0 %v3423_v2  ;;  %4182 = vmatmul.mubr.f32.gmra.mrb[158].mxu1 %v3423_v2  ;;  %v3382_v30 = vmax.f32 %v10165_v52, 0.0  ;;  %v3381_v48 = vmax.f32 %v10164_v42, 0.0  ;;  %v3386_v54 = vmax.f32 %v10167_v7, 0.0  ;;  %v10168_v63 = vadd.f32 %v12064_v11, %v12123_v26  ;;  %v4572_v52 = vld [vmem:[%s13078_s11 + $0x8] sm:$0xff] }
 0x4c5   : > { %9329 = vmatpush1.bf16.msra.mxu0 %v9328_v16  ;;  %3930 = vmatprep.mubr.f32.mxu0 %v3366_v50  ;;  %v3385_v60 = vmax.f32 %v10166_v32, 0.0  ;;  %v3390_v51 = vmax.f32 %v10169_v13, 0.0  ;;  %v10171_v23 = vadd.f32 %v12073_v4, %v12116_v46  ;;  %v10170_v56 = vadd.f32 %v12070_v21, %v12123_v26  ;;  %v4576_v42 = vld [vmem:[%s13078_s11 + $0x28] sm:$0xff] }
 0x4c6   : > { %9457 = vmatpush1.bf16.msra.mxu1 %v9456_v44  ;;  %4252 = vmatprep.mubr.f32.mxu1 %v3366_v50  ;;  %v3389_v43 = vmax.f32 %v10168_v63, 0.0  ;;  %v10173_v19 = vadd.f32 %v12079_v36, %v12116_v46  ;;  %v10172_v27 = vadd.f32 %v12076_v5, %v12123_v26  ;;  %v10175_v0 = vadd.f32 %v12085_v45, %v12116_v46 }
 0x4c7   : > { %9459 = vmatprep.subr.bf16.mxu0 %v13073_v14  ;;  %9463 = vmatprep.subr.bf16.mxu1 %v13074_v61  ;;  %v3394_v15 = vmax.f32 %v10171_v23, 0.0  ;;  %v3393_v11 = vmax.f32 %v10170_v56, 0.0  ;;  %v10174_v16 = vadd.f32 %v12082_v22, %v12123_v26  ;;  %v10177_v47 = vadd.f32 %v12091_v10, %v12116_v46 }
 0x4c8   : > { %3931 = vmatmul.mubr.f32.vlgmr.msra.gmra.mrb[128].mxu0 %v3365_v25  ;;  %v3398_v4 = vmax.f32 %v10173_v19, 0.0  ;;  %v3397_v21 = vmax.f32 %v10172_v27, 0.0  ;;  %v3402_v36 = vmax.f32 %v10175_v0, 0.0  ;;  %v10176_v2 = vadd.f32 %v12088_v40, %v12123_v26 }
 0x4c9   : > { %4253 = vmatmul.mubr.f32.vlgmr.msra.gmra.mrb[128].mxu1 %v3365_v25  ;;  %3936 = vmatprep.mubr.f32.mxu0 %v3370_v3  ;;  %v3401_v5 = vmax.f32 %v10174_v16, 0.0  ;;  %v3406_v45 = vmax.f32 %v10177_v47, 0.0  ;;  %v10179_v44 = vadd.f32 %v12097_v31, %v12116_v46  ;;  %v10178_v50 = vadd.f32 %v12094_v18, %v12123_v26  ;;  %v4579_v47 = vld [vmem:[%s13078_s11 + $0x40] sm:$0xff] }
 0x4ca   : > { %4258 = vmatprep.mubr.f32.mxu1 %v3370_v3  ;;  %9461 = vmatpush1.bf16.msra.mxu0 %v13075_v38  ;;  %v3405_v22 = vmax.f32 %v10176_v2, 0.0  ;;  %v10181_v28 = vadd.f32 %v12103_v49, %v12116_v46  ;;  %v10180_v25 = vadd.f32 %v12100_v33, %v12123_v26  ;;  %v10183_v1 = vadd.f32 %v12109_v20, %v12116_v46 }
 0x4cb   : > { %9465 = vmatpush1.bf16.msra.mxu1 %v13076_v9  ;;  %v3410_v10 = vmax.f32 %v10179_v44, 0.0  ;;  %v3409_v40 = vmax.f32 %v10178_v50, 0.0  ;;  %v10182_v3 = vadd.f32 %v12106_v62, %v12123_v26  ;;  %v10185_v35 = vadd.f32 %v12119_v34, %v12116_v46  ;;  %v4571_v9 = vld [vmem:[%s13078_s11] sm:$0xff]  ;;  %v4580_v44 = vld [vmem:[%s13078_s11 + $0x48] sm:$0xff] }
 0x4cc   : > { %3937 = vmatmul.mubr.f32.gmra.mrb[130].mxu0 %v3369_v55  ;;  %v3414_v31 = vmax.f32 %v10181_v28, 0.0  ;;  %v3413_v18 = vmax.f32 %v10180_v25, 0.0  ;;  %v3418_v49 = vmax.f32 %v10183_v1, 0.0  ;;  %v10184_v14 = vadd.f32 %v12112_v53, %v12123_v26  ;;  %v4584_v50 = vld [vmem:[%s13078_s11 + $0x68] sm:$0xff] }
 0x4cd   : > { %4259 = vmatmul.mubr.f32.gmra.mrb[130].mxu1 %v3369_v55  ;;  %3942 = vmatprep.mubr.f32.mxu0 %v3374_v17  ;;  %v3417_v33 = vmax.f32 %v10182_v3, 0.0  ;;  %v3422_v20 = vmax.f32 %v10185_v35, 0.0  ;;  %v10187_v61 = vadd.f32 %v12131_v37, %v12116_v46  ;;  %v10186_v55 = vadd.f32 %v12126_v57, %v12123_v26  ;;  %v4366_v46 = vpop.trf.xlu1  ;;  %v5012_v3 = vld [vmem:[#allocation7 + $0x8] sm:$0xff] }
 0x4ce   : > { %4264 = vmatprep.mubr.f32.mxu1 %v3374_v17  ;;  %v3421_v62 = vmax.f32 %v10184_v14, 0.0  ;;  %v13077_v53 = vmov 0.0  }
 0x4cf   : > { %v3426_v34 = vmax.f32 %v10187_v61, 0.0  ;;  %v3425_v38 = vmax.f32 %v10186_v55, 0.0  ;;  %v5018_v55 = vld [vmem:[#allocation7 + $0x38] sm:$0xff] }
 0x4d0   : > { %3943 = vmatmul.mubr.f32.gmra.mrb[132].mxu0 %v3373_v59 }
 0x4d1   : > { %4265 = vmatmul.mubr.f32.gmra.mrb[132].mxu1 %v3373_v59  ;;  %3948 = vmatprep.mubr.f32.mxu0 %v3378_v39  ;;  %v4367_v26 = vpop.trf.xlu1  ;;  %v4573_v59 = vld [vmem:[%s13078_s11 + $0x10] sm:$0xff] }
 0x4d2   : > { %4270 = vmatprep.mubr.f32.mxu1 %v3378_v39  ;;  %v4575_v39 = vld [vmem:[%s13078_s11 + $0x20] sm:$0xff] }
 0x4d4   : > { %3949 = vmatmul.mubr.f32.gmra.mrb[134].mxu0 %v3377_v41 }
 0x4d5   : > { %4271 = vmatmul.mubr.f32.gmra.mrb[134].mxu1 %v3377_v41  ;;  %3954 = vmatprep.mubr.f32.mxu0 %v3382_v30  ;;  %v4368_v57 = vpop.trf.xlu1  ;;  %v4577_v41 = vld [vmem:[%s13078_s11 + $0x30] sm:$0xff] }
 0x4d6   : > { %4276 = vmatprep.mubr.f32.mxu1 %v3382_v30  ;;  %v4574_v30 = vld [vmem:[%s13078_s11 + $0x18] sm:$0xff] }
 0x4d8   : > { %3955 = vmatmul.mubr.f32.gmra.mrb[136].mxu0 %v3381_v48 }
 0x4d9   : > { %4277 = vmatmul.mubr.f32.gmra.mrb[136].mxu1 %v3381_v48  ;;  %3960 = vmatprep.mubr.f32.mxu0 %v3386_v54  ;;  %v4578_v48 = vld [vmem:[%s13078_s11 + $0x38] sm:$0xff] }
 0x4da   : > { %4282 = vmatprep.mubr.f32.mxu1 %v3386_v54 }
 0x4dc   : > { %3961 = vmatmul.mubr.f32.gmra.mrb[138].mxu0 %v3385_v60 }
 0x4dd   : > { %4283 = vmatmul.mubr.f32.gmra.mrb[138].mxu1 %v3385_v60  ;;  %3966 = vmatprep.mubr.f32.mxu0 %v3390_v51 }
 0x4de   : > { %4288 = vmatprep.mubr.f32.mxu1 %v3390_v51 }
 0x4e0   : > { %3967 = vmatmul.mubr.f32.gmra.mrb[140].mxu0 %v3389_v43 }
 0x4e1   : > { %4289 = vmatmul.mubr.f32.gmra.mrb[140].mxu1 %v3389_v43  ;;  %3972 = vmatprep.mubr.f32.mxu0 %v3394_v15 }
 0x4e2   : > { %4294 = vmatprep.mubr.f32.mxu1 %v3394_v15 }
 0x4e4   : > { %3973 = vmatmul.mubr.f32.gmra.mrb[142].mxu0 %v3393_v11 }
 0x4e5   : > { %4295 = vmatmul.mubr.f32.gmra.mrb[142].mxu1 %v3393_v11  ;;  %3978 = vmatprep.mubr.f32.mxu0 %v3398_v4 }
 0x4e6   : > { %4300 = vmatprep.mubr.f32.mxu1 %v3398_v4 }
 0x4e8   : > { %3979 = vmatmul.mubr.f32.gmra.mrb[144].mxu0 %v3397_v21 }
 0x4e9   : > { %4301 = vmatmul.mubr.f32.gmra.mrb[144].mxu1 %v3397_v21  ;;  %3984 = vmatprep.mubr.f32.mxu0 %v3402_v36 }
 0x4ea   : > { %4306 = vmatprep.mubr.f32.mxu1 %v3402_v36 }
 0x4ec   : > { %3985 = vmatmul.mubr.f32.gmra.mrb[146].mxu0 %v3401_v5 }
 0x4ed   : > { %4307 = vmatmul.mubr.f32.gmra.mrb[146].mxu1 %v3401_v5  ;;  %3990 = vmatprep.mubr.f32.mxu0 %v3406_v45  ;;  %v4581_v5 = vld [vmem:[%s13078_s11 + $0x50] sm:$0xff] }
 0x4ee   : > { %4312 = vmatprep.mubr.f32.mxu1 %v3406_v45  ;;  %v4583_v45 = vld [vmem:[%s13078_s11 + $0x60] sm:$0xff] }
 0x4f0   : > { %3991 = vmatmul.mubr.f32.gmra.mrb[148].mxu0 %v3405_v22 }
 0x4f1   : > { %4313 = vmatmul.mubr.f32.gmra.mrb[148].mxu1 %v3405_v22  ;;  %3996 = vmatprep.mubr.f32.mxu0 %v3410_v10  ;;  %v4585_v22 = vld [vmem:[%s13078_s11 + $0x70] sm:$0xff] }
 0x4f2   : > { %4318 = vmatprep.mubr.f32.mxu1 %v3410_v10  ;;  %v4582_v10 = vld [vmem:[%s13078_s11 + $0x58] sm:$0xff] }
 0x4f4   : > { %3997 = vmatmul.mubr.f32.gmra.mrb[150].mxu0 %v3409_v40 }
 0x4f5   : > { %4319 = vmatmul.mubr.f32.gmra.mrb[150].mxu1 %v3409_v40  ;;  %4002 = vmatprep.mubr.f32.mxu0 %v3414_v31  ;;  %v4586_v40 = vld [vmem:[%s13078_s11 + $0x78] sm:$0xff] }
 0x4f6   : > { %4324 = vmatprep.mubr.f32.mxu1 %v3414_v31 }
 0x4f8   : > { %4003 = vmatmul.mubr.f32.gmra.mrb[152].mxu0 %v3413_v18 }
 0x4f9   : > { %4325 = vmatmul.mubr.f32.gmra.mrb[152].mxu1 %v3413_v18  ;;  %4008 = vmatprep.mubr.f32.mxu0 %v3418_v49 }
 0x4fa   : > { %4330 = vmatprep.mubr.f32.mxu1 %v3418_v49  ;;  %v5016_v49 = vld [vmem:[#allocation7 + $0x28] sm:$0xff] }
 0x4fc   : > { %4009 = vmatmul.mubr.f32.gmra.mrb[154].mxu0 %v3417_v33 }
 0x4fd   : > { %4331 = vmatmul.mubr.f32.gmra.mrb[154].mxu1 %v3417_v33  ;;  %4014 = vmatprep.mubr.f32.mxu0 %v3422_v20 }
 0x4fe   : > { %4336 = vmatprep.mubr.f32.mxu1 %v3422_v20 }
 0x500   : > { %4015 = vmatmul.mubr.f32.gmra.mrb[156].mxu0 %v3421_v62 }
 0x501   : > { %4337 = vmatmul.mubr.f32.gmra.mrb[156].mxu1 %v3421_v62  ;;  %4020 = vmatprep.mubr.f32.mxu0 %v3426_v34  ;;  %v5014_v62 = vld [vmem:[#allocation7 + $0x18] sm:$0xff] }
 0x502   : > { %4342 = vmatprep.mubr.f32.mxu1 %v3426_v34 }
 0x504   : > { %4021 = vmatmul.mubr.f32.gmra.mrb[158].mxu0 %v3425_v38 }
 0x505   : > { %4343 = vmatmul.mubr.f32.gmra.mrb[158].mxu1 %v3425_v38  ;;  %4457 = vmatprep.mubr.f32.mxu0 %v13077_v53 }
 0x506   : > { %4546 = vmatprep.mubr.f32.mxu1 %v13077_v53 }
 0x508   : > { %8510 = vmatmul.mubr.msk.f32.vlgmr.msra.gmra.mrb[160].mxu0 %vm1227_vm0, %v4365_v24 }
 0x509   : > { %8514 = vmatmul.mubr.msk.f32.vlgmr.msra.gmra.mrb[160].mxu1 %vm1227_vm0, %v4365_v24  ;;  %4463 = vmatprep.mubr.f32.mxu0 %v13077_v53 }
 0x50a   : > { %4552 = vmatprep.mubr.f32.mxu1 %v13077_v53 }
 0x50c   : > { %8511 = vmatmul.mubr.msk.f32.gmra.mrb[162].mxu0 %vm1227_vm0, %v4366_v46 }
 0x50d   : > { %8515 = vmatmul.mubr.msk.f32.gmra.mrb[162].mxu1 %vm1227_vm0, %v4366_v46  ;;  %4469 = vmatprep.mubr.f32.mxu0 %v13077_v53 }
 0x50e   : > { %4558 = vmatprep.mubr.f32.mxu1 %v13077_v53 }
 0x510   : > { %8512 = vmatmul.mubr.msk.f32.gmra.mrb[164].mxu0 %vm1227_vm0, %v4367_v26 }
 0x511   : > { %8516 = vmatmul.mubr.msk.f32.gmra.mrb[164].mxu1 %vm1227_vm0, %v4367_v26  ;;  %4475 = vmatprep.mubr.f32.mxu0 %v13077_v53 }
 0x512   : > { %4564 = vmatprep.mubr.f32.mxu1 %v13077_v53 }
 0x514   : > { %8513 = vmatmul.mubr.msk.f32.gmra.mrb[166].mxu0 %vm1227_vm0, %v4368_v57 }
 0x515   : > { %8517 = vmatmul.mubr.msk.f32.gmra.mrb[166].mxu1 %vm1227_vm0, %v4368_v57  ;;  %4689 = vmatprep.mubr.f32.mxu0 %v13077_v53  ;;  %v9482_v57 = vpack.c.bf16 %v5016_v49, %v5012_v3  ;;  %v5044_v3 = vld [vmem:[#allocation7 + $0x108] sm:$0xff] }
 0x516   : > { %4850 = vmatprep.mubr.f32.mxu1 %v13077_v53  ;;  %v5048_v49 = vld [vmem:[#allocation7 + $0x128] sm:$0xff] }
 0x5db   : > { %v4459_v37 = vpop.f32.mrb[160].mxu0 }
 0x5dc   : > { %v4548_v17 = vpop.f32.mrb[160].mxu1  ;;  %v4461_v8 = vpop.f32.mrb[161].mxu0  ;;  %v4587_v32 = vmul.f32 %v4571_v9, %v4459_v37  ;;  %v5015_v9 = vld [vmem:[#allocation7 + $0x20] sm:$0xff] }
 0x5dd   : > { %v4550_v12 = vpop.f32.mrb[161].mxu1  ;;  %v4589_v63 = vmul.f32 %v4573_v59, %v4548_v17  ;;  %v4588_v51 = vmul.f32 %v4572_v52, %v4461_v8  ;;  %v9610_v17 = vpack.c.bf16 %v5018_v55, %v5014_v62  ;;  %v5011_v8 = vld [vmem:[#allocation7] sm:$0xff]  ;;  %v5013_v59 = vld [vmem:[#allocation7 + $0x10] sm:$0xff]  ;;  %v5024_v52 = vld [vmem:[#allocation7 + $0x68] sm:$0xff] }
 0x5de   : > { %v4590_v15 = vmul.f32 %v4574_v30, %v4550_v12  ;;  %v5017_v12 = vld [vmem:[#allocation7 + $0x30] sm:$0xff]  ;;  %v9484_v30 = vpack.c.bf16 %v5015_v9, %v5011_v8  ;;  %v5043_v62 = vld [vmem:[#allocation7 + $0x100] sm:$0xff] }
 0x5df   : > { %v4465_v7 = vpop.f32.mrb[162].mxu0  ;;  %v5047_v55 = vld [vmem:[#allocation7 + $0x120] sm:$0xff] }
 0x5e0   : > { %v4591_v54 = vmul.f32 %v4575_v39, %v4465_v7  ;;  %v4554_v13 = vpop.f32.mrb[162].mxu1  ;;  %v4467_v60 = vpop.f32.mrb[163].mxu0  ;;  %v5020_v39 = vld [vmem:[#allocation7 + $0x48] sm:$0xff]  ;;  %v9612_v7 = vpack.c.bf16 %v5017_v12, %v5013_v59  ;;  %v9500_v8 = vpack.c.bf16 %v5047_v55, %v5043_v62  ;;  %v5051_v12 = vld [vmem:[#allocation7 + $0x140] sm:$0xff]  ;;  %v5086_v62 = vld [vmem:[#allocation7 + $0x258] sm:$0xff] }
 0x5e1   : > { %v4593_v23 = vmul.f32 %v4577_v41, %v4554_v13  ;;  %v4592_v43 = vmul.f32 %v4576_v42, %v4467_v60  ;;  %v4556_v56 = vpop.f32.mrb[163].mxu1  ;;  %v5022_v41 = vld [vmem:[#allocation7 + $0x58] sm:$0xff]  ;;  %v5021_v13 = vld [vmem:[#allocation7 + $0x50] sm:$0xff] }
 0x5e2   : > { %v9468_v19 = vpack.c.bf16 %v4591_v54, %v4587_v32  ;;  %v4594_v11 = vmul.f32 %v4578_v48, %v4556_v56  ;;  %v5026_v42 = vld [vmem:[#allocation7 + $0x78] sm:$0xff]  ;;  %v9486_v48 = vpack.c.bf16 %v5024_v52, %v5020_v39  ;;  %v5019_v32 = vld [vmem:[#allocation7 + $0x40] sm:$0xff]  ;;  %v5053_v52 = vld [vmem:[#allocation7 + $0x150] sm:$0xff] }
 0x5e3   : > { %v9476_v27 = vpack.c.bf16 %v4593_v23, %v4589_v63  ;;  %v9466_v4 = vpack.c.bf16 %v4592_v43, %v4588_v51  ;;  %v4471_v0 = vpop.f32.mrb[164].mxu0  ;;  %v5023_v54 = vld [vmem:[#allocation7 + $0x60] sm:$0xff]  ;;  %v9614_v63 = vpack.c.bf16 %v5026_v42, %v5022_v41  ;;  %v5025_v51 = vld [vmem:[#allocation7 + $0x70] sm:$0xff]  ;;  %v5028_v23 = vld [vmem:[#allocation7 + $0x88] sm:$0xff] }
 0x5e4   : > { %v9474_v21 = vpack.c.bf16 %v4594_v11, %v4590_v15  ;;  %v4560_v16 = vpop.f32.mrb[164].mxu1  ;;  %v4473_v36 = vpop.f32.mrb[165].mxu0  ;;  %v4595_v25 = vmul.f32 %v4579_v47, %v4471_v0  ;;  %v10898_v60 = vld [vmem:[%s11117_s5] sm:$0xff]  ;;  %v5032_v43 = vld [vmem:[#allocation7 + $0xa8] sm:$0xff]  ;;  %v9616_v11 = vpack.c.bf16 %v5025_v51, %v5021_v13  ;;  %v5033_v47 = vld [vmem:[#allocation7 + $0xb0] sm:$0xff] }
 0x5e5   : > { %v4562_v2 = vpop.f32.mrb[165].mxu1  ;;  %9467 = vmatprep.subr.bf16.mxu0 %v9466_v4  ;;  %v4597_v35 = vmul.f32 %v4581_v5, %v4560_v16  ;;  %v4596_v33 = vmul.f32 %v4580_v44, %v4473_v36  ;;  %v5030_v56 = vld [vmem:[#allocation7 + $0x98] sm:$0xff]  ;;  %v5027_v4 = vld [vmem:[#allocation7 + $0x80] sm:$0xff]  ;;  %v5036_v5 = vld [vmem:[#allocation7 + $0xc8] sm:$0xff] }
 0x5e6   : > { %9475 = vmatprep.subr.bf16.mxu1 %v9474_v21  ;;  %9469 = vmatpush1.bf16.msra.mxu0 %v9468_v19  ;;  %v4598_v34 = vmul.f32 %v4582_v10, %v4562_v2  ;;  %v5034_v15 = vld [vmem:[#allocation7 + $0xb8] sm:$0xff]  ;;  %v9488_v19 = vpack.c.bf16 %v5023_v54, %v5019_v32  ;;  %v5031_v0 = vld [vmem:[#allocation7 + $0xa0] sm:$0xff]  ;;  %v5029_v21 = vld [vmem:[#allocation7 + $0x90] sm:$0xff] }
 0x5e7   : > { %9477 = vmatpush1.bf16.msra.mxu1 %v9476_v27  ;;  %v4477_v28 = vpop.f32.mrb[166].mxu0  ;;  %v9490_v27 = vpack.c.bf16 %v5032_v43, %v5028_v23  ;;  %v10899_v16 = vld [vmem:[%s11117_s5 + $0x8] sm:$0xff]  ;;  %v9618_v36 = vpack.c.bf16 %v5034_v15, %v5030_v56  ;;  %v5042_v44 = vld [vmem:[#allocation7 + $0xf8] sm:$0xff]  ;;  %v5061_v43 = vld [vmem:[#allocation7 + $0x190] sm:$0xff] }
 0x5e8   : > { %v4599_v31 = vmul.f32 %v4583_v45, %v4477_v28  ;;  %v4566_v1 = vpop.f32.mrb[166].mxu1  ;;  %v4479_v18 = vpop.f32.mrb[167].mxu0  ;;  %v5040_v2 = vld [vmem:[#allocation7 + $0xe8] sm:$0xff]  ;;  %v5038_v45 = vld [vmem:[#allocation7 + $0xd8] sm:$0xff]  ;;  %v5035_v28 = vld [vmem:[#allocation7 + $0xc0] sm:$0xff] }
 0x5e9   : > { %v4601_v14 = vmul.f32 %v4585_v22, %v4566_v1  ;;  %v4600_v20 = vmul.f32 %v4584_v50, %v4479_v18  ;;  %v4568_v61 = vpop.f32.mrb[167].mxu1  ;;  %v9492_v22 = vpack.c.bf16 %v5031_v0, %v5027_v4  ;;  %v9620_v50 = vpack.c.bf16 %v5033_v47, %v5029_v21  ;;  %v5041_v18 = vld [vmem:[#allocation7 + $0xf0] sm:$0xff]  ;;  %v5055_v39 = vld [vmem:[#allocation7 + $0x160] sm:$0xff]  ;;  %v5062_v32 = vld [vmem:[#allocation7 + $0x198] sm:$0xff] }
 0x5ea   : > { %v9472_v24 = vpack.c.bf16 %v4599_v31, %v4595_v25  ;;  %v4602_v38 = vmul.f32 %v4586_v40, %v4568_v61  ;;  %v9494_v10 = vpack.c.bf16 %v5040_v2, %v5036_v5  ;;  %v5039_v40 = vld [vmem:[#allocation7 + $0xe0] sm:$0xff]  ;;  %v5037_v25 = vld [vmem:[#allocation7 + $0xd0] sm:$0xff]  ;;  %v9622_v1 = vpack.c.bf16 %v5042_v44, %v5038_v45  ;;  %v5066_v54 = vld [vmem:[#allocation7 + $0x1b8] sm:$0xff] }
 0x5eb   : > { %v9480_v46 = vpack.c.bf16 %v4601_v14, %v4597_v35  ;;  %v9470_v26 = vpack.c.bf16 %v4600_v20, %v4596_v33  ;;  %v10900_v31 = vld [vmem:[%s11117_s5 + $0x10] sm:$0xff]  ;;  %v5046_v35 = vld [vmem:[#allocation7 + $0x118] sm:$0xff]  ;;  %v9496_v14 = vpack.c.bf16 %v5039_v40, %v5035_v28  ;;  %v9624_v20 = vpack.c.bf16 %v5041_v18, %v5037_v25  ;;  %v5059_v51 = vld [vmem:[#allocation7 + $0x180] sm:$0xff] }
 0x5ec   : > { %v9478_v37 = vpack.c.bf16 %v4602_v38, %v4598_v34  ;;  %v5050_v33 = vld [vmem:[#allocation7 + $0x138] sm:$0xff]  ;;  %v9498_v61 = vpack.c.bf16 %v5048_v49, %v5044_v3  ;;  %v5045_v34 = vld [vmem:[#allocation7 + $0x110] sm:$0xff]  ;;  %v9504_v13 = vpack.c.bf16 %v5055_v39, %v5051_v12  ;;  %v5063_v23 = vld [vmem:[#allocation7 + $0x1a0] sm:$0xff]  ;;  %v9634_v15 = vpack.c.bf16 %v5066_v54, %v5062_v32 }
 0x5ed   : > { %9471 = vmatprep.subr.bf16.mxu0 %v9470_v26  ;;  %v9626_v38 = vpack.c.bf16 %v5050_v33, %v5046_v35  ;;  %v5052_v26 = vld [vmem:[#allocation7 + $0x148] sm:$0xff]  ;;  %v10902_v41 = vld [vmem:[%s11117_s5 + $0x20] sm:$0xff]  ;;  %v9508_v21 = vpack.c.bf16 %v5063_v23, %v5059_v51  ;;  %v5069_v2 = vld [vmem:[#allocation7 + $0x1d0] sm:$0xff] }
 0x5ee   : > { %9479 = vmatprep.subr.bf16.mxu1 %v9478_v37  ;;  %9473 = vmatpush1.bf16.msra.mxu0 %v9472_v24  ;;  %v10901_v24 = vld [vmem:[%s11117_s5 + $0x18] sm:$0xff]  ;;  %v10903_v56 = vld [vmem:[%s11117_s5 + $0x28] sm:$0xff]  ;;  %v10904_v45 = vld [vmem:[%s11117_s5 + $0x30] sm:$0xff] }
 0x5ef   : > { %9481 = vmatpush1.bf16.msra.mxu1 %v9480_v46  ;;  %9483 = vmatprep.subr.bf16.mxu0 %v9482_v57  ;;  %v5049_v46 = vld [vmem:[#allocation7 + $0x130] sm:$0xff]  ;;  %v5056_v57 = vld [vmem:[#allocation7 + $0x168] sm:$0xff]  ;;  %v5054_v37 = vld [vmem:[#allocation7 + $0x158] sm:$0xff] }
 0x5f0   : > { %9611 = vmatprep.subr.bf16.mxu1 %v9610_v17  ;;  %v5058_v17 = vld [vmem:[#allocation7 + $0x178] sm:$0xff]  ;;  %v9628_v9 = vpack.c.bf16 %v5049_v46, %v5045_v34  ;;  %v9502_v59 = vpack.c.bf16 %v5056_v57, %v5052_v26  ;;  %v5067_v47 = vld [vmem:[#allocation7 + $0x1c0] sm:$0xff]  ;;  %v5077_v49 = vld [vmem:[#allocation7 + $0x210] sm:$0xff] }
 0x5f1   : > { %8518 = vmatmul.mubr.msk.f32.vlgmr.msra.gmra.mrb[168].mxu0 %vm1614_vm1, %v10898_v60  ;;  %v9630_v42 = vpack.c.bf16 %v5058_v17, %v5054_v37  ;;  %v5070_v4 = vld [vmem:[#allocation7 + $0x1d8] sm:$0xff]  ;;  %v5071_v5 = vld [vmem:[#allocation7 + $0x1e0] sm:$0xff]  ;;  %v5085_v57 = vld [vmem:[#allocation7 + $0x250] sm:$0xff] }
 0x5f2   : > { %4695 = vmatprep.mubr.f32.mxu0 %v13077_v53  ;;  %8534 = vmatmul.mubr.msk.f32.vlgmr.msra.gmra.mrb[168].mxu1 %vm1614_vm1, %v10898_v60  ;;  %v5074_v0 = vld [vmem:[#allocation7 + $0x1f8] sm:$0xff]  ;;  %v9512_v25 = vpack.c.bf16 %v5071_v5, %v5067_v47  ;;  %v5075_v18 = vld [vmem:[#allocation7 + $0x200] sm:$0xff] }
 0x5f3   : > { %4856 = vmatprep.mubr.f32.mxu1 %v13077_v53  ;;  %9485 = vmatpush1.bf16.msra.mxu0 %v9484_v30  ;;  %v5057_v30 = vld [vmem:[#allocation7 + $0x170] sm:$0xff]  ;;  %v9638_v44 = vpack.c.bf16 %v5074_v0, %v5070_v4  ;;  %v5078_v28 = vld [vmem:[#allocation7 + $0x218] sm:$0xff]  ;;  %v5079_v3 = vld [vmem:[#allocation7 + $0x220] sm:$0xff] }
 0x5f4   : > { %9613 = vmatpush1.bf16.msra.mxu1 %v9612_v7  ;;  %9487 = vmatprep.subr.bf16.mxu0 %v9486_v48  ;;  %v5060_v7 = vld [vmem:[#allocation7 + $0x188] sm:$0xff]  ;;  %v9632_v60 = vpack.c.bf16 %v5057_v30, %v5053_v52  ;;  %v5082_v40 = vld [vmem:[#allocation7 + $0x238] sm:$0xff]  ;;  %v9516_v34 = vpack.c.bf16 %v5079_v3, %v5075_v18  ;;  %v5083_v46 = vld [vmem:[#allocation7 + $0x240] sm:$0xff] }
 0x5f5   : > { %8519 = vmatmul.mubr.msk.f32.gmra.mrb[170].mxu0 %vm1614_vm1, %v10899_v16  ;;  %9615 = vmatprep.subr.bf16.mxu1 %v9614_v63  ;;  %v5064_v48 = vld [vmem:[#allocation7 + $0x1a8] sm:$0xff]  ;;  %v10905_v35 = vld [vmem:[%s11117_s5 + $0x38] sm:$0xff]  ;;  %v9642_v33 = vpack.c.bf16 %v5082_v40, %v5078_v28  ;;  %v5087_v26 = vld [vmem:[#allocation7 + $0x260] sm:$0xff] }
 0x5f6   : > { %4701 = vmatprep.mubr.f32.mxu0 %v13077_v53  ;;  %8535 = vmatmul.mubr.msk.f32.gmra.mrb[170].mxu1 %vm1614_vm1, %v10899_v16  ;;  %v9506_v63 = vpack.c.bf16 %v5064_v48, %v5060_v7  ;;  %v5090_v55 = vld [vmem:[#allocation7 + $0x278] sm:$0xff]  ;;  %v9520_v52 = vpack.c.bf16 %v5087_v26, %v5083_v46  ;;  %v5091_v30 = vld [vmem:[#allocation7 + $0x280] sm:$0xff]  ;;  %v5093_v48 = vld [vmem:[#allocation7 + $0x290] sm:$0xff] }
 0x5f7   : > { %4862 = vmatprep.mubr.f32.mxu1 %v13077_v53  ;;  %9489 = vmatpush1.bf16.msra.mxu0 %v9488_v19  ;;  %v5065_v19 = vld [vmem:[#allocation7 + $0x1b0] sm:$0xff]  ;;  %v10906_v37 = vld [vmem:[%s11117_s5 + $0x40] sm:$0xff]  ;;  %v9646_v17 = vpack.c.bf16 %v5090_v55, %v5086_v62  ;;  %v10907_v32 = vld [vmem:[%s11117_s5 + $0x48] sm:$0xff] }
 0x5f8   : > { %9617 = vmatpush1.bf16.msra.mxu1 %v9616_v11  ;;  %9491 = vmatprep.subr.bf16.mxu0 %v9490_v27  ;;  %v5068_v11 = vld [vmem:[#allocation7 + $0x1c8] sm:$0xff]  ;;  %v9636_v16 = vpack.c.bf16 %v5065_v19, %v5061_v43  ;;  %v5094_v12 = vld [vmem:[#allocation7 + $0x298] sm:$0xff]  ;;  %v5095_v7 = vld [vmem:[#allocation7 + $0x2a0] sm:$0xff] }
 0x5f9   : > { %8520 = vmatmul.mubr.msk.f32.gmra.mrb[172].mxu0 %vm1614_vm1, %v10900_v31  ;;  %9619 = vmatprep.subr.bf16.mxu1 %v9618_v36  ;;  %v5072_v27 = vld [vmem:[#allocation7 + $0x1e8] sm:$0xff]  ;;  %v5098_v39 = vld [vmem:[#allocation7 + $0x2b8] sm:$0xff]  ;;  %v9524_v43 = vpack.c.bf16 %v5095_v7, %v5091_v30  ;;  %v5099_v19 = vld [vmem:[#allocation7 + $0x2c0] sm:$0xff] }
 0x5fa   : > { %4707 = vmatprep.mubr.f32.mxu0 %v13077_v53  ;;  %8536 = vmatmul.mubr.msk.f32.gmra.mrb[172].mxu1 %vm1614_vm1, %v10900_v31  ;;  %v9510_v36 = vpack.c.bf16 %v5072_v27, %v5068_v11  ;;  %v9650_v54 = vpack.c.bf16 %v5098_v39, %v5094_v12  ;;  %v5102_v51 = vld [vmem:[#allocation7 + $0x2d8] sm:$0xff]  ;;  %v5103_v11 = vld [vmem:[#allocation7 + $0x2e0] sm:$0xff]  ;;  %v5101_v27 = vld [vmem:[#allocation7 + $0x2d0] sm:$0xff] }
 0x5fb   : > { %4868 = vmatprep.mubr.f32.mxu1 %v13077_v53  ;;  %9493 = vmatpush1.bf16.msra.mxu0 %v9492_v22  ;;  %v5073_v22 = vld [vmem:[#allocation7 + $0x1f0] sm:$0xff]  ;;  %v5106_v23 = vld [vmem:[#allocation7 + $0x2f8] sm:$0xff]  ;;  %v5123_v39 = vld [vmem:[#allocation7 + $0x380] sm:$0xff] }
 0x5fc   : > { %9621 = vmatpush1.bf16.msra.mxu1 %v9620_v50  ;;  %9495 = vmatprep.subr.bf16.mxu0 %v9494_v10  ;;  %v5076_v50 = vld [vmem:[#allocation7 + $0x208] sm:$0xff]  ;;  %v9640_v31 = vpack.c.bf16 %v5073_v22, %v5069_v2  ;;  %v9654_v0 = vpack.c.bf16 %v5106_v23, %v5102_v51  ;;  %v5110_v47 = vld [vmem:[#allocation7 + $0x318] sm:$0xff]  ;;  %v9528_v2 = vpack.c.bf16 %v5103_v11, %v5099_v19  ;;  %v5107_v22 = vld [vmem:[#allocation7 + $0x300] sm:$0xff] }
 0x5fd   : > { %8521 = vmatmul.mubr.msk.f32.gmra.mrb[174].mxu0 %vm1614_vm1, %v10901_v24  ;;  %9623 = vmatprep.subr.bf16.mxu1 %v9622_v1  ;;  %v5080_v10 = vld [vmem:[#allocation7 + $0x228] sm:$0xff]  ;;  %v5114_v5 = vld [vmem:[#allocation7 + $0x338] sm:$0xff]  ;;  %v5129_v30 = vld [vmem:[#allocation7 + $0x3b0] sm:$0xff] }
 0x5fe   : > { %4713 = vmatprep.mubr.f32.mxu0 %v13077_v53  ;;  %8537 = vmatmul.mubr.msk.f32.gmra.mrb[174].mxu1 %vm1614_vm1, %v10901_v24  ;;  %v9514_v1 = vpack.c.bf16 %v5080_v10, %v5076_v50  ;;  %v10908_v4 = vld [vmem:[%s11117_s5 + $0x50] sm:$0xff]  ;;  %v5111_v50 = vld [vmem:[#allocation7 + $0x320] sm:$0xff]  ;;  %v10909_v28 = vld [vmem:[%s11117_s5 + $0x58] sm:$0xff]  ;;  %v9658_v40 = vpack.c.bf16 %v5114_v5, %v5110_v47 }
 0x5ff   : > { %4874 = vmatprep.mubr.f32.mxu1 %v13077_v53  ;;  %9497 = vmatpush1.bf16.msra.mxu0 %v9496_v14  ;;  %v5081_v14 = vld [vmem:[#allocation7 + $0x230] sm:$0xff]  ;;  %v5118_v18 = vld [vmem:[#allocation7 + $0x358] sm:$0xff]  ;;  %v5135_v51 = vld [vmem:[#allocation7 + $0x3e0] sm:$0xff] }
 0x600   : > { %9625 = vmatpush1.bf16.msra.mxu1 %v9624_v20  ;;  %9499 = vmatprep.subr.bf16.mxu0 %v9498_v61  ;;  %v5084_v20 = vld [vmem:[#allocation7 + $0x248] sm:$0xff]  ;;  %v9644_v24 = vpack.c.bf16 %v5081_v14, %v5077_v49  ;;  %v5109_v10 = vld [vmem:[#allocation7 + $0x310] sm:$0xff]  ;;  %v5122_v3 = vld [vmem:[#allocation7 + $0x378] sm:$0xff]  ;;  %v9532_v49 = vpack.c.bf16 %v5111_v50, %v5107_v22 }
 0x601   : > { %8522 = vmatmul.mubr.msk.f32.gmra.mrb[176].mxu0 %vm1614_vm1, %v10902_v41  ;;  %9627 = vmatprep.subr.bf16.mxu1 %v9626_v38  ;;  %v5088_v61 = vld [vmem:[#allocation7 + $0x268] sm:$0xff]  ;;  %v5115_v14 = vld [vmem:[#allocation7 + $0x340] sm:$0xff]  ;;  %v9662_v55 = vpack.c.bf16 %v5122_v3, %v5118_v18  ;;  %v5126_v46 = vld [vmem:[#allocation7 + $0x398] sm:$0xff] }
 0x602   : > { %4719 = vmatprep.mubr.f32.mxu0 %v13077_v53  ;;  %8538 = vmatmul.mubr.msk.f32.gmra.mrb[176].mxu1 %vm1614_vm1, %v10902_v41  ;;  %v9518_v38 = vpack.c.bf16 %v5088_v61, %v5084_v20  ;;  %v5119_v20 = vld [vmem:[#allocation7 + $0x360] sm:$0xff]  ;;  %v5117_v61 = vld [vmem:[#allocation7 + $0x350] sm:$0xff]  ;;  %v5130_v26 = vld [vmem:[#allocation7 + $0x3b8] sm:$0xff] }
 0x603   : > { %4880 = vmatprep.mubr.f32.mxu1 %v13077_v53  ;;  %9501 = vmatpush1.bf16.msra.mxu0 %v9500_v8  ;;  %v5089_v8 = vld [vmem:[#allocation7 + $0x270] sm:$0xff]  ;;  %v10910_v62 = vld [vmem:[%s11117_s5 + $0x60] sm:$0xff]  ;;  %v5140_v11 = vld [vmem:[#allocation7 + $0x408] sm:$0xff] }
 0x604   : > { %9629 = vmatpush1.bf16.msra.mxu1 %v9628_v9  ;;  %9503 = vmatprep.subr.bf16.mxu0 %v9502_v59  ;;  %v5092_v9 = vld [vmem:[#allocation7 + $0x288] sm:$0xff]  ;;  %v9648_v41 = vpack.c.bf16 %v5089_v8, %v5085_v57  ;;  %v9536_v57 = vpack.c.bf16 %v5119_v20, %v5115_v14  ;;  %v10913_v12 = vld [vmem:[%s11117_s5 + $0x78] sm:$0xff] }
 0x605   : > { %8523 = vmatmul.mubr.msk.f32.gmra.mrb[178].mxu0 %vm1614_vm1, %v10903_v56  ;;  %9631 = vmatprep.subr.bf16.mxu1 %v9630_v42  ;;  %v5096_v59 = vld [vmem:[#allocation7 + $0x2a8] sm:$0xff]  ;;  %v5150_v18 = vld [vmem:[#allocation7 + $0x458] sm:$0xff] }
 0x606   : > { %4725 = vmatprep.mubr.f32.mxu0 %v13077_v53  ;;  %8539 = vmatmul.mubr.msk.f32.gmra.mrb[178].mxu1 %vm1614_vm1, %v10903_v56  ;;  %v9522_v42 = vpack.c.bf16 %v5096_v59, %v5092_v9  ;;  %v10911_v8 = vld [vmem:[%s11117_s5 + $0x68] sm:$0xff]  ;;  %v9666_v9 = vpack.c.bf16 %v5130_v26, %v5126_v46  ;;  %v10912_v59 = vld [vmem:[%s11117_s5 + $0x70] sm:$0xff]  ;;  %v5154_v3 = vld [vmem:[#allocation7 + $0x478] sm:$0xff] }
 0x607   : > { %4886 = vmatprep.mubr.f32.mxu1 %v13077_v53  ;;  %9505 = vmatpush1.bf16.msra.mxu0 %v9504_v13  ;;  %v5097_v13 = vld [vmem:[#allocation7 + $0x2b0] sm:$0xff]  ;;  %v9678_v46 = vpack.c.bf16 %v5154_v3, %v5150_v18  ;;  %v5172_v18 = vld [vmem:[#allocation7 + $0x508] sm:$0xff] }
 0x608   : > { %9633 = vmatpush1.bf16.msra.mxu1 %v9632_v60  ;;  %9507 = vmatprep.subr.bf16.mxu0 %v9506_v63  ;;  %v5100_v60 = vld [vmem:[#allocation7 + $0x2c8] sm:$0xff]  ;;  %v9652_v56 = vpack.c.bf16 %v5097_v13, %v5093_v48  ;;  %v5149_v26 = vld [vmem:[#allocation7 + $0x450] sm:$0xff] }
 0x609   : > { %8524 = vmatmul.mubr.msk.f32.gmra.mrb[180].mxu0 %vm1614_vm1, %v10904_v45  ;;  %9635 = vmatprep.subr.bf16.mxu1 %v9634_v15  ;;  %v5104_v63 = vld [vmem:[#allocation7 + $0x2e8] sm:$0xff] }
 0x60a   : > { %4731 = vmatprep.mubr.f32.mxu0 %v13077_v53  ;;  %8540 = vmatmul.mubr.msk.f32.gmra.mrb[180].mxu1 %vm1614_vm1, %v10904_v45  ;;  %v9526_v15 = vpack.c.bf16 %v5104_v63, %v5100_v60  ;;  %v5132_v48 = vld [vmem:[#allocation7 + $0x3c8] sm:$0xff]  ;;  %v5138_v60 = vld [vmem:[#allocation7 + $0x3f8] sm:$0xff]  ;;  %v5131_v63 = vld [vmem:[#allocation7 + $0x3c0] sm:$0xff] }
 0x60b   : > { %4892 = vmatprep.mubr.f32.mxu1 %v13077_v53  ;;  %9509 = vmatpush1.bf16.msra.mxu0 %v9508_v21  ;;  %v5105_v21 = vld [vmem:[#allocation7 + $0x2f0] sm:$0xff] }
 0x60c   : > { %9637 = vmatpush1.bf16.msra.mxu1 %v9636_v16  ;;  %9511 = vmatprep.subr.bf16.mxu0 %v9510_v36  ;;  %v5108_v16 = vld [vmem:[#allocation7 + $0x308] sm:$0xff]  ;;  %v9656_v45 = vpack.c.bf16 %v5105_v21, %v5101_v27  ;;  %v5146_v21 = vld [vmem:[#allocation7 + $0x438] sm:$0xff] }
 0x60d   : > { %8525 = vmatmul.mubr.msk.f32.gmra.mrb[182].mxu0 %vm1614_vm1, %v10905_v35  ;;  %9639 = vmatprep.subr.bf16.mxu1 %v9638_v44  ;;  %v5112_v36 = vld [vmem:[#allocation7 + $0x328] sm:$0xff] }
 0x60e   : > { %4737 = vmatprep.mubr.f32.mxu0 %v13077_v53  ;;  %8541 = vmatmul.mubr.msk.f32.gmra.mrb[182].mxu1 %vm1614_vm1, %v10905_v35  ;;  %v9530_v44 = vpack.c.bf16 %v5112_v36, %v5108_v16  ;;  %v5144_v27 = vld [vmem:[#allocation7 + $0x428] sm:$0xff]  ;;  %v12312_v36 = vld [vmem:[%s13079_s22] sm:$0xf]  ;;  %s13092_s22 = sld [smem:[#allocation22_spill]] }
 0x60f   : > { %4898 = vmatprep.mubr.f32.mxu1 %v13077_v53  ;;  %9513 = vmatpush1.bf16.msra.mxu0 %v9512_v25  ;;  %v5113_v25 = vld [vmem:[#allocation7 + $0x330] sm:$0xff]  ;;  %v12316_v47 = vrot.slane %v12312_v36, %v13070_v6  ;;  %v12320_v5 = vrot.slane %v12312_v36, %v13071_v29 }
 0x610   : > { %9641 = vmatpush1.bf16.msra.mxu1 %v9640_v31  ;;  %9515 = vmatprep.subr.bf16.mxu0 %v9514_v1  ;;  %v5116_v31 = vld [vmem:[#allocation7 + $0x348] sm:$0xff]  ;;  %v9660_v35 = vpack.c.bf16 %v5113_v25, %v5109_v10  ;;  %v5141_v10 = vld [vmem:[#allocation7 + $0x410] sm:$0xff] }
 0x611   : > { %8526 = vmatmul.mubr.msk.f32.gmra.mrb[184].mxu0 %vm1614_vm1, %v10906_v37  ;;  %9643 = vmatprep.subr.bf16.mxu1 %v9642_v33  ;;  %v5120_v1 = vld [vmem:[#allocation7 + $0x368] sm:$0xff] }
 0x612   : > { %4743 = vmatprep.mubr.f32.mxu0 %v13077_v53  ;;  %8542 = vmatmul.mubr.msk.f32.gmra.mrb[184].mxu1 %vm1614_vm1, %v10906_v37  ;;  %v9534_v33 = vpack.c.bf16 %v5120_v1, %v5116_v31  ;;  %v5152_v1 = vld [vmem:[#allocation7 + $0x468] sm:$0xff] }
 0x613   : > { %4904 = vmatprep.mubr.f32.mxu1 %v13077_v53  ;;  %9517 = vmatpush1.bf16.msra.mxu0 %v9516_v34  ;;  %v5121_v34 = vld [vmem:[#allocation7 + $0x370] sm:$0xff] }
 0x614   : > { %9645 = vmatpush1.bf16.msra.mxu1 %v9644_v24  ;;  %9519 = vmatprep.subr.bf16.mxu0 %v9518_v38  ;;  %v5124_v24 = vld [vmem:[#allocation7 + $0x388] sm:$0xff]  ;;  %v9664_v37 = vpack.c.bf16 %v5121_v34, %v5117_v61  ;;  %v5147_v61 = vld [vmem:[#allocation7 + $0x440] sm:$0xff] }
 0x615   : > { %8527 = vmatmul.mubr.msk.f32.gmra.mrb[186].mxu0 %vm1614_vm1, %v10907_v32  ;;  %9647 = vmatprep.subr.bf16.mxu1 %v9646_v17  ;;  %v5128_v38 = vld [vmem:[#allocation7 + $0x3a8] sm:$0xff] }
 0x616   : > { %4749 = vmatprep.mubr.f32.mxu0 %v13077_v53  ;;  %8543 = vmatmul.mubr.msk.f32.gmra.mrb[186].mxu1 %vm1614_vm1, %v10907_v32  ;;  %v9538_v17 = vpack.c.bf16 %v5128_v38, %v5124_v24  ;;  %v5136_v32 = vld [vmem:[#allocation7 + $0x3e8] sm:$0xff] }
 0x617   : > { %4910 = vmatprep.mubr.f32.mxu1 %v13077_v53  ;;  %9521 = vmatpush1.bf16.msra.mxu0 %v9520_v52  ;;  %v5127_v52 = vld [vmem:[#allocation7 + $0x3a0] sm:$0xff]  ;;  %v9542_v13 = vpack.c.bf16 %v5136_v32, %v5132_v48 }
 0x618   : > { %9649 = vmatpush1.bf16.msra.mxu1 %v9648_v41  ;;  %9523 = vmatprep.subr.bf16.mxu0 %v9522_v42  ;;  %v5125_v41 = vld [vmem:[#allocation7 + $0x390] sm:$0xff]  ;;  %v9540_v42 = vpack.c.bf16 %v5127_v52, %v5123_v39  ;;  %v5159_v48 = vld [vmem:[#allocation7 + $0x4a0] sm:$0xff] }
 0x619   : > { %8528 = vmatmul.mubr.msk.f32.gmra.mrb[188].mxu0 %vm1614_vm1, %v10908_v4  ;;  %9651 = vmatprep.subr.bf16.mxu1 %v9650_v54  ;;  %v9668_v7 = vpack.c.bf16 %v5129_v30, %v5125_v41  ;;  %v5134_v54 = vld [vmem:[#allocation7 + $0x3d8] sm:$0xff] }
 0x61a   : > { %4755 = vmatprep.mubr.f32.mxu0 %v13077_v53  ;;  %8544 = vmatmul.mubr.msk.f32.gmra.mrb[188].mxu1 %vm1614_vm1, %v10908_v4  ;;  %v9670_v23 = vpack.c.bf16 %v5138_v60, %v5134_v54  ;;  %v5142_v4 = vld [vmem:[#allocation7 + $0x418] sm:$0xff] }
 0x61b   : > { %4916 = vmatprep.mubr.f32.mxu1 %v13077_v53  ;;  %9525 = vmatpush1.bf16.msra.mxu0 %v9524_v43  ;;  %v9544_v43 = vpack.c.bf16 %v5135_v51, %v5131_v63  ;;  %v9674_v16 = vpack.c.bf16 %v5146_v21, %v5142_v4  ;;  %v5157_v51 = vld [vmem:[#allocation7 + $0x490] sm:$0xff] }
 0x61c   : > { %9653 = vmatpush1.bf16.msra.mxu1 %v9652_v56  ;;  %9527 = vmatprep.subr.bf16.mxu0 %v9526_v15  ;;  %v5133_v56 = vld [vmem:[#allocation7 + $0x3d0] sm:$0xff] }
 0x61d   : > { %8529 = vmatmul.mubr.msk.f32.gmra.mrb[190].mxu0 %vm1614_vm1, %v10909_v28  ;;  %9655 = vmatprep.subr.bf16.mxu1 %v9654_v0  ;;  %v5137_v15 = vld [vmem:[#allocation7 + $0x3f0] sm:$0xff]  ;;  %v9546_v0 = vpack.c.bf16 %v5144_v27, %v5140_v11  ;;  %v5166_v11 = vld [vmem:[#allocation7 + $0x4d8] sm:$0xff] }
 0x61e   : > { %4761 = vmatprep.mubr.f32.mxu0 %v13077_v53  ;;  %8545 = vmatmul.mubr.msk.f32.gmra.mrb[190].mxu1 %vm1614_vm1, %v10909_v28  ;;  %v9672_v19 = vpack.c.bf16 %v5137_v15, %v5133_v56  ;;  %v5145_v28 = vld [vmem:[#allocation7 + $0x430] sm:$0xff]  ;;  %v5170_v27 = vld [vmem:[#allocation7 + $0x4f8] sm:$0xff] }
 0x61f   : > { %4922 = vmatprep.mubr.f32.mxu1 %v13077_v53  ;;  %9529 = vmatpush1.bf16.msra.mxu0 %v9528_v2  ;;  %v9676_v20 = vpack.c.bf16 %v5145_v28, %v5141_v10 }
 0x620   : > { %9657 = vmatpush1.bf16.msra.mxu1 %v9656_v45  ;;  %9531 = vmatprep.subr.bf16.mxu0 %v9530_v44  ;;  %v5139_v45 = vld [vmem:[#allocation7 + $0x400] sm:$0xff] }
 0x621   : > { %8530 = vmatmul.mubr.msk.f32.gmra.mrb[192].mxu0 %vm1614_vm1, %v10910_v62  ;;  %9659 = vmatprep.subr.bf16.mxu1 %v9658_v40  ;;  %v5143_v44 = vld [vmem:[#allocation7 + $0x420] sm:$0xff]  ;;  %v5148_v40 = vld [vmem:[#allocation7 + $0x448] sm:$0xff] }
 0x622   : > { %4767 = vmatprep.mubr.f32.mxu0 %v13077_v53  ;;  %8546 = vmatmul.mubr.msk.f32.gmra.mrb[192].mxu1 %vm1614_vm1, %v10910_v62  ;;  %v9548_v14 = vpack.c.bf16 %v5143_v44, %v5139_v45  ;;  %v5151_v62 = vld [vmem:[#allocation7 + $0x460] sm:$0xff]  ;;  %v9550_v38 = vpack.c.bf16 %v5152_v1, %v5148_v40  ;;  %v9686_v40 = vpack.c.bf16 %v5170_v27, %v5166_v11  ;;  %v5169_v1 = vld [vmem:[#allocation7 + $0x4f0] sm:$0xff] }
 0x623   : > { %4928 = vmatprep.mubr.f32.mxu1 %v13077_v53  ;;  %9533 = vmatpush1.bf16.msra.mxu0 %v9532_v49  ;;  %v5163_v45 = vld [vmem:[#allocation7 + $0x4c0] sm:$0xff] }
 0x624   : > { %9661 = vmatpush1.bf16.msra.mxu1 %v9660_v35  ;;  %9535 = vmatprep.subr.bf16.mxu0 %v9534_v33  ;;  %v5167_v44 = vld [vmem:[#allocation7 + $0x4e0] sm:$0xff] }
 0x625   : > { %8531 = vmatmul.mubr.msk.f32.gmra.mrb[194].mxu0 %vm1614_vm1, %v10911_v8  ;;  %9663 = vmatprep.subr.bf16.mxu1 %v9662_v55 }
 0x626   : > { %4773 = vmatprep.mubr.f32.mxu0 %v13077_v53  ;;  %8547 = vmatmul.mubr.msk.f32.gmra.mrb[194].mxu1 %vm1614_vm1, %v10911_v8 }
 0x627   : > { %4934 = vmatprep.mubr.f32.mxu1 %v13077_v53  ;;  %9537 = vmatpush1.bf16.msra.mxu0 %v9536_v57  ;;  %v5153_v57 = vld [vmem:[#allocation7 + $0x470] sm:$0xff] }
 0x628   : > { %9665 = vmatpush1.bf16.msra.mxu1 %v9664_v37  ;;  %9539 = vmatprep.subr.bf16.mxu0 %v9538_v17  ;;  %v5156_v37 = vld [vmem:[#allocation7 + $0x488] sm:$0xff]  ;;  %v9680_v30 = vpack.c.bf16 %v5153_v57, %v5149_v26 }
 0x629   : > { %8532 = vmatmul.mubr.msk.f32.gmra.mrb[196].mxu0 %vm1614_vm1, %v10912_v59  ;;  %9667 = vmatprep.subr.bf16.mxu1 %v9666_v9  ;;  %v5160_v9 = vld [vmem:[#allocation7 + $0x4a8] sm:$0xff] }
 0x62a   : > { %4779 = vmatprep.mubr.f32.mxu0 %v13077_v53  ;;  %8548 = vmatmul.mubr.msk.f32.gmra.mrb[196].mxu1 %vm1614_vm1, %v10912_v59  ;;  %v5158_v59 = vld [vmem:[#allocation7 + $0x498] sm:$0xff]  ;;  %v9554_v60 = vpack.c.bf16 %v5160_v9, %v5156_v37 }
 0x62b   : > { %4940 = vmatprep.mubr.f32.mxu1 %v13077_v53  ;;  %9541 = vmatpush1.bf16.msra.mxu0 %v9540_v42  ;;  %v9552_v42 = vpack.c.bf16 %v5151_v62, %v5147_v61 }
 0x62c   : > { %9669 = vmatpush1.bf16.msra.mxu1 %v9668_v7  ;;  %9543 = vmatprep.subr.bf16.mxu0 %v9542_v13  ;;  %v5155_v7 = vld [vmem:[#allocation7 + $0x480] sm:$0xff] }
 0x62d   : > { %8533 = vmatmul.mubr.msk.f32.gmra.mrb[198].mxu0 %vm1614_vm1, %v10913_v12  ;;  %9671 = vmatprep.subr.bf16.mxu1 %v9670_v23  ;;  %v5161_v23 = vld [vmem:[#allocation7 + $0x4b0] sm:$0xff] }
 0x62e   : > { %8549 = vmatmul.mubr.msk.f32.gmra.mrb[198].mxu1 %vm1614_vm1, %v10913_v12  ;;  %v5162_v12 = vld [vmem:[#allocation7 + $0x4b8] sm:$0xff] }
 0x62f   : > { %9545 = vmatpush1.bf16.msra.mxu0 %v9544_v43  ;;  %v9682_v63 = vpack.c.bf16 %v5162_v12, %v5158_v59  ;;  %v5164_v43 = vld [vmem:[#allocation7 + $0x4c8] sm:$0xff]  ;;  %v5173_v59 = vld [vmem:[#allocation7 + $0x510] sm:$0xff] }
 0x630   : > { %9673 = vmatpush1.bf16.msra.mxu1 %v9672_v19  ;;  %9547 = vmatprep.subr.bf16.mxu0 %v9546_v0  ;;  %v5168_v19 = vld [vmem:[#allocation7 + $0x4e8] sm:$0xff]  ;;  %v5177_v12 = vld [vmem:[#allocation7 + $0x530] sm:$0xff] }
 0x631   : > { %9675 = vmatprep.subr.bf16.mxu1 %v9674_v16  ;;  %v9556_v16 = vpack.c.bf16 %v5159_v48, %v5155_v7  ;;  %v9558_v28 = vpack.c.bf16 %v5168_v19, %v5164_v43  ;;  %v5182_v7 = vld [vmem:[#allocation7 + $0x558] sm:$0xff] }
 0x632   : > { %v5186_v48 = vld [vmem:[#allocation7 + $0x578] sm:$0xff] }
 0x633   : > { %v9694_v27 = vpack.c.bf16 %v5186_v48, %v5182_v7  ;;  %v5199_v7 = vld [vmem:[#allocation7 + $0x5e0] sm:$0xff] }
 0x6c4   : > { %v4691_v2 = vpop.f32.mrb[168].mxu0 }
 0x6c5   : > { %v4692_v22 = vadd.f32 %v4691_v2, %v12316_v47  ;;  %v4693_v50 = vpop.f32.mrb[169].mxu0  ;;  %v12323_v25 = vpop.f32.mrb[168].mxu1  ;;  %v9684_v2 = vpack.c.bf16 %v5161_v23, %v5157_v51  ;;  %v5179_v51 = vld [vmem:[#allocation7 + $0x540] sm:$0xff] }
 0x6c6   : > { %v4694_v31 = vadd.f32 %v4693_v50, %v12320_v5  ;;  %v12326_v49 = vpop.f32.mrb[169].mxu1  ;;  %v5183_v23 = vld [vmem:[#allocation7 + $0x560] sm:$0xff] }
 0x6c7   : > { %v4947_v55 = vmax.f32 %v4692_v22, 0.0 }
 0x6c8   : > { %v4948_v35 = vmax.f32 %v4694_v31, 0.0  ;;  %v4697_v33 = vpop.f32.mrb[170].mxu0  ;;  %v5165_v31 = vld [vmem:[#allocation7 + $0x4d0] sm:$0xff] }
 0x6c9   : > { %v4698_v34 = vadd.f32 %v4697_v33, %v12316_v47  ;;  %v4699_v24 = vpop.f32.mrb[171].mxu0  ;;  %v12329_v17 = vpop.f32.mrb[170].mxu1  ;;  %v5176_v33 = vld [vmem:[#allocation7 + $0x528] sm:$0xff] }
 0x6ca   : > { %v4700_v8 = vadd.f32 %v4699_v24, %v12320_v5  ;;  %5353 = vmatprep.mubr.f32.mxu0 %v4948_v35  ;;  %5675 = vmatprep.mubr.f32.mxu1 %v4948_v35  ;;  %v12332_v39 = vpop.f32.mrb[171].mxu1  ;;  %v9688_v24 = vpack.c.bf16 %v5169_v1, %v5165_v31  ;;  %v9568_v31 = vpack.c.bf16 %v5183_v23, %v5179_v51  ;;  %v5197_v51 = vld [vmem:[#allocation7 + $0x5d0] sm:$0xff] }
 0x6cb   : > { %5354 = vmatmul.mubr.f32.vlgmr.msra.gmra.mrb[128].mxu0 %v4947_v55  ;;  %5676 = vmatmul.mubr.f32.vlgmr.msra.gmra.mrb[128].mxu1 %v4947_v55  ;;  %v4951_v32 = vmax.f32 %v4698_v34, 0.0  ;;  %v9560_v34 = vpack.c.bf16 %v5167_v44, %v5163_v45  ;;  %v5192_v44 = vld [vmem:[#allocation7 + $0x5a8] sm:$0xff]  ;;  %v5201_v23 = vld [vmem:[#allocation7 + $0x5f0] sm:$0xff] }
 0x6cc   : > { %v4952_v52 = vmax.f32 %v4700_v8, 0.0  ;;  %v4703_v41 = vpop.f32.mrb[172].mxu0  ;;  %9549 = vmatpush1.bf16.msra.mxu0 %v9548_v14  ;;  %9677 = vmatpush1.bf16.msra.mxu1 %v9676_v20  ;;  %v5174_v14 = vld [vmem:[#allocation7 + $0x518] sm:$0xff]  ;;  %v9562_v8 = vpack.c.bf16 %v5176_v33, %v5172_v18  ;;  %v5187_v18 = vld [vmem:[#allocation7 + $0x580] sm:$0xff] }
 0x6cd   : > { %v4704_v54 = vadd.f32 %v4703_v41, %v12316_v47  ;;  %v4705_v13 = vpop.f32.mrb[173].mxu0  ;;  %9551 = vmatprep.subr.bf16.mxu0 %v9550_v38  ;;  %9679 = vmatprep.subr.bf16.mxu1 %v9678_v46  ;;  %v12335_v56 = vpop.f32.mrb[172].mxu1  ;;  %v5178_v20 = vld [vmem:[#allocation7 + $0x538] sm:$0xff]  ;;  %v5171_v38 = vld [vmem:[#allocation7 + $0x500] sm:$0xff] }
 0x6ce   : > { %v4706_v15 = vadd.f32 %v4705_v13, %v12320_v5  ;;  %5359 = vmatprep.mubr.f32.mxu0 %v4952_v52  ;;  %5681 = vmatprep.mubr.f32.mxu1 %v4952_v52  ;;  %v12338_v4 = vpop.f32.mrb[173].mxu1  ;;  %v5175_v46 = vld [vmem:[#allocation7 + $0x520] sm:$0xff]  ;;  %v9690_v9 = vpack.c.bf16 %v5178_v20, %v5174_v14  ;;  %v5180_v52 = vld [vmem:[#allocation7 + $0x548] sm:$0xff] }
 0x6cf   : > { %5360 = vmatmul.mubr.f32.gmra.mrb[130].mxu0 %v4951_v32  ;;  %5682 = vmatmul.mubr.f32.gmra.mrb[130].mxu1 %v4951_v32  ;;  %v4955_v22 = vmax.f32 %v4704_v54, 0.0 }
 0x6d0   : > { %v4956_v0 = vmax.f32 %v4706_v15, 0.0  ;;  %v4709_v21 = vpop.f32.mrb[174].mxu0  ;;  %9553 = vmatpush1.bf16.msra.mxu0 %v9552_v42  ;;  %9681 = vmatpush1.bf16.msra.mxu1 %v9680_v30  ;;  %v5184_v30 = vld [vmem:[#allocation7 + $0x568] sm:$0xff] }
 0x6d1   : > { %v4710_v50 = vadd.f32 %v4709_v21, %v12316_v47  ;;  %v4711_v10 = vpop.f32.mrb[175].mxu0  ;;  %9555 = vmatprep.subr.bf16.mxu0 %v9554_v60  ;;  %9683 = vmatprep.subr.bf16.mxu1 %v9682_v63  ;;  %v12341_v3 = vpop.f32.mrb[174].mxu1  ;;  %v9564_v60 = vpack.c.bf16 %v5175_v46, %v5171_v38  ;;  %v9692_v63 = vpack.c.bf16 %v5177_v12, %v5173_v59  ;;  %v5185_v21 = vld [vmem:[#allocation7 + $0x570] sm:$0xff]  ;;  %v5196_v38 = vld [vmem:[#allocation7 + $0x5c8] sm:$0xff] }
 0x6d2   : > { %v4712_v35 = vadd.f32 %v4711_v10, %v12320_v5  ;;  %5365 = vmatprep.mubr.f32.mxu0 %v4956_v0  ;;  %5687 = vmatprep.mubr.f32.mxu1 %v4956_v0  ;;  %v12344_v61 = vpop.f32.mrb[175].mxu1  ;;  %v9566_v11 = vpack.c.bf16 %v5184_v30, %v5180_v52  ;;  %v5181_v0 = vld [vmem:[#allocation7 + $0x550] sm:$0xff]  ;;  %v5195_v30 = vld [vmem:[#allocation7 + $0x5c0] sm:$0xff] }
 0x6d3   : > { %5366 = vmatmul.mubr.f32.gmra.mrb[132].mxu0 %v4955_v22  ;;  %5688 = vmatmul.mubr.f32.gmra.mrb[132].mxu1 %v4955_v22  ;;  %v4959_v26 = vmax.f32 %v4710_v50, 0.0  ;;  %v5190_v22 = vld [vmem:[#allocation7 + $0x598] sm:$0xff]  ;;  %v9696_v1 = vpack.c.bf16 %v5185_v21, %v5181_v0 }
 0x6d4   : > { %v4960_v62 = vmax.f32 %v4712_v35, 0.0  ;;  %v4715_v55 = vpop.f32.mrb[176].mxu0  ;;  %9557 = vmatpush1.bf16.msra.mxu0 %v9556_v16  ;;  %9685 = vmatpush1.bf16.msra.mxu1 %v9684_v2  ;;  %v5188_v16 = vld [vmem:[#allocation7 + $0x588] sm:$0xff]  ;;  %v5194_v50 = vld [vmem:[#allocation7 + $0x5b8] sm:$0xff]  ;;  %v5191_v35 = vld [vmem:[#allocation7 + $0x5a0] sm:$0xff] }
 0x6d5   : > { %v4716_v57 = vadd.f32 %v4715_v55, %v12316_v47  ;;  %v4717_v37 = vpop.f32.mrb[177].mxu0  ;;  %9559 = vmatprep.subr.bf16.mxu0 %v9558_v28  ;;  %9687 = vmatprep.subr.bf16.mxu1 %v9686_v40  ;;  %v12347_v41 = vpop.f32.mrb[176].mxu1  ;;  %v9698_v55 = vpack.c.bf16 %v5194_v50, %v5190_v22  ;;  %v9572_v52 = vpack.c.bf16 %v5191_v35, %v5187_v18  ;;  %v5210_v0 = vld [vmem:[#allocation7 + $0x638] sm:$0xff]  ;;  %v5203_v50 = vld [vmem:[#allocation7 + $0x600] sm:$0xff] }
 0x6d6   : > { %v4718_v42 = vadd.f32 %v4717_v37, %v12320_v5  ;;  %5371 = vmatprep.mubr.f32.mxu0 %v4960_v62  ;;  %5693 = vmatprep.mubr.f32.mxu1 %v4960_v62  ;;  %v12350_v32 = vpop.f32.mrb[177].mxu1  ;;  %v9570_v62 = vpack.c.bf16 %v5192_v44, %v5188_v16  ;;  %v5198_v37 = vld [vmem:[#allocation7 + $0x5d8] sm:$0xff]  ;;  %v9576_v44 = vpack.c.bf16 %v5199_v7, %v5195_v30 }
 0x6d7   : > { %5372 = vmatmul.mubr.f32.gmra.mrb[134].mxu0 %v4959_v26  ;;  %5694 = vmatmul.mubr.f32.gmra.mrb[134].mxu1 %v4959_v26  ;;  %v4963_v43 = vmax.f32 %v4716_v57, 0.0  ;;  %v5200_v57 = vld [vmem:[#allocation7 + $0x5e8] sm:$0xff]  ;;  %v9704_v22 = vpack.c.bf16 %v5201_v23, %v5197_v51 }
 0x6d8   : > { %v4964_v54 = vmax.f32 %v4718_v42, 0.0  ;;  %v4721_v13 = vpop.f32.mrb[178].mxu0  ;;  %9561 = vmatpush1.bf16.msra.mxu0 %v9560_v34  ;;  %9689 = vmatpush1.bf16.msra.mxu1 %v9688_v24  ;;  %v5189_v34 = vld [vmem:[#allocation7 + $0x590] sm:$0xff] }
 0x6d9   : > { %v4722_v15 = vadd.f32 %v4721_v13, %v12316_v47  ;;  %v4723_v19 = vpop.f32.mrb[179].mxu0  ;;  %9563 = vmatprep.subr.bf16.mxu0 %v9562_v8  ;;  %9691 = vmatprep.subr.bf16.mxu1 %v9690_v9  ;;  %v12353_v2 = vpop.f32.mrb[178].mxu1  ;;  %v5193_v24 = vld [vmem:[#allocation7 + $0x5b0] sm:$0xff]  ;;  %v5202_v8 = vld [vmem:[#allocation7 + $0x5f8] sm:$0xff] }
 0x6da   : > { %v4724_v45 = vadd.f32 %v4723_v19, %v12320_v5  ;;  %5377 = vmatprep.mubr.f32.mxu0 %v4964_v54  ;;  %5699 = vmatprep.mubr.f32.mxu1 %v4964_v54  ;;  %v12356_v10 = vpop.f32.mrb[179].mxu1  ;;  %v9700_v42 = vpack.c.bf16 %v5193_v24, %v5189_v34  ;;  %v5216_v34 = vld [vmem:[#allocation7 + $0x668] sm:$0xff]  ;;  %v5214_v24 = vld [vmem:[#allocation7 + $0x658] sm:$0xff] }
 0x6db   : > { %5378 = vmatmul.mubr.f32.gmra.mrb[136].mxu0 %v4963_v43  ;;  %5700 = vmatmul.mubr.f32.gmra.mrb[136].mxu1 %v4963_v43  ;;  %v4967_v33 = vmax.f32 %v4722_v15, 0.0  ;;  %v5204_v43 = vld [vmem:[#allocation7 + $0x608] sm:$0xff] }
 0x6dc   : > { %v4968_v28 = vmax.f32 %v4724_v45, 0.0  ;;  %v4727_v40 = vpop.f32.mrb[180].mxu0  ;;  %9565 = vmatpush1.bf16.msra.mxu0 %v9564_v60  ;;  %9693 = vmatpush1.bf16.msra.mxu1 %v9692_v63  ;;  %v9574_v60 = vpack.c.bf16 %v5200_v57, %v5196_v38  ;;  %v9702_v63 = vpack.c.bf16 %v5202_v8, %v5198_v37  ;;  %v5218_v38 = vld [vmem:[#allocation7 + $0x678] sm:$0xff] }
 0x6dd   : > { %v4728_v14 = vadd.f32 %v4727_v40, %v12316_v47  ;;  %v4729_v20 = vpop.f32.mrb[181].mxu0  ;;  %9567 = vmatprep.subr.bf16.mxu0 %v9566_v11  ;;  %9695 = vmatprep.subr.bf16.mxu1 %v9694_v27  ;;  %v12359_v46 = vpop.f32.mrb[180].mxu1  ;;  %v5208_v11 = vld [vmem:[#allocation7 + $0x628] sm:$0xff]  ;;  %v5206_v27 = vld [vmem:[#allocation7 + $0x618] sm:$0xff] }
 0x6de   : > { %v4730_v26 = vadd.f32 %v4729_v20, %v12320_v5  ;;  %5383 = vmatprep.mubr.f32.mxu0 %v4968_v28  ;;  %5705 = vmatprep.mubr.f32.mxu1 %v4968_v28  ;;  %v12362_v9 = vpop.f32.mrb[181].mxu1  ;;  %v5207_v28 = vld [vmem:[#allocation7 + $0x620] sm:$0xff]  ;;  %v9578_v18 = vpack.c.bf16 %v5208_v11, %v5204_v43  ;;  %v9706_v35 = vpack.c.bf16 %v5210_v0, %v5206_v27  ;;  %v5212_v20 = vld [vmem:[#allocation7 + $0x648] sm:$0xff]  ;;  %v5226_v11 = vld [vmem:[#allocation7 + $0x6b8] sm:$0xff] }
 0x6df   : > { %5384 = vmatmul.mubr.f32.gmra.mrb[138].mxu0 %v4967_v33  ;;  %5706 = vmatmul.mubr.f32.gmra.mrb[138].mxu1 %v4967_v33  ;;  %v4971_v48 = vmax.f32 %v4728_v14, 0.0  ;;  %v5205_v33 = vld [vmem:[#allocation7 + $0x610] sm:$0xff]  ;;  %v9580_v8 = vpack.c.bf16 %v5207_v28, %v5203_v50  ;;  %v5224_v43 = vld [vmem:[#allocation7 + $0x6a8] sm:$0xff]  ;;  %v5223_v50 = vld [vmem:[#allocation7 + $0x6a0] sm:$0xff] }
 0x6e0   : > { %v4972_v59 = vmax.f32 %v4730_v26, 0.0  ;;  %v4733_v12 = vpop.f32.mrb[182].mxu0  ;;  %9569 = vmatpush1.bf16.msra.mxu0 %v9568_v31  ;;  %9697 = vmatpush1.bf16.msra.mxu1 %v9696_v1  ;;  %v5209_v14 = vld [vmem:[#allocation7 + $0x630] sm:$0xff] }
 0x6e1   : > { %v4734_v54 = vadd.f32 %v4733_v12, %v12316_v47  ;;  %v4735_v13 = vpop.f32.mrb[183].mxu0  ;;  %9571 = vmatprep.subr.bf16.mxu0 %v9570_v62  ;;  %9699 = vmatprep.subr.bf16.mxu1 %v9698_v55  ;;  %v12365_v15 = vpop.f32.mrb[182].mxu1  ;;  %v5211_v12 = vld [vmem:[#allocation7 + $0x640] sm:$0xff] }
 0x6e2   : > { %v4736_v19 = vadd.f32 %v4735_v13, %v12320_v5  ;;  %5389 = vmatprep.mubr.f32.mxu0 %v4972_v59  ;;  %5711 = vmatprep.mubr.f32.mxu1 %v4972_v59  ;;  %v12368_v21 = vpop.f32.mrb[183].mxu1  ;;  %v9708_v59 = vpack.c.bf16 %v5209_v14, %v5205_v33  ;;  %v5213_v13 = vld [vmem:[#allocation7 + $0x650] sm:$0xff]  ;;  %v5228_v14 = vld [vmem:[#allocation7 + $0x6c8] sm:$0xff] }
 0x6e3   : > { %5390 = vmatmul.mubr.f32.gmra.mrb[140].mxu0 %v4971_v48  ;;  %5712 = vmatmul.mubr.f32.gmra.mrb[140].mxu1 %v4971_v48  ;;  %v4975_v40 = vmax.f32 %v4734_v54, 0.0  ;;  %v9582_v48 = vpack.c.bf16 %v5216_v34, %v5212_v20  ;;  %v9710_v54 = vpack.c.bf16 %v5218_v38, %v5214_v24  ;;  %v5225_v33 = vld [vmem:[#allocation7 + $0x6b0] sm:$0xff]  ;;  %v5232_v34 = vld [vmem:[#allocation7 + $0x6e8] sm:$0xff]  ;;  %v5230_v24 = vld [vmem:[#allocation7 + $0x6d8] sm:$0xff] }
 0x6e4   : > { %v4976_v16 = vmax.f32 %v4736_v19, 0.0  ;;  %v4739_v45 = vpop.f32.mrb[184].mxu0  ;;  %9573 = vmatpush1.bf16.msra.mxu0 %v9572_v52  ;;  %9701 = vmatpush1.bf16.msra.mxu1 %v9700_v42  ;;  %v5215_v52 = vld [vmem:[#allocation7 + $0x660] sm:$0xff]  ;;  %v5222_v19 = vld [vmem:[#allocation7 + $0x698] sm:$0xff] }
 0x6e5   : > { %v4740_v31 = vadd.f32 %v4739_v45, %v12316_v47  ;;  %v4741_v1 = vpop.f32.mrb[185].mxu0  ;;  %9575 = vmatprep.subr.bf16.mxu0 %v9574_v60  ;;  %9703 = vmatprep.subr.bf16.mxu1 %v9702_v63  ;;  %v12371_v62 = vpop.f32.mrb[184].mxu1  ;;  %v5217_v60 = vld [vmem:[#allocation7 + $0x670] sm:$0xff]  ;;  %v5220_v63 = vld [vmem:[#allocation7 + $0x688] sm:$0xff]  ;;  %v9584_v45 = vpack.c.bf16 %v5215_v52, %v5211_v12  ;;  %v5234_v38 = vld [vmem:[#allocation7 + $0x6f8] sm:$0xff] }
 0x6e6   : > { %v4742_v55 = vadd.f32 %v4741_v1, %v12320_v5  ;;  %5395 = vmatprep.mubr.f32.mxu0 %v4976_v16  ;;  %5717 = vmatprep.mubr.f32.mxu1 %v4976_v16  ;;  %v12374_v26 = vpop.f32.mrb[185].mxu1  ;;  %v9586_v1 = vpack.c.bf16 %v5224_v43, %v5220_v63  ;;  %v5227_v52 = vld [vmem:[#allocation7 + $0x6c0] sm:$0xff]  ;;  %v5233_v63 = vld [vmem:[#allocation7 + $0x6f0] sm:$0xff] }
 0x6e7   : > { %5396 = vmatmul.mubr.f32.gmra.mrb[142].mxu0 %v4975_v40  ;;  %5718 = vmatmul.mubr.f32.gmra.mrb[142].mxu1 %v4975_v40  ;;  %v4979_v42 = vmax.f32 %v4740_v31, 0.0 }
 0x6e8   : > { %v4980_v57 = vmax.f32 %v4742_v55, 0.0  ;;  %v4745_v37 = vpop.f32.mrb[186].mxu0  ;;  %9577 = vmatpush1.bf16.msra.mxu0 %v9576_v44  ;;  %9705 = vmatpush1.bf16.msra.mxu1 %v9704_v22  ;;  %v9712_v44 = vpack.c.bf16 %v5217_v60, %v5213_v13  ;;  %v5219_v22 = vld [vmem:[#allocation7 + $0x680] sm:$0xff]  ;;  %v9718_v13 = vpack.c.bf16 %v5234_v38, %v5230_v24  ;;  %v5229_v60 = vld [vmem:[#allocation7 + $0x6d0] sm:$0xff]  ;;  %v5244_v24 = vld [vmem:[#allocation7 + $0x748] sm:$0xff] }
 0x6e9   : > { %v4746_v30 = vadd.f32 %v4745_v37, %v12316_v47  ;;  %v4747_v7 = vpop.f32.mrb[187].mxu0  ;;  %9579 = vmatprep.subr.bf16.mxu0 %v9578_v18  ;;  %9707 = vmatprep.subr.bf16.mxu1 %v9706_v35  ;;  %v12377_v51 = vpop.f32.mrb[186].mxu1  ;;  %v9714_v18 = vpack.c.bf16 %v5226_v11, %v5222_v19  ;;  %v5221_v35 = vld [vmem:[#allocation7 + $0x690] sm:$0xff]  ;;  %v5240_v11 = vld [vmem:[#allocation7 + $0x728] sm:$0xff] }
 0x6ea   : > { %v4748_v23 = vadd.f32 %v4747_v7, %v12320_v5  ;;  %5401 = vmatprep.mubr.f32.mxu0 %v4980_v57  ;;  %5723 = vmatprep.mubr.f32.mxu1 %v4980_v57  ;;  %v12380_v27 = vpop.f32.mrb[187].mxu1  ;;  %v9716_v12 = vpack.c.bf16 %v5225_v33, %v5221_v35 }
 0x6eb   : > { %5402 = vmatmul.mubr.f32.gmra.mrb[144].mxu0 %v4979_v42  ;;  %5724 = vmatmul.mubr.f32.gmra.mrb[144].mxu1 %v4979_v42  ;;  %v4983_v28 = vmax.f32 %v4746_v30, 0.0  ;;  %v5231_v42 = vld [vmem:[#allocation7 + $0x6e0] sm:$0xff] }
 0x6ec   : > { %v4984_v0 = vmax.f32 %v4748_v23, 0.0  ;;  %v4751_v16 = vpop.f32.mrb[188].mxu0  ;;  %9581 = vmatpush1.bf16.msra.mxu0 %v9580_v8  ;;  %9709 = vmatpush1.bf16.msra.mxu1 %v9708_v59  ;;  %v9588_v59 = vpack.c.bf16 %v5223_v50, %v5219_v22  ;;  %v5236_v23 = vld [vmem:[#allocation7 + $0x708] sm:$0xff]  ;;  %v9592_v50 = vpack.c.bf16 %v5231_v42, %v5227_v52 }
 0x6ed   : > { %v4752_v40 = vadd.f32 %v4751_v16, %v12316_v47  ;;  %v4753_v31 = vpop.f32.mrb[189].mxu0  ;;  %9583 = vmatprep.subr.bf16.mxu0 %v9582_v48  ;;  %9711 = vmatprep.subr.bf16.mxu1 %v9710_v54  ;;  %v12383_v20 = vpop.f32.mrb[188].mxu1  ;;  %v9590_v54 = vpack.c.bf16 %v5232_v34, %v5228_v14  ;;  %v5242_v16 = vld [vmem:[#allocation7 + $0x738] sm:$0xff]  ;;  %v9594_v33 = vpack.c.bf16 %v5240_v11, %v5236_v23  ;;  %v5241_v34 = vld [vmem:[#allocation7 + $0x730] sm:$0xff] }
 0x6ee   : > { %v4754_v55 = vadd.f32 %v4753_v31, %v12320_v5  ;;  %5407 = vmatprep.mubr.f32.mxu0 %v4984_v0  ;;  %5729 = vmatprep.mubr.f32.mxu1 %v4984_v0  ;;  %v12386_v57 = vpop.f32.mrb[189].mxu1  ;;  %v5238_v0 = vld [vmem:[#allocation7 + $0x718] sm:$0xff]  ;;  %v5239_v31 = vld [vmem:[#allocation7 + $0x720] sm:$0xff] }
 0x6ef   : > { %5408 = vmatmul.mubr.f32.gmra.mrb[146].mxu0 %v4983_v28  ;;  %5730 = vmatmul.mubr.f32.gmra.mrb[146].mxu1 %v4983_v28  ;;  %v4987_v30 = vmax.f32 %v4752_v40, 0.0  ;;  %v9720_v28 = vpack.c.bf16 %v5233_v63, %v5229_v60  ;;  %v5235_v40 = vld [vmem:[#allocation7 + $0x700] sm:$0xff]  ;;  %v9722_v14 = vpack.c.bf16 %v5242_v16, %v5238_v0  ;;  %v5245_v60 = vld [vmem:[#allocation7 + $0x750] sm:$0xff] }
 0x6f0   : > { %v4988_v37 = vmax.f32 %v4754_v55, 0.0  ;;  %v4757_v8 = vpop.f32.mrb[190].mxu0  ;;  %9585 = vmatpush1.bf16.msra.mxu0 %v9584_v45  ;;  %9713 = vmatpush1.bf16.msra.mxu1 %v9712_v44  ;;  %v5237_v55 = vld [vmem:[#allocation7 + $0x710] sm:$0xff] }
 0x6f1   : > { %v4758_v7 = vadd.f32 %v4757_v8, %v12316_v47  ;;  %v4759_v48 = vpop.f32.mrb[191].mxu0  ;;  %9587 = vmatprep.subr.bf16.mxu0 %v9586_v1  ;;  %9715 = vmatprep.subr.bf16.mxu1 %v9714_v18  ;;  %v12389_v43 = vpop.f32.mrb[190].mxu1  ;;  %v5248_v8 = vld [vmem:[#allocation7 + $0x768] sm:$0xff]  ;;  %v5249_v16 = vld [vmem:[#allocation7 + $0x770] sm:$0xff] }
 0x6f2   : > { %v4760_v19 = vadd.f32 %v4759_v48, %v12320_v5  ;;  %5413 = vmatprep.mubr.f32.mxu0 %v4988_v37  ;;  %5735 = vmatprep.mubr.f32.mxu1 %v4988_v37  ;;  %v12392_v45 = vpop.f32.mrb[191].mxu1  ;;  %v9724_v48 = vpack.c.bf16 %v5241_v34, %v5237_v55  ;;  %v9598_v11 = vpack.c.bf16 %v5248_v8, %v5244_v24  ;;  %v5251_v34 = vld [vmem:[#allocation7 + $0x780] sm:$0xff] }
 0x6f3   : > { %5414 = vmatmul.mubr.f32.gmra.mrb[148].mxu0 %v4987_v30  ;;  %5736 = vmatmul.mubr.f32.gmra.mrb[148].mxu1 %v4987_v30  ;;  %v4991_v1 = vmax.f32 %v4758_v7, 0.0  ;;  %v9596_v7 = vpack.c.bf16 %v5239_v31, %v5235_v40  ;;  %v5258_v40 = vld [vmem:[#allocation7 + $0x7b8] sm:$0xff]  ;;  %v5255_v24 = vld [vmem:[#allocation7 + $0x7a0] sm:$0xff] }
 0x6f4   : > { %v4992_v44 = vmax.f32 %v4760_v19, 0.0  ;;  %v4763_v22 = vpop.f32.mrb[192].mxu0  ;;  %9589 = vmatpush1.bf16.msra.mxu0 %v9588_v59  ;;  %9717 = vmatpush1.bf16.msra.mxu1 %v9716_v12  ;;  %v5246_v59 = vld [vmem:[#allocation7 + $0x758] sm:$0xff] }
 0x6f5   : > { %v4764_v18 = vadd.f32 %v4763_v22, %v12316_v47  ;;  %v4765_v35 = vpop.f32.mrb[193].mxu0  ;;  %9591 = vmatprep.subr.bf16.mxu0 %v9590_v54  ;;  %9719 = vmatprep.subr.bf16.mxu1 %v9718_v13  ;;  %v12395_v38 = vpop.f32.mrb[192].mxu1  ;;  %v5250_v12 = vld [vmem:[#allocation7 + $0x778] sm:$0xff]  ;;  %v5243_v54 = vld [vmem:[#allocation7 + $0x740] sm:$0xff]  ;;  %v5256_v22 = vld [vmem:[#allocation7 + $0x7a8] sm:$0xff] }
 0x6f6   : > { %v4766_v37 = vadd.f32 %v4765_v35, %v12320_v5  ;;  %5419 = vmatprep.mubr.f32.mxu0 %v4992_v44  ;;  %5741 = vmatprep.mubr.f32.mxu1 %v4992_v44  ;;  %v12398_v52 = vpop.f32.mrb[193].mxu1  ;;  %v5247_v13 = vld [vmem:[#allocation7 + $0x760] sm:$0xff]  ;;  %v9726_v0 = vpack.c.bf16 %v5250_v12, %v5246_v59  ;;  %v5252_v44 = vld [vmem:[#allocation7 + $0x788] sm:$0xff] }
 0x6f7   : > { %5420 = vmatmul.mubr.f32.gmra.mrb[150].mxu0 %v4991_v1  ;;  %5742 = vmatmul.mubr.f32.gmra.mrb[150].mxu1 %v4991_v1  ;;  %v4995_v63 = vmax.f32 %v4764_v18, 0.0  ;;  %v9602_v55 = vpack.c.bf16 %v5256_v22, %v5252_v44  ;;  %v12418_v22 = vrot.slane %v12312_v36, %v11936_v58 }
 0x6f8   : > { %v4996_v42 = vmax.f32 %v4766_v37, 0.0  ;;  %v4769_v30 = vpop.f32.mrb[194].mxu0  ;;  %9593 = vmatpush1.bf16.msra.mxu0 %v9592_v50  ;;  %9721 = vmatpush1.bf16.msra.mxu1 %v9720_v28  ;;  %v5254_v28 = vld [vmem:[#allocation7 + $0x798] sm:$0xff]  ;;  %v5253_v37 = vld [vmem:[#allocation7 + $0x790] sm:$0xff] }
 0x6f9   : > { %v4770_v23 = vadd.f32 %v4769_v30, %v12316_v47  ;;  %v4771_v19 = vpop.f32.mrb[195].mxu0  ;;  %9595 = vmatprep.subr.bf16.mxu0 %v9594_v33  ;;  %9723 = vmatprep.subr.bf16.mxu1 %v9722_v14  ;;  %v12401_v1 = vpop.f32.mrb[194].mxu1  ;;  %v9600_v33 = vpack.c.bf16 %v5247_v13, %v5243_v54  ;;  %v9728_v14 = vpack.c.bf16 %v5249_v16, %v5245_v60  ;;  %v5257_v30 = vld [vmem:[#allocation7 + $0x7b0] sm:$0xff]  ;;  %v5262_v60 = vld [vmem:[#allocation7 + $0x7d8] sm:$0xff] }
 0x6fa   : > { %v4772_v50 = vadd.f32 %v4771_v19, %v12320_v5  ;;  %5425 = vmatprep.mubr.f32.mxu0 %v4996_v42  ;;  %5747 = vmatprep.mubr.f32.mxu1 %v4996_v42  ;;  %v12404_v31 = vpop.f32.mrb[195].mxu1  ;;  %v9730_v42 = vpack.c.bf16 %v5258_v40, %v5254_v28  ;;  %v13080_v19 = vld [vmem:[#allocation36_spill] sm:$0xff]  ;;  %v5259_v40 = vld [vmem:[#allocation7 + $0x7c0] sm:$0xff] }
 0x6fb   : > { %5426 = vmatmul.mubr.f32.gmra.mrb[152].mxu0 %v4995_v63  ;;  %5748 = vmatmul.mubr.f32.gmra.mrb[152].mxu1 %v4995_v63  ;;  %v4999_v8 = vmax.f32 %v4770_v23, 0.0  ;;  %v12409_v63 = vrot.slane %v12312_v36, %v13080_v19  ;;  %v5266_v23 = vld [vmem:[#allocation7 + $0x7f8] sm:$0xff] }
 0x6fc   : > { %v5000_v18 = vmax.f32 %v4772_v50, 0.0  ;;  %v4775_v35 = vpop.f32.mrb[196].mxu0  ;;  %9597 = vmatpush1.bf16.msra.mxu0 %v9596_v7  ;;  %9725 = vmatpush1.bf16.msra.mxu1 %v9724_v48  ;;  %v5260_v7 = vld [vmem:[#allocation7 + $0x7c8] sm:$0xff]  ;;  %v9732_v50 = vpack.c.bf16 %v5257_v30, %v5253_v37 }
 0x6fd   : > { %v4776_v59 = vadd.f32 %v4775_v35, %v12316_v47  ;;  %v4777_v12 = vpop.f32.mrb[197].mxu0  ;;  %9599 = vmatprep.subr.bf16.mxu0 %v9598_v11  ;;  %9727 = vmatprep.subr.bf16.mxu1 %v9726_v0  ;;  %v5264_v48 = vld [vmem:[#allocation7 + $0x7e8] sm:$0xff]  ;;  %v12411_v54 = vpop.f32.mrb[196].mxu1  ;;  %v9604_v11 = vpack.c.bf16 %v5255_v24, %v5251_v34  ;;  %v4855_v34 = vadd.f32 %v12326_v49, %v12409_v63 }
 0x6fe   : > { %v4778_v13 = vadd.f32 %v4777_v12, %v12320_v5  ;;  %5431 = vmatprep.mubr.f32.mxu0 %v5000_v18  ;;  %5753 = vmatprep.mubr.f32.mxu1 %v5000_v18  ;;  %v12414_v16 = vpop.f32.mrb[197].mxu1  ;;  %v9606_v28 = vpack.c.bf16 %v5264_v48, %v5260_v7  ;;  %v9734_v24 = vpack.c.bf16 %v5266_v23, %v5262_v60 }
 0x6ff   : > { %5432 = vmatmul.mubr.f32.gmra.mrb[154].mxu0 %v4999_v8  ;;  %5754 = vmatmul.mubr.f32.gmra.mrb[154].mxu1 %v4999_v8  ;;  %v5003_v35 = vmax.f32 %v4776_v59, 0.0  ;;  %v5263_v8 = vld [vmem:[#allocation7 + $0x7e0] sm:$0xff]  ;;  %v5998_v59 = vld [vmem:[#allocation8 + $0x8] sm:$0xff]  ;;  %v4861_v48 = vadd.f32 %v12332_v39, %v12409_v63  ;;  %v4950_v23 = vmax.f32 %v4855_v34, 0.0  ;;  %v6008_v39 = vld [vmem:[#allocation8 + $0x58] sm:$0xff] }
 0x700   : > { %v5004_v0 = vmax.f32 %v4778_v13, 0.0  ;;  %v4781_v44 = vpop.f32.mrb[198].mxu0  ;;  %9601 = vmatpush1.bf16.msra.mxu0 %v9600_v33  ;;  %9729 = vmatpush1.bf16.msra.mxu1 %v9728_v14  ;;  %v5261_v33 = vld [vmem:[#allocation7 + $0x7d0] sm:$0xff]  ;;  %v9608_v49 = vpack.c.bf16 %v5263_v8, %v5259_v40  ;;  %v6006_v40 = vld [vmem:[#allocation8 + $0x48] sm:$0xff] }
 0x701   : > { %v4782_v18 = vadd.f32 %v4781_v44, %v12316_v47  ;;  %v4783_v12 = vpop.f32.mrb[199].mxu0  ;;  %9603 = vmatprep.subr.bf16.mxu0 %v9602_v55  ;;  %9731 = vmatprep.subr.bf16.mxu1 %v9730_v42  ;;  %v5265_v14 = vld [vmem:[#allocation7 + $0x7f0] sm:$0xff]  ;;  %v12423_v13 = vpop.f32.mrb[198].mxu1  ;;  %v6002_v47 = vld [vmem:[#allocation8 + $0x28] sm:$0xff]  ;;  %v6000_v55 = vld [vmem:[#allocation8 + $0x18] sm:$0xff] }
 0x702   : > { %v4784_v36 = vadd.f32 %v4783_v12, %v12320_v5  ;;  %5437 = vmatprep.mubr.f32.mxu0 %v5004_v0  ;;  %5759 = vmatprep.mubr.f32.mxu1 %v5004_v0  ;;  %v12426_v37 = vpop.f32.mrb[199].mxu1  ;;  %v6004_v42 = vld [vmem:[#allocation8 + $0x38] sm:$0xff]  ;;  %v9736_v7 = vpack.c.bf16 %v5265_v14, %v5261_v33  ;;  %v4853_v5 = vadd.f32 %v12323_v25, %v12418_v22  ;;  %v5997_v0 = vld [vmem:[#allocation8] sm:$0xff]  ;;  %v6010_v8 = vld [vmem:[#allocation8 + $0x68] sm:$0xff]  ;;  %v4954_v25 = vmax.f32 %v4861_v48, 0.0 }
 0x703   : > { %5438 = vmatmul.mubr.f32.gmra.mrb[156].mxu0 %v5003_v35  ;;  %5760 = vmatmul.mubr.f32.gmra.mrb[156].mxu1 %v5003_v35  ;;  %v5007_v60 = vmax.f32 %v4782_v18, 0.0  ;;  %v6001_v44 = vld [vmem:[#allocation8 + $0x20] sm:$0xff]  ;;  %v9738_v35 = vpack.c.bf16 %v6002_v47, %v5998_v59  ;;  %v9866_v12 = vpack.c.bf16 %v6004_v42, %v6000_v55  ;;  %v6012_v18 = vld [vmem:[#allocation8 + $0x78] sm:$0xff]  ;;  %v9742_v47 = vpack.c.bf16 %v6010_v8, %v6006_v40  ;;  %v6007_v42 = vld [vmem:[#allocation8 + $0x50] sm:$0xff] }
 0x704   : > { %v5008_v30 = vmax.f32 %v4784_v36, 0.0  ;;  %9605 = vmatpush1.bf16.msra.mxu0 %v9604_v11  ;;  %9733 = vmatpush1.bf16.msra.mxu1 %v9732_v50  ;;  %v5999_v11 = vld [vmem:[#allocation8 + $0x10] sm:$0xff]  ;;  %v4949_v34 = vmax.f32 %v4853_v5, 0.0  ;;  %v9740_v33 = vpack.c.bf16 %v6001_v44, %v5997_v0  ;;  %v6005_v36 = vld [vmem:[#allocation8 + $0x40] sm:$0xff]  ;;  %v9870_v55 = vpack.c.bf16 %v6012_v18, %v6008_v39  ;;  %v6020_v48 = vld [vmem:[#allocation8 + $0xb8] sm:$0xff] }
 0x705   : > { %9607 = vmatprep.subr.bf16.mxu0 %v9606_v28  ;;  %9735 = vmatprep.subr.bf16.mxu1 %v9734_v24  ;;  %v6003_v50 = vld [vmem:[#allocation8 + $0x30] sm:$0xff]  ;;  %v4867_v28 = vadd.f32 %v12338_v4, %v12409_v63  ;;  %v4859_v24 = vadd.f32 %v12329_v17, %v12418_v22  ;;  %v6009_v59 = vld [vmem:[#allocation8 + $0x60] sm:$0xff]  ;;  %v6018_v4 = vld [vmem:[#allocation8 + $0xa8] sm:$0xff]  ;;  %v4873_v17 = vadd.f32 %v12344_v61, %v12409_v63 }
 0x706   : > { %5443 = vmatprep.mubr.f32.mxu0 %v5008_v30  ;;  %5765 = vmatprep.mubr.f32.mxu1 %v5008_v30  ;;  %v9868_v14 = vpack.c.bf16 %v6003_v50, %v5999_v11  ;;  %v6011_v30 = vld [vmem:[#allocation8 + $0x70] sm:$0xff]  ;;  %v9744_v0 = vpack.c.bf16 %v6009_v59, %v6005_v36  ;;  %v6022_v39 = vld [vmem:[#allocation8 + $0xc8] sm:$0xff]  ;;  %v6024_v18 = vld [vmem:[#allocation8 + $0xd8] sm:$0xff] }
 0x707   : > { %5444 = vmatmul.mubr.f32.gmra.mrb[158].mxu0 %v5007_v60  ;;  %5766 = vmatmul.mubr.f32.gmra.mrb[158].mxu1 %v5007_v60  ;;  %v4958_v60 = vmax.f32 %v4867_v28, 0.0  ;;  %v4953_v5 = vmax.f32 %v4859_v24, 0.0  ;;  %v9872_v44 = vpack.c.bf16 %v6011_v30, %v6007_v42  ;;  %v6015_v40 = vld [vmem:[#allocation8 + $0x90] sm:$0xff]  ;;  %v6026_v61 = vld [vmem:[#allocation8 + $0xe8] sm:$0xff]  ;;  %v4962_v28 = vmax.f32 %v4873_v17, 0.0  ;;  %v6021_v36 = vld [vmem:[#allocation8 + $0xc0] sm:$0xff] }
 0x708   : > { %9609 = vmatpush1.bf16.msra.mxu0 %v9608_v49  ;;  %9737 = vmatpush1.bf16.msra.mxu1 %v9736_v7  ;;  %v6014_v49 = vld [vmem:[#allocation8 + $0x88] sm:$0xff]  ;;  %v6016_v7 = vld [vmem:[#allocation8 + $0x98] sm:$0xff]  ;;  %v6019_v8 = vld [vmem:[#allocation8 + $0xb0] sm:$0xff]  ;;  %v4871_v24 = vadd.f32 %v12341_v3, %v12418_v22  ;;  %v4885_v3 = vadd.f32 %v12356_v10, %v12409_v63  ;;  %v4877_v17 = vadd.f32 %v12347_v41, %v12418_v22 }
 0x709   : > { %5514 = vmatprep.mubr.f32.mxu0 %v4950_v23  ;;  %5836 = vmatprep.mubr.f32.mxu1 %v4950_v23  ;;  %v4865_v23 = vadd.f32 %v12335_v56, %v12418_v22  ;;  %v9746_v11 = vpack.c.bf16 %v6018_v4, %v6014_v49  ;;  %v9874_v50 = vpack.c.bf16 %v6020_v48, %v6016_v7  ;;  %v6025_v59 = vld [vmem:[#allocation8 + $0xe0] sm:$0xff]  ;;  %v6023_v42 = vld [vmem:[#allocation8 + $0xd0] sm:$0xff]  ;;  %v6030_v49 = vld [vmem:[#allocation8 + $0x108] sm:$0xff] }
 0x70a   : > { %9739 = vmatprep.subr.bf16.mxu0 %v9738_v35  ;;  %9867 = vmatprep.subr.bf16.mxu1 %v9866_v12  ;;  %v6013_v35 = vld [vmem:[#allocation8 + $0x80] sm:$0xff]  ;;  %v4879_v56 = vadd.f32 %v12350_v32, %v12409_v63  ;;  %v6027_v30 = vld [vmem:[#allocation8 + $0xf0] sm:$0xff]  ;;  %v6034_v32 = vld [vmem:[#allocation8 + $0x128] sm:$0xff]  ;;  %v4891_v41 = vadd.f32 %v12362_v9, %v12409_v63 }
 0x70b   : > { %5515 = vmatmul.mubr.f32.vlgmr.msra.gmra.mrb[128].mxu0 %v4949_v34  ;;  %5837 = vmatmul.mubr.f32.vlgmr.msra.gmra.mrb[128].mxu1 %v4949_v34  ;;  %v6017_v12 = vld [vmem:[#allocation8 + $0xa0] sm:$0xff]  ;;  %v4957_v34 = vmax.f32 %v4865_v23, 0.0  ;;  %v6032_v4 = vld [vmem:[#allocation8 + $0x118] sm:$0xff]  ;;  %v9880_v23 = vpack.c.bf16 %v6027_v30, %v6023_v42  ;;  %v6042_v10 = vld [vmem:[#allocation8 + $0x168] sm:$0xff] }
 0x70c   : > { %5520 = vmatprep.mubr.f32.mxu0 %v4954_v25  ;;  %5842 = vmatprep.mubr.f32.mxu1 %v4954_v25  ;;  %v6028_v25 = vld [vmem:[#allocation8 + $0xf8] sm:$0xff]  ;;  %v4966_v48 = vmax.f32 %v4879_v56, 0.0  ;;  %v6050_v9 = vld [vmem:[#allocation8 + $0x1a8] sm:$0xff]  ;;  %v4974_v30 = vmax.f32 %v4891_v41, 0.0 }
 0x70d   : > { %9741 = vmatpush1.bf16.msra.mxu0 %v9740_v33  ;;  %9869 = vmatpush1.bf16.msra.mxu1 %v9868_v14  ;;  %v9748_v33 = vpack.c.bf16 %v6017_v12, %v6013_v35  ;;  %v9876_v14 = vpack.c.bf16 %v6019_v8, %v6015_v40  ;;  %v6036_v7 = vld [vmem:[#allocation8 + $0x138] sm:$0xff]  ;;  %v9754_v35 = vpack.c.bf16 %v6034_v32, %v6030_v49  ;;  %v6038_v40 = vld [vmem:[#allocation8 + $0x148] sm:$0xff] }
 0x70e   : > { %9743 = vmatprep.subr.bf16.mxu0 %v9742_v47  ;;  %9871 = vmatprep.subr.bf16.mxu1 %v9870_v55  ;;  %v9750_v47 = vpack.c.bf16 %v6026_v61, %v6022_v39  ;;  %v9878_v55 = vpack.c.bf16 %v6028_v25, %v6024_v18  ;;  %v9882_v12 = vpack.c.bf16 %v6036_v7, %v6032_v4  ;;  %v6040_v8 = vld [vmem:[#allocation8 + $0x158] sm:$0xff]  ;;  %v4970_v61 = vmax.f32 %v4885_v3, 0.0  ;;  %v6049_v3 = vld [vmem:[#allocation8 + $0x1a0] sm:$0xff] }
 0x70f   : > { %5521 = vmatmul.mubr.f32.gmra.mrb[130].mxu0 %v4953_v5  ;;  %5843 = vmatmul.mubr.f32.gmra.mrb[130].mxu1 %v4953_v5  ;;  %v9752_v5 = vpack.c.bf16 %v6025_v59, %v6021_v36  ;;  %v6044_v39 = vld [vmem:[#allocation8 + $0x178] sm:$0xff]  ;;  %v4965_v18 = vmax.f32 %v4877_v17, 0.0  ;;  %v4883_v25 = vadd.f32 %v12353_v2, %v12418_v22  ;;  %v6039_v36 = vld [vmem:[#allocation8 + $0x150] sm:$0xff]  ;;  %v4897_v2 = vadd.f32 %v12368_v21, %v12409_v63  ;;  %v6058_v21 = vld [vmem:[#allocation8 + $0x1e8] sm:$0xff] }
 0x710   : > { %5526 = vmatprep.mubr.f32.mxu0 %v4958_v60  ;;  %5848 = vmatprep.mubr.f32.mxu1 %v4958_v60  ;;  %v4961_v60 = vmax.f32 %v4871_v24, 0.0  ;;  %v6041_v24 = vld [vmem:[#allocation8 + $0x160] sm:$0xff]  ;;  %v6043_v59 = vld [vmem:[#allocation8 + $0x170] sm:$0xff]  ;;  %v6052_v42 = vld [vmem:[#allocation8 + $0x1b8] sm:$0xff]  ;;  %v4889_v32 = vadd.f32 %v12359_v46, %v12418_v22  ;;  %v4903_v46 = vadd.f32 %v12374_v26, %v12409_v63 }
 0x711   : > { %9745 = vmatpush1.bf16.msra.mxu0 %v9744_v0  ;;  %9873 = vmatpush1.bf16.msra.mxu1 %v9872_v44  ;;  %v6029_v0 = vld [vmem:[#allocation8 + $0x100] sm:$0xff]  ;;  %v4969_v49 = vmax.f32 %v4883_v25, 0.0  ;;  %v9888_v7 = vpack.c.bf16 %v6043_v59, %v6039_v36  ;;  %v6059_v25 = vld [vmem:[#allocation8 + $0x1f0] sm:$0xff]  ;;  %v6066_v26 = vld [vmem:[#allocation8 + $0x228] sm:$0xff] }
 0x712   : > { %9747 = vmatprep.subr.bf16.mxu0 %v9746_v11  ;;  %9875 = vmatprep.subr.bf16.mxu1 %v9874_v50  ;;  %v6033_v44 = vld [vmem:[#allocation8 + $0x120] sm:$0xff]  ;;  %v6031_v11 = vld [vmem:[#allocation8 + $0x110] sm:$0xff] }
 0x713   : > { %5527 = vmatmul.mubr.f32.gmra.mrb[132].mxu0 %v4957_v34  ;;  %5849 = vmatmul.mubr.f32.gmra.mrb[132].mxu1 %v4957_v34  ;;  %v6035_v50 = vld [vmem:[#allocation8 + $0x130] sm:$0xff]  ;;  %v6037_v34 = vld [vmem:[#allocation8 + $0x140] sm:$0xff] }
 0x714   : > { %5532 = vmatprep.mubr.f32.mxu0 %v4962_v28  ;;  %5854 = vmatprep.mubr.f32.mxu1 %v4962_v28  ;;  %v9756_v28 = vpack.c.bf16 %v6033_v44, %v6029_v0  ;;  %v9884_v56 = vpack.c.bf16 %v6035_v50, %v6031_v11  ;;  %v9760_v4 = vpack.c.bf16 %v6041_v24, %v6037_v34  ;;  %v6054_v0 = vld [vmem:[#allocation8 + $0x1c8] sm:$0xff]  ;;  %v6056_v44 = vld [vmem:[#allocation8 + $0x1d8] sm:$0xff]  ;;  %v4973_v11 = vmax.f32 %v4889_v32, 0.0 }
 0x715   : > { %9749 = vmatpush1.bf16.msra.mxu0 %v9748_v33  ;;  %9877 = vmatpush1.bf16.msra.mxu1 %v9876_v14  ;;  %v9758_v33 = vpack.c.bf16 %v6042_v10, %v6038_v40  ;;  %v9886_v14 = vpack.c.bf16 %v6044_v39, %v6040_v8  ;;  %v4895_v50 = vadd.f32 %v12365_v15, %v12418_v22  ;;  %v6053_v8 = vld [vmem:[#allocation8 + $0x1c0] sm:$0xff]  ;;  %v6068_v34 = vld [vmem:[#allocation8 + $0x238] sm:$0xff]  ;;  %v4982_v24 = vmax.f32 %v4903_v46, 0.0 }
 0x716   : > { %9751 = vmatprep.subr.bf16.mxu0 %v9750_v47  ;;  %9879 = vmatprep.subr.bf16.mxu1 %v9878_v55  ;;  %v6046_v47 = vld [vmem:[#allocation8 + $0x188] sm:$0xff]  ;;  %v6048_v55 = vld [vmem:[#allocation8 + $0x198] sm:$0xff]  ;;  %v6057_v39 = vld [vmem:[#allocation8 + $0x1e0] sm:$0xff]  ;;  %v4909_v15 = vadd.f32 %v12380_v27, %v12409_v63 }
 0x717   : > { %5533 = vmatmul.mubr.f32.gmra.mrb[134].mxu0 %v4961_v60  ;;  %5855 = vmatmul.mubr.f32.gmra.mrb[134].mxu1 %v4961_v60  ;;  %v9762_v60 = vpack.c.bf16 %v6050_v9, %v6046_v47  ;;  %v9890_v17 = vpack.c.bf16 %v6052_v42, %v6048_v55  ;;  %v9768_v36 = vpack.c.bf16 %v6057_v39, %v6053_v8  ;;  %v6061_v47 = vld [vmem:[#allocation8 + $0x200] sm:$0xff]  ;;  %v6074_v27 = vld [vmem:[#allocation8 + $0x268] sm:$0xff]  ;;  %v6072_v32 = vld [vmem:[#allocation8 + $0x258] sm:$0xff] }
 0x718   : > { %5538 = vmatprep.mubr.f32.mxu0 %v4966_v48  ;;  %5860 = vmatprep.mubr.f32.mxu1 %v4966_v48  ;;  %v6045_v48 = vld [vmem:[#allocation8 + $0x180] sm:$0xff]  ;;  %v6080_v46 = vld [vmem:[#allocation8 + $0x298] sm:$0xff] }
 0x719   : > { %9753 = vmatpush1.bf16.msra.mxu0 %v9752_v5  ;;  %9881 = vmatpush1.bf16.msra.mxu1 %v9880_v23  ;;  %v6047_v5 = vld [vmem:[#allocation8 + $0x190] sm:$0xff]  ;;  %v9764_v40 = vpack.c.bf16 %v6049_v3, %v6045_v48  ;;  %v6065_v9 = vld [vmem:[#allocation8 + $0x220] sm:$0xff]  ;;  %v4907_v3 = vadd.f32 %v12377_v51, %v12418_v22  ;;  %v4921_v51 = vadd.f32 %v12392_v45, %v12409_v63  ;;  %v6090_v45 = vld [vmem:[#allocation8 + $0x2e8] sm:$0xff] }
 0x71a   : > { %9755 = vmatprep.subr.bf16.mxu0 %v9754_v35  ;;  %9883 = vmatprep.subr.bf16.mxu1 %v9882_v12  ;;  %v6051_v23 = vld [vmem:[#allocation8 + $0x1b0] sm:$0xff]  ;;  %v6060_v35 = vld [vmem:[#allocation8 + $0x1f8] sm:$0xff]  ;;  %v4978_v12 = vmax.f32 %v4897_v2, 0.0 }
 0x71b   : > { %5539 = vmatmul.mubr.f32.gmra.mrb[136].mxu0 %v4965_v18  ;;  %5861 = vmatmul.mubr.f32.gmra.mrb[136].mxu1 %v4965_v18  ;;  %v9892_v10 = vpack.c.bf16 %v6051_v23, %v6047_v5  ;;  %v9894_v41 = vpack.c.bf16 %v6060_v35, %v6056_v44  ;;  %v6055_v18 = vld [vmem:[#allocation8 + $0x1d0] sm:$0xff]  ;;  %v6069_v5 = vld [vmem:[#allocation8 + $0x240] sm:$0xff] }
 0x71c   : > { %5544 = vmatprep.mubr.f32.mxu0 %v4970_v61  ;;  %5866 = vmatprep.mubr.f32.mxu1 %v4970_v61  ;;  %v9766_v61 = vpack.c.bf16 %v6058_v21, %v6054_v0  ;;  %v9896_v59 = vpack.c.bf16 %v6059_v25, %v6055_v18  ;;  %v6067_v2 = vld [vmem:[#allocation8 + $0x230] sm:$0xff]  ;;  %v6073_v23 = vld [vmem:[#allocation8 + $0x260] sm:$0xff] }
 0x71d   : > { %9757 = vmatpush1.bf16.msra.mxu0 %v9756_v28  ;;  %9885 = vmatpush1.bf16.msra.mxu1 %v9884_v56  ;;  %v6062_v28 = vld [vmem:[#allocation8 + $0x208] sm:$0xff]  ;;  %v6064_v56 = vld [vmem:[#allocation8 + $0x218] sm:$0xff]  ;;  %v6071_v44 = vld [vmem:[#allocation8 + $0x250] sm:$0xff]  ;;  %v9776_v8 = vpack.c.bf16 %v6073_v23, %v6069_v5 }
 0x71e   : > { %9759 = vmatprep.subr.bf16.mxu0 %v9758_v33  ;;  %9887 = vmatprep.subr.bf16.mxu1 %v9886_v14  ;;  %v4977_v33 = vmax.f32 %v4895_v50, 0.0  ;;  %v4901_v14 = vadd.f32 %v12371_v62, %v12418_v22  ;;  %v9770_v55 = vpack.c.bf16 %v6066_v26, %v6062_v28  ;;  %v9898_v42 = vpack.c.bf16 %v6068_v34, %v6064_v56  ;;  %v6075_v35 = vld [vmem:[#allocation8 + $0x270] sm:$0xff]  ;;  %v6086_v56 = vld [vmem:[#allocation8 + $0x2c8] sm:$0xff]  ;;  %v6088_v34 = vld [vmem:[#allocation8 + $0x2d8] sm:$0xff] }
 0x71f   : > { %5545 = vmatmul.mubr.f32.gmra.mrb[138].mxu0 %v4969_v49  ;;  %5867 = vmatmul.mubr.f32.gmra.mrb[138].mxu1 %v4969_v49  ;;  %v6070_v49 = vld [vmem:[#allocation8 + $0x248] sm:$0xff]  ;;  %v4915_v62 = vadd.f32 %v12386_v57, %v12409_v63  ;;  %v9904_v39 = vpack.c.bf16 %v6075_v35, %v6071_v44  ;;  %v6079_v28 = vld [vmem:[#allocation8 + $0x290] sm:$0xff]  ;;  %v6104_v35 = vld [vmem:[#allocation8 + $0x358] sm:$0xff] }
 0x720   : > { %5550 = vmatprep.mubr.f32.mxu0 %v4974_v30  ;;  %5872 = vmatprep.mubr.f32.mxu1 %v4974_v30  ;;  %v6063_v30 = vld [vmem:[#allocation8 + $0x210] sm:$0xff]  ;;  %v4981_v48 = vmax.f32 %v4901_v14, 0.0  ;;  %v9774_v0 = vpack.c.bf16 %v6074_v27, %v6070_v49  ;;  %v6082_v57 = vld [vmem:[#allocation8 + $0x2a8] sm:$0xff]  ;;  %v4919_v14 = vadd.f32 %v12389_v43, %v12418_v22  ;;  %v6096_v27 = vld [vmem:[#allocation8 + $0x318] sm:$0xff]  ;;  %v4933_v43 = vadd.f32 %v12404_v31, %v12409_v63 }
 0x721   : > { %9761 = vmatpush1.bf16.msra.mxu0 %v9760_v4  ;;  %9889 = vmatpush1.bf16.msra.mxu1 %v9888_v7  ;;  %v6076_v4 = vld [vmem:[#allocation8 + $0x278] sm:$0xff]  ;;  %v4986_v7 = vmax.f32 %v4909_v15, 0.0  ;;  %v4990_v50 = vmax.f32 %v4915_v62, 0.0  ;;  %v6083_v26 = vld [vmem:[#allocation8 + $0x2b0] sm:$0xff]  ;;  %v4994_v15 = vmax.f32 %v4921_v51, 0.0  ;;  %v6094_v49 = vld [vmem:[#allocation8 + $0x308] sm:$0xff]  ;;  %v4925_v62 = vadd.f32 %v12395_v38, %v12418_v22 }
 0x722   : > { %9763 = vmatprep.subr.bf16.mxu0 %v9762_v60  ;;  %9891 = vmatprep.subr.bf16.mxu1 %v9890_v17  ;;  %v9772_v60 = vpack.c.bf16 %v6065_v9, %v6061_v47  ;;  %v9900_v17 = vpack.c.bf16 %v6067_v2, %v6063_v30  ;;  %v9902_v21 = vpack.c.bf16 %v6076_v4, %v6072_v32  ;;  %v6085_v47 = vld [vmem:[#allocation8 + $0x2c0] sm:$0xff]  ;;  %v6087_v30 = vld [vmem:[#allocation8 + $0x2d0] sm:$0xff]  ;;  %v6100_v32 = vld [vmem:[#allocation8 + $0x338] sm:$0xff] }
 0x723   : > { %5551 = vmatmul.mubr.f32.gmra.mrb[140].mxu0 %v4973_v11  ;;  %5873 = vmatmul.mubr.f32.gmra.mrb[140].mxu1 %v4973_v11  ;;  %v6084_v11 = vld [vmem:[#allocation8 + $0x2b8] sm:$0xff]  ;;  %v6089_v9 = vld [vmem:[#allocation8 + $0x2e0] sm:$0xff]  ;;  %v6091_v2 = vld [vmem:[#allocation8 + $0x2f0] sm:$0xff]  ;;  %v9914_v23 = vpack.c.bf16 %v6100_v32, %v6096_v27  ;;  %v4939_v38 = vadd.f32 %v12414_v16, %v12409_v63 }
 0x724   : > { %5556 = vmatprep.mubr.f32.mxu0 %v4978_v12  ;;  %5878 = vmatprep.mubr.f32.mxu1 %v4978_v12  ;;  %v6078_v12 = vld [vmem:[#allocation8 + $0x288] sm:$0xff]  ;;  %v9906_v25 = vpack.c.bf16 %v6084_v11, %v6080_v46  ;;  %v4997_v46 = vmax.f32 %v4925_v62, 0.0  ;;  %v4931_v11 = vadd.f32 %v12401_v1, %v12418_v22  ;;  %v4945_v1 = vadd.f32 %v12426_v37, %v12409_v63 }
 0x725   : > { %9765 = vmatpush1.bf16.msra.mxu0 %v9764_v40  ;;  %9893 = vmatpush1.bf16.msra.mxu1 %v9892_v10  ;;  %v4985_v40 = vmax.f32 %v4907_v3, 0.0  ;;  %v4913_v10 = vadd.f32 %v12383_v20, %v12418_v22  ;;  %v9778_v18 = vpack.c.bf16 %v6082_v57, %v6078_v12  ;;  %v4927_v20 = vadd.f32 %v12398_v52, %v12409_v63  ;;  %v6098_v52 = vld [vmem:[#allocation8 + $0x328] sm:$0xff]  ;;  %v6108_v12 = vld [vmem:[#allocation8 + $0x378] sm:$0xff] }
 0x726   : > { %9767 = vmatprep.subr.bf16.mxu0 %v9766_v61  ;;  %9895 = vmatprep.subr.bf16.mxu1 %v9894_v41  ;;  %v6077_v61 = vld [vmem:[#allocation8 + $0x280] sm:$0xff]  ;;  %v9912_v3 = vpack.c.bf16 %v6091_v2, %v6087_v30  ;;  %v9786_v5 = vpack.c.bf16 %v6098_v52, %v6094_v49  ;;  %v6102_v44 = vld [vmem:[#allocation8 + $0x348] sm:$0xff]  ;;  %v5002_v57 = vmax.f32 %v4933_v43, 0.0  ;;  %v6120_v2 = vld [vmem:[#allocation8 + $0x3d8] sm:$0xff] }
 0x727   : > { %5557 = vmatmul.mubr.f32.gmra.mrb[142].mxu0 %v4977_v33  ;;  %5879 = vmatmul.mubr.f32.gmra.mrb[142].mxu1 %v4977_v33  ;;  %v6081_v41 = vld [vmem:[#allocation8 + $0x2a0] sm:$0xff]  ;;  %v4989_v33 = vmax.f32 %v4913_v10, 0.0  ;;  %v4998_v4 = vmax.f32 %v4927_v20, 0.0  ;;  %v6106_v31 = vld [vmem:[#allocation8 + $0x368] sm:$0xff]  ;;  %v6123_v43 = vld [vmem:[#allocation8 + $0x3f0] sm:$0xff] }
 0x728   : > { %5562 = vmatprep.mubr.f32.mxu0 %v4982_v24  ;;  %5884 = vmatprep.mubr.f32.mxu1 %v4982_v24  ;;  %v6092_v24 = vld [vmem:[#allocation8 + $0x2f8] sm:$0xff]  ;;  %v6105_v10 = vld [vmem:[#allocation8 + $0x360] sm:$0xff]  ;;  %v6114_v16 = vld [vmem:[#allocation8 + $0x3a8] sm:$0xff] }
 0x729   : > { %9769 = vmatpush1.bf16.msra.mxu0 %v9768_v36  ;;  %9897 = vmatpush1.bf16.msra.mxu1 %v9896_v59  ;;  %v9780_v36 = vpack.c.bf16 %v6081_v41, %v6077_v61  ;;  %v9908_v59 = vpack.c.bf16 %v6083_v26, %v6079_v28  ;;  %v6103_v61 = vld [vmem:[#allocation8 + $0x350] sm:$0xff]  ;;  %v6116_v28 = vld [vmem:[#allocation8 + $0x3b8] sm:$0xff]  ;;  %v5006_v26 = vmax.f32 %v4939_v38, 0.0  ;;  %v6122_v30 = vld [vmem:[#allocation8 + $0x3e8] sm:$0xff] }
 0x72a   : > { %9771 = vmatprep.subr.bf16.mxu0 %v9770_v55  ;;  %9899 = vmatprep.subr.bf16.mxu1 %v9898_v42  ;;  %v9782_v55 = vpack.c.bf16 %v6090_v45, %v6086_v56  ;;  %v9910_v42 = vpack.c.bf16 %v6092_v24, %v6088_v34  ;;  %v6107_v41 = vld [vmem:[#allocation8 + $0x370] sm:$0xff]  ;;  %v5001_v56 = vmax.f32 %v4931_v11, 0.0  ;;  %v4937_v45 = vadd.f32 %v12411_v54, %v12418_v22  ;;  %v6121_v52 = vld [vmem:[#allocation8 + $0x3e0] sm:$0xff]  ;;  %v6126_v62 = vld [vmem:[#allocation8 + $0x408] sm:$0xff] }
 0x72b   : > { %5563 = vmatmul.mubr.f32.gmra.mrb[144].mxu0 %v4981_v48  ;;  %5885 = vmatmul.mubr.f32.gmra.mrb[144].mxu1 %v4981_v48  ;;  %v9784_v48 = vpack.c.bf16 %v6089_v9, %v6085_v47  ;;  %v9920_v24 = vpack.c.bf16 %v6107_v41, %v6103_v61  ;;  %v5010_v47 = vmax.f32 %v4945_v1, 0.0  ;;  %v4943_v54 = vadd.f32 %v12423_v13, %v12418_v22  ;;  %v6124_v22 = vld [vmem:[#allocation8 + $0x3f8] sm:$0xff]  ;;  %v6117_v13 = vld [vmem:[#allocation8 + $0x3c0] sm:$0xff]  ;;  %v6127_v11 = vld [vmem:[#allocation8 + $0x410] sm:$0xff] }
 0x72c   : > { %5568 = vmatprep.mubr.f32.mxu0 %v4986_v7  ;;  %5890 = vmatprep.mubr.f32.mxu1 %v4986_v7  ;;  %v4993_v7 = vmax.f32 %v4919_v14, 0.0  ;;  %v6113_v14 = vld [vmem:[#allocation8 + $0x3a0] sm:$0xff]  ;;  %v5005_v63 = vmax.f32 %v4937_v45, 0.0  ;;  %v9926_v27 = vpack.c.bf16 %v6124_v22, %v6120_v2  ;;  %v9800_v32 = vpack.c.bf16 %v6121_v52, %v6117_v13  ;;  %v6140_v61 = vld [vmem:[#allocation8 + $0x478] sm:$0xff]  ;;  %v6143_v13 = vld [vmem:[#allocation8 + $0x490] sm:$0xff] }
 0x72d   : > { %9773 = vmatpush1.bf16.msra.mxu0 %v9772_v60  ;;  %9901 = vmatpush1.bf16.msra.mxu1 %v9900_v17  ;;  %v6093_v60 = vld [vmem:[#allocation8 + $0x300] sm:$0xff]  ;;  %v6147_v52 = vld [vmem:[#allocation8 + $0x4b0] sm:$0xff] }
 0x72e   : > { %9775 = vmatprep.subr.bf16.mxu0 %v9774_v0  ;;  %9903 = vmatprep.subr.bf16.mxu1 %v9902_v21  ;;  %v6097_v17 = vld [vmem:[#allocation8 + $0x320] sm:$0xff]  ;;  %v6095_v0 = vld [vmem:[#allocation8 + $0x310] sm:$0xff] }
 0x72f   : > { %5569 = vmatmul.mubr.f32.gmra.mrb[146].mxu0 %v4985_v40  ;;  %5891 = vmatmul.mubr.f32.gmra.mrb[146].mxu1 %v4985_v40  ;;  %v6099_v21 = vld [vmem:[#allocation8 + $0x330] sm:$0xff]  ;;  %v6101_v40 = vld [vmem:[#allocation8 + $0x340] sm:$0xff] }
 0x730   : > { %5574 = vmatprep.mubr.f32.mxu0 %v4990_v50  ;;  %5896 = vmatprep.mubr.f32.mxu1 %v4990_v50  ;;  %v9788_v50 = vpack.c.bf16 %v6097_v17, %v6093_v60  ;;  %v9916_v51 = vpack.c.bf16 %v6099_v21, %v6095_v0  ;;  %v9792_v34 = vpack.c.bf16 %v6105_v10, %v6101_v40  ;;  %v6132_v17 = vld [vmem:[#allocation8 + $0x438] sm:$0xff]  ;;  %v6129_v38 = vld [vmem:[#allocation8 + $0x420] sm:$0xff] }
 0x731   : > { %9777 = vmatpush1.bf16.msra.mxu0 %v9776_v8  ;;  %9905 = vmatpush1.bf16.msra.mxu1 %v9904_v39  ;;  %v9790_v8 = vpack.c.bf16 %v6106_v31, %v6102_v44  ;;  %v9918_v39 = vpack.c.bf16 %v6108_v12, %v6104_v35  ;;  %v12494_v0 = vld [vmem:[%s13082_s7] sm:$0xf]  ;;  %s13095_s7 = sld [smem:[#allocation26_spill]] }
 0x732   : > { %9779 = vmatprep.subr.bf16.mxu0 %v9778_v18  ;;  %9907 = vmatprep.subr.bf16.mxu1 %v9906_v25  ;;  %v6110_v18 = vld [vmem:[#allocation8 + $0x388] sm:$0xff]  ;;  %v6112_v25 = vld [vmem:[#allocation8 + $0x398] sm:$0xff]  ;;  %v5276_v44 = vrot.slane %v12494_v0, %v13071_v29  ;;  %v5272_v35 = vrot.slane %v12494_v0, %v13070_v6  ;;  %v6137_v1 = vld [vmem:[#allocation8 + $0x460] sm:$0xff] }
 0x733   : > { %5575 = vmatmul.mubr.f32.gmra.mrb[148].mxu0 %v4989_v33  ;;  %5897 = vmatmul.mubr.f32.gmra.mrb[148].mxu1 %v4989_v33  ;;  %v9794_v20 = vpack.c.bf16 %v6114_v16, %v6110_v18  ;;  %v9922_v33 = vpack.c.bf16 %v6116_v28, %v6112_v25 }
 0x734   : > { %5580 = vmatprep.mubr.f32.mxu0 %v4994_v15  ;;  %5902 = vmatprep.mubr.f32.mxu1 %v4994_v15  ;;  %v6109_v15 = vld [vmem:[#allocation8 + $0x380] sm:$0xff] }
 0x735   : > { %9781 = vmatpush1.bf16.msra.mxu0 %v9780_v36  ;;  %9909 = vmatpush1.bf16.msra.mxu1 %v9908_v59  ;;  %v6111_v36 = vld [vmem:[#allocation8 + $0x390] sm:$0xff]  ;;  %v9796_v37 = vpack.c.bf16 %v6113_v14, %v6109_v15 }
 0x736   : > { %9783 = vmatprep.subr.bf16.mxu0 %v9782_v55  ;;  %9911 = vmatprep.subr.bf16.mxu1 %v9910_v42  ;;  %v6115_v59 = vld [vmem:[#allocation8 + $0x3b0] sm:$0xff]  ;;  %v5009_v55 = vmax.f32 %v4943_v54, 0.0  ;;  %v6118_v42 = vld [vmem:[#allocation8 + $0x3c8] sm:$0xff] }
 0x737   : > { %5581 = vmatmul.mubr.f32.gmra.mrb[150].mxu0 %v4993_v7  ;;  %5903 = vmatmul.mubr.f32.gmra.mrb[150].mxu1 %v4993_v7  ;;  %v9924_v9 = vpack.c.bf16 %v6115_v59, %v6111_v36  ;;  %v9798_v49 = vpack.c.bf16 %v6122_v30, %v6118_v42  ;;  %v6139_v15 = vld [vmem:[#allocation8 + $0x470] sm:$0xff]  ;;  %v6146_v36 = vld [vmem:[#allocation8 + $0x4a8] sm:$0xff]  ;;  %v6144_v59 = vld [vmem:[#allocation8 + $0x498] sm:$0xff] }
 0x738   : > { %5586 = vmatprep.mubr.f32.mxu0 %v4998_v4  ;;  %5908 = vmatprep.mubr.f32.mxu1 %v4998_v4  ;;  %v6119_v4 = vld [vmem:[#allocation8 + $0x3d0] sm:$0xff]  ;;  %v6141_v42 = vld [vmem:[#allocation8 + $0x480] sm:$0xff] }
 0x739   : > { %9785 = vmatpush1.bf16.msra.mxu0 %v9784_v48  ;;  %9913 = vmatpush1.bf16.msra.mxu1 %v9912_v3  ;;  %v9928_v7 = vpack.c.bf16 %v6123_v43, %v6119_v4  ;;  %v6130_v48 = vld [vmem:[#allocation8 + $0x428] sm:$0xff]  ;;  %v6128_v3 = vld [vmem:[#allocation8 + $0x418] sm:$0xff]  ;;  %v6145_v30 = vld [vmem:[#allocation8 + $0x4a0] sm:$0xff] }
 0x73a   : > { %9787 = vmatprep.subr.bf16.mxu0 %v9786_v5  ;;  %9915 = vmatprep.subr.bf16.mxu1 %v9914_v23  ;;  %v9802_v60 = vpack.c.bf16 %v6130_v48, %v6126_v62  ;;  %v9930_v5 = vpack.c.bf16 %v6132_v17, %v6128_v3  ;;  %v12491_v23 = vld [vmem:[%s13081_s28] sm:$0xf]  ;;  %v6154_v43 = vld [vmem:[#allocation8 + $0x4e8] sm:$0xff]  ;;  %v9812_v17 = vpack.c.bf16 %v6145_v30, %v6141_v42  ;;  %s13093_s28 = sld [smem:[#allocation27_spill]] }
 0x73b   : > { %5587 = vmatmul.mubr.f32.gmra.mrb[152].mxu0 %v4997_v46  ;;  %5909 = vmatmul.mubr.f32.gmra.mrb[152].mxu1 %v4997_v46  ;;  %v3692_v21 = vrot.slane %v12491_v23, %v13071_v29  ;;  %v3688_v31 = vrot.slane %v12491_v23, %v13070_v6  ;;  %v6156_v62 = vld [vmem:[#allocation8 + $0x4f8] sm:$0xff] }
 0x73c   : > { %5592 = vmatprep.mubr.f32.mxu0 %v5002_v57  ;;  %5914 = vmatprep.mubr.f32.mxu1 %v5002_v57  ;;  %v6125_v57 = vld [vmem:[#allocation8 + $0x400] sm:$0xff] }
 0x73d   : > { %9789 = vmatpush1.bf16.msra.mxu0 %v9788_v50  ;;  %9917 = vmatpush1.bf16.msra.mxu1 %v9916_v51  ;;  %v12504_v12 = vadd.f32 %v5276_v44, %v3692_v21  ;;  %v12506_v46 = vadd.f32 %v5272_v35, %v3688_v31  ;;  %v6131_v50 = vld [vmem:[#allocation8 + $0x430] sm:$0xff]  ;;  %v6134_v51 = vld [vmem:[#allocation8 + $0x448] sm:$0xff]  ;;  %v9804_v25 = vpack.c.bf16 %v6129_v38, %v6125_v57  ;;  %v6149_v21 = vld [vmem:[#allocation8 + $0x4c0] sm:$0xff] }
 0x73e   : > { %9791 = vmatprep.subr.bf16.mxu0 %v9790_v8  ;;  %9919 = vmatprep.subr.bf16.mxu1 %v9918_v39  ;;  %v6138_v8 = vld [vmem:[#allocation8 + $0x468] sm:$0xff]  ;;  %v6136_v39 = vld [vmem:[#allocation8 + $0x458] sm:$0xff]  ;;  %v9932_v28 = vpack.c.bf16 %v6131_v50, %v6127_v11  ;;  %v6153_v44 = vld [vmem:[#allocation8 + $0x4e0] sm:$0xff] }
 0x73f   : > { %5593 = vmatmul.mubr.f32.gmra.mrb[154].mxu0 %v5001_v56  ;;  %5915 = vmatmul.mubr.f32.gmra.mrb[154].mxu1 %v5001_v56  ;;  %v9806_v45 = vpack.c.bf16 %v6138_v8, %v6134_v51  ;;  %v6151_v38 = vld [vmem:[#allocation8 + $0x4d0] sm:$0xff]  ;;  %v6158_v50 = vld [vmem:[#allocation8 + $0x508] sm:$0xff] }
 0x740   : > { %5598 = vmatprep.mubr.f32.mxu0 %v5006_v26  ;;  %5920 = vmatprep.mubr.f32.mxu1 %v5006_v26  ;;  %v6133_v26 = vld [vmem:[#allocation8 + $0x440] sm:$0xff]  ;;  %v6155_v11 = vld [vmem:[#allocation8 + $0x4f0] sm:$0xff]  ;;  %v6162_v8 = vld [vmem:[#allocation8 + $0x528] sm:$0xff] }
 0x741   : > { %9793 = vmatpush1.bf16.msra.mxu0 %v9792_v34  ;;  %9921 = vmatpush1.bf16.msra.mxu1 %v9920_v24  ;;  %v9934_v34 = vpack.c.bf16 %v6140_v61, %v6136_v39  ;;  %v6135_v24 = vld [vmem:[#allocation8 + $0x450] sm:$0xff]  ;;  %v6160_v39 = vld [vmem:[#allocation8 + $0x518] sm:$0xff] }
 0x742   : > { %9795 = vmatprep.subr.bf16.mxu0 %v9794_v20  ;;  %9923 = vmatprep.subr.bf16.mxu1 %v9922_v33  ;;  %v6142_v20 = vld [vmem:[#allocation8 + $0x488] sm:$0xff]  ;;  %v6164_v61 = vld [vmem:[#allocation8 + $0x538] sm:$0xff] }
 0x743   : > { %5599 = vmatmul.mubr.f32.gmra.mrb[156].mxu0 %v5005_v63  ;;  %5921 = vmatmul.mubr.f32.gmra.mrb[156].mxu1 %v5005_v63 }
 0x744   : > { %5604 = vmatprep.mubr.f32.mxu0 %v5010_v47  ;;  %5926 = vmatprep.mubr.f32.mxu1 %v5010_v47  ;;  %v6148_v47 = vld [vmem:[#allocation8 + $0x4b8] sm:$0xff] }
 0x745   : > { %9797 = vmatpush1.bf16.msra.mxu0 %v9796_v37  ;;  %9925 = vmatpush1.bf16.msra.mxu1 %v9924_v9  ;;  %v9808_v9 = vpack.c.bf16 %v6137_v1, %v6133_v26  ;;  %v9938_v22 = vpack.c.bf16 %v6148_v47, %v6144_v59  ;;  %v9944_v26 = vpack.c.bf16 %v6155_v11, %v6151_v38  ;;  %v6157_v1 = vld [vmem:[#allocation8 + $0x500] sm:$0xff]  ;;  %v6170_v47 = vld [vmem:[#allocation8 + $0x568] sm:$0xff] }
 0x746   : > { %9799 = vmatprep.subr.bf16.mxu0 %v9798_v49  ;;  %9927 = vmatprep.subr.bf16.mxu1 %v9926_v27  ;;  %v9810_v49 = vpack.c.bf16 %v6146_v36, %v6142_v20  ;;  %v6150_v27 = vld [vmem:[#allocation8 + $0x4c8] sm:$0xff]  ;;  %v6163_v20 = vld [vmem:[#allocation8 + $0x530] sm:$0xff]  ;;  %v6173_v38 = vld [vmem:[#allocation8 + $0x580] sm:$0xff] }
 0x747   : > { %5605 = vmatmul.mubr.f32.gmra.mrb[158].mxu0 %v5009_v55  ;;  %5927 = vmatmul.mubr.f32.gmra.mrb[158].mxu1 %v5009_v55  ;;  %v9936_v55 = vpack.c.bf16 %v6139_v15, %v6135_v24  ;;  %v9814_v35 = vpack.c.bf16 %v6154_v43, %v6150_v27  ;;  %v9946_v24 = vpack.c.bf16 %v6164_v61, %v6160_v39  ;;  %v6159_v15 = vld [vmem:[#allocation8 + $0x510] sm:$0xff]  ;;  %v6177_v11 = vld [vmem:[#allocation8 + $0x5a0] sm:$0xff] }
 0x748   : > { %v6171_v43 = vld [vmem:[#allocation8 + $0x570] sm:$0xff] }
 0x749   : > { %9801 = vmatpush1.bf16.msra.mxu0 %v9800_v32  ;;  %9929 = vmatpush1.bf16.msra.mxu1 %v9928_v7  ;;  %v6152_v7 = vld [vmem:[#allocation8 + $0x4d8] sm:$0xff]  ;;  %v6175_v39 = vld [vmem:[#allocation8 + $0x590] sm:$0xff] }
 0x74a   : > { %9803 = vmatprep.subr.bf16.mxu0 %v9802_v60  ;;  %9931 = vmatprep.subr.bf16.mxu1 %v9930_v5  ;;  %v9940_v5 = vpack.c.bf16 %v6147_v52, %v6143_v13  ;;  %v9942_v57 = vpack.c.bf16 %v6156_v62, %v6152_v7  ;;  %v6174_v7 = vld [vmem:[#allocation8 + $0x588] sm:$0xff]  ;;  %v6179_v61 = vld [vmem:[#allocation8 + $0x5b0] sm:$0xff] }
 0x7de   : > { %v5516_v40 = vpop.f32.mrb[128].mxu0  ;;  %v12508_v10 = vpop.f32.mrb[128].mxu1 }
 0x7df   : > { %v5518_v41 = vpop.f32.mrb[129].mxu0  ;;  %v12510_v18 = vpop.f32.mrb[129].mxu1  ;;  %v10189_v56 = vadd.f32 %v12506_v46, %v5516_v40 }
 0x7e0   : > { %v10191_v16 = vadd.f32 %v12504_v12, %v5518_v41 }
 0x7e2   : > { %v5522_v33 = vpop.f32.mrb[130].mxu0  ;;  %v12514_v14 = vpop.f32.mrb[130].mxu1  ;;  %6339 = vmatprep.mubr.f32.mxu0 %v10191_v16  ;;  %6661 = vmatprep.mubr.f32.mxu1 %v10191_v16 }
 0x7e3   : > { %v5524_v63 = vpop.f32.mrb[131].mxu0  ;;  %v12516_v54 = vpop.f32.mrb[131].mxu1  ;;  %6340 = vmatmul.mubr.f32.vlgmr.msra.gmra.mrb[200].mxu0 %v10189_v56  ;;  %6662 = vmatmul.mubr.f32.vlgmr.msra.gmra.mrb[200].mxu1 %v10189_v56  ;;  %v10193_v2 = vadd.f32 %v12506_v46, %v5522_v33  ;;  %v6161_v56 = vld [vmem:[#allocation8 + $0x520] sm:$0xff]  ;;  %v6166_v33 = vld [vmem:[#allocation8 + $0x548] sm:$0xff] }
 0x7e4   : > { %v10195_v37 = vadd.f32 %v12504_v12, %v5524_v63  ;;  %9805 = vmatpush1.bf16.msra.mxu0 %v9804_v25  ;;  %9933 = vmatpush1.bf16.msra.mxu1 %v9932_v28  ;;  %v9816_v28 = vpack.c.bf16 %v6153_v44, %v6149_v21  ;;  %v6168_v63 = vld [vmem:[#allocation8 + $0x558] sm:$0xff]  ;;  %v9820_v30 = vpack.c.bf16 %v6161_v56, %v6157_v1 }
 0x7e5   : > { %9807 = vmatprep.subr.bf16.mxu0 %v9806_v45  ;;  %9935 = vmatprep.subr.bf16.mxu1 %v9934_v34  ;;  %v9818_v34 = vpack.c.bf16 %v6162_v8, %v6158_v50  ;;  %v9822_v52 = vpack.c.bf16 %v6170_v47, %v6166_v33  ;;  %v6184_v1 = vld [vmem:[#allocation8 + $0x5d8] sm:$0xff]  ;;  %v6181_v33 = vld [vmem:[#allocation8 + $0x5c0] sm:$0xff] }
 0x7e6   : > { %v5528_v32 = vpop.f32.mrb[132].mxu0  ;;  %v12520_v4 = vpop.f32.mrb[132].mxu1  ;;  %6345 = vmatprep.mubr.f32.mxu0 %v10195_v37  ;;  %6667 = vmatprep.mubr.f32.mxu1 %v10195_v37  ;;  %v6172_v37 = vld [vmem:[#allocation8 + $0x578] sm:$0xff] }
 0x7e7   : > { %v5530_v48 = vpop.f32.mrb[133].mxu0  ;;  %v12522_v3 = vpop.f32.mrb[133].mxu1  ;;  %6346 = vmatmul.mubr.f32.gmra.mrb[202].mxu0 %v10193_v2  ;;  %6668 = vmatmul.mubr.f32.gmra.mrb[202].mxu1 %v10193_v2  ;;  %v10197_v31 = vadd.f32 %v12506_v46, %v5528_v32  ;;  %v9948_v2 = vpack.c.bf16 %v6163_v20, %v6159_v15  ;;  %v9950_v27 = vpack.c.bf16 %v6172_v37, %v6168_v63  ;;  %v6167_v32 = vld [vmem:[#allocation8 + $0x550] sm:$0xff]  ;;  %v6188_v56 = vld [vmem:[#allocation8 + $0x5f8] sm:$0xff] }
 0x7e8   : > { %v10199_v60 = vadd.f32 %v12504_v12, %v5530_v48  ;;  %9809 = vmatpush1.bf16.msra.mxu0 %v9808_v9  ;;  %9937 = vmatpush1.bf16.msra.mxu1 %v9936_v55  ;;  %v9828_v15 = vpack.c.bf16 %v6177_v11, %v6173_v38  ;;  %v9956_v20 = vpack.c.bf16 %v6179_v61, %v6175_v39  ;;  %v6198_v38 = vld [vmem:[#allocation8 + $0x648] sm:$0xff]  ;;  %v6204_v39 = vld [vmem:[#allocation8 + $0x678] sm:$0xff] }
 0x7e9   : > { %9811 = vmatprep.subr.bf16.mxu0 %v9810_v49  ;;  %9939 = vmatprep.subr.bf16.mxu1 %v9938_v22  ;;  %v6165_v49 = vld [vmem:[#allocation8 + $0x540] sm:$0xff]  ;;  %v9958_v37 = vpack.c.bf16 %v6188_v56, %v6184_v1 }
 0x7ea   : > { %v5534_v51 = vpop.f32.mrb[134].mxu0  ;;  %v12526_v40 = vpop.f32.mrb[134].mxu1  ;;  %6351 = vmatprep.mubr.f32.mxu0 %v10199_v60  ;;  %6673 = vmatprep.mubr.f32.mxu1 %v10199_v60  ;;  %v6169_v22 = vld [vmem:[#allocation8 + $0x560] sm:$0xff]  ;;  %v6178_v60 = vld [vmem:[#allocation8 + $0x5a8] sm:$0xff] }
 0x7eb   : > { %v5536_v41 = vpop.f32.mrb[135].mxu0  ;;  %v12528_v16 = vpop.f32.mrb[135].mxu1  ;;  %6352 = vmatmul.mubr.f32.gmra.mrb[204].mxu0 %v10197_v31  ;;  %6674 = vmatmul.mubr.f32.gmra.mrb[204].mxu1 %v10197_v31  ;;  %v10201_v45 = vadd.f32 %v12506_v46, %v5534_v51  ;;  %v9826_v51 = vpack.c.bf16 %v6178_v60, %v6174_v7  ;;  %v6189_v60 = vld [vmem:[#allocation8 + $0x600] sm:$0xff] }
 0x7ec   : > { %v10203_v25 = vadd.f32 %v12504_v12, %v5536_v41  ;;  %9813 = vmatpush1.bf16.msra.mxu0 %v9812_v17  ;;  %9941 = vmatpush1.bf16.msra.mxu1 %v9940_v5  ;;  %v6176_v17 = vld [vmem:[#allocation8 + $0x598] sm:$0xff]  ;;  %v6182_v41 = vld [vmem:[#allocation8 + $0x5c8] sm:$0xff]  ;;  %v6197_v56 = vld [vmem:[#allocation8 + $0x640] sm:$0xff] }
 0x7ed   : > { %9815 = vmatprep.subr.bf16.mxu0 %v9814_v35  ;;  %9943 = vmatprep.subr.bf16.mxu1 %v9942_v57  ;;  %v6180_v5 = vld [vmem:[#allocation8 + $0x5b8] sm:$0xff]  ;;  %v9824_v35 = vpack.c.bf16 %v6169_v22, %v6165_v49  ;;  %v9952_v57 = vpack.c.bf16 %v6171_v43, %v6167_v32  ;;  %v6194_v22 = vld [vmem:[#allocation8 + $0x628] sm:$0xff] }
 0x7ee   : > { %v5540_v36 = vpop.f32.mrb[136].mxu0  ;;  %v12532_v59 = vpop.f32.mrb[136].mxu1  ;;  %6357 = vmatprep.mubr.f32.mxu0 %v10203_v25  ;;  %6679 = vmatprep.mubr.f32.mxu1 %v10203_v25  ;;  %v9954_v8 = vpack.c.bf16 %v6180_v5, %v6176_v17  ;;  %v6193_v17 = vld [vmem:[#allocation8 + $0x620] sm:$0xff] }
 0x7ef   : > { %v5542_v9 = vpop.f32.mrb[137].mxu0  ;;  %v12534_v55 = vpop.f32.mrb[137].mxu1  ;;  %6358 = vmatmul.mubr.f32.gmra.mrb[206].mxu0 %v10201_v45  ;;  %6680 = vmatmul.mubr.f32.gmra.mrb[206].mxu1 %v10201_v45  ;;  %v10205_v13 = vadd.f32 %v12506_v46, %v5540_v36  ;;  %v6185_v36 = vld [vmem:[#allocation8 + $0x5e0] sm:$0xff] }
 0x7f0   : > { %v10207_v42 = vadd.f32 %v12504_v12, %v5542_v9  ;;  %9817 = vmatpush1.bf16.msra.mxu0 %v9816_v28  ;;  %9945 = vmatpush1.bf16.msra.mxu1 %v9944_v26  ;;  %v6186_v26 = vld [vmem:[#allocation8 + $0x5e8] sm:$0xff]  ;;  %v6183_v9 = vld [vmem:[#allocation8 + $0x5d0] sm:$0xff]  ;;  %v9832_v7 = vpack.c.bf16 %v6185_v36, %v6181_v33 }
 0x7f1   : > { %9819 = vmatprep.subr.bf16.mxu0 %v9818_v34  ;;  %9947 = vmatprep.subr.bf16.mxu1 %v9946_v24  ;;  %v9830_v63 = vpack.c.bf16 %v6186_v26, %v6182_v41  ;;  %v9836_v26 = vpack.c.bf16 %v6193_v17, %v6189_v60  ;;  %v6199_v33 = vld [vmem:[#allocation8 + $0x650] sm:$0xff] }
 0x7f2   : > { %v5546_v62 = vpop.f32.mrb[138].mxu0  ;;  %v12538_v48 = vpop.f32.mrb[138].mxu1  ;;  %6363 = vmatprep.mubr.f32.mxu0 %v10207_v42  ;;  %6685 = vmatprep.mubr.f32.mxu1 %v10207_v42  ;;  %v6187_v42 = vld [vmem:[#allocation8 + $0x5f0] sm:$0xff] }
 0x7f3   : > { %v5548_v21 = vpop.f32.mrb[139].mxu0  ;;  %v12540_v44 = vpop.f32.mrb[139].mxu1  ;;  %6364 = vmatmul.mubr.f32.gmra.mrb[208].mxu0 %v10205_v13  ;;  %6686 = vmatmul.mubr.f32.gmra.mrb[208].mxu1 %v10205_v13  ;;  %v10209_v50 = vadd.f32 %v12506_v46, %v5546_v62  ;;  %v6192_v13 = vld [vmem:[#allocation8 + $0x618] sm:$0xff]  ;;  %v9960_v62 = vpack.c.bf16 %v6187_v42, %v6183_v9  ;;  %v6203_v36 = vld [vmem:[#allocation8 + $0x670] sm:$0xff]  ;;  %v6210_v9 = vld [vmem:[#allocation8 + $0x6a8] sm:$0xff] }
 0x7f4   : > { %v10211_v31 = vadd.f32 %v12504_v12, %v5548_v21  ;;  %9821 = vmatpush1.bf16.msra.mxu0 %v9820_v30  ;;  %9949 = vmatpush1.bf16.msra.mxu1 %v9948_v2  ;;  %v6190_v30 = vld [vmem:[#allocation8 + $0x608] sm:$0xff]  ;;  %v6208_v42 = vld [vmem:[#allocation8 + $0x698] sm:$0xff] }
 0x7f5   : > { %9823 = vmatprep.subr.bf16.mxu0 %v9822_v52  ;;  %9951 = vmatprep.subr.bf16.mxu1 %v9950_v27  ;;  %v6196_v52 = vld [vmem:[#allocation8 + $0x638] sm:$0xff]  ;;  %v9834_v21 = vpack.c.bf16 %v6194_v22, %v6190_v30 }
 0x7f6   : > { %v5552_v25 = vpop.f32.mrb[140].mxu0  ;;  %v12544_v28 = vpop.f32.mrb[140].mxu1  ;;  %6369 = vmatprep.mubr.f32.mxu0 %v10211_v31  ;;  %6691 = vmatprep.mubr.f32.mxu1 %v10211_v31  ;;  %v9962_v31 = vpack.c.bf16 %v6196_v52, %v6192_v13  ;;  %v6212_v30 = vld [vmem:[#allocation8 + $0x6b8] sm:$0xff] }
 0x7f7   : > { %v5554_v45 = vpop.f32.mrb[141].mxu0  ;;  %v12546_v34 = vpop.f32.mrb[141].mxu1  ;;  %6370 = vmatmul.mubr.f32.gmra.mrb[210].mxu0 %v10209_v50  ;;  %6692 = vmatmul.mubr.f32.gmra.mrb[210].mxu1 %v10209_v50  ;;  %v10213_v47 = vadd.f32 %v12506_v46, %v5552_v25  ;;  %v9970_v17 = vpack.c.bf16 %v6212_v30, %v6208_v42  ;;  %v6224_v42 = vld [vmem:[#allocation8 + $0x718] sm:$0xff] }
 0x7f8   : > { %v10215_v24 = vadd.f32 %v12504_v12, %v5554_v45  ;;  %9825 = vmatpush1.bf16.msra.mxu0 %v9824_v35  ;;  %9953 = vmatpush1.bf16.msra.mxu1 %v9952_v57  ;;  %v6191_v35 = vld [vmem:[#allocation8 + $0x610] sm:$0xff]  ;;  %v6201_v45 = vld [vmem:[#allocation8 + $0x660] sm:$0xff]  ;;  %v6228_v30 = vld [vmem:[#allocation8 + $0x738] sm:$0xff] }
 0x7f9   : > { %9827 = vmatprep.subr.bf16.mxu0 %v9826_v51  ;;  %9955 = vmatprep.subr.bf16.mxu1 %v9954_v8  ;;  %v6195_v57 = vld [vmem:[#allocation8 + $0x630] sm:$0xff]  ;;  %v6202_v51 = vld [vmem:[#allocation8 + $0x668] sm:$0xff]  ;;  %v6200_v8 = vld [vmem:[#allocation8 + $0x658] sm:$0xff]  ;;  %v9840_v52 = vpack.c.bf16 %v6201_v45, %v6197_v56 }
 0x7fa   : > { %v5558_v2 = vpop.f32.mrb[142].mxu0  ;;  %v12550_v49 = vpop.f32.mrb[142].mxu1  ;;  %6375 = vmatprep.mubr.f32.mxu0 %v10215_v24  ;;  %6697 = vmatprep.mubr.f32.mxu1 %v10215_v24  ;;  %v9964_v1 = vpack.c.bf16 %v6195_v57, %v6191_v35  ;;  %v6217_v56 = vld [vmem:[#allocation8 + $0x6e0] sm:$0xff] }
 0x7fb   : > { %v5560_v27 = vpop.f32.mrb[143].mxu0  ;;  %v12552_v32 = vpop.f32.mrb[143].mxu1  ;;  %6376 = vmatmul.mubr.f32.gmra.mrb[212].mxu0 %v10213_v47  ;;  %6698 = vmatmul.mubr.f32.gmra.mrb[212].mxu1 %v10213_v47  ;;  %v10217_v5 = vadd.f32 %v12506_v46, %v5558_v2  ;;  %v6206_v47 = vld [vmem:[#allocation8 + $0x688] sm:$0xff] }
 0x7fc   : > { %v10219_v43 = vadd.f32 %v12504_v12, %v5560_v27  ;;  %9829 = vmatpush1.bf16.msra.mxu0 %v9828_v15  ;;  %9957 = vmatpush1.bf16.msra.mxu1 %v9956_v20  ;;  %v9838_v15 = vpack.c.bf16 %v6202_v51, %v6198_v38  ;;  %v9966_v20 = vpack.c.bf16 %v6204_v39, %v6200_v8  ;;  %v6218_v38 = vld [vmem:[#allocation8 + $0x6e8] sm:$0xff]  ;;  %v6220_v51 = vld [vmem:[#allocation8 + $0x6f8] sm:$0xff] }
 0x7fd   : > { %9831 = vmatprep.subr.bf16.mxu0 %v9830_v63  ;;  %9959 = vmatprep.subr.bf16.mxu1 %v9958_v37  ;;  %v9968_v27 = vpack.c.bf16 %v6203_v36, %v6199_v33  ;;  %v9842_v60 = vpack.c.bf16 %v6210_v9, %v6206_v47  ;;  %v6219_v33 = vld [vmem:[#allocation8 + $0x6f0] sm:$0xff]  ;;  %v6222_v36 = vld [vmem:[#allocation8 + $0x708] sm:$0xff] }
 0x7fe   : > { %v5564_v11 = vpop.f32.mrb[144].mxu0  ;;  %v12556_v50 = vpop.f32.mrb[144].mxu1  ;;  %6381 = vmatprep.mubr.f32.mxu0 %v10219_v43  ;;  %6703 = vmatprep.mubr.f32.mxu1 %v10219_v43  ;;  %v6205_v43 = vld [vmem:[#allocation8 + $0x680] sm:$0xff]  ;;  %v6226_v9 = vld [vmem:[#allocation8 + $0x728] sm:$0xff] }
 0x7ff   : > { %v5566_v61 = vpop.f32.mrb[145].mxu0  ;;  %v12558_v41 = vpop.f32.mrb[145].mxu1  ;;  %6382 = vmatmul.mubr.f32.gmra.mrb[214].mxu0 %v10217_v5  ;;  %6704 = vmatmul.mubr.f32.gmra.mrb[214].mxu1 %v10217_v5  ;;  %v10221_v24 = vadd.f32 %v12506_v46, %v5564_v11  ;;  %v6207_v5 = vld [vmem:[#allocation8 + $0x690] sm:$0xff]  ;;  %v6216_v11 = vld [vmem:[#allocation8 + $0x6d8] sm:$0xff] }
 0x800   : > { %v10223_v25 = vadd.f32 %v12504_v12, %v5566_v61  ;;  %9833 = vmatpush1.bf16.msra.mxu0 %v9832_v7  ;;  %9961 = vmatpush1.bf16.msra.mxu1 %v9960_v62  ;;  %v6209_v7 = vld [vmem:[#allocation8 + $0x6a0] sm:$0xff] }
 0x801   : > { %9835 = vmatprep.subr.bf16.mxu0 %v9834_v21  ;;  %9963 = vmatprep.subr.bf16.mxu1 %v9962_v31  ;;  %v6211_v21 = vld [vmem:[#allocation8 + $0x6b0] sm:$0xff]  ;;  %v6214_v31 = vld [vmem:[#allocation8 + $0x6c8] sm:$0xff] }
 0x802   : > { %v5570_v63 = vpop.f32.mrb[146].mxu0  ;;  %v12562_v37 = vpop.f32.mrb[146].mxu1  ;;  %6387 = vmatprep.mubr.f32.mxu0 %v10223_v25  ;;  %6709 = vmatprep.mubr.f32.mxu1 %v10223_v25  ;;  %v9844_v25 = vpack.c.bf16 %v6209_v7, %v6205_v43  ;;  %v6221_v7 = vld [vmem:[#allocation8 + $0x700] sm:$0xff] }
 0x803   : > { %v5572_v2 = vpop.f32.mrb[147].mxu0  ;;  %v12564_v22 = vpop.f32.mrb[147].mxu1  ;;  %6388 = vmatmul.mubr.f32.gmra.mrb[216].mxu0 %v10221_v24  ;;  %6710 = vmatmul.mubr.f32.gmra.mrb[216].mxu1 %v10221_v24  ;;  %v10225_v62 = vadd.f32 %v12506_v46, %v5570_v63  ;;  %v9846_v24 = vpack.c.bf16 %v6218_v38, %v6214_v31  ;;  %v6227_v31 = vld [vmem:[#allocation8 + $0x730] sm:$0xff] }
 0x804   : > { %v10227_v13 = vadd.f32 %v12504_v12, %v5572_v2  ;;  %9837 = vmatpush1.bf16.msra.mxu0 %v9836_v26  ;;  %9965 = vmatpush1.bf16.msra.mxu1 %v9964_v1  ;;  %v9972_v26 = vpack.c.bf16 %v6211_v21, %v6207_v5  ;;  %v6213_v1 = vld [vmem:[#allocation8 + $0x6c0] sm:$0xff]  ;;  %v9978_v5 = vpack.c.bf16 %v6228_v30, %v6224_v42  ;;  %v6223_v21 = vld [vmem:[#allocation8 + $0x710] sm:$0xff]  ;;  %v6238_v42 = vld [vmem:[#allocation8 + $0x788] sm:$0xff] }
 0x805   : > { %9839 = vmatprep.subr.bf16.mxu0 %v9838_v15  ;;  %9967 = vmatprep.subr.bf16.mxu1 %v9966_v20  ;;  %v9974_v15 = vpack.c.bf16 %v6220_v51, %v6216_v11  ;;  %v6215_v20 = vld [vmem:[#allocation8 + $0x6d0] sm:$0xff]  ;;  %v6234_v51 = vld [vmem:[#allocation8 + $0x768] sm:$0xff] }
 0x806   : > { %v5576_v35 = vpop.f32.mrb[148].mxu0  ;;  %v12568_v57 = vpop.f32.mrb[148].mxu1  ;;  %6393 = vmatprep.mubr.f32.mxu0 %v10227_v13  ;;  %6715 = vmatprep.mubr.f32.mxu1 %v10227_v13  ;;  %v9976_v43 = vpack.c.bf16 %v6219_v33, %v6215_v20 }
 0x807   : > { %v5578_v8 = vpop.f32.mrb[149].mxu0  ;;  %v12570_v39 = vpop.f32.mrb[149].mxu1  ;;  %6394 = vmatmul.mubr.f32.gmra.mrb[218].mxu0 %v10225_v62  ;;  %6716 = vmatmul.mubr.f32.gmra.mrb[218].mxu1 %v10225_v62  ;;  %v10229_v45 = vadd.f32 %v12506_v46, %v5576_v35  ;;  %v6225_v62 = vld [vmem:[#allocation8 + $0x720] sm:$0xff]  ;;  %v6230_v35 = vld [vmem:[#allocation8 + $0x748] sm:$0xff] }
 0x808   : > { %v10231_v61 = vadd.f32 %v12504_v12, %v5578_v8  ;;  %9841 = vmatpush1.bf16.msra.mxu0 %v9840_v52  ;;  %9969 = vmatpush1.bf16.msra.mxu1 %v9968_v27  ;;  %v9848_v27 = vpack.c.bf16 %v6217_v56, %v6213_v1  ;;  %v6232_v8 = vld [vmem:[#allocation8 + $0x758] sm:$0xff]  ;;  %v9852_v56 = vpack.c.bf16 %v6225_v62, %v6221_v7 }
 0x809   : > { %9843 = vmatprep.subr.bf16.mxu0 %v9842_v60  ;;  %9971 = vmatprep.subr.bf16.mxu1 %v9970_v17  ;;  %v9850_v17 = vpack.c.bf16 %v6226_v9, %v6222_v36  ;;  %v9854_v33 = vpack.c.bf16 %v6234_v51, %v6230_v35  ;;  %v6235_v9 = vld [vmem:[#allocation8 + $0x770] sm:$0xff] }
 0x80a   : > { %v5582_v47 = vpop.f32.mrb[150].mxu0  ;;  %v12574_v63 = vpop.f32.mrb[150].mxu1  ;;  %6399 = vmatprep.mubr.f32.mxu0 %v10231_v61  ;;  %6721 = vmatprep.mubr.f32.mxu1 %v10231_v61  ;;  %v6236_v61 = vld [vmem:[#allocation8 + $0x778] sm:$0xff] }
 0x80b   : > { %v5584_v2 = vpop.f32.mrb[151].mxu0  ;;  %v12576_v13 = vpop.f32.mrb[151].mxu1  ;;  %6400 = vmatmul.mubr.f32.gmra.mrb[220].mxu0 %v10229_v45  ;;  %6722 = vmatmul.mubr.f32.gmra.mrb[220].mxu1 %v10229_v45  ;;  %v10233_v60 = vadd.f32 %v12506_v46, %v5582_v47  ;;  %v9980_v45 = vpack.c.bf16 %v6227_v31, %v6223_v21  ;;  %v9982_v36 = vpack.c.bf16 %v6236_v61, %v6232_v8  ;;  %v6231_v47 = vld [vmem:[#allocation8 + $0x750] sm:$0xff]  ;;  %v6237_v21 = vld [vmem:[#allocation8 + $0x780] sm:$0xff] }
 0x80c   : > { %v10235_v52 = vadd.f32 %v12504_v12, %v5584_v2  ;;  %9845 = vmatpush1.bf16.msra.mxu0 %v9844_v25  ;;  %9973 = vmatpush1.bf16.msra.mxu1 %v9972_v26  ;;  %v6241_v31 = vld [vmem:[#allocation8 + $0x7a0] sm:$0xff]  ;;  %v6239_v8 = vld [vmem:[#allocation8 + $0x790] sm:$0xff] }
 0x80d   : > { %9847 = vmatprep.subr.bf16.mxu0 %v9846_v24  ;;  %9975 = vmatprep.subr.bf16.mxu1 %v9974_v15  ;;  %v6229_v24 = vld [vmem:[#allocation8 + $0x740] sm:$0xff]  ;;  %v6243_v61 = vld [vmem:[#allocation8 + $0x7b0] sm:$0xff] }
 0x80e   : > { %v5588_v38 = vpop.f32.mrb[152].mxu0  ;;  %v12580_v11 = vpop.f32.mrb[152].mxu1  ;;  %6405 = vmatprep.mubr.f32.mxu0 %v10235_v52  ;;  %6727 = vmatprep.mubr.f32.mxu1 %v10235_v52  ;;  %v6233_v15 = vld [vmem:[#allocation8 + $0x760] sm:$0xff]  ;;  %v6242_v52 = vld [vmem:[#allocation8 + $0x7a8] sm:$0xff] }
 0x80f   : > { %v5590_v25 = vpop.f32.mrb[153].mxu0  ;;  %v12582_v26 = vpop.f32.mrb[153].mxu1  ;;  %6406 = vmatmul.mubr.f32.gmra.mrb[222].mxu0 %v10233_v60  ;;  %6728 = vmatmul.mubr.f32.gmra.mrb[222].mxu1 %v10233_v60  ;;  %v10237_v20 = vadd.f32 %v12506_v46, %v5588_v38  ;;  %v9858_v38 = vpack.c.bf16 %v6242_v52, %v6238_v42  ;;  %v9860_v52 = vpack.c.bf16 %v6241_v31, %v6237_v21  ;;  %v6999_v21 = vld [vmem:[%s13083_s18 + $0x80] sm:$0xff] }
 0x810   : > { %v10239_v1 = vadd.f32 %v12504_v12, %v5590_v25  ;;  %9849 = vmatpush1.bf16.msra.mxu0 %v9848_v27  ;;  %9977 = vmatpush1.bf16.msra.mxu1 %v9976_v43  ;;  %v6240_v27 = vld [vmem:[#allocation8 + $0x798] sm:$0xff]  ;;  %v6246_v25 = vld [vmem:[#allocation8 + $0x7c8] sm:$0xff] }
 0x811   : > { %9851 = vmatprep.subr.bf16.mxu0 %v9850_v17  ;;  %9979 = vmatprep.subr.bf16.mxu1 %v9978_v5  ;;  %v6244_v43 = vld [vmem:[#allocation8 + $0x7b8] sm:$0xff]  ;;  %v9856_v17 = vpack.c.bf16 %v6233_v15, %v6229_v24  ;;  %v9984_v5 = vpack.c.bf16 %v6235_v9, %v6231_v47  ;;  %v6250_v15 = vld [vmem:[#allocation8 + $0x7e8] sm:$0xff]  ;;  %v5280_v47 = vrot.slane %v12494_v0, %v11936_v58 }
 0x812   : > { %v5594_v30 = vpop.f32.mrb[154].mxu0  ;;  %v12586_v2 = vpop.f32.mrb[154].mxu1  ;;  %6411 = vmatprep.mubr.f32.mxu0 %v10239_v1  ;;  %6733 = vmatprep.mubr.f32.mxu1 %v10239_v1  ;;  %v9986_v51 = vpack.c.bf16 %v6244_v43, %v6240_v27  ;;  %v3700_v1 = vrot.slane %v12491_v23, %v13080_v19  ;;  %v9988_v27 = vpack.c.bf16 %v6243_v61, %v6239_v8  ;;  %v7031_v8 = vld [vmem:[%s13083_s18 + $0x180] sm:$0xff]  ;;  %v7032_v61 = vld [vmem:[%s13083_s18 + $0x188] sm:$0xff] }
 0x813   : > { %v5596_v7 = vpop.f32.mrb[155].mxu0  ;;  %v12588_v62 = vpop.f32.mrb[155].mxu1  ;;  %6412 = vmatmul.mubr.f32.gmra.mrb[224].mxu0 %v10237_v20  ;;  %6734 = vmatmul.mubr.f32.gmra.mrb[224].mxu1 %v10237_v20  ;;  %v10241_v35 = vadd.f32 %v12506_v46, %v5594_v30  ;;  %v6248_v20 = vld [vmem:[#allocation8 + $0x7d8] sm:$0xff] }
 0x814   : > { %v10243_v60 = vadd.f32 %v12504_v12, %v5596_v7  ;;  %9853 = vmatpush1.bf16.msra.mxu0 %v9852_v56  ;;  %9981 = vmatpush1.bf16.msra.mxu1 %v9980_v45  ;;  %v5284_v56 = vrot.slane %v12494_v0, %v13080_v19  ;;  %v6245_v0 = vld [vmem:[#allocation8 + $0x7c0] sm:$0xff] }
 0x815   : > { %9855 = vmatprep.subr.bf16.mxu0 %v9854_v33  ;;  %9983 = vmatprep.subr.bf16.mxu1 %v9982_v36  ;;  %v6252_v33 = vld [vmem:[#allocation8 + $0x7f8] sm:$0xff]  ;;  %v3696_v36 = vrot.slane %v12491_v23, %v11936_v58  ;;  %v9862_v23 = vpack.c.bf16 %v6250_v15, %v6246_v25 }
 0x816   : > { %v5600_v45 = vpop.f32.mrb[156].mxu0  ;;  %v12596_v24 = vpop.f32.mrb[156].mxu1  ;;  %6417 = vmatprep.mubr.f32.mxu0 %v10243_v60  ;;  %6739 = vmatprep.mubr.f32.mxu1 %v10243_v60  ;;  %v9990_v7 = vpack.c.bf16 %v6252_v33, %v6248_v20  ;;  %v6249_v60 = vld [vmem:[#allocation8 + $0x7e0] sm:$0xff]  ;;  %v12606_v53 = vadd.f32 %v5284_v56, %v3700_v1 }
 0x817   : > { %v5602_v9 = vpop.f32.mrb[157].mxu0  ;;  %v12602_v42 = vpop.f32.mrb[157].mxu1  ;;  %6418 = vmatmul.mubr.f32.gmra.mrb[226].mxu0 %v10241_v35  ;;  %6740 = vmatmul.mubr.f32.gmra.mrb[226].mxu1 %v10241_v35  ;;  %v10245_v43 = vadd.f32 %v12506_v46, %v5600_v45  ;;  %v9864_v1 = vpack.c.bf16 %v6249_v60, %v6245_v0  ;;  %v12617_v56 = vadd.f32 %v5280_v47, %v3696_v36  ;;  %v6983_v33 = vld [vmem:[%s13083_s18] sm:$0xff]  ;;  %v7016_v47 = vld [vmem:[%s13083_s18 + $0x108] sm:$0xff] }
 0x818   : > { %v10247_v30 = vadd.f32 %v12504_v12, %v5602_v9  ;;  %9857 = vmatpush1.bf16.msra.mxu0 %v9856_v17  ;;  %9985 = vmatpush1.bf16.msra.mxu1 %v9984_v5  ;;  %v6247_v17 = vld [vmem:[#allocation8 + $0x7d0] sm:$0xff]  ;;  %v10255_v20 = vadd.f32 %v12606_v53, %v12510_v18  ;;  %v7015_v36 = vld [vmem:[%s13083_s18 + $0x100] sm:$0xff]  ;;  %v10259_v0 = vadd.f32 %v12606_v53, %v12516_v54  ;;  %v7036_v54 = vld [vmem:[%s13083_s18 + $0x1a8] sm:$0xff] }
 0x819   : > { %9859 = vmatprep.subr.bf16.mxu0 %v9858_v38  ;;  %9987 = vmatprep.subr.bf16.mxu1 %v9986_v51  ;;  %v6251_v5 = vld [vmem:[#allocation8 + $0x7f0] sm:$0xff]  ;;  %v7000_v51 = vld [vmem:[%s13083_s18 + $0x88] sm:$0xff]  ;;  %v10028_v60 = vpack.c.bf16 %v7016_v47, %v7015_v36 }
 0x81a   : > { %v5606_v35 = vpop.f32.mrb[158].mxu0  ;;  %v12608_v9 = vpop.f32.mrb[158].mxu1  ;;  %6423 = vmatprep.mubr.f32.mxu0 %v10247_v30  ;;  %6745 = vmatprep.mubr.f32.mxu1 %v10247_v30  ;;  %v9992_v15 = vpack.c.bf16 %v6251_v5, %v6247_v17  ;;  %v6984_v30 = vld [vmem:[%s13083_s18 + $0x8] sm:$0xff]  ;;  %v7034_v18 = vld [vmem:[%s13083_s18 + $0x198] sm:$0xff]  ;;  %v6985_v17 = vld [vmem:[%s13083_s18 + $0x10] sm:$0xff] }
 0x81b   : > { %v5608_v31 = vpop.f32.mrb[159].mxu0  ;;  %v12611_v38 = vpop.f32.mrb[159].mxu1  ;;  %6424 = vmatmul.mubr.f32.gmra.mrb[228].mxu0 %v10245_v43  ;;  %6746 = vmatmul.mubr.f32.gmra.mrb[228].mxu1 %v10245_v43  ;;  %v10249_v45 = vadd.f32 %v12506_v46, %v5606_v35  ;;  %v7001_v46 = vld [vmem:[%s13083_s18 + $0x90] sm:$0xff]  ;;  %v6986_v5 = vld [vmem:[%s13083_s18 + $0x18] sm:$0xff] }
 0x81c   : > { %v10251_v25 = vadd.f32 %v12504_v12, %v5608_v31  ;;  %9861 = vmatpush1.bf16.msra.mxu0 %v9860_v52  ;;  %9989 = vmatpush1.bf16.msra.mxu1 %v9988_v27  ;;  %v9994_v12 = vpack.c.bf16 %v7000_v51, %v6999_v21  ;;  %v10026_v52 = vpack.c.bf16 %v7032_v61, %v7031_v8  ;;  %v7002_v27 = vld [vmem:[%s13083_s18 + $0x98] sm:$0xff]  ;;  %v7033_v43 = vld [vmem:[%s13083_s18 + $0x190] sm:$0xff]  ;;  %v7004_v8 = vld [vmem:[%s13083_s18 + $0xa8] sm:$0xff] }
 0x81d   : > { %9863 = vmatprep.subr.bf16.mxu0 %v9862_v23  ;;  %9991 = vmatprep.subr.bf16.mxu1 %v9990_v7  ;;  %v10253_v23 = vadd.f32 %v12617_v56, %v12508_v10  ;;  %v9996_v7 = vpack.c.bf16 %v6984_v30, %v6983_v33  ;;  %v9998_v35 = vpack.c.bf16 %v7002_v27, %v7001_v46  ;;  %v7017_v21 = vld [vmem:[%s13083_s18 + $0x110] sm:$0xff]  ;;  %v7018_v51 = vld [vmem:[%s13083_s18 + $0x118] sm:$0xff]  ;;  %v7003_v10 = vld [vmem:[%s13083_s18 + $0xa0] sm:$0xff] }
 0x81e   : > { %6429 = vmatprep.mubr.f32.mxu0 %v10251_v25  ;;  %6751 = vmatprep.mubr.f32.mxu1 %v10251_v25  ;;  %v10030_v31 = vpack.c.bf16 %v7034_v18, %v7033_v43  ;;  %v7035_v61 = vld [vmem:[%s13083_s18 + $0x1a0] sm:$0xff]  ;;  %v10257_v25 = vadd.f32 %v12617_v56, %v12514_v14  ;;  %v6988_v33 = vld [vmem:[%s13083_s18 + $0x28] sm:$0xff]  ;;  %v7005_v36 = vld [vmem:[%s13083_s18 + $0xb0] sm:$0xff]  ;;  %v10261_v27 = vadd.f32 %v12617_v56, %v12520_v4 }
 0x81f   : > { %6430 = vmatmul.mubr.f32.gmra.mrb[230].mxu0 %v10249_v45  ;;  %6752 = vmatmul.mubr.f32.gmra.mrb[230].mxu1 %v10249_v45  ;;  %v10263_v45 = vadd.f32 %v12606_v53, %v12522_v3  ;;  %v7019_v30 = vld [vmem:[%s13083_s18 + $0x120] sm:$0xff]  ;;  %v10034_v14 = vpack.c.bf16 %v7036_v54, %v7035_v61  ;;  %v7006_v47 = vld [vmem:[%s13083_s18 + $0xb8] sm:$0xff]  ;;  %v7037_v3 = vld [vmem:[%s13083_s18 + $0x1b0] sm:$0xff]  ;;  %v10267_v18 = vadd.f32 %v12606_v53, %v12528_v16 }
 0x820   : > { %9865 = vmatpush1.bf16.msra.mxu0 %v9864_v1  ;;  %6500 = vmatprep.mubr.f32.mxu0 %v10255_v20  ;;  %v10000_v1 = vpack.c.bf16 %v6986_v5, %v6985_v17  ;;  %v7038_v46 = vld [vmem:[%s13083_s18 + $0x1b8] sm:$0xff]  ;;  %v7007_v5 = vld [vmem:[%s13083_s18 + $0xc0] sm:$0xff] }
 0x821   : > { %9993 = vmatpush1.bf16.msra.mxu1 %v9992_v15  ;;  %6822 = vmatprep.mubr.f32.mxu1 %v10255_v20  ;;  %v10032_v15 = vpack.c.bf16 %v7018_v51, %v7017_v21  ;;  %v10002_v20 = vpack.c.bf16 %v7004_v8, %v7003_v10  ;;  %v10038_v4 = vpack.c.bf16 %v7038_v46, %v7037_v3  ;;  %v7022_v17 = vld [vmem:[%s13083_s18 + $0x138] sm:$0xff]  ;;  %v7008_v21 = vld [vmem:[%s13083_s18 + $0xc8] sm:$0xff]  ;;  %v7039_v16 = vld [vmem:[%s13083_s18 + $0x1c0] sm:$0xff] }
 0x822   : > { %9995 = vmatprep.subr.bf16.mxu0 %v9994_v12  ;;  %10027 = vmatprep.subr.bf16.mxu1 %v10026_v52  ;;  %v6987_v12 = vld [vmem:[%s13083_s18 + $0x20] sm:$0xff]  ;;  %v7020_v52 = vld [vmem:[%s13083_s18 + $0x128] sm:$0xff]  ;;  %v10265_v51 = vadd.f32 %v12617_v56, %v12526_v40  ;;  %v10271_v8 = vadd.f32 %v12606_v53, %v12534_v55  ;;  %v10010_v54 = vpack.c.bf16 %v7008_v21, %v7007_v5  ;;  %v7041_v55 = vld [vmem:[%s13083_s18 + $0x1d0] sm:$0xff] }
 0x823   : > { %6501 = vmatmul.mubr.f32.vlgmr.msra.gmra.mrb[200].mxu0 %v10253_v23  ;;  %v10004_v43 = vpack.c.bf16 %v6988_v33, %v6987_v12  ;;  %v7010_v12 = vld [vmem:[%s13083_s18 + $0xd8] sm:$0xff]  ;;  %v6993_v3 = vld [vmem:[%s13083_s18 + $0x50] sm:$0xff]  ;;  %v6995_v5 = vld [vmem:[%s13083_s18 + $0x60] sm:$0xff] }
 0x824   : > { %6823 = vmatmul.mubr.f32.vlgmr.msra.gmra.mrb[200].mxu1 %v10253_v23  ;;  %6506 = vmatprep.mubr.f32.mxu0 %v10259_v0  ;;  %v10036_v23 = vpack.c.bf16 %v7020_v52, %v7019_v30  ;;  %v7042_v33 = vld [vmem:[%s13083_s18 + $0x1d8] sm:$0xff]  ;;  %v10269_v30 = vadd.f32 %v12617_v56, %v12532_v59  ;;  %v10275_v52 = vadd.f32 %v12606_v53, %v12540_v44  ;;  %v7043_v44 = vld [vmem:[%s13083_s18 + $0x1e0] sm:$0xff]  ;;  %v6996_v21 = vld [vmem:[%s13083_s18 + $0x68] sm:$0xff] }
 0x825   : > { %6828 = vmatprep.mubr.f32.mxu1 %v10259_v0  ;;  %9997 = vmatpush3.bf16.msra.mxu0 %v9996_v7  ;;  %v10006_v7 = vpack.c.bf16 %v7006_v47, %v7005_v36  ;;  %v6989_v0 = vld [vmem:[%s13083_s18 + $0x30] sm:$0xff]  ;;  %v6994_v46 = vld [vmem:[%s13083_s18 + $0x58] sm:$0xff]  ;;  %v10046_v59 = vpack.c.bf16 %v7042_v33, %v7041_v55 }
 0x826   : > { %10029 = vmatpush3.bf16.msra.mxu1 %v10028_v60  ;;  %9999 = vmatprep.subr.bf16.mxu0 %v9998_v35  ;;  %v6990_v60 = vld [vmem:[%s13083_s18 + $0x38] sm:$0xff]  ;;  %v7021_v35 = vld [vmem:[%s13083_s18 + $0x130] sm:$0xff] }
 0x827   : > { %6507 = vmatmul.mubr.f32.gmra.mrb[202].mxu0 %v10257_v25  ;;  %10031 = vmatprep.subr.bf16.mxu1 %v10030_v31  ;;  %v7040_v31 = vld [vmem:[%s13083_s18 + $0x1c8] sm:$0xff]  ;;  %v10008_v10 = vpack.c.bf16 %v6990_v60, %v6989_v0  ;;  %v10040_v61 = vpack.c.bf16 %v7022_v17, %v7021_v35  ;;  %v10273_v0 = vadd.f32 %v12617_v56, %v12538_v48 }
 0x828   : > { %6829 = vmatmul.mubr.f32.gmra.mrb[202].mxu1 %v10257_v25  ;;  %6512 = vmatprep.mubr.f32.mxu0 %v10263_v45  ;;  %v6991_v25 = vld [vmem:[%s13083_s18 + $0x40] sm:$0xff]  ;;  %v10042_v40 = vpack.c.bf16 %v7040_v31, %v7039_v16  ;;  %v10016_v60 = vpack.c.bf16 %v6994_v46, %v6993_v3  ;;  %v10279_v35 = vadd.f32 %v12606_v53, %v12546_v34 }
 0x829   : > { %6834 = vmatprep.mubr.f32.mxu1 %v10263_v45  ;;  %10001 = vmatpush3.bf16.msra.mxu0 %v10000_v1  ;;  %v6992_v1 = vld [vmem:[%s13083_s18 + $0x48] sm:$0xff]  ;;  %v7023_v45 = vld [vmem:[%s13083_s18 + $0x140] sm:$0xff]  ;;  %v10277_v48 = vadd.f32 %v12617_v56, %v12544_v28  ;;  %v10283_v34 = vadd.f32 %v12606_v53, %v12552_v32  ;;  %v10287_v28 = vadd.f32 %v12606_v53, %v12558_v41 }
 0x82a   : > { %10033 = vmatpush3.bf16.msra.mxu1 %v10032_v15  ;;  %10003 = vmatprep.subr.bf16.mxu0 %v10002_v20  ;;  %v7024_v15 = vld [vmem:[%s13083_s18 + $0x148] sm:$0xff]  ;;  %v7009_v20 = vld [vmem:[%s13083_s18 + $0xd0] sm:$0xff]  ;;  %v7027_v31 = vld [vmem:[%s13083_s18 + $0x160] sm:$0xff]  ;;  %v10285_v32 = vadd.f32 %v12617_v56, %v12556_v50  ;;  %v10295_v41 = vadd.f32 %v12606_v53, %v12570_v39  ;;  %v10293_v50 = vadd.f32 %v12617_v56, %v12568_v57 }
 0x82b   : > { %6513 = vmatmul.mubr.f32.gmra.mrb[204].mxu0 %v10261_v27  ;;  %10035 = vmatprep.subr.bf16.mxu1 %v10034_v14  ;;  %v10012_v14 = vpack.c.bf16 %v6992_v1, %v6991_v25  ;;  %v10044_v36 = vpack.c.bf16 %v7024_v15, %v7023_v45  ;;  %v10014_v47 = vpack.c.bf16 %v7010_v12, %v7009_v20  ;;  %v7014_v25 = vld [vmem:[%s13083_s18 + $0xf8] sm:$0xff]  ;;  %v7045_v1 = vld [vmem:[%s13083_s18 + $0x1f0] sm:$0xff] }
 0x82c   : > { %6835 = vmatmul.mubr.f32.gmra.mrb[204].mxu1 %v10261_v27  ;;  %6518 = vmatprep.mubr.f32.mxu0 %v10267_v18  ;;  %v7025_v27 = vld [vmem:[%s13083_s18 + $0x150] sm:$0xff]  ;;  %v10303_v39 = vadd.f32 %v12606_v53, %v12582_v26  ;;  %v10301_v57 = vadd.f32 %v12617_v56, %v12580_v11  ;;  %v10311_v26 = vadd.f32 %v12606_v53, %v12602_v42  ;;  %v7046_v45 = vld [vmem:[%s13083_s18 + $0x1f8] sm:$0xff] }
 0x82d   : > { %6840 = vmatprep.mubr.f32.mxu1 %v10267_v18  ;;  %10005 = vmatpush3.bf16.msra.mxu0 %v10004_v43  ;;  %v7026_v43 = vld [vmem:[%s13083_s18 + $0x158] sm:$0xff]  ;;  %v7011_v18 = vld [vmem:[%s13083_s18 + $0xe0] sm:$0xff]  ;;  %v10309_v11 = vadd.f32 %v12617_v56, %v12596_v24  ;;  %v7013_v42 = vld [vmem:[%s13083_s18 + $0xf0] sm:$0xff] }
 0x82e   : > { %10037 = vmatpush3.bf16.msra.mxu1 %v10036_v23  ;;  %10007 = vmatprep.subr.bf16.mxu0 %v10006_v7  ;;  %v7012_v23 = vld [vmem:[%s13083_s18 + $0xe8] sm:$0xff]  ;;  %v10022_v24 = vpack.c.bf16 %v7014_v25, %v7013_v42  ;;  %v6998_v15 = vld [vmem:[%s13083_s18 + $0x78] sm:$0xff]  ;;  %v7029_v20 = vld [vmem:[%s13083_s18 + $0x170] sm:$0xff] }
 0x82f   : > { %6519 = vmatmul.mubr.f32.gmra.mrb[206].mxu0 %v10265_v51  ;;  %10039 = vmatprep.subr.bf16.mxu1 %v10038_v4  ;;  %v7044_v7 = vld [vmem:[%s13083_s18 + $0x1e8] sm:$0xff]  ;;  %v10048_v4 = vpack.c.bf16 %v7026_v43, %v7025_v27  ;;  %v10018_v17 = vpack.c.bf16 %v7012_v23, %v7011_v18  ;;  %v7030_v12 = vld [vmem:[%s13083_s18 + $0x178] sm:$0xff] }
 0x830   : > { %6841 = vmatmul.mubr.f32.gmra.mrb[206].mxu1 %v10265_v51  ;;  %6524 = vmatprep.mubr.f32.mxu0 %v10271_v8  ;;  %v10050_v16 = vpack.c.bf16 %v7044_v7, %v7043_v44  ;;  %v7028_v51 = vld [vmem:[%s13083_s18 + $0x168] sm:$0xff]  ;;  %v10056_v55 = vpack.c.bf16 %v7030_v12, %v7029_v20 }
 0x831   : > { %6846 = vmatprep.mubr.f32.mxu1 %v10271_v8  ;;  %10009 = vmatpush3.bf16.msra.mxu0 %v10008_v10  ;;  %v10020_v10 = vpack.c.bf16 %v6996_v21, %v6995_v5  ;;  %v10052_v8 = vpack.c.bf16 %v7028_v51, %v7027_v31 }
 0x832   : > { %10041 = vmatpush3.bf16.msra.mxu1 %v10040_v61  ;;  %10011 = vmatprep.subr.bf16.mxu0 %v10010_v54  ;;  %v10281_v61 = vadd.f32 %v12617_v56, %v12550_v49  ;;  %v10291_v54 = vadd.f32 %v12606_v53, %v12564_v22  ;;  %v10289_v49 = vadd.f32 %v12617_v56, %v12562_v37 }
 0x833   : > { %6525 = vmatmul.mubr.f32.gmra.mrb[208].mxu0 %v10269_v30  ;;  %10043 = vmatprep.subr.bf16.mxu1 %v10042_v40  ;;  %v10299_v22 = vadd.f32 %v12606_v53, %v12576_v13  ;;  %v10297_v37 = vadd.f32 %v12617_v56, %v12574_v63  ;;  %v10307_v13 = vadd.f32 %v12606_v53, %v12588_v62  ;;  %v6997_v40 = vld [vmem:[%s13083_s18 + $0x70] sm:$0xff] }
 0x834   : > { %6847 = vmatmul.mubr.f32.gmra.mrb[208].mxu1 %v10269_v30  ;;  %6530 = vmatprep.mubr.f32.mxu0 %v10275_v52  ;;  %v10305_v63 = vadd.f32 %v12617_v56, %v12586_v2  ;;  %v10315_v2 = vadd.f32 %v12606_v53, %v12611_v38  ;;  %v10313_v62 = vadd.f32 %v12617_v56, %v12608_v9  ;;  %v8550_v9 = vld [vmem:[#allocation2] ss:$0 sm:$0xff] }
 0x835   : > { %6852 = vmatprep.mubr.f32.mxu1 %v10275_v52  ;;  %10013 = vmatpush3.bf16.msra.mxu0 %v10012_v14  ;;  %v10054_v53 = vpack.c.bf16 %v7046_v45, %v7045_v1  ;;  %v10024_v38 = vpack.c.bf16 %v6998_v15, %v6997_v40  ;;  %v6253_v56 = vld [vmem:[%s13084_s6] sm:$0xf]  ;;  %s13096_s6 = sld [smem:[#allocation24_spill]] }
 0x836   : > { %10045 = vmatpush3.bf16.msra.mxu1 %v10044_v36  ;;  %10015 = vmatprep.subr.bf16.mxu0 %v10014_v47  ;;  %v12746_v33 = vrot.slane %v6253_v56, %v13070_v6  ;;  %v12749_v30 = vrot.slane %v6253_v56, %v11936_v58  ;;  %v12752_v14 = vrot.slane %v6253_v56, %v13071_v29 }
 0x837   : > { %6531 = vmatmul.mubr.f32.gmra.mrb[210].mxu0 %v10273_v0  ;;  %10047 = vmatprep.subr.bf16.mxu1 %v10046_v59  ;;  %v12755_v52 = vrot.slane %v6253_v56, %v13080_v19 }
 0x838   : > { %6853 = vmatmul.mubr.f32.gmra.mrb[210].mxu1 %v10273_v0  ;;  %6536 = vmatprep.mubr.f32.mxu0 %v10279_v35 }
 0x839   : > { %6858 = vmatprep.mubr.f32.mxu1 %v10279_v35  ;;  %10017 = vmatpush3.bf16.msra.mxu0 %v10016_v60 }
 0x83a   : > { %10049 = vmatpush3.bf16.msra.mxu1 %v10048_v4  ;;  %10019 = vmatprep.subr.bf16.mxu0 %v10018_v17 }
 0x83b   : > { %6537 = vmatmul.mubr.f32.gmra.mrb[212].mxu0 %v10277_v48  ;;  %10051 = vmatprep.subr.bf16.mxu1 %v10050_v16 }
 0x83c   : > { %6859 = vmatmul.mubr.f32.gmra.mrb[212].mxu1 %v10277_v48  ;;  %6542 = vmatprep.mubr.f32.mxu0 %v10283_v34 }
 0x83d   : > { %6864 = vmatprep.mubr.f32.mxu1 %v10283_v34  ;;  %10021 = vmatpush3.bf16.msra.mxu0 %v10020_v10 }
 0x83e   : > { %10053 = vmatpush3.bf16.msra.mxu1 %v10052_v8  ;;  %10023 = vmatprep.subr.bf16.mxu0 %v10022_v24 }
 0x83f   : > { %6543 = vmatmul.mubr.f32.gmra.mrb[214].mxu0 %v10281_v61  ;;  %10055 = vmatprep.subr.bf16.mxu1 %v10054_v53 }
 0x840   : > { %6865 = vmatmul.mubr.f32.gmra.mrb[214].mxu1 %v10281_v61  ;;  %6548 = vmatprep.mubr.f32.mxu0 %v10287_v28 }
 0x841   : > { %6870 = vmatprep.mubr.f32.mxu1 %v10287_v28  ;;  %10025 = vmatpush3.bf16.msra.mxu0 %v10024_v38 }
 0x842   : > { %10057 = vmatpush3.bf16.msra.mxu1 %v10056_v55  ;;  %7054 = vperm.xlu0 %10793, %v8550_v9  }
 0x843   : > { %6549 = vmatmul.mubr.f32.gmra.mrb[216].mxu0 %v10285_v32 }
 0x844   : > { %6871 = vmatmul.mubr.f32.gmra.mrb[216].mxu1 %v10285_v32  ;;  %6554 = vmatprep.mubr.f32.mxu0 %v10291_v54 }
 0x845   : > { %6876 = vmatprep.mubr.f32.mxu1 %v10291_v54 }
 0x847   : > { %6555 = vmatmul.mubr.f32.gmra.mrb[218].mxu0 %v10289_v49 }
 0x848   : > { %6877 = vmatmul.mubr.f32.gmra.mrb[218].mxu1 %v10289_v49  ;;  %6560 = vmatprep.mubr.f32.mxu0 %v10295_v41 }
 0x849   : > { %6882 = vmatprep.mubr.f32.mxu1 %v10295_v41 }
 0x84b   : > { %6561 = vmatmul.mubr.f32.gmra.mrb[220].mxu0 %v10293_v50 }
 0x84c   : > { %6883 = vmatmul.mubr.f32.gmra.mrb[220].mxu1 %v10293_v50  ;;  %6566 = vmatprep.mubr.f32.mxu0 %v10299_v22 }
 0x84d   : > { %6888 = vmatprep.mubr.f32.mxu1 %v10299_v22 }
 0x84f   : > { %6567 = vmatmul.mubr.f32.gmra.mrb[222].mxu0 %v10297_v37 }
 0x850   : > { %6889 = vmatmul.mubr.f32.gmra.mrb[222].mxu1 %v10297_v37  ;;  %6572 = vmatprep.mubr.f32.mxu0 %v10303_v39 }
 0x851   : > { %6894 = vmatprep.mubr.f32.mxu1 %v10303_v39 }
 0x853   : > { %6573 = vmatmul.mubr.f32.gmra.mrb[224].mxu0 %v10301_v57 }
 0x854   : > { %6895 = vmatmul.mubr.f32.gmra.mrb[224].mxu1 %v10301_v57  ;;  %6578 = vmatprep.mubr.f32.mxu0 %v10307_v13 }
 0x855   : > { %6900 = vmatprep.mubr.f32.mxu1 %v10307_v13 }
 0x857   : > { %6579 = vmatmul.mubr.f32.gmra.mrb[226].mxu0 %v10305_v63 }
 0x858   : > { %6901 = vmatmul.mubr.f32.gmra.mrb[226].mxu1 %v10305_v63  ;;  %6584 = vmatprep.mubr.f32.mxu0 %v10311_v26 }
 0x859   : > { %6906 = vmatprep.mubr.f32.mxu1 %v10311_v26 }
 0x85b   : > { %6585 = vmatmul.mubr.f32.gmra.mrb[228].mxu0 %v10309_v11 }
 0x85c   : > { %6907 = vmatmul.mubr.f32.gmra.mrb[228].mxu1 %v10309_v11  ;;  %6590 = vmatprep.mubr.f32.mxu0 %v10315_v2 }
 0x85d   : > { %6912 = vmatprep.mubr.f32.mxu1 %v10315_v2 }
 0x85f   : > { %6591 = vmatmul.mubr.f32.gmra.mrb[230].mxu0 %v10313_v62 }
 0x860   : > { %6913 = vmatmul.mubr.f32.gmra.mrb[230].mxu1 %v10313_v62 }
 0x8f6   : > { %v6502_v36 = vpop.f32.mrb[200].mxu0 }
 0x8f7   : > { %v10316_v47 = vadd.f32 %v6502_v36, %v12746_v33  ;;  %v6824_v3 = vpop.f32.mrb[200].mxu1  ;;  %v6504_v46 = vpop.f32.mrb[201].mxu0 }
 0x8f8   : > { %v10348_v27 = vadd.f32 %v6824_v3, %v12749_v30  ;;  %v10317_v59 = vadd.f32 %v6504_v46, %v12752_v14  ;;  %v6826_v6 = vpop.f32.mrb[201].mxu1 }
 0x8f9   : > { %v10349_v43 = vadd.f32 %v6826_v6, %v12755_v52  ;;  %v6919_v23 = vmax.f32 %v10316_v47, 0.0 }
 0x8fa   : > { %v6920_v58 = vmax.f32 %v10317_v59, 0.0  ;;  %v6508_v18 = vpop.f32.mrb[202].mxu0  ;;  %v6921_v0 = vmax.f32 %v10348_v27, 0.0 }
 0x8fb   : > { %v6922_v29 = vmax.f32 %v10349_v43, 0.0  ;;  %v10318_v44 = vadd.f32 %v6508_v18, %v12746_v33  ;;  %v6830_v19 = vpop.f32.mrb[202].mxu1  ;;  %v6510_v7 = vpop.f32.mrb[203].mxu0 }
 0x8fc   : > { %v10350_v60 = vadd.f32 %v6830_v19, %v12749_v30  ;;  %v10319_v35 = vadd.f32 %v6510_v7, %v12752_v14  ;;  %v6832_v4 = vpop.f32.mrb[203].mxu1  ;;  %7121 = vmatprep.mubr.f32.mxu0 %v6920_v58 }
 0x8fd   : > { %v10351_v17 = vadd.f32 %v6832_v4, %v12755_v52  ;;  %7266 = vmatprep.mubr.f32.mxu1 %v6922_v29  ;;  %7122 = vmatmul.mubr.f32.vlgmr.msra.gmra.mrb[232].mxu0 %v6919_v23  ;;  %v6923_v16 = vmax.f32 %v10318_v44, 0.0 }
 0x8fe   : > { %v6924_v5 = vmax.f32 %v10319_v35, 0.0  ;;  %7267 = vmatmul.mubr.f32.vlgmr.msra.gmra.mrb[232].mxu1 %v6921_v0  ;;  %v6514_v21 = vpop.f32.mrb[204].mxu0  ;;  %v6925_v34 = vmax.f32 %v10350_v60, 0.0 }
 0x8ff   : > { %v6926_v31 = vmax.f32 %v10351_v17, 0.0  ;;  %v10320_v51 = vadd.f32 %v6514_v21, %v12746_v33  ;;  %v6836_v48 = vpop.f32.mrb[204].mxu1  ;;  %v6516_v10 = vpop.f32.mrb[205].mxu0 }
 0x900   : > { %v10352_v8 = vadd.f32 %v6836_v48, %v12749_v30  ;;  %v10321_v61 = vadd.f32 %v6516_v10, %v12752_v14  ;;  %v6838_v28 = vpop.f32.mrb[205].mxu1  ;;  %7126 = vmatprep.mubr.f32.mxu0 %v6924_v5 }
 0x901   : > { %v10353_v32 = vadd.f32 %v6838_v28, %v12755_v52  ;;  %7271 = vmatprep.mubr.f32.mxu1 %v6926_v31  ;;  %7127 = vmatmul.mubr.f32.gmra.mrb[234].mxu0 %v6923_v16  ;;  %v6927_v41 = vmax.f32 %v10320_v51, 0.0 }
 0x902   : > { %v6928_v54 = vmax.f32 %v10321_v61, 0.0  ;;  %7272 = vmatmul.mubr.f32.gmra.mrb[234].mxu1 %v6925_v34  ;;  %v6520_v49 = vpop.f32.mrb[206].mxu0  ;;  %v6929_v57 = vmax.f32 %v10352_v8, 0.0 }
 0x903   : > { %v6930_v50 = vmax.f32 %v10353_v32, 0.0  ;;  %v10322_v22 = vadd.f32 %v6520_v49, %v12746_v33  ;;  %v6842_v37 = vpop.f32.mrb[206].mxu1  ;;  %v6522_v39 = vpop.f32.mrb[207].mxu0 }
 0x904   : > { %v10354_v13 = vadd.f32 %v6842_v37, %v12749_v30  ;;  %v10323_v63 = vadd.f32 %v6522_v39, %v12752_v14  ;;  %v6844_v26 = vpop.f32.mrb[207].mxu1  ;;  %7131 = vmatprep.mubr.f32.mxu0 %v6928_v54 }
 0x905   : > { %v10355_v11 = vadd.f32 %v6844_v26, %v12755_v52  ;;  %7276 = vmatprep.mubr.f32.mxu1 %v6930_v50  ;;  %7132 = vmatmul.mubr.f32.gmra.mrb[236].mxu0 %v6927_v41  ;;  %v6931_v42 = vmax.f32 %v10322_v22, 0.0 }
 0x906   : > { %v6932_v2 = vmax.f32 %v10323_v63, 0.0  ;;  %7277 = vmatmul.mubr.f32.gmra.mrb[236].mxu1 %v6929_v57  ;;  %v6526_v62 = vpop.f32.mrb[208].mxu0  ;;  %v6933_v40 = vmax.f32 %v10354_v13, 0.0 }
 0x907   : > { %v6934_v25 = vmax.f32 %v10355_v11, 0.0  ;;  %v10324_v1 = vadd.f32 %v6526_v62, %v12746_v33  ;;  %v6848_v24 = vpop.f32.mrb[208].mxu1  ;;  %v6528_v45 = vpop.f32.mrb[209].mxu0 }
 0x908   : > { %v10356_v15 = vadd.f32 %v6848_v24, %v12749_v30  ;;  %v10325_v53 = vadd.f32 %v6528_v45, %v12752_v14  ;;  %v6850_v38 = vpop.f32.mrb[209].mxu1  ;;  %7136 = vmatprep.mubr.f32.mxu0 %v6932_v2 }
 0x909   : > { %v10357_v20 = vadd.f32 %v6850_v38, %v12755_v52  ;;  %7281 = vmatprep.mubr.f32.mxu1 %v6934_v25  ;;  %7137 = vmatmul.mubr.f32.gmra.mrb[238].mxu0 %v6931_v42  ;;  %v6935_v9 = vmax.f32 %v10324_v1, 0.0 }
 0x90a   : > { %v6936_v12 = vmax.f32 %v10325_v53, 0.0  ;;  %7282 = vmatmul.mubr.f32.gmra.mrb[238].mxu1 %v6933_v40  ;;  %v6532_v55 = vpop.f32.mrb[210].mxu0  ;;  %v6937_v46 = vmax.f32 %v10356_v15, 0.0 }
 0x90b   : > { %v6938_v56 = vmax.f32 %v10357_v20, 0.0  ;;  %v10326_v36 = vadd.f32 %v6532_v55, %v12746_v33  ;;  %v6854_v47 = vpop.f32.mrb[210].mxu1  ;;  %v6534_v3 = vpop.f32.mrb[211].mxu0 }
 0x90c   : > { %v10358_v27 = vadd.f32 %v6854_v47, %v12749_v30  ;;  %v10327_v59 = vadd.f32 %v6534_v3, %v12752_v14  ;;  %v6856_v6 = vpop.f32.mrb[211].mxu1  ;;  %7141 = vmatprep.mubr.f32.mxu0 %v6936_v12 }
 0x90d   : > { %v10359_v43 = vadd.f32 %v6856_v6, %v12755_v52  ;;  %7286 = vmatprep.mubr.f32.mxu1 %v6938_v56  ;;  %7142 = vmatmul.mubr.f32.gmra.mrb[240].mxu0 %v6935_v9  ;;  %v6939_v23 = vmax.f32 %v10326_v36, 0.0 }
 0x90e   : > { %v6940_v58 = vmax.f32 %v10327_v59, 0.0  ;;  %7287 = vmatmul.mubr.f32.gmra.mrb[240].mxu1 %v6937_v46  ;;  %v6538_v18 = vpop.f32.mrb[212].mxu0  ;;  %v6941_v0 = vmax.f32 %v10358_v27, 0.0 }
 0x90f   : > { %v6942_v29 = vmax.f32 %v10359_v43, 0.0  ;;  %v10328_v44 = vadd.f32 %v6538_v18, %v12746_v33  ;;  %v6860_v19 = vpop.f32.mrb[212].mxu1  ;;  %v6540_v7 = vpop.f32.mrb[213].mxu0 }
 0x910   : > { %v10360_v60 = vadd.f32 %v6860_v19, %v12749_v30  ;;  %v10329_v35 = vadd.f32 %v6540_v7, %v12752_v14  ;;  %v6862_v4 = vpop.f32.mrb[213].mxu1  ;;  %7146 = vmatprep.mubr.f32.mxu0 %v6940_v58 }
 0x911   : > { %v10361_v17 = vadd.f32 %v6862_v4, %v12755_v52  ;;  %7291 = vmatprep.mubr.f32.mxu1 %v6942_v29  ;;  %7147 = vmatmul.mubr.f32.gmra.mrb[242].mxu0 %v6939_v23  ;;  %v6943_v16 = vmax.f32 %v10328_v44, 0.0 }
 0x912   : > { %v6944_v5 = vmax.f32 %v10329_v35, 0.0  ;;  %7292 = vmatmul.mubr.f32.gmra.mrb[242].mxu1 %v6941_v0  ;;  %v6544_v21 = vpop.f32.mrb[214].mxu0  ;;  %v6945_v34 = vmax.f32 %v10360_v60, 0.0 }
 0x913   : > { %v6946_v31 = vmax.f32 %v10361_v17, 0.0  ;;  %v10330_v51 = vadd.f32 %v6544_v21, %v12746_v33  ;;  %v6866_v48 = vpop.f32.mrb[214].mxu1  ;;  %v6546_v10 = vpop.f32.mrb[215].mxu0 }
 0x914   : > { %v10362_v8 = vadd.f32 %v6866_v48, %v12749_v30  ;;  %v10331_v61 = vadd.f32 %v6546_v10, %v12752_v14  ;;  %v6868_v28 = vpop.f32.mrb[215].mxu1  ;;  %7151 = vmatprep.mubr.f32.mxu0 %v6944_v5 }
 0x915   : > { %v10363_v32 = vadd.f32 %v6868_v28, %v12755_v52  ;;  %7296 = vmatprep.mubr.f32.mxu1 %v6946_v31  ;;  %7152 = vmatmul.mubr.f32.gmra.mrb[244].mxu0 %v6943_v16  ;;  %v6947_v41 = vmax.f32 %v10330_v51, 0.0 }
 0x916   : > { %v6948_v54 = vmax.f32 %v10331_v61, 0.0  ;;  %7297 = vmatmul.mubr.f32.gmra.mrb[244].mxu1 %v6945_v34  ;;  %v6550_v49 = vpop.f32.mrb[216].mxu0  ;;  %v6949_v57 = vmax.f32 %v10362_v8, 0.0 }
 0x917   : > { %v6950_v50 = vmax.f32 %v10363_v32, 0.0  ;;  %v10332_v22 = vadd.f32 %v6550_v49, %v12746_v33  ;;  %v6872_v37 = vpop.f32.mrb[216].mxu1  ;;  %v6552_v39 = vpop.f32.mrb[217].mxu0 }
 0x918   : > { %v10364_v13 = vadd.f32 %v6872_v37, %v12749_v30  ;;  %v10333_v63 = vadd.f32 %v6552_v39, %v12752_v14  ;;  %v6874_v26 = vpop.f32.mrb[217].mxu1  ;;  %7156 = vmatprep.mubr.f32.mxu0 %v6948_v54 }
 0x919   : > { %v10365_v11 = vadd.f32 %v6874_v26, %v12755_v52  ;;  %7301 = vmatprep.mubr.f32.mxu1 %v6950_v50  ;;  %7157 = vmatmul.mubr.f32.gmra.mrb[246].mxu0 %v6947_v41  ;;  %v6951_v42 = vmax.f32 %v10332_v22, 0.0 }
 0x91a   : > { %v6952_v2 = vmax.f32 %v10333_v63, 0.0  ;;  %7302 = vmatmul.mubr.f32.gmra.mrb[246].mxu1 %v6949_v57  ;;  %v6556_v62 = vpop.f32.mrb[218].mxu0  ;;  %v6953_v40 = vmax.f32 %v10364_v13, 0.0 }
 0x91b   : > { %v6954_v25 = vmax.f32 %v10365_v11, 0.0  ;;  %v10334_v1 = vadd.f32 %v6556_v62, %v12746_v33  ;;  %v6878_v24 = vpop.f32.mrb[218].mxu1  ;;  %v6558_v45 = vpop.f32.mrb[219].mxu0 }
 0x91c   : > { %v10366_v15 = vadd.f32 %v6878_v24, %v12749_v30  ;;  %v10335_v53 = vadd.f32 %v6558_v45, %v12752_v14  ;;  %v6880_v38 = vpop.f32.mrb[219].mxu1  ;;  %7161 = vmatprep.mubr.f32.mxu0 %v6952_v2 }
 0x91d   : > { %v10367_v20 = vadd.f32 %v6880_v38, %v12755_v52  ;;  %7306 = vmatprep.mubr.f32.mxu1 %v6954_v25  ;;  %7162 = vmatmul.mubr.f32.gmra.mrb[248].mxu0 %v6951_v42  ;;  %v6955_v9 = vmax.f32 %v10334_v1, 0.0 }
 0x91e   : > { %v6956_v12 = vmax.f32 %v10335_v53, 0.0  ;;  %7307 = vmatmul.mubr.f32.gmra.mrb[248].mxu1 %v6953_v40  ;;  %v6562_v55 = vpop.f32.mrb[220].mxu0  ;;  %v6957_v46 = vmax.f32 %v10366_v15, 0.0 }
 0x91f   : > { %v6958_v56 = vmax.f32 %v10367_v20, 0.0  ;;  %v10336_v36 = vadd.f32 %v6562_v55, %v12746_v33  ;;  %v6884_v47 = vpop.f32.mrb[220].mxu1  ;;  %v6564_v3 = vpop.f32.mrb[221].mxu0 }
 0x920   : > { %v10368_v27 = vadd.f32 %v6884_v47, %v12749_v30  ;;  %v10337_v59 = vadd.f32 %v6564_v3, %v12752_v14  ;;  %v6886_v6 = vpop.f32.mrb[221].mxu1  ;;  %7166 = vmatprep.mubr.f32.mxu0 %v6956_v12 }
 0x921   : > { %v10369_v43 = vadd.f32 %v6886_v6, %v12755_v52  ;;  %7311 = vmatprep.mubr.f32.mxu1 %v6958_v56  ;;  %7167 = vmatmul.mubr.f32.gmra.mrb[250].mxu0 %v6955_v9  ;;  %v6959_v23 = vmax.f32 %v10336_v36, 0.0 }
 0x922   : > { %v6960_v58 = vmax.f32 %v10337_v59, 0.0  ;;  %7312 = vmatmul.mubr.f32.gmra.mrb[250].mxu1 %v6957_v46  ;;  %v6568_v18 = vpop.f32.mrb[222].mxu0  ;;  %v6961_v0 = vmax.f32 %v10368_v27, 0.0 }
 0x923   : > { %v6962_v29 = vmax.f32 %v10369_v43, 0.0  ;;  %v10338_v44 = vadd.f32 %v6568_v18, %v12746_v33  ;;  %v6890_v19 = vpop.f32.mrb[222].mxu1  ;;  %v6570_v7 = vpop.f32.mrb[223].mxu0 }
 0x924   : > { %v10370_v60 = vadd.f32 %v6890_v19, %v12749_v30  ;;  %v10339_v35 = vadd.f32 %v6570_v7, %v12752_v14  ;;  %v6892_v4 = vpop.f32.mrb[223].mxu1  ;;  %7171 = vmatprep.mubr.f32.mxu0 %v6960_v58  ;;  %v10917_v19 = vld [vmem:[%s11117_s5 + $0x18] sm:$0xff] }
 0x925   : > { %v10371_v17 = vadd.f32 %v6892_v4, %v12755_v52  ;;  %7316 = vmatprep.mubr.f32.mxu1 %v6962_v29  ;;  %7172 = vmatmul.mubr.f32.gmra.mrb[252].mxu0 %v6959_v23  ;;  %v6963_v16 = vmax.f32 %v10338_v44, 0.0  ;;  %v11107_v44 = vmov 0.0|0.0  }
 0x926   : > { %v6964_v5 = vmax.f32 %v10339_v35, 0.0  ;;  %7317 = vmatmul.mubr.f32.gmra.mrb[252].mxu1 %v6961_v0  ;;  %v6574_v21 = vpop.f32.mrb[224].mxu0  ;;  %v6965_v34 = vmax.f32 %v10370_v60, 0.0  ;;  %10058 = vmatprep.subr.bf16.mxu0 %v11107_v44  ;;  %v10918_v0 = vld [vmem:[%s11117_s5 + $0x20] sm:$0xff]  ;;  %v10919_v60 = vld [vmem:[%s11117_s5 + $0x28] sm:$0xff] }
 0x927   : > { %v6966_v31 = vmax.f32 %v10371_v17, 0.0  ;;  %v10340_v51 = vadd.f32 %v6574_v21, %v12746_v33  ;;  %v6896_v48 = vpop.f32.mrb[224].mxu1  ;;  %v6576_v10 = vpop.f32.mrb[225].mxu0  ;;  %10082 = vmatprep.subr.bf16.mxu1 %v11107_v44  ;;  %v10065_v35 = vpack.c.bf16 %v10919_v60, %v10918_v0  ;;  %v10921_v21 = vld [vmem:[%s11117_s5 + $0x38] sm:$0xff] }
 0x928   : > { %v10372_v8 = vadd.f32 %v6896_v48, %v12749_v30  ;;  %v10341_v61 = vadd.f32 %v6576_v10, %v12752_v14  ;;  %v6898_v28 = vpop.f32.mrb[225].mxu1  ;;  %7176 = vmatprep.mubr.f32.mxu0 %v6964_v5  ;;  %v12831_v17 = vpop.permute.xlu0 %7054  ;;  %v10920_v5 = vld [vmem:[%s11117_s5 + $0x30] sm:$0xff] }
 0x929   : > { %v10373_v32 = vadd.f32 %v6898_v28, %v12755_v52  ;;  %7321 = vmatprep.mubr.f32.mxu1 %v6966_v31  ;;  %7177 = vmatmul.mubr.f32.gmra.mrb[254].mxu0 %v6963_v16  ;;  %v6967_v41 = vmax.f32 %v10340_v51, 0.0  ;;  %v10068_v16 = vpack.c.bf16 %v10921_v21, %v10920_v5  ;;  %v10922_v28 = vld [vmem:[%s11117_s5 + $0x40] sm:$0xff] }
 0x92a   : > { %v6968_v54 = vmax.f32 %v10341_v61, 0.0  ;;  %7322 = vmatmul.mubr.f32.gmra.mrb[254].mxu1 %v6965_v34  ;;  %v6580_v49 = vpop.f32.mrb[226].mxu0  ;;  %v6969_v57 = vmax.f32 %v10372_v8, 0.0 }
 0x92b   : > { %v6970_v50 = vmax.f32 %v10373_v32, 0.0  ;;  %v10342_v22 = vadd.f32 %v6580_v49, %v12746_v33  ;;  %v6902_v37 = vpop.f32.mrb[226].mxu1  ;;  %v6582_v39 = vpop.f32.mrb[227].mxu0  ;;  %v10923_v32 = vld [vmem:[%s11117_s5 + $0x48] sm:$0xff] }
 0x92c   : > { %v10374_v13 = vadd.f32 %v6902_v37, %v12749_v30  ;;  %v10343_v63 = vadd.f32 %v6582_v39, %v12752_v14  ;;  %v6904_v26 = vpop.f32.mrb[227].mxu1  ;;  %7181 = vmatprep.mubr.f32.mxu0 %v6968_v54  ;;  %v10071_v54 = vpack.c.bf16 %v10923_v32, %v10922_v28 }
 0x92d   : > { %v10375_v11 = vadd.f32 %v6904_v26, %v12755_v52  ;;  %7326 = vmatprep.mubr.f32.mxu1 %v6970_v50  ;;  %7182 = vmatmul.mubr.f32.gmra.mrb[0].mxu0 %v6967_v41  ;;  %v6971_v42 = vmax.f32 %v10342_v22, 0.0  ;;  %v10924_v26 = vld [vmem:[%s11117_s5 + $0x50] sm:$0xff] }
 0x92e   : > { %v6972_v2 = vmax.f32 %v10343_v63, 0.0  ;;  %7327 = vmatmul.mubr.f32.gmra.mrb[0].mxu1 %v6969_v57  ;;  %v6586_v62 = vpop.f32.mrb[228].mxu0  ;;  %v6973_v40 = vmax.f32 %v10374_v13, 0.0 }
 0x92f   : > { %v6974_v25 = vmax.f32 %v10375_v11, 0.0  ;;  %v10344_v1 = vadd.f32 %v6586_v62, %v12746_v33  ;;  %v6908_v24 = vpop.f32.mrb[228].mxu1  ;;  %v6588_v45 = vpop.f32.mrb[229].mxu0  ;;  %v10925_v11 = vld [vmem:[%s11117_s5 + $0x58] sm:$0xff] }
 0x930   : > { %v10376_v15 = vadd.f32 %v6908_v24, %v12749_v30  ;;  %v10345_v53 = vadd.f32 %v6588_v45, %v12752_v14  ;;  %v6910_v38 = vpop.f32.mrb[229].mxu1  ;;  %7186 = vmatprep.mubr.f32.mxu0 %v6972_v2  ;;  %v10074_v2 = vpack.c.bf16 %v10925_v11, %v10924_v26 }
 0x931   : > { %v10377_v20 = vadd.f32 %v6910_v38, %v12755_v52  ;;  %7331 = vmatprep.mubr.f32.mxu1 %v6974_v25  ;;  %7187 = vmatmul.mubr.f32.gmra.mrb[2].mxu0 %v6971_v42  ;;  %v6975_v9 = vmax.f32 %v10344_v1, 0.0 }
 0x932   : > { %v6976_v12 = vmax.f32 %v10345_v53, 0.0  ;;  %7332 = vmatmul.mubr.f32.gmra.mrb[2].mxu1 %v6973_v40  ;;  %v6592_v55 = vpop.f32.mrb[230].mxu0  ;;  %v6977_v46 = vmax.f32 %v10376_v15, 0.0 }
 0x933   : > { %v6978_v56 = vmax.f32 %v10377_v20, 0.0  ;;  %v10346_v36 = vadd.f32 %v6592_v55, %v12746_v33  ;;  %v6914_v47 = vpop.f32.mrb[230].mxu1  ;;  %v6594_v3 = vpop.f32.mrb[231].mxu0  ;;  %v10927_v55 = vld [vmem:[%s11117_s5 + $0x68] sm:$0xff] }
 0x934   : > { %v10378_v27 = vadd.f32 %v6914_v47, %v12749_v30  ;;  %v10347_v59 = vadd.f32 %v6594_v3, %v12752_v14  ;;  %v6916_v6 = vpop.f32.mrb[231].mxu1  ;;  %7191 = vmatprep.mubr.f32.mxu0 %v6976_v12  ;;  %v10914_v30 = vld [vmem:[%s11117_s5] sm:$0xff]  ;;  %v10915_v14 = vld [vmem:[%s11117_s5 + $0x8] sm:$0xff] }
 0x935   : > { %v10379_v43 = vadd.f32 %v6916_v6, %v12755_v52  ;;  %7336 = vmatprep.mubr.f32.mxu1 %v6978_v56  ;;  %7192 = vmatmul.mubr.f32.gmra.mrb[4].mxu0 %v6975_v9  ;;  %v6979_v33 = vmax.f32 %v10346_v36, 0.0  ;;  %v10059_v29 = vpack.c.bf16 %v10915_v14, %v10914_v30  ;;  %v10916_v52 = vld [vmem:[%s11117_s5 + $0x10] sm:$0xff]  ;;  %v10926_v12 = vld [vmem:[%s11117_s5 + $0x60] sm:$0xff] }
 0x936   : > { %v6980_v58 = vmax.f32 %v10347_v59, 0.0  ;;  %7337 = vmatmul.mubr.f32.gmra.mrb[4].mxu1 %v6977_v46  ;;  %v6981_v23 = vmax.f32 %v10378_v27, 0.0  ;;  %v10062_v7 = vpack.c.bf16 %v10917_v19, %v10916_v52  ;;  %v10077_v9 = vpack.c.bf16 %v10927_v55, %v10926_v12 }
 0x937   : > { %v6982_v18 = vmax.f32 %v10379_v43, 0.0  ;;  %10060 = vmatpush3.bf16.msra.mxu0 %v10059_v29 }
 0x938   : > { %7196 = vmatprep.mubr.f32.mxu0 %v6980_v58  ;;  %10061 = vmatprep.subr.bf16.mxu0 %v11107_v44 }
 0x939   : > { %7341 = vmatprep.mubr.f32.mxu1 %v6982_v18  ;;  %7197 = vmatmul.mubr.f32.gmra.mrb[6].mxu0 %v6979_v33 }
 0x93a   : > { %7342 = vmatmul.mubr.f32.gmra.mrb[6].mxu1 %v6981_v23 }
 0x93b   : > { %10063 = vmatpush3.bf16.msra.mxu0 %v10062_v7 }
 0x93c   : > { %10064 = vmatprep.subr.bf16.mxu0 %v11107_v44 }
 0x93f   : > { %10066 = vmatpush3.bf16.msra.mxu0 %v10065_v35 }
 0x940   : > { %10067 = vmatprep.subr.bf16.mxu0 %v11107_v44 }
 0x943   : > { %10069 = vmatpush3.bf16.msra.mxu0 %v10068_v16 }
 0x944   : > { %10070 = vmatprep.subr.bf16.mxu0 %v11107_v44 }
 0x947   : > { %10072 = vmatpush3.bf16.msra.mxu0 %v10071_v54 }
 0x948   : > { %10073 = vmatprep.subr.bf16.mxu0 %v11107_v44 }
 0x94b   : > { %10075 = vmatpush3.bf16.msra.mxu0 %v10074_v2 }
 0x94c   : > { %10076 = vmatprep.subr.bf16.mxu0 %v11107_v44 }
 0x94f   : > { %10078 = vmatpush3.bf16.msra.mxu0 %v10077_v9 }
 0x950   : > { %10079 = vmatprep.subr.bf16.mxu0 %v11107_v44 }
 0x9d0   : > { %v8630_v4 = vpop.f32.mrb[232].mxu0 }
 0x9d1   : > { %v8710_v31 = vpop.f32.mrb[232].mxu1  ;;  %v8631_v51 = vpop.f32.mrb[233].mxu0 }
 0x9d2   : > { %v8632_v48 = vadd.f32 %v8631_v51, %v8630_v4  ;;  %v8711_v10 = vpop.f32.mrb[233].mxu1 }
 0x9d3   : > { %v8712_v34 = vadd.f32 %v8711_v10, %v8710_v31 }
 0x9d4   : > { %v8633_v8 = vpop.f32.mrb[234].mxu0  ;;  %v7124_v61 = vadd.f32 %v8632_v48, %v12831_v17 }
 0x9d5   : > { %v8713_v49 = vpop.f32.mrb[234].mxu1  ;;  %v8634_v41 = vpop.f32.mrb[235].mxu0 }
 0x9d6   : > { %v8635_v50 = vadd.f32 %v8634_v41, %v8633_v8  ;;  %v8714_v22 = vpop.f32.mrb[235].mxu1  ;;  %v7269_v37 = vadd.f32 %v8712_v34, %v7124_v61 }
 0x9d7   : > { %v8715_v39 = vadd.f32 %v8714_v22, %v8713_v49 }
 0x9d8   : > { %v7129_v57 = vadd.f32 %v8635_v50, %v12831_v17  ;;  %v8636_v13 = vpop.f32.mrb[236].mxu0  ;;  %v8551_v63 = vadd.f32 -3.0, %v7269_v37 }
 0x9d9   : > { %v8716_v62 = vpop.f32.mrb[236].mxu1  ;;  %v8637_v42 = vpop.f32.mrb[237].mxu0 }
 0x9da   : > { %v7274_v25 = vadd.f32 %v8715_v39, %v7129_v57  ;;  %v8638_v1 = vadd.f32 %v8637_v42, %v8636_v13  ;;  %v8717_v24 = vpop.f32.mrb[237].mxu1  ;;  %v8567_v45 = vmul.f32 -5.0, %v8551_v63 }
 0x9db   : > { %v8718_v40 = vadd.f32 %v8717_v24, %v8716_v62 }
 0x9dc   : > { %v8552_v15 = vadd.f32 -3.0, %v7274_v25  ;;  %v7134_v53 = vadd.f32 %v8638_v1, %v12831_v17  ;;  %v8639_v38 = vpop.f32.mrb[238].mxu0  ;;  %v7395_v20 = vmul.f32 1.442695, %v8567_v45 }
 0x9dd   : > { %v8719_v56 = vpop.f32.mrb[238].mxu1  ;;  %v8640_v36 = vpop.f32.mrb[239].mxu0 }
 0x9de   : > { %v8568_v47 = vmul.f32 -5.0, %v8552_v15  ;;  %v7279_v3 = vadd.f32 %v8718_v40, %v7134_v53  ;;  %v8641_v46 = vadd.f32 %v8640_v36, %v8639_v38  ;;  %v8720_v27 = vpop.f32.mrb[239].mxu1  ;;  %10802 = vpow2.f32 %v7395_v20 }
 0x9df   : > { %v8721_v59 = vadd.f32 %v8720_v27, %v8719_v56 }
 0x9e0   : > { %v7397_v6 = vmul.f32 1.442695, %v8568_v47  ;;  %v8553_v43 = vadd.f32 -3.0, %v7279_v3  ;;  %v7139_v58 = vadd.f32 %v8641_v46, %v12831_v17  ;;  %v8642_v33 = vpop.f32.mrb[240].mxu0 }
 0x9e1   : > { %v8722_v18 = vpop.f32.mrb[240].mxu1  ;;  %v8643_v23 = vpop.f32.mrb[241].mxu0 }
 0x9e2   : > { %10804 = vpow2.f32 %v7397_v6  ;;  %v8569_v30 = vmul.f32 -5.0, %v8553_v43  ;;  %v7284_v14 = vadd.f32 %v8721_v59, %v7139_v58  ;;  %v8644_v29 = vadd.f32 %v8643_v23, %v8642_v33  ;;  %v8723_v52 = vpop.f32.mrb[241].mxu1 }
 0x9e3   : > { %v8724_v19 = vadd.f32 %v8723_v52, %v8722_v18 }
 0x9e4   : > { %v7399_v7 = vmul.f32 1.442695, %v8569_v30  ;;  %v8554_v0 = vadd.f32 -3.0, %v7284_v14  ;;  %v7144_v60 = vadd.f32 %v8644_v29, %v12831_v17  ;;  %v8645_v35 = vpop.f32.mrb[242].mxu0 }
 0x9e5   : > { %v8725_v4 = vpop.f32.mrb[242].mxu1  ;;  %v8646_v5 = vpop.f32.mrb[243].mxu0 }
 0x9e6   : > { %10806 = vpow2.f32 %v7399_v7  ;;  %v8570_v21 = vmul.f32 -5.0, %v8554_v0  ;;  %v7289_v16 = vadd.f32 %v8724_v19, %v7144_v60  ;;  %v8647_v31 = vadd.f32 %v8646_v5, %v8645_v35  ;;  %v8726_v51 = vpop.f32.mrb[243].mxu1 }
 0x9e7   : > { %v8727_v48 = vadd.f32 %v8726_v51, %v8725_v4 }
 0x9e8   : > { %v10803_v10 = vpop.eup %10802  ;;  %v7401_v34 = vmul.f32 1.442695, %v8570_v21  ;;  %v8555_v8 = vadd.f32 -3.0, %v7289_v16  ;;  %v7149_v61 = vadd.f32 %v8647_v31, %v12831_v17  ;;  %v8648_v28 = vpop.f32.mrb[244].mxu0 }
 0x9e9   : > { %v8728_v32 = vpop.f32.mrb[244].mxu1  ;;  %v8649_v54 = vpop.f32.mrb[245].mxu0  ;;  %v7427_v49 = vadd.f32 1.0, %v10803_v10 }
 0x9ea   : > { %10808 = vpow2.f32 %v7401_v34  ;;  %v8571_v41 = vmul.f32 -5.0, %v8555_v8  ;;  %v7294_v50 = vadd.f32 %v8727_v48, %v7149_v61  ;;  %v8650_v22 = vadd.f32 %v8649_v54, %v8648_v28  ;;  %v8729_v37 = vpop.f32.mrb[245].mxu1 }
 0x9eb   : > { %v8730_v39 = vadd.f32 %v8729_v37, %v8728_v32  ;;  %10810 = vrcp.f32 %v7427_v49 }
 0x9ec   : > { %v10805_v57 = vpop.eup %10804  ;;  %v7403_v13 = vmul.f32 1.442695, %v8571_v41  ;;  %v8556_v63 = vadd.f32 -3.0, %v7294_v50  ;;  %v7154_v26 = vadd.f32 %v8650_v22, %v12831_v17  ;;  %v8651_v11 = vpop.f32.mrb[246].mxu0 }
 0x9ed   : > { %v7428_v2 = vadd.f32 1.0, %v10805_v57  ;;  %v8731_v62 = vpop.f32.mrb[246].mxu1  ;;  %v8652_v42 = vpop.f32.mrb[247].mxu0 }
 0x9ee   : > { %10812 = vpow2.f32 %v7403_v13  ;;  %v8572_v25 = vmul.f32 -5.0, %v8556_v63  ;;  %v7299_v1 = vadd.f32 %v8730_v39, %v7154_v26  ;;  %v8653_v24 = vadd.f32 %v8652_v42, %v8651_v11  ;;  %v8732_v45 = vpop.f32.mrb[247].mxu1 }
 0x9ef   : > { %10814 = vrcp.f32 %v7428_v2  ;;  %v8733_v40 = vadd.f32 %v8732_v45, %v8731_v62 }
 0x9f0   : > { %v10807_v15 = vpop.eup %10806  ;;  %v7405_v53 = vmul.f32 1.442695, %v8572_v25  ;;  %v8557_v38 = vadd.f32 -3.0, %v7299_v1  ;;  %v7159_v20 = vadd.f32 %v8653_v24, %v12831_v17  ;;  %v8654_v12 = vpop.f32.mrb[248].mxu0 }
 0x9f1   : > { %v7429_v55 = vadd.f32 1.0, %v10807_v15  ;;  %v8734_v9 = vpop.f32.mrb[248].mxu1  ;;  %v8655_v56 = vpop.f32.mrb[249].mxu0 }
 0x9f2   : > { %10816 = vpow2.f32 %v7405_v53  ;;  %v8573_v36 = vmul.f32 -5.0, %v8557_v38  ;;  %v7304_v47 = vadd.f32 %v8733_v40, %v7159_v20  ;;  %v8656_v3 = vadd.f32 %v8655_v56, %v8654_v12  ;;  %v8735_v46 = vpop.f32.mrb[249].mxu1 }
 0x9f3   : > { %10818 = vrcp.f32 %v7429_v55  ;;  %v8736_v27 = vadd.f32 %v8735_v46, %v8734_v9 }
 0x9f4   : > { %v10809_v59 = vpop.eup %10808  ;;  %v7407_v6 = vmul.f32 1.442695, %v8573_v36  ;;  %v8558_v43 = vadd.f32 -3.0, %v7304_v47  ;;  %v7164_v58 = vadd.f32 %v8656_v3, %v12831_v17  ;;  %v8657_v33 = vpop.f32.mrb[250].mxu0 }
 0x9f5   : > { %v10811_v18 = vpop.eup %10810  ;;  %v7430_v23 = vadd.f32 1.0, %v10809_v59  ;;  %v8737_v30 = vpop.f32.mrb[250].mxu1 }
 0x9f6   : > { %v8658_v14 = vpop.f32.mrb[251].mxu0  ;;  %10820 = vpow2.f32 %v7407_v6  ;;  %v8574_v29 = vmul.f32 -5.0, %v8558_v43  ;;  %v7309_v52 = vadd.f32 %v8736_v27, %v7164_v58  ;;  %v8738_v7 = vpop.f32.mrb[251].mxu1  ;;  %v12855_v60 = vmul.f32 0.5, %v10811_v18 }
 0x9f7   : > { %v8659_v19 = vadd.f32 %v8658_v14, %v8657_v33  ;;  %10822 = vrcp.f32 %v7430_v23  ;;  %v8739_v0 = vadd.f32 %v8738_v7, %v8737_v30 }
 0x9f8   : > { %v10813_v35 = vpop.eup %10812  ;;  %v7409_v4 = vmul.f32 1.442695, %v8574_v29  ;;  %v8559_v5 = vadd.f32 -3.0, %v7309_v52  ;;  %v8660_v16 = vpop.f32.mrb[252].mxu0  ;;  %v7491_v34 = vadd.f32 1.0, %v12855_v60 }
 0x9f9   : > { %v7169_v21 = vadd.f32 %v8659_v19, %v12831_v17  ;;  %v10815_v31 = vpop.eup %10814  ;;  %v7431_v51 = vadd.f32 1.0, %v10813_v35  ;;  %v8740_v48 = vpop.f32.mrb[252].mxu1 }
 0x9fa   : > { %v8661_v10 = vpop.f32.mrb[253].mxu0  ;;  %10824 = vpow2.f32 %v7409_v4  ;;  %v8575_v8 = vmul.f32 -5.0, %v8559_v5  ;;  %v8741_v32 = vpop.f32.mrb[253].mxu1  ;;  %v7507_v49 = vsub.f32 %v7491_v34, %v10811_v18  ;;  %v12859_v41 = vmul.f32 0.5, %v10815_v31 }
 0x9fb   : > { %v7314_v61 = vadd.f32 %v8739_v0, %v7169_v21  ;;  %v8662_v28 = vadd.f32 %v8661_v10, %v8660_v16  ;;  %10826 = vrcp.f32 %v7431_v51  ;;  %v8742_v54 = vadd.f32 %v8741_v32, %v8740_v48 }
 0x9fc   : > { %v10817_v50 = vpop.eup %10816  ;;  %v7411_v22 = vmul.f32 1.442695, %v8575_v8  ;;  %v8663_v57 = vpop.f32.mrb[254].mxu0  ;;  %10828 = vrcp.f32 %v7507_v49  ;;  %v7492_v2 = vadd.f32 1.0, %v12859_v41 }
 0x9fd   : > { %v8560_v37 = vadd.f32 -3.0, %v7314_v61  ;;  %v7174_v39 = vadd.f32 %v8662_v28, %v12831_v17  ;;  %v10819_v13 = vpop.eup %10818  ;;  %v7432_v63 = vadd.f32 1.0, %v10817_v50  ;;  %v8743_v26 = vpop.f32.mrb[254].mxu1 }
 0x9fe   : > { %v8664_v11 = vpop.f32.mrb[255].mxu0  ;;  %10830 = vpow2.f32 %v7411_v22  ;;  %v8744_v1 = vpop.f32.mrb[255].mxu1  ;;  %v7508_v45 = vsub.f32 %v7492_v2, %v10815_v31  ;;  %v12863_v40 = vmul.f32 0.5, %v10819_v13 }
 0x9ff   : > { %v8576_v62 = vmul.f32 -5.0, %v8560_v37  ;;  %v7319_v42 = vadd.f32 %v8742_v54, %v7174_v39  ;;  %v8665_v25 = vadd.f32 %v8664_v11, %v8663_v57  ;;  %10832 = vrcp.f32 %v7432_v63 }
 0xa00   : > { %v8745_v24 = vadd.f32 %v8744_v1, %v8743_v26  ;;  %v10821_v15 = vpop.eup %10820  ;;  %v8666_v12 = vpop.f32.mrb[0].mxu0  ;;  %10834 = vrcp.f32 %v7508_v45  ;;  %v7493_v47 = vadd.f32 1.0, %v12863_v40 }
 0xa01   : > { %v7413_v53 = vmul.f32 1.442695, %v8576_v62  ;;  %v8561_v38 = vadd.f32 -3.0, %v7319_v42  ;;  %v7179_v20 = vadd.f32 %v8665_v25, %v12831_v17  ;;  %v10823_v55 = vpop.eup %10822  ;;  %v7433_v9 = vadd.f32 1.0, %v10821_v15  ;;  %v8746_v56 = vpop.f32.mrb[0].mxu1 }
 0xa02   : > { %v8667_v36 = vpop.f32.mrb[1].mxu0  ;;  %v8747_v59 = vpop.f32.mrb[1].mxu1  ;;  %v7509_v43 = vsub.f32 %v7493_v47, %v10819_v13  ;;  %v12867_v58 = vmul.f32 0.5, %v10823_v55 }
 0xa03   : > { %10836 = vpow2.f32 %v7413_v53  ;;  %v8577_v3 = vmul.f32 -5.0, %v8561_v38  ;;  %v7324_v46 = vadd.f32 %v8745_v24, %v7179_v20  ;;  %v8668_v27 = vadd.f32 %v8667_v36, %v8666_v12 }
 0xa04   : > { %10838 = vrcp.f32 %v7433_v9  ;;  %v8748_v6 = vadd.f32 %v8747_v59, %v8746_v56  ;;  %v10825_v33 = vpop.eup %10824  ;;  %v8669_v14 = vpop.f32.mrb[2].mxu0  ;;  %v7494_v0 = vadd.f32 1.0, %v12867_v58 }
 0xa05   : > { %v7415_v18 = vmul.f32 1.442695, %v8577_v3  ;;  %v8562_v23 = vadd.f32 -3.0, %v7324_v46  ;;  %v7184_v30 = vadd.f32 %v8668_v27, %v12831_v17  ;;  %v10827_v29 = vpop.eup %10826  ;;  %v7434_v52 = vadd.f32 1.0, %v10825_v33  ;;  %v8749_v19 = vpop.f32.mrb[2].mxu1 }
 0xa06   : > { %v8670_v7 = vpop.f32.mrb[3].mxu0  ;;  %10840 = vrcp.f32 %v7509_v43  ;;  %v8750_v21 = vpop.f32.mrb[3].mxu1  ;;  %v7510_v51 = vsub.f32 %v7494_v0, %v10823_v55  ;;  %v12871_v48 = vmul.f32 0.5, %v10827_v29  ;;  %v10928_v0 = vld [vmem:[%s11117_s5 + $0x70] sm:$0xff] }
 0xa07   : > { %10842 = vpow2.f32 %v7415_v18  ;;  %v8578_v35 = vmul.f32 -5.0, %v8562_v23  ;;  %v7329_v4 = vadd.f32 %v8748_v6, %v7184_v30  ;;  %v8671_v5 = vadd.f32 %v8670_v7, %v8669_v14  ;;  %v10829_v16 = vpop.eup %10828 }
 0xa08   : > { %10844 = vrcp.f32 %v7434_v52  ;;  %v8751_v31 = vadd.f32 %v8750_v21, %v8749_v19  ;;  %v10831_v10 = vpop.eup %10830  ;;  %v8672_v28 = vpop.f32.mrb[4].mxu0  ;;  %v7539_v32 = vmul.f32 %v10829_v16, %v12855_v60  ;;  %v7495_v37 = vadd.f32 1.0, %v12871_v48 }
 0xa09   : > { %v7417_v34 = vmul.f32 1.442695, %v8578_v35  ;;  %v8563_v8 = vadd.f32 -3.0, %v7329_v4  ;;  %v7189_v61 = vadd.f32 %v8671_v5, %v12831_v17  ;;  %v10833_v54 = vpop.eup %10832  ;;  %v7435_v49 = vadd.f32 1.0, %v10831_v10  ;;  %v8752_v50 = vpop.f32.mrb[4].mxu1 }
 0xa0a   : > { %v8673_v22 = vpop.f32.mrb[5].mxu0  ;;  %10846 = vrcp.f32 %v7510_v51  ;;  %v8753_v63 = vpop.f32.mrb[5].mxu1  ;;  %7555 = vxpose.xlu1.b32.start [1/16] (narrow) %v7539_v32, 16  ;;  %v7511_v2 = vsub.f32 %v7495_v37, %v10827_v29  ;;  %v12876_v62 = vmul.f32 0.5, %v10833_v54  ;;  %v7668_v32 = vld [vmem:[%s13085_s23 + $0x10] sm:$0xff] }
 0xa0b   : > { %10848 = vpow2.f32 %v7417_v34  ;;  %v8579_v39 = vmul.f32 -5.0, %v8563_v8  ;;  %v7334_v57 = vadd.f32 %v8751_v31, %v7189_v61  ;;  %v8674_v13 = vadd.f32 %v8673_v22, %v8672_v28  ;;  %v10835_v26 = vpop.eup %10834  ;;  %v7666_v34 = vld [vmem:[%s13085_s23] sm:$0xff]  ;;  %v7667_v8 = vld [vmem:[%s13085_s23 + $0x8] sm:$0xff] }
 0xa0c   : > { %10850 = vrcp.f32 %v7435_v49  ;;  %v8754_v11 = vadd.f32 %v8753_v63, %v8752_v50  ;;  %v8675_v24 = vpop.f32.mrb[6].mxu0  ;;  %v7540_v45 = vmul.f32 %v10835_v26, %v12859_v41  ;;  %v7496_v12 = vadd.f32 1.0, %v12876_v62 }
 0xa0d   : > { %v10837_v60 = vpop.eup %10836  ;;  %v7419_v42 = vmul.f32 1.442695, %v8579_v39  ;;  %v8564_v25 = vadd.f32 -3.0, %v7334_v57  ;;  %v7194_v1 = vadd.f32 %v8674_v13, %v12831_v17  ;;  %v8755_v38 = vpop.f32.mrb[6].mxu1  ;;  %10852 = vrcp.f32 %v7511_v2 }
 0xa0e   : > { %v10839_v15 = vpop.eup %10838  ;;  %v7436_v53 = vadd.f32 1.0, %v10837_v60  ;;  %v8676_v20 = vpop.f32.mrb[7].mxu0  ;;  %7556 = vxpose.xlu1.b32.cont [2/16] (narrow) %v7540_v45, 16  ;;  %v7512_v46 = vsub.f32 %v7496_v12, %v10833_v54  ;;  %v13086_v31 = vmov 0.0   ;;  %v7669_v54 = vld [vmem:[%s13085_s23 + $0x18] sm:$0xff]  ;;  %v10083_v50 = vpack.c.bf16 %v7667_v8, %v7666_v34 }
 0xa0f   : > { %10854 = vpow2.f32 %v7419_v42  ;;  %v8580_v55 = vmul.f32 -5.0, %v8564_v25  ;;  %v7339_v9 = vadd.f32 %v8754_v11, %v7194_v1  ;;  %v8677_v56 = vadd.f32 %v8676_v20, %v8675_v24  ;;  %v8756_v36 = vpop.f32.mrb[7].mxu1  ;;  %8842 = vmatprep.mubr.msk.f32.mxu0 %vm11108_vm2, %v13086_v31  ;;  %8853 = vmatprep.mubr.msk.f32.mxu1 %vm11108_vm2, %v13086_v31 }
 0xa10   : > { %v10841_v47 = vpop.eup %10840  ;;  %10856 = vrcp.f32 %v7436_v53  ;;  %v8757_v3 = vadd.f32 %v8756_v36, %v8755_v38  ;;  %v12881_v27 = vmul.f32 0.5, %v10839_v15  ;;  %10084 = vmatpush3.bf16.msra.mxu1 %v10083_v50  ;;  %v10086_v26 = vpack.c.bf16 %v7669_v54, %v7668_v32 }
 0xa11   : > { %v10843_v41 = vpop.eup %10842  ;;  %v7421_v59 = vmul.f32 1.442695, %v8580_v55  ;;  %v8565_v6 = vadd.f32 -3.0, %v7339_v9  ;;  %v7199_v43 = vadd.f32 %v8677_v56, %v12831_v17  ;;  %v7541_v33 = vmul.f32 %v10841_v47, %v12863_v40  ;;  %v10929_v17 = vld [vmem:[%s11117_s5 + $0x78] sm:$0xff]  ;;  %10085 = vmatprep.subr.bf16.mxu1 %v11107_v44 }
 0xa12   : > { %v10845_v18 = vpop.eup %10844  ;;  %v7437_v23 = vadd.f32 1.0, %v10843_v41  ;;  %10858 = vrcp.f32 %v7512_v46  ;;  %v7497_v30 = vadd.f32 1.0, %v12881_v27  ;;  %v10080_v35 = vpack.c.bf16 %v10929_v17, %v10928_v0 }
 0xa13   : > { %10860 = vpow2.f32 %v7421_v59  ;;  %v8581_v14 = vmul.f32 -5.0, %v8565_v6  ;;  %v7344_v29 = vadd.f32 %v8757_v3, %v7199_v43  ;;  %7557 = vxpose.xlu1.b32.cont [3/16] (narrow) %v7541_v33, 16  ;;  %v12886_v52 = vmul.f32 0.5, %v10845_v18 }
 0xa14   : > { %v10847_v19 = vpop.eup %10846  ;;  %10862 = vrcp.f32 %v7437_v23  ;;  %v7513_v7 = vsub.f32 %v7497_v30, %v10839_v15  ;;  %10081 = vmatpush3.bf16.msra.mxu0 %v10080_v35  ;;  %10087 = vmatpush3.bf16.msra.mxu1 %v10086_v26 }
 0xa15   : > { %v10849_v40 = vpop.eup %10848  ;;  %v7423_v4 = vmul.f32 1.442695, %v8581_v14  ;;  %v8566_v5 = vadd.f32 -3.0, %v7344_v29  ;;  %v7542_v21 = vmul.f32 %v10847_v19, %v12867_v58  ;;  %v7498_v16 = vadd.f32 1.0, %v12886_v52  ;;  %10088 = vmatprep.subr.bf16.mxu0 %v11107_v44  ;;  %10094 = vmatprep.subr.bf16.mxu1 %v11107_v44 }
 0xa16   : > { %v10851_v51 = vpop.eup %10850  ;;  %v7438_v10 = vadd.f32 1.0, %v10849_v40  ;;  %10864 = vrcp.f32 %v7513_v7 }
 0xa17   : > { %10866 = vpow2.f32 %v7423_v4  ;;  %v8582_v61 = vmul.f32 -5.0, %v8566_v5  ;;  %7558 = vxpose.xlu1.b32.cont [4/16] (narrow) %v7542_v21, 16  ;;  %v7514_v58 = vsub.f32 %v7498_v16, %v10845_v18  ;;  %v7483_v28 = vmul.f32 0.5, %v10851_v51  ;;  %v10853_v49 = vpop.eup %10852 }
 0xa18   : > { %10868 = vrcp.f32 %v7438_v10  ;;  %v7543_v39 = vmul.f32 %v10853_v49, %v12871_v48 }
 0xa19   : > { %v10855_v22 = vpop.eup %10854  ;;  %v7425_v37 = vmul.f32 1.442695, %v8582_v61  ;;  %10870 = vrcp.f32 %v7514_v58  ;;  %v7499_v57 = vadd.f32 1.0, %v7483_v28 }
 0xa1a   : > { %v10857_v13 = vpop.eup %10856  ;;  %v7439_v63 = vadd.f32 1.0, %v10855_v22 }
 0xa1b   : > { %10872 = vpow2.f32 %v7425_v37  ;;  %7559 = vxpose.xlu1.b32.cont [5/16] (narrow) %v7543_v39, 16  ;;  %v7515_v11 = vsub.f32 %v7499_v57, %v10851_v51  ;;  %v7484_v2 = vmul.f32 0.5, %v10857_v13  ;;  %v10930_v37 = vld [vmem:[%s11414_s26] sm:$0xff]  ;;  %s13089_s26 = sld [smem:[#allocation20_spill]] }
 0xa1c   : > { %v10859_v60 = vpop.eup %10858  ;;  %10874 = vrcp.f32 %v7439_v63  ;;  %v7589_v39 = vsub.f32 1.0, %v10930_v37 }
 0xa1d   : > { %v10861_v42 = vpop.eup %10860  ;;  %v7544_v25 = vmul.f32 %v10859_v60, %v12876_v62  ;;  %10876 = vrcp.f32 %v7515_v11  ;;  %v7500_v1 = vadd.f32 1.0, %v7484_v2 }
 0xa1e   : > { %v10863_v48 = vpop.eup %10862  ;;  %v7440_v24 = vadd.f32 1.0, %v10861_v42 }
 0xa1f   : > { %7560 = vxpose.xlu1.b32.cont [6/16] (narrow) %v7544_v25, 16  ;;  %v7516_v45 = vsub.f32 %v7500_v1, %v10857_v13  ;;  %v7485_v15 = vmul.f32 0.5, %v10863_v48  ;;  %v10931_v13 = vld [vmem:[%s11418_s1] sm:$0xff]  ;;  %s13090_s1 = sld [smem:[#allocation25_spill]] }
 0xa20   : > { %v10865_v53 = vpop.eup %10864  ;;  %10878 = vrcp.f32 %v7440_v24  ;;  %v7587_v26 = vmul.f32 %v10931_v13, %v10930_v37  ;;  %v7671_v24 = vld [vmem:[%s13087_s2] sm:$0xff] }
 0xa21   : > { %v10867_v38 = vpop.eup %10866  ;;  %v7545_v20 = vmul.f32 %v10865_v53, %v12881_v27  ;;  %10880 = vrcp.f32 %v7516_v45  ;;  %v7501_v12 = vadd.f32 1.0, %v7485_v15  ;;  %v7672_v45 = vld [vmem:[%s13087_s2 + $0x8] sm:$0xff] }
 0xa22   : > { %v10869_v55 = vpop.eup %10868  ;;  %v7441_v9 = vadd.f32 1.0, %v10867_v38 }
 0xa23   : > { %v10871_v62 = vpop.eup %10870  ;;  %7561 = vxpose.xlu1.b32.cont [7/16] (narrow) %v7545_v20, 16  ;;  %v7517_v56 = vsub.f32 %v7501_v12, %v10863_v48  ;;  %v7486_v36 = vmul.f32 0.5, %v10869_v55  ;;  %v7673_v20 = vld [vmem:[%s13087_s2 + $0x10] sm:$0xff]  ;;  %v7674_v12 = vld [vmem:[%s13087_s2 + $0x18] sm:$0xff] }
 0xa24   : > { %10882 = vrcp.f32 %v7441_v9  ;;  %v7546_v47 = vmul.f32 %v10871_v62, %v12886_v52  ;;  %v7676_v9 = vld [vmem:[%s13088_s16] sm:$0xff]  ;;  %v7677_v62 = vld [vmem:[%s13088_s16 + $0x8] sm:$0xff] }
 0xa25   : > { %v10873_v3 = vpop.eup %10872  ;;  %10884 = vrcp.f32 %v7517_v56  ;;  %v7502_v46 = vadd.f32 1.0, %v7486_v36  ;;  %v10095_v56 = vpack.c.bf16 %v7677_v62, %v7676_v9 }
 0xa26   : > { %v10875_v41 = vpop.eup %10874  ;;  %v7442_v59 = vadd.f32 1.0, %v10873_v3  ;;  %v7682_v3 = vld [vmem:[%s13090_s1 + $0x8] sm:$0xff] }
 0xa27   : > { %v10877_v6 = vpop.eup %10876  ;;  %7562 = vxpose.xlu1.b32.cont [8/16] (narrow) %v7546_v47, 16  ;;  %v7518_v43 = vsub.f32 %v7502_v46, %v10869_v55  ;;  %v7487_v27 = vmul.f32 0.5, %v10875_v41  ;;  %v10092_v55 = vpack.c.bf16 %v7674_v12, %v7673_v20  ;;  %v7681_v47 = vld [vmem:[%s13090_s1] sm:$0xff] }
 0xa28   : > { %10886 = vrcp.f32 %v7442_v59  ;;  %v7547_v33 = vmul.f32 %v10877_v6, %v7483_v28  ;;  %v10101_v6 = vpack.c.bf16 %v7682_v3, %v7681_v47 }
 0xa29   : > { %10888 = vrcp.f32 %v7518_v43  ;;  %v7503_v18 = vadd.f32 1.0, %v7487_v27 }
 0xa2a   : > { %v10879_v23 = vpop.eup %10878 }
 0xa2b   : > { %v10881_v30 = vpop.eup %10880  ;;  %7563 = vxpose.xlu1.b32.cont [9/16] (narrow) %v7547_v33, 16  ;;  %v7519_v14 = vsub.f32 %v7503_v18, %v10875_v41  ;;  %v7488_v29 = vmul.f32 0.5, %v10879_v23  ;;  %v7684_v33 = vld [vmem:[%s13090_s1 + $0x18] sm:$0xff] }
 0xa2c   : > { %v7548_v19 = vmul.f32 %v10881_v30, %v7484_v2  ;;  %v7593_v2 = vsub.f32 1.0, %v10931_v13  ;;  %v7678_v30 = vld [vmem:[%s13088_s16 + $0x10] sm:$0xff] }
 0xa2d   : > { %10890 = vrcp.f32 %v7519_v14  ;;  %v7504_v52 = vadd.f32 1.0, %v7488_v29  ;;  %v7679_v14 = vld [vmem:[%s13088_s16 + $0x18] sm:$0xff] }
 0xa2e   : > { %v10883_v7 = vpop.eup %10882 }
 0xa2f   : > { %v10885_v0 = vpop.eup %10884  ;;  %7564 = vxpose.xlu1.b32.cont [10/16] (narrow) %v7548_v19, 16  ;;  %v7520_v17 = vsub.f32 %v7504_v52, %v10879_v23  ;;  %v7489_v35 = vmul.f32 0.5, %v10883_v7  ;;  %v13094_v23 = vld [vmem:[#allocation37_spill] sm:$0xff]  ;;  %v7692_v52 = vld [vmem:[%s13091_s10 + $0x8] sm:$0xff] }
 0xa30   : > { %v7549_v40 = vmul.f32 %v10885_v0, %v7485_v15  ;;  %v10089_v15 = vpack.c.bf16 %v7672_v45, %v7671_v24  ;;  %v7691_v19 = vld [vmem:[%s13091_s10] sm:$0xff] }
 0xa31   : > { %10892 = vrcp.f32 %v7520_v17  ;;  %v7505_v4 = vadd.f32 1.0, %v7489_v35  ;;  %v8585_v0 = vld [vmem:[%s13092_s22] ss:$0 sm:$0xff]  ;;  %s1149_s22 = scalar_lea.vmem %s11285_s30, %s11410_s0 }
 0xa32   : > { %v10887_v5 = vpop.eup %10886  ;;  %v7686_v17 = vld [vmem:[%s13093_s28] sm:$0xff] }
 0xa33   : > { %v10889_v21 = vpop.eup %10888  ;;  %7565 = vxpose.xlu1.b32.cont [11/16] (narrow) %v7549_v40, 16  ;;  %v7521_v16 = vsub.f32 %v7505_v4, %v10883_v7  ;;  %v7490_v51 = vmul.f32 0.5, %v10887_v5  ;;  %v10113_v7 = vpack.c.bf16 %v7692_v52, %v7691_v19 }
 0xa34   : > { %v7550_v10 = vmul.f32 %v10889_v21, %v7486_v36  ;;  %v8583_v36 = vld [vmem:[%s13089_s26] ss:$0 sm:$0xff]  ;;  %s13097_s26 = sld [smem:[#allocation28_spill]] }
 0xa35   : > { %10894 = vrcp.f32 %v7521_v16  ;;  %v7506_v34 = vadd.f32 1.0, %v7490_v51 }
 0xa37   : > { %v10891_v8 = vpop.eup %10890  ;;  %7566 = vxpose.xlu1.b32.cont [12/16] (narrow) %v7550_v10, 16  ;;  %v7522_v61 = vsub.f32 %v7506_v34, %v10887_v5  ;;  %v7689_v10 = vld [vmem:[%s13093_s28 + $0x18] sm:$0xff]  ;;  %v8589_v34 = vld [vmem:[%s13095_s7] ss:$0 sm:$0xff] }
 0xa38   : > { %v7551_v58 = vmul.f32 %v10891_v8, %v7487_v27  ;;  %v7683_v27 = vld [vmem:[%s13090_s1 + $0x10] sm:$0xff] }
 0xa39   : > { %10896 = vrcp.f32 %v7522_v61  ;;  %v10104_v18 = vpack.c.bf16 %v7684_v33, %v7683_v27 }
 0xa3b   : > { %v10893_v28 = vpop.eup %10892  ;;  %7567 = vxpose.xlu1.b32.cont [13/16] (narrow) %v7551_v58, 16 }
 0xa3c   : > { %v7552_v32 = vmul.f32 %v10893_v28, %v7488_v29  ;;  %v10098_v29 = vpack.c.bf16 %v7679_v14, %v7678_v30 }
 0xa3f   : > { %v10895_v54 = vpop.eup %10894  ;;  %7568 = vxpose.xlu1.b32.cont [14/16] (narrow) %v7552_v32, 16 }
 0xa40   : > { %v7553_v49 = vmul.f32 %v10895_v54, %v7489_v35  ;;  %v7687_v35 = vld [vmem:[%s13093_s28 + $0x8] sm:$0xff]  ;;  %v7693_v54 = vld [vmem:[%s13091_s10 + $0x10] sm:$0xff] }
 0xa41   : > { %v10107_v21 = vpack.c.bf16 %v7687_v35, %v7686_v17 }
 0xa43   : > { %v10897_v50 = vpop.eup %10896  ;;  %7569 = vxpose.xlu1.b32.cont [15/16] (narrow) %v7553_v49, 16  ;;  %v7694_v49 = vld [vmem:[%s13091_s10 + $0x18] sm:$0xff] }
 0xa44   : > { %v7554_v22 = vmul.f32 %v10897_v50, %v7490_v51  ;;  %v7688_v51 = vld [vmem:[%s13093_s28 + $0x10] sm:$0xff]  ;;  %v10116_v50 = vpack.c.bf16 %v7694_v49, %v7693_v54 }
 0xa45   : > { %v10110_v8 = vpack.c.bf16 %v7689_v10, %v7688_v51 }
 0xa47   : > { %7570 = vxpose.xlu1.b32.end [16/16] (narrow) %v7554_v22, 16  ;;  %v7696_v22 = vld [vmem:[%s11277_s27] sm:$0xff] }
 0xa8b   : > { %v7571_v57 = vpop.trf.xlu1 }
 0xa8c   : > { %v7588_v63 = vmul.f32 %v10931_v13, %v7571_v57  ;;  %v8587_v57 = vld [vmem:[%s13096_s6] ss:$0 sm:$0xff] }
 0xa8d   : > { %v8591_v13 = vld [vmem:[%s13097_s26] ss:$0 sm:$0xff] }
 0xa8e   : > { %v7590_v11 = vmul.f32 %v7589_v39, %v7588_v63  ;;  %v10380_v63 = vadd.f32 %v8591_v13, %v8587_v57 }
 0xa8f   : > { %v7572_v60 = vpop.trf.xlu1 }
 0xa90   : > { %v7592_v42 = vmul.f32 %v10930_v37, %v7572_v60  ;;  %v7591_v25 = vadd.f32 %v7590_v11, %v7587_v26  ;;  %v7697_v37 = vld [vmem:[%s11277_s27 + $0x8] sm:$0xff]  ;;  %v7699_v60 = vld [vmem:[%s11277_s27 + $0x18] sm:$0xff] }
 0xa91   : > { %v10119_v39 = vpack.c.bf16 %v7697_v37, %v7696_v22 }
 0xa92   : > { %v7594_v1 = vmul.f32 %v7593_v2, %v7592_v42  ;;  %v7698_v2 = vld [vmem:[%s11277_s27 + $0x10] sm:$0xff] }
 0xa93   : > { %v10122_v42 = vpack.c.bf16 %v7699_v60, %v7698_v2 }
 0xa94   : > { %v7595_v48 = vadd.f32 %v7594_v1, %v7591_v25  ;;  %v8593_v25 = vld [vmem:[%s11272_s12] ss:$0 sm:$0xff] }
 0xa96   : > { %8843 = vmatmul.mubr.f32.vlgmr.msra.gmra.mrb[8].mxu0 %v7595_v48 }
 0xa97   : > { %8864 = vmatprep.mubr.msk.f32.mxu0 %vm11108_vm2, %v13086_v31  ;;  %10090 = vmatpush3.bf16.msra.mxu0 %v10089_v15  ;;  %v10932_v15 = vld [vmem:[#allocation2] ss:$0 sm:$0xff] }
 0xa98   : > { %10091 = vmatprep.subr.bf16.mxu0 %v11107_v44 }
 0xa9b   : > { %10093 = vmatpush3.bf16.msra.mxu0 %v10092_v55 }
 0xa9c   : > { %10100 = vmatprep.subr.bf16.mxu0 %v11107_v44 }
 0xb69   : > { %v7662_v53 = vpop.f32.mrb[8].mxu0 }
 0xb6a   : > { %8854 = vmatmul.mubr.msk.f32.vlgmr.msra.gmra.mrb[8].mxu1 %vm1614_vm1, %v7662_v53  ;;  %v8844_v38 = vpop.f32.mrb[9].mxu0 }
 0xb6b   : > { %8875 = vmatprep.mubr.msk.f32.mxu1 %vm11108_vm2, %v13086_v31  ;;  %10096 = vmatpush3.bf16.msra.mxu1 %v10095_v56 }
 0xb6c   : > { %10097 = vmatprep.subr.bf16.mxu1 %v11107_v44 }
 0xb6f   : > { %10099 = vmatpush3.bf16.msra.mxu1 %v10098_v29 }
 0xb70   : > { %10106 = vmatprep.subr.bf16.mxu1 %v11107_v44 }
 0xc3d   : > { %v7776_v46 = vpop.f32.mrb[8].mxu1 }
 0xc3e   : > { %v7777_v41 = vadd.f32 %v8583_v36, %v7776_v46  ;;  %v8855_v59 = vpop.f32.mrb[9].mxu1 }
 0xc40   : > { %v7780_v43 = vmax.f32 %v7777_v41, 0.0 }
 0xc42   : > { %8865 = vmatmul.mubr.msk.f32.vlgmr.msra.gmra.mrb[10].mxu0 %vm1614_vm1, %v7780_v43 }
 0xc43   : > { %10102 = vmatpush3.bf16.msra.mxu0 %v10101_v6  ;;  %8886 = vmatprep.mubr.msk.f32.mxu0 %vm11108_vm2, %v13086_v31 }
 0xc44   : > { %10103 = vmatprep.subr.bf16.mxu0 %v11107_v44 }
 0xc47   : > { %10105 = vmatpush3.bf16.msra.mxu0 %v10104_v18 }
 0xc48   : > { %10112 = vmatprep.subr.bf16.mxu0 %v11107_v44 }
 0xc4a   : > { %8887 = vmatmul.mubr.msk.f32.vlgmr.msra.gmra.mrb[12].mxu0 %vm1614_vm1, %v13094_v23 }
 0xc4b   : > { %8908 = vmatprep.mubr.msk.f32.mxu0 %vm11108_vm2, %v13086_v31  ;;  %10114 = vmatpush3.bf16.msra.mxu0 %v10113_v7 }
 0xc4c   : > { %10115 = vmatprep.subr.bf16.mxu0 %v11107_v44 }
 0xc4f   : > { %10117 = vmatpush3.bf16.msra.mxu0 %v10116_v50 }
 0xd15   : > { %v7856_v40 = vpop.f32.mrb[10].mxu0 }
 0xd16   : > { %v7857_v4 = vadd.f32 %v8585_v0, %v7856_v40  ;;  %v8866_v5 = vpop.f32.mrb[11].mxu0 }
 0xd18   : > { %v7860_v16 = vmax.f32 %v7857_v4, 0.0 }
 0xd1a   : > { %8876 = vmatmul.mubr.msk.f32.vlgmr.msra.gmra.mrb[10].mxu1 %vm1614_vm1, %v7860_v16 }
 0xd1b   : > { %10108 = vmatpush3.bf16.msra.mxu1 %v10107_v21  ;;  %8897 = vmatprep.mubr.msk.f32.mxu1 %vm11108_vm2, %v13086_v31 }
 0xd1c   : > { %10109 = vmatprep.subr.bf16.mxu1 %v11107_v44 }
 0xd1d   : > { %v8015_v61 = vpop.f32.mrb[12].mxu0 }
 0xd1e   : > { %v8016_v58 = vadd.f32 %v8589_v34, %v8015_v61  ;;  %v8888_v28 = vpop.f32.mrb[13].mxu0 }
 0xd1f   : > { %10111 = vmatpush3.bf16.msra.mxu1 %v10110_v8 }
 0xd20   : > { %v8019_v32 = vmax.f32 %v8016_v58, 0.0  ;;  %10118 = vmatprep.subr.bf16.mxu1 %v11107_v44 }
 0xd22   : > { %8898 = vmatmul.mubr.msk.f32.vlgmr.msra.gmra.mrb[10].mxu1 %vm1614_vm1, %v8019_v32 }
 0xd23   : > { %8919 = vmatprep.mubr.msk.f32.mxu1 %vm11108_vm2, %v13086_v31  ;;  %10120 = vmatpush3.bf16.msra.mxu1 %v10119_v39 }
 0xd24   : > { %10121 = vmatprep.subr.bf16.mxu1 %v11107_v44 }
 0xd27   : > { %10123 = vmatpush3.bf16.msra.mxu1 %v10122_v42 }
 0xdf5   : > { %v8095_v26 = vpop.f32.mrb[10].mxu1 }
 0xdf6   : > { %v10381_v31 = vadd.f32 %v10380_v63, %v8095_v26  ;;  %v8899_v11 = vpop.f32.mrb[11].mxu1 }
 0xdf8   : > { %8909 = vmatmul.mubr.msk.f32.vlgmr.msra.gmra.mrb[14].mxu0 %vm1614_vm1, %v10381_v31 }
 0xecb   : > { %v8175_v1 = vpop.f32.mrb[14].mxu0 }
 0xecc   : > { %v8176_v48 = vadd.f32 %v8593_v25, %v8175_v1  ;;  %v8910_v24 = vpop.f32.mrb[15].mxu0 }
 0xece   : > { %v8179_v45 = vmax.f32 %v8176_v48, 0.0 }
 0xed0   : > { %8920 = vmatmul.mubr.msk.f32.vlgmr.msra.gmra.mrb[12].mxu1 %vm1614_vm1, %v8179_v45 }
 0xfa3   : > { %v8250_v44 = vpop.f32.mrb[12].mxu1 }
 0xfa4   : > { %v8251_v53 = vadd.f32 %v10932_v15, %v8250_v44  ;;  %v8921_v38 = vpop.f32.mrb[13].mxu1 }
 0xfa6   : > { %8255 = vst.msk [vmem:[%s1149_s22] sm:$0xff] %vm8254_vm3, %v8251_v53 }
 0xfa7 PF: > { %s84_s15 = sadd.s32 1, %s11063_s15  }
 0xfa8   : > { %p81_p11 = scmp.ge.s32.totalorder %s84_s15, 4  }
 0xfaa   :  { %83 = sbr.rel (!%p81_p11) target bundleno = 65 (0x41), region = 246 }
 0xfb1   :  { %8275 = vsyncpa [#allocation4], 1 }
 0xfb2   :  { %8277 = vsyncpa [#allocation4 + $0x1], 1 }
 0xfb3   :  { %8278 = vsyncpa [#allocation6], 1 }
 0xfb4   :  { %8279 = vsyncpa [#allocation9], 1 }

</bundles_post_ra>
